<compile_context>
chip_gen: v6e
topology: v6e:2x2x1
jax: 0.10.0
libtpu: 0.0.40
codegen_flags: <defaults>
</compile_context>

<pallas_src>
import math

import jax
import jax.numpy as jnp
from jax import lax
from jax.experimental import pallas as pl
from jax.experimental.pallas import tpu as pltpu

CP = 128  # lane-dense padded channel width used throughout the kernel


# ------------------------------- the kernel -------------------------------- #

def _classifier_kernel(p1_ref, w1_ref, b1_ref, w2_ref, b2_ref,
                       w3_ref, b3_ref, w4_ref, b4_ref, o_ref):
    B = o_ref.shape[0]
    n1 = B * 16 * 16          # padded pooled conv1 grid (valid region 12x12)

    # ---- conv1: one fused matmul over all 4 pool sub-positions ------------ #
    # p1_ref: (4*n1, 25) bf16, rows ordered (sub-pos, b, h, w)
    y1 = jnp.dot(p1_ref[...], w1_ref[...],
                 preferred_element_type=jnp.float32)            # (4*n1, 128)
    y1 = y1.reshape(4, n1, CP)
    y1 = jnp.maximum(jnp.maximum(y1[0], y1[1]),
                     jnp.maximum(y1[2], y1[3]))                 # 2x2 max-pool
    # bias after the pool is exact: max(x + b) == max(x) + b (per-channel b)
    a1 = jnp.maximum(y1 + b1_ref[...], 0.0)                     # (n1, 128)
    a1 = a1.reshape(B, 16, 16, CP).astype(jnp.bfloat16)

    # ---- conv2: in-kernel im2col (static slices, lane-aligned concat) ----- #
    cols = [a1[:, kh:kh + 8, kw:kw + 8, :]
            for kh in range(5) for kw in range(5)]              # 25 x (B,8,8,128)
    p2 = jnp.concatenate(cols, axis=-1)                         # (B,8,8,3200)
    p2 = p2.reshape(B * 64, 25 * CP)
    y2 = jnp.dot(p2, w2_ref[...],
                 preferred_element_type=jnp.float32) + b2_ref[...]
    y2 = y2.reshape(B, 8, 8, CP)                                # (B,8,8,128)

    # ---- 2x2 max-pool + relu + NHWC flatten (fc1 weights are permuted) ---- #
    pieces = []
    for p in range(4):
        for q in range(4):
            m = jnp.maximum(
                jnp.maximum(y2[:, 2 * p, 2 * q, :], y2[:, 2 * p, 2 * q + 1, :]),
                jnp.maximum(y2[:, 2 * p + 1, 2 * q, :], y2[:, 2 * p + 1, 2 * q + 1, :]))
            pieces.append(m)
    flat = jnp.maximum(jnp.concatenate(pieces, axis=-1), 0.0)   # (B, 2048)

    # TODO(synk): both F.dropout calls default to training=True in PyTorch;
    # torch RNG cannot be reproduced, so dropout is treated as identity
    # (inference mode) here.

    # ---- fc1 + relu, fc2 --------------------------------------------------- #
    h = jnp.dot(flat.astype(jnp.bfloat16), w3_ref[...],
                preferred_element_type=jnp.float32) + b3_ref[...]
    h = jnp.maximum(h, 0.0).astype(jnp.bfloat16)                # (B, 128)
    o_ref[...] = jnp.dot(h, w4_ref[...],
                         preferred_element_type=jnp.float32) + b4_ref[...]


def _classifier_pallas(p1, w1p, b1p, w2p, b2p, w3p, b3p, w4p, b4p, *, batch):
    def spec(a):
        return pl.BlockSpec(a.shape, lambda i: (0, 0))

    args = (p1, w1p, b1p, w2p, b2p, w3p, b3p, w4p, b4p)
    return pl.pallas_call(
        _classifier_kernel,
        out_shape=jax.ShapeDtypeStruct((batch, CP), jnp.float32),
        grid=(1,),
        in_specs=[spec(a) for a in args],
        out_specs=pl.BlockSpec((batch, CP), lambda i: (0, 0)),
        compiler_params=pltpu.CompilerParams(
            # Single-step grid: the whole (tiny) problem fits VMEM on every
            # generation.  For large batches, tile the row axes and mark them
            # "parallel" to use v7x's second TensorCore.
            dimension_semantics=("arbitrary",),
            # Raise v5e's 16 MiB scoped-VMEM default (== v6e/v7x default).
            vmem_limit_bytes=32 * 1024 * 1024,
        ),
    )(*args)


# ---------------------------- wrapper / weight prep ------------------------- #

def classifier_forward(x, params):
    """Pallas forward pass.  x: (B, 1, 28, 28) float32 -> (B, 10) float32."""
    c1w, c1b, c2w, c2b, f1w, f1b, f2w, f2b = params
    B = x.shape[0]
    xs = x.reshape(B, 28, 28).astype(jnp.float32)

    # conv1 im2col with the 4 max-pool sub-positions on the leading axis.
    # Only static (strided) slices -- no gathers.
    taps = jnp.stack([xs[:, kh:kh + 24, kw:kw + 24]
                      for kh in range(5) for kw in range(5)], axis=-1)   # (B,24,24,25)
    p1 = jnp.stack([taps[:, ii::2, jj::2, :]
                    for ii in range(2) for jj in range(2)], axis=0)      # (4,B,12,12,25)
    # pad pooled grid 12x12 -> 16x16 so in-kernel reshapes are tile aligned
    p1 = jnp.pad(p1, ((0, 0), (0, 0), (0, 4), (0, 4), (0, 0)))           # (4,B,16,16,25)
    p1 = p1.reshape(4 * B * 256, 25).astype(jnp.bfloat16)

    # conv1 weights: (10,1,5,5) -> (25, 128), cols padded to 128 lanes
    w1p = jnp.zeros((25, CP), jnp.bfloat16).at[:, :10].set(
        c1w.reshape(10, 25).T.astype(jnp.bfloat16))
    b1p = jnp.zeros((1, CP), jnp.float32).at[:, :10].set(
        c1b.astype(jnp.float32)[None, :])

    # conv2 weights: (24,10,5,5) -> (25*128, 128); row = (kh*5+kw)*128 + ci
    w2t = jnp.transpose(c2w, (2, 3, 1, 0)).astype(jnp.bfloat16)          # (5,5,10,24)
    w2p = jnp.zeros((5, 5, CP, CP), jnp.bfloat16).at[:, :, :10, :24].set(
        w2t).reshape(25 * CP, CP)
    b2p = jnp.zeros((1, CP), jnp.float32).at[:, :24].set(
        c2b.astype(jnp.float32)[None, :])

    # fc1 weights: (50, 384) with PyTorch NCHW flatten (c,h,w) ->
    # rows reordered to the kernel's (h,w,c-padded) flatten.
    f1t = jnp.transpose(f1w.reshape(50, 24, 4, 4), (2, 3, 1, 0)).astype(jnp.bfloat16)  # (4,4,24,50)
    w3p = jnp.zeros((4, 4, CP, CP), jnp.bfloat16).at[:, :, :24, :50].set(
        f1t).reshape(16 * CP, CP)
    b3p = jnp.zeros((1, CP), jnp.float32).at[:, :50].set(
        f1b.astype(jnp.float32)[None, :])

    # fc2 weights: (10, 50) -> (128, 128)
    w4p = jnp.zeros((CP, CP), jnp.bfloat16).at[:50, :10].set(
        f2w.T.astype(jnp.bfloat16))
    b4p = jnp.zeros((1, CP), jnp.float32).at[:, :10].set(
        f2b.astype(jnp.float32)[None, :])

    out_pad = _classifier_pallas(p1, w1p, b1p, w2p, b2p, w3p, b3p, w4p, b4p,
                                 batch=B)
    return out_pad[:, :10]


# --------------------------------- reference -------------------------------- #

def classifier_reference(x, params):
    """Pure-JAX f32 reference (same semantics, dropout as identity)."""
    c1w, c1b, c2w, c2b, f1w, f1b, f2w, f2b = params
    dn = ("NCHW", "OIHW", "NCHW")
    y = lax.conv_general_dilated(x, c1w, (1, 1), "VALID", dimension_numbers=dn)
    y = y + c1b[None, :, None, None]
    y = lax.reduce_window(y, -jnp.inf, lax.max, (1, 1, 2, 2), (1, 1, 2, 2), "VALID")
    y = jnp.maximum(y, 0.0)
    y = lax.conv_general_dilated(y, c2w, (1, 1), "VALID", dimension_numbers=dn)
    y = y + c2b[None, :, None, None]
    y = lax.reduce_window(y, -jnp.inf, lax.max, (1, 1, 2, 2), (1, 1, 2, 2), "VALID")
    y = jnp.maximum(y, 0.0)
    y = y.reshape(y.shape[0], -1)
    y = jnp.maximum(y @ f1w.T + f1b, 0.0)
    return y @ f2w.T + f2b


# ----------------------------------- main ------------------------------------ #

if __name__ == "__main__":
    key = jax.random.PRNGKey(0)
    ks = jax.random.split(key, 9)

    def uinit(k, shape, fan_in):
        bound = 1.0 / math.sqrt(fan_in)
        return jax.random.uniform(k, shape, jnp.float32, -bound, bound)

    params = (
        uinit(ks[0], (10, 1, 5, 5), 1 * 5 * 5),    # conv1.weight
        uinit(ks[1], (10,), 1 * 5 * 5),            # conv1.bias
        uinit(ks[2], (24, 10, 5, 5), 10 * 5 * 5),  # conv2.weight
        uinit(ks[3], (24,), 10 * 5 * 5),           # conv2.bias
        uinit(ks[4], (50, 384), 384),              # fc1.weight
        uinit(ks[5], (50,), 384),                  # fc1.bias
        uinit(ks[6], (10, 50), 50),                # fc2.weight
        uinit(ks[7], (10,), 50),                   # fc2.bias
    )
    x = jax.random.normal(ks[8], (2, 1, 28, 28), dtype=jnp.float32)

    out = jax.block_until_ready(jax.jit(classifier_forward)(x, params))
    ref = jax.block_until_ready(classifier_reference(x, params))

    assert out.shape == (2, 10), out.shape
    assert out.dtype == jnp.float32
    assert bool(jnp.allclose(out, ref, atol=5e-2, rtol=5e-2)), (out, ref)
    print("KERNEL_OK")
</pallas_src>

<mosaic_0001>
module attributes {stable_mosaic.version = 11 : i64} {
  func.func @_classifier_kernel(%arg0: i32, %arg1: memref<2048x25xbf16, #tpu.memory_space<vmem>>, %arg2: memref<25x128xbf16, #tpu.memory_space<vmem>>, %arg3: memref<1x128xf32, #tpu.memory_space<vmem>>, %arg4: memref<3200x128xbf16, #tpu.memory_space<vmem>>, %arg5: memref<1x128xf32, #tpu.memory_space<vmem>>, %arg6: memref<2048x128xbf16, #tpu.memory_space<vmem>>, %arg7: memref<1x128xf32, #tpu.memory_space<vmem>>, %arg8: memref<128x128xbf16, #tpu.memory_space<vmem>>, %arg9: memref<1x128xf32, #tpu.memory_space<vmem>>, %arg10: memref<2x128xf32, #tpu.memory_space<vmem>>) attributes {dimension_semantics = [#tpu.dimension_semantics<arbitrary>], iteration_bounds = array<i64: 1>, scalar_prefetch = 0 : i64, scratch_operands = 0 : i64, tpu.core_type = #tpu.core_type<tc>, window_params = [{pipeline_mode = #tpu.pipeline_mode<synchronous>, transform_indices = @transform_0, window_bounds = array<i64: 2048, 25>}, {pipeline_mode = #tpu.pipeline_mode<synchronous>, transform_indices = @transform_1, window_bounds = array<i64: 25, 128>}, {pipeline_mode = #tpu.pipeline_mode<synchronous>, transform_indices = @transform_2, window_bounds = array<i64: 1, 128>}, {pipeline_mode = #tpu.pipeline_mode<synchronous>, transform_indices = @transform_3, window_bounds = array<i64: 3200, 128>}, {pipeline_mode = #tpu.pipeline_mode<synchronous>, transform_indices = @transform_4, window_bounds = array<i64: 1, 128>}, {pipeline_mode = #tpu.pipeline_mode<synchronous>, transform_indices = @transform_5, window_bounds = array<i64: 2048, 128>}, {pipeline_mode = #tpu.pipeline_mode<synchronous>, transform_indices = @transform_6, window_bounds = array<i64: 1, 128>}, {pipeline_mode = #tpu.pipeline_mode<synchronous>, transform_indices = @transform_7, window_bounds = array<i64: 128, 128>}, {pipeline_mode = #tpu.pipeline_mode<synchronous>, transform_indices = @transform_8, window_bounds = array<i64: 1, 128>}, {pipeline_mode = #tpu.pipeline_mode<synchronous>, transform_indices = @transform_9, window_bounds = array<i64: 2, 128>}]} {
    %c0 = arith.constant 0 : index
    %c0_0 = arith.constant 0 : index
    %0 = vector.load %arg1[%c0, %c0_0] : memref<2048x25xbf16, #tpu.memory_space<vmem>>, vector<2048x25xbf16>
    %c0_1 = arith.constant 0 : index
    %c0_2 = arith.constant 0 : index
    %1 = vector.load %arg2[%c0_1, %c0_2] : memref<25x128xbf16, #tpu.memory_space<vmem>>, vector<25x128xbf16>
    %cst = arith.constant dense<0.000000e+00> : vector<2048x128xf32>
    %2 = tpu.matmul %0, %1, %cst {dimension_numbers = #tpu.dot_dimension_numbers<[1], [0], [0], [1], [0, 0, 1, 1], [], []>} : vector<2048x25xbf16>, vector<25x128xbf16>, vector<2048x128xf32> -> vector<2048x128xf32>
    %3 = vector.shape_cast %2 : vector<2048x128xf32> to vector<4x512x128xf32>
    %4 = vector.extract_strided_slice %3 {offsets = [0, 0, 0], sizes = [1, 512, 128], strides = [1, 1, 1]} : vector<4x512x128xf32> to vector<1x512x128xf32>
    %5 = vector.shape_cast %4 : vector<1x512x128xf32> to vector<512x128xf32>
    %6 = vector.extract_strided_slice %3 {offsets = [1, 0, 0], sizes = [1, 512, 128], strides = [1, 1, 1]} : vector<4x512x128xf32> to vector<1x512x128xf32>
    %7 = vector.shape_cast %6 : vector<1x512x128xf32> to vector<512x128xf32>
    %8 = arith.maximumf %5, %7 : vector<512x128xf32>
    %9 = vector.extract_strided_slice %3 {offsets = [2, 0, 0], sizes = [1, 512, 128], strides = [1, 1, 1]} : vector<4x512x128xf32> to vector<1x512x128xf32>
    %10 = vector.shape_cast %9 : vector<1x512x128xf32> to vector<512x128xf32>
    %11 = vector.extract_strided_slice %3 {offsets = [3, 0, 0], sizes = [1, 512, 128], strides = [1, 1, 1]} : vector<4x512x128xf32> to vector<1x512x128xf32>
    %12 = vector.shape_cast %11 : vector<1x512x128xf32> to vector<512x128xf32>
    %13 = arith.maximumf %10, %12 : vector<512x128xf32>
    %14 = arith.maximumf %8, %13 : vector<512x128xf32>
    %c0_3 = arith.constant 0 : index
    %c0_4 = arith.constant 0 : index
    %15 = vector.load %arg3[%c0_3, %c0_4] : memref<1x128xf32, #tpu.memory_space<vmem>>, vector<1x128xf32>
    %16 = vector.broadcast %15 : vector<1x128xf32> to vector<512x128xf32>
    %17 = arith.addf %14, %16 : vector<512x128xf32>
    %cst_5 = arith.constant 0.000000e+00 : f32
    %18 = vector.broadcast %cst_5 : f32 to vector<512x128xf32>
    %19 = arith.maximumf %17, %18 : vector<512x128xf32>
    %20 = vector.shape_cast %19 : vector<512x128xf32> to vector<2x16x16x128xf32>
    %21 = arith.truncf %20 : vector<2x16x16x128xf32> to vector<2x16x16x128xbf16>
    %22 = vector.extract_strided_slice %21 {offsets = [0, 0, 0, 0], sizes = [2, 8, 8, 128], strides = [1, 1, 1, 1]} : vector<2x16x16x128xbf16> to vector<2x8x8x128xbf16>
    %23 = vector.extract_strided_slice %21 {offsets = [0, 0, 1, 0], sizes = [2, 8, 8, 128], strides = [1, 1, 1, 1]} : vector<2x16x16x128xbf16> to vector<2x8x8x128xbf16>
    %24 = vector.extract_strided_slice %21 {offsets = [0, 0, 2, 0], sizes = [2, 8, 8, 128], strides = [1, 1, 1, 1]} : vector<2x16x16x128xbf16> to vector<2x8x8x128xbf16>
    %25 = vector.extract_strided_slice %21 {offsets = [0, 0, 3, 0], sizes = [2, 8, 8, 128], strides = [1, 1, 1, 1]} : vector<2x16x16x128xbf16> to vector<2x8x8x128xbf16>
    %26 = vector.extract_strided_slice %21 {offsets = [0, 0, 4, 0], sizes = [2, 8, 8, 128], strides = [1, 1, 1, 1]} : vector<2x16x16x128xbf16> to vector<2x8x8x128xbf16>
    %27 = vector.extract_strided_slice %21 {offsets = [0, 1, 0, 0], sizes = [2, 8, 8, 128], strides = [1, 1, 1, 1]} : vector<2x16x16x128xbf16> to vector<2x8x8x128xbf16>
    %28 = vector.extract_strided_slice %21 {offsets = [0, 1, 1, 0], sizes = [2, 8, 8, 128], strides = [1, 1, 1, 1]} : vector<2x16x16x128xbf16> to vector<2x8x8x128xbf16>
    %29 = vector.extract_strided_slice %21 {offsets = [0, 1, 2, 0], sizes = [2, 8, 8, 128], strides = [1, 1, 1, 1]} : vector<2x16x16x128xbf16> to vector<2x8x8x128xbf16>
    %30 = vector.extract_strided_slice %21 {offsets = [0, 1, 3, 0], sizes = [2, 8, 8, 128], strides = [1, 1, 1, 1]} : vector<2x16x16x128xbf16> to vector<2x8x8x128xbf16>
    %31 = vector.extract_strided_slice %21 {offsets = [0, 1, 4, 0], sizes = [2, 8, 8, 128], strides = [1, 1, 1, 1]} : vector<2x16x16x128xbf16> to vector<2x8x8x128xbf16>
    %32 = vector.extract_strided_slice %21 {offsets = [0, 2, 0, 0], sizes = [2, 8, 8, 128], strides = [1, 1, 1, 1]} : vector<2x16x16x128xbf16> to vector<2x8x8x128xbf16>
    %33 = vector.extract_strided_slice %21 {offsets = [0, 2, 1, 0], sizes = [2, 8, 8, 128], strides = [1, 1, 1, 1]} : vector<2x16x16x128xbf16> to vector<2x8x8x128xbf16>
    %34 = vector.extract_strided_slice %21 {offsets = [0, 2, 2, 0], sizes = [2, 8, 8, 128], strides = [1, 1, 1, 1]} : vector<2x16x16x128xbf16> to vector<2x8x8x128xbf16>
    %35 = vector.extract_strided_slice %21 {offsets = [0, 2, 3, 0], sizes = [2, 8, 8, 128], strides = [1, 1, 1, 1]} : vector<2x16x16x128xbf16> to vector<2x8x8x128xbf16>
    %36 = vector.extract_strided_slice %21 {offsets = [0, 2, 4, 0], sizes = [2, 8, 8, 128], strides = [1, 1, 1, 1]} : vector<2x16x16x128xbf16> to vector<2x8x8x128xbf16>
    %37 = vector.extract_strided_slice %21 {offsets = [0, 3, 0, 0], sizes = [2, 8, 8, 128], strides = [1, 1, 1, 1]} : vector<2x16x16x128xbf16> to vector<2x8x8x128xbf16>
    %38 = vector.extract_strided_slice %21 {offsets = [0, 3, 1, 0], sizes = [2, 8, 8, 128], strides = [1, 1, 1, 1]} : vector<2x16x16x128xbf16> to vector<2x8x8x128xbf16>
    %39 = vector.extract_strided_slice %21 {offsets = [0, 3, 2, 0], sizes = [2, 8, 8, 128], strides = [1, 1, 1, 1]} : vector<2x16x16x128xbf16> to vector<2x8x8x128xbf16>
    %40 = vector.extract_strided_slice %21 {offsets = [0, 3, 3, 0], sizes = [2, 8, 8, 128], strides = [1, 1, 1, 1]} : vector<2x16x16x128xbf16> to vector<2x8x8x128xbf16>
    %41 = vector.extract_strided_slice %21 {offsets = [0, 3, 4, 0], sizes = [2, 8, 8, 128], strides = [1, 1, 1, 1]} : vector<2x16x16x128xbf16> to vector<2x8x8x128xbf16>
    %42 = vector.extract_strided_slice %21 {offsets = [0, 4, 0, 0], sizes = [2, 8, 8, 128], strides = [1, 1, 1, 1]} : vector<2x16x16x128xbf16> to vector<2x8x8x128xbf16>
    %43 = vector.extract_strided_slice %21 {offsets = [0, 4, 1, 0], sizes = [2, 8, 8, 128], strides = [1, 1, 1, 1]} : vector<2x16x16x128xbf16> to vector<2x8x8x128xbf16>
    %44 = vector.extract_strided_slice %21 {offsets = [0, 4, 2, 0], sizes = [2, 8, 8, 128], strides = [1, 1, 1, 1]} : vector<2x16x16x128xbf16> to vector<2x8x8x128xbf16>
    %45 = vector.extract_strided_slice %21 {offsets = [0, 4, 3, 0], sizes = [2, 8, 8, 128], strides = [1, 1, 1, 1]} : vector<2x16x16x128xbf16> to vector<2x8x8x128xbf16>
    %46 = vector.extract_strided_slice %21 {offsets = [0, 4, 4, 0], sizes = [2, 8, 8, 128], strides = [1, 1, 1, 1]} : vector<2x16x16x128xbf16> to vector<2x8x8x128xbf16>
    %47 = tpu.concatenate %22, %23, %24, %25, %26, %27, %28, %29, %30, %31, %32, %33, %34, %35, %36, %37 in 3 : vector<2x8x8x128xbf16>, vector<2x8x8x128xbf16>, vector<2x8x8x128xbf16>, vector<2x8x8x128xbf16>, vector<2x8x8x128xbf16>, vector<2x8x8x128xbf16>, vector<2x8x8x128xbf16>, vector<2x8x8x128xbf16>, vector<2x8x8x128xbf16>, vector<2x8x8x128xbf16>, vector<2x8x8x128xbf16>, vector<2x8x8x128xbf16>, vector<2x8x8x128xbf16>, vector<2x8x8x128xbf16>, vector<2x8x8x128xbf16>, vector<2x8x8x128xbf16> -> vector<2x8x8x2048xbf16>
    %48 = tpu.concatenate %38, %39, %40, %41, %42, %43, %44, %45, %46 in 3 : vector<2x8x8x128xbf16>, vector<2x8x8x128xbf16>, vector<2x8x8x128xbf16>, vector<2x8x8x128xbf16>, vector<2x8x8x128xbf16>, vector<2x8x8x128xbf16>, vector<2x8x8x128xbf16>, vector<2x8x8x128xbf16>, vector<2x8x8x128xbf16> -> vector<2x8x8x1152xbf16>
    %49 = tpu.concatenate %47, %48 in 3 : vector<2x8x8x2048xbf16>, vector<2x8x8x1152xbf16> -> vector<2x8x8x3200xbf16>
    %50 = vector.shape_cast %49 : vector<2x8x8x3200xbf16> to vector<128x3200xbf16>
    %c0_6 = arith.constant 0 : index
    %c0_7 = arith.constant 0 : index
    %51 = vector.load %arg4[%c0_6, %c0_7] : memref<3200x128xbf16, #tpu.memory_space<vmem>>, vector<3200x128xbf16>
    %cst_8 = arith.constant dense<0.000000e+00> : vector<128x128xf32>
    %52 = tpu.matmul %50, %51, %cst_8 {dimension_numbers = #tpu.dot_dimension_numbers<[1], [0], [0], [1], [0, 0, 1, 1], [], []>} : vector<128x3200xbf16>, vector<3200x128xbf16>, vector<128x128xf32> -> vector<128x128xf32>
    %c0_9 = arith.constant 0 : index
    %c0_10 = arith.constant 0 : index
    %53 = vector.load %arg5[%c0_9, %c0_10] : memref<1x128xf32, #tpu.memory_space<vmem>>, vector<1x128xf32>
    %54 = vector.broadcast %53 : vector<1x128xf32> to vector<128x128xf32>
    %55 = arith.addf %52, %54 : vector<128x128xf32>
    %56 = vector.shape_cast %55 : vector<128x128xf32> to vector<2x8x8x128xf32>
    %57 = vector.extract_strided_slice %56 {offsets = [0, 0, 0, 0], sizes = [2, 1, 1, 128], strides = [1, 1, 1, 1]} : vector<2x8x8x128xf32> to vector<2x1x1x128xf32>
    %58 = vector.shape_cast %57 : vector<2x1x1x128xf32> to vector<2x128xf32>
    %59 = vector.extract_strided_slice %56 {offsets = [0, 0, 1, 0], sizes = [2, 1, 1, 128], strides = [1, 1, 1, 1]} : vector<2x8x8x128xf32> to vector<2x1x1x128xf32>
    %60 = vector.shape_cast %59 : vector<2x1x1x128xf32> to vector<2x128xf32>
    %61 = arith.maximumf %58, %60 : vector<2x128xf32>
    %62 = vector.extract_strided_slice %56 {offsets = [0, 1, 0, 0], sizes = [2, 1, 1, 128], strides = [1, 1, 1, 1]} : vector<2x8x8x128xf32> to vector<2x1x1x128xf32>
    %63 = vector.shape_cast %62 : vector<2x1x1x128xf32> to vector<2x128xf32>
    %64 = vector.extract_strided_slice %56 {offsets = [0, 1, 1, 0], sizes = [2, 1, 1, 128], strides = [1, 1, 1, 1]} : vector<2x8x8x128xf32> to vector<2x1x1x128xf32>
    %65 = vector.shape_cast %64 : vector<2x1x1x128xf32> to vector<2x128xf32>
    %66 = arith.maximumf %63, %65 : vector<2x128xf32>
    %67 = arith.maximumf %61, %66 : vector<2x128xf32>
    %68 = vector.extract_strided_slice %56 {offsets = [0, 0, 2, 0], sizes = [2, 1, 1, 128], strides = [1, 1, 1, 1]} : vector<2x8x8x128xf32> to vector<2x1x1x128xf32>
    %69 = vector.shape_cast %68 : vector<2x1x1x128xf32> to vector<2x128xf32>
    %70 = vector.extract_strided_slice %56 {offsets = [0, 0, 3, 0], sizes = [2, 1, 1, 128], strides = [1, 1, 1, 1]} : vector<2x8x8x128xf32> to vector<2x1x1x128xf32>
    %71 = vector.shape_cast %70 : vector<2x1x1x128xf32> to vector<2x128xf32>
    %72 = arith.maximumf %69, %71 : vector<2x128xf32>
    %73 = vector.extract_strided_slice %56 {offsets = [0, 1, 2, 0], sizes = [2, 1, 1, 128], strides = [1, 1, 1, 1]} : vector<2x8x8x128xf32> to vector<2x1x1x128xf32>
    %74 = vector.shape_cast %73 : vector<2x1x1x128xf32> to vector<2x128xf32>
    %75 = vector.extract_strided_slice %56 {offsets = [0, 1, 3, 0], sizes = [2, 1, 1, 128], strides = [1, 1, 1, 1]} : vector<2x8x8x128xf32> to vector<2x1x1x128xf32>
    %76 = vector.shape_cast %75 : vector<2x1x1x128xf32> to vector<2x128xf32>
    %77 = arith.maximumf %74, %76 : vector<2x128xf32>
    %78 = arith.maximumf %72, %77 : vector<2x128xf32>
    %79 = vector.extract_strided_slice %56 {offsets = [0, 0, 4, 0], sizes = [2, 1, 1, 128], strides = [1, 1, 1, 1]} : vector<2x8x8x128xf32> to vector<2x1x1x128xf32>
    %80 = vector.shape_cast %79 : vector<2x1x1x128xf32> to vector<2x128xf32>
    %81 = vector.extract_strided_slice %56 {offsets = [0, 0, 5, 0], sizes = [2, 1, 1, 128], strides = [1, 1, 1, 1]} : vector<2x8x8x128xf32> to vector<2x1x1x128xf32>
    %82 = vector.shape_cast %81 : vector<2x1x1x128xf32> to vector<2x128xf32>
    %83 = arith.maximumf %80, %82 : vector<2x128xf32>
    %84 = vector.extract_strided_slice %56 {offsets = [0, 1, 4, 0], sizes = [2, 1, 1, 128], strides = [1, 1, 1, 1]} : vector<2x8x8x128xf32> to vector<2x1x1x128xf32>
    %85 = vector.shape_cast %84 : vector<2x1x1x128xf32> to vector<2x128xf32>
    %86 = vector.extract_strided_slice %56 {offsets = [0, 1, 5, 0], sizes = [2, 1, 1, 128], strides = [1, 1, 1, 1]} : vector<2x8x8x128xf32> to vector<2x1x1x128xf32>
    %87 = vector.shape_cast %86 : vector<2x1x1x128xf32> to vector<2x128xf32>
    %88 = arith.maximumf %85, %87 : vector<2x128xf32>
    %89 = arith.maximumf %83, %88 : vector<2x128xf32>
    %90 = vector.extract_strided_slice %56 {offsets = [0, 0, 6, 0], sizes = [2, 1, 1, 128], strides = [1, 1, 1, 1]} : vector<2x8x8x128xf32> to vector<2x1x1x128xf32>
    %91 = vector.shape_cast %90 : vector<2x1x1x128xf32> to vector<2x128xf32>
    %92 = vector.extract_strided_slice %56 {offsets = [0, 0, 7, 0], sizes = [2, 1, 1, 128], strides = [1, 1, 1, 1]} : vector<2x8x8x128xf32> to vector<2x1x1x128xf32>
    %93 = vector.shape_cast %92 : vector<2x1x1x128xf32> to vector<2x128xf32>
    %94 = arith.maximumf %91, %93 : vector<2x128xf32>
    %95 = vector.extract_strided_slice %56 {offsets = [0, 1, 6, 0], sizes = [2, 1, 1, 128], strides = [1, 1, 1, 1]} : vector<2x8x8x128xf32> to vector<2x1x1x128xf32>
    %96 = vector.shape_cast %95 : vector<2x1x1x128xf32> to vector<2x128xf32>
    %97 = vector.extract_strided_slice %56 {offsets = [0, 1, 7, 0], sizes = [2, 1, 1, 128], strides = [1, 1, 1, 1]} : vector<2x8x8x128xf32> to vector<2x1x1x128xf32>
    %98 = vector.shape_cast %97 : vector<2x1x1x128xf32> to vector<2x128xf32>
    %99 = arith.maximumf %96, %98 : vector<2x128xf32>
    %100 = arith.maximumf %94, %99 : vector<2x128xf32>
    %101 = vector.extract_strided_slice %56 {offsets = [0, 2, 0, 0], sizes = [2, 1, 1, 128], strides = [1, 1, 1, 1]} : vector<2x8x8x128xf32> to vector<2x1x1x128xf32>
    %102 = vector.shape_cast %101 : vector<2x1x1x128xf32> to vector<2x128xf32>
    %103 = vector.extract_strided_slice %56 {offsets = [0, 2, 1, 0], sizes = [2, 1, 1, 128], strides = [1, 1, 1, 1]} : vector<2x8x8x128xf32> to vector<2x1x1x128xf32>
    %104 = vector.shape_cast %103 : vector<2x1x1x128xf32> to vector<2x128xf32>
    %105 = arith.maximumf %102, %104 : vector<2x128xf32>
    %106 = vector.extract_strided_slice %56 {offsets = [0, 3, 0, 0], sizes = [2, 1, 1, 128], strides = [1, 1, 1, 1]} : vector<2x8x8x128xf32> to vector<2x1x1x128xf32>
    %107 = vector.shape_cast %106 : vector<2x1x1x128xf32> to vector<2x128xf32>
    %108 = vector.extract_strided_slice %56 {offsets = [0, 3, 1, 0], sizes = [2, 1, 1, 128], strides = [1, 1, 1, 1]} : vector<2x8x8x128xf32> to vector<2x1x1x128xf32>
    %109 = vector.shape_cast %108 : vector<2x1x1x128xf32> to vector<2x128xf32>
    %110 = arith.maximumf %107, %109 : vector<2x128xf32>
    %111 = arith.maximumf %105, %110 : vector<2x128xf32>
    %112 = vector.extract_strided_slice %56 {offsets = [0, 2, 2, 0], sizes = [2, 1, 1, 128], strides = [1, 1, 1, 1]} : vector<2x8x8x128xf32> to vector<2x1x1x128xf32>
    %113 = vector.shape_cast %112 : vector<2x1x1x128xf32> to vector<2x128xf32>
    %114 = vector.extract_strided_slice %56 {offsets = [0, 2, 3, 0], sizes = [2, 1, 1, 128], strides = [1, 1, 1, 1]} : vector<2x8x8x128xf32> to vector<2x1x1x128xf32>
    %115 = vector.shape_cast %114 : vector<2x1x1x128xf32> to vector<2x128xf32>
    %116 = arith.maximumf %113, %115 : vector<2x128xf32>
    %117 = vector.extract_strided_slice %56 {offsets = [0, 3, 2, 0], sizes = [2, 1, 1, 128], strides = [1, 1, 1, 1]} : vector<2x8x8x128xf32> to vector<2x1x1x128xf32>
    %118 = vector.shape_cast %117 : vector<2x1x1x128xf32> to vector<2x128xf32>
    %119 = vector.extract_strided_slice %56 {offsets = [0, 3, 3, 0], sizes = [2, 1, 1, 128], strides = [1, 1, 1, 1]} : vector<2x8x8x128xf32> to vector<2x1x1x128xf32>
    %120 = vector.shape_cast %119 : vector<2x1x1x128xf32> to vector<2x128xf32>
    %121 = arith.maximumf %118, %120 : vector<2x128xf32>
    %122 = arith.maximumf %116, %121 : vector<2x128xf32>
    %123 = vector.extract_strided_slice %56 {offsets = [0, 2, 4, 0], sizes = [2, 1, 1, 128], strides = [1, 1, 1, 1]} : vector<2x8x8x128xf32> to vector<2x1x1x128xf32>
    %124 = vector.shape_cast %123 : vector<2x1x1x128xf32> to vector<2x128xf32>
    %125 = vector.extract_strided_slice %56 {offsets = [0, 2, 5, 0], sizes = [2, 1, 1, 128], strides = [1, 1, 1, 1]} : vector<2x8x8x128xf32> to vector<2x1x1x128xf32>
    %126 = vector.shape_cast %125 : vector<2x1x1x128xf32> to vector<2x128xf32>
    %127 = arith.maximumf %124, %126 : vector<2x128xf32>
    %128 = vector.extract_strided_slice %56 {offsets = [0, 3, 4, 0], sizes = [2, 1, 1, 128], strides = [1, 1, 1, 1]} : vector<2x8x8x128xf32> to vector<2x1x1x128xf32>
    %129 = vector.shape_cast %128 : vector<2x1x1x128xf32> to vector<2x128xf32>
    %130 = vector.extract_strided_slice %56 {offsets = [0, 3, 5, 0], sizes = [2, 1, 1, 128], strides = [1, 1, 1, 1]} : vector<2x8x8x128xf32> to vector<2x1x1x128xf32>
    %131 = vector.shape_cast %130 : vector<2x1x1x128xf32> to vector<2x128xf32>
    %132 = arith.maximumf %129, %131 : vector<2x128xf32>
    %133 = arith.maximumf %127, %132 : vector<2x128xf32>
    %134 = vector.extract_strided_slice %56 {offsets = [0, 2, 6, 0], sizes = [2, 1, 1, 128], strides = [1, 1, 1, 1]} : vector<2x8x8x128xf32> to vector<2x1x1x128xf32>
    %135 = vector.shape_cast %134 : vector<2x1x1x128xf32> to vector<2x128xf32>
    %136 = vector.extract_strided_slice %56 {offsets = [0, 2, 7, 0], sizes = [2, 1, 1, 128], strides = [1, 1, 1, 1]} : vector<2x8x8x128xf32> to vector<2x1x1x128xf32>
    %137 = vector.shape_cast %136 : vector<2x1x1x128xf32> to vector<2x128xf32>
    %138 = arith.maximumf %135, %137 : vector<2x128xf32>
    %139 = vector.extract_strided_slice %56 {offsets = [0, 3, 6, 0], sizes = [2, 1, 1, 128], strides = [1, 1, 1, 1]} : vector<2x8x8x128xf32> to vector<2x1x1x128xf32>
    %140 = vector.shape_cast %139 : vector<2x1x1x128xf32> to vector<2x128xf32>
    %141 = vector.extract_strided_slice %56 {offsets = [0, 3, 7, 0], sizes = [2, 1, 1, 128], strides = [1, 1, 1, 1]} : vector<2x8x8x128xf32> to vector<2x1x1x128xf32>
    %142 = vector.shape_cast %141 : vector<2x1x1x128xf32> to vector<2x128xf32>
    %143 = arith.maximumf %140, %142 : vector<2x128xf32>
    %144 = arith.maximumf %138, %143 : vector<2x128xf32>
    %145 = vector.extract_strided_slice %56 {offsets = [0, 4, 0, 0], sizes = [2, 1, 1, 128], strides = [1, 1, 1, 1]} : vector<2x8x8x128xf32> to vector<2x1x1x128xf32>
    %146 = vector.shape_cast %145 : vector<2x1x1x128xf32> to vector<2x128xf32>
    %147 = vector.extract_strided_slice %56 {offsets = [0, 4, 1, 0], sizes = [2, 1, 1, 128], strides = [1, 1, 1, 1]} : vector<2x8x8x128xf32> to vector<2x1x1x128xf32>
    %148 = vector.shape_cast %147 : vector<2x1x1x128xf32> to vector<2x128xf32>
    %149 = arith.maximumf %146, %148 : vector<2x128xf32>
    %150 = vector.extract_strided_slice %56 {offsets = [0, 5, 0, 0], sizes = [2, 1, 1, 128], strides = [1, 1, 1, 1]} : vector<2x8x8x128xf32> to vector<2x1x1x128xf32>
    %151 = vector.shape_cast %150 : vector<2x1x1x128xf32> to vector<2x128xf32>
    %152 = vector.extract_strided_slice %56 {offsets = [0, 5, 1, 0], sizes = [2, 1, 1, 128], strides = [1, 1, 1, 1]} : vector<2x8x8x128xf32> to vector<2x1x1x128xf32>
    %153 = vector.shape_cast %152 : vector<2x1x1x128xf32> to vector<2x128xf32>
    %154 = arith.maximumf %151, %153 : vector<2x128xf32>
    %155 = arith.maximumf %149, %154 : vector<2x128xf32>
    %156 = vector.extract_strided_slice %56 {offsets = [0, 4, 2, 0], sizes = [2, 1, 1, 128], strides = [1, 1, 1, 1]} : vector<2x8x8x128xf32> to vector<2x1x1x128xf32>
    %157 = vector.shape_cast %156 : vector<2x1x1x128xf32> to vector<2x128xf32>
    %158 = vector.extract_strided_slice %56 {offsets = [0, 4, 3, 0], sizes = [2, 1, 1, 128], strides = [1, 1, 1, 1]} : vector<2x8x8x128xf32> to vector<2x1x1x128xf32>
    %159 = vector.shape_cast %158 : vector<2x1x1x128xf32> to vector<2x128xf32>
    %160 = arith.maximumf %157, %159 : vector<2x128xf32>
    %161 = vector.extract_strided_slice %56 {offsets = [0, 5, 2, 0], sizes = [2, 1, 1, 128], strides = [1, 1, 1, 1]} : vector<2x8x8x128xf32> to vector<2x1x1x128xf32>
    %162 = vector.shape_cast %161 : vector<2x1x1x128xf32> to vector<2x128xf32>
    %163 = vector.extract_strided_slice %56 {offsets = [0, 5, 3, 0], sizes = [2, 1, 1, 128], strides = [1, 1, 1, 1]} : vector<2x8x8x128xf32> to vector<2x1x1x128xf32>
    %164 = vector.shape_cast %163 : vector<2x1x1x128xf32> to vector<2x128xf32>
    %165 = arith.maximumf %162, %164 : vector<2x128xf32>
    %166 = arith.maximumf %160, %165 : vector<2x128xf32>
    %167 = vector.extract_strided_slice %56 {offsets = [0, 4, 4, 0], sizes = [2, 1, 1, 128], strides = [1, 1, 1, 1]} : vector<2x8x8x128xf32> to vector<2x1x1x128xf32>
    %168 = vector.shape_cast %167 : vector<2x1x1x128xf32> to vector<2x128xf32>
    %169 = vector.extract_strided_slice %56 {offsets = [0, 4, 5, 0], sizes = [2, 1, 1, 128], strides = [1, 1, 1, 1]} : vector<2x8x8x128xf32> to vector<2x1x1x128xf32>
    %170 = vector.shape_cast %169 : vector<2x1x1x128xf32> to vector<2x128xf32>
    %171 = arith.maximumf %168, %170 : vector<2x128xf32>
    %172 = vector.extract_strided_slice %56 {offsets = [0, 5, 4, 0], sizes = [2, 1, 1, 128], strides = [1, 1, 1, 1]} : vector<2x8x8x128xf32> to vector<2x1x1x128xf32>
    %173 = vector.shape_cast %172 : vector<2x1x1x128xf32> to vector<2x128xf32>
    %174 = vector.extract_strided_slice %56 {offsets = [0, 5, 5, 0], sizes = [2, 1, 1, 128], strides = [1, 1, 1, 1]} : vector<2x8x8x128xf32> to vector<2x1x1x128xf32>
    %175 = vector.shape_cast %174 : vector<2x1x1x128xf32> to vector<2x128xf32>
    %176 = arith.maximumf %173, %175 : vector<2x128xf32>
    %177 = arith.maximumf %171, %176 : vector<2x128xf32>
    %178 = vector.extract_strided_slice %56 {offsets = [0, 4, 6, 0], sizes = [2, 1, 1, 128], strides = [1, 1, 1, 1]} : vector<2x8x8x128xf32> to vector<2x1x1x128xf32>
    %179 = vector.shape_cast %178 : vector<2x1x1x128xf32> to vector<2x128xf32>
    %180 = vector.extract_strided_slice %56 {offsets = [0, 4, 7, 0], sizes = [2, 1, 1, 128], strides = [1, 1, 1, 1]} : vector<2x8x8x128xf32> to vector<2x1x1x128xf32>
    %181 = vector.shape_cast %180 : vector<2x1x1x128xf32> to vector<2x128xf32>
    %182 = arith.maximumf %179, %181 : vector<2x128xf32>
    %183 = vector.extract_strided_slice %56 {offsets = [0, 5, 6, 0], sizes = [2, 1, 1, 128], strides = [1, 1, 1, 1]} : vector<2x8x8x128xf32> to vector<2x1x1x128xf32>
    %184 = vector.shape_cast %183 : vector<2x1x1x128xf32> to vector<2x128xf32>
    %185 = vector.extract_strided_slice %56 {offsets = [0, 5, 7, 0], sizes = [2, 1, 1, 128], strides = [1, 1, 1, 1]} : vector<2x8x8x128xf32> to vector<2x1x1x128xf32>
    %186 = vector.shape_cast %185 : vector<2x1x1x128xf32> to vector<2x128xf32>
    %187 = arith.maximumf %184, %186 : vector<2x128xf32>
    %188 = arith.maximumf %182, %187 : vector<2x128xf32>
    %189 = vector.extract_strided_slice %56 {offsets = [0, 6, 0, 0], sizes = [2, 1, 1, 128], strides = [1, 1, 1, 1]} : vector<2x8x8x128xf32> to vector<2x1x1x128xf32>
    %190 = vector.shape_cast %189 : vector<2x1x1x128xf32> to vector<2x128xf32>
    %191 = vector.extract_strided_slice %56 {offsets = [0, 6, 1, 0], sizes = [2, 1, 1, 128], strides = [1, 1, 1, 1]} : vector<2x8x8x128xf32> to vector<2x1x1x128xf32>
    %192 = vector.shape_cast %191 : vector<2x1x1x128xf32> to vector<2x128xf32>
    %193 = arith.maximumf %190, %192 : vector<2x128xf32>
    %194 = vector.extract_strided_slice %56 {offsets = [0, 7, 0, 0], sizes = [2, 1, 1, 128], strides = [1, 1, 1, 1]} : vector<2x8x8x128xf32> to vector<2x1x1x128xf32>
    %195 = vector.shape_cast %194 : vector<2x1x1x128xf32> to vector<2x128xf32>
    %196 = vector.extract_strided_slice %56 {offsets = [0, 7, 1, 0], sizes = [2, 1, 1, 128], strides = [1, 1, 1, 1]} : vector<2x8x8x128xf32> to vector<2x1x1x128xf32>
    %197 = vector.shape_cast %196 : vector<2x1x1x128xf32> to vector<2x128xf32>
    %198 = arith.maximumf %195, %197 : vector<2x128xf32>
    %199 = arith.maximumf %193, %198 : vector<2x128xf32>
    %200 = vector.extract_strided_slice %56 {offsets = [0, 6, 2, 0], sizes = [2, 1, 1, 128], strides = [1, 1, 1, 1]} : vector<2x8x8x128xf32> to vector<2x1x1x128xf32>
    %201 = vector.shape_cast %200 : vector<2x1x1x128xf32> to vector<2x128xf32>
    %202 = vector.extract_strided_slice %56 {offsets = [0, 6, 3, 0], sizes = [2, 1, 1, 128], strides = [1, 1, 1, 1]} : vector<2x8x8x128xf32> to vector<2x1x1x128xf32>
    %203 = vector.shape_cast %202 : vector<2x1x1x128xf32> to vector<2x128xf32>
    %204 = arith.maximumf %201, %203 : vector<2x128xf32>
    %205 = vector.extract_strided_slice %56 {offsets = [0, 7, 2, 0], sizes = [2, 1, 1, 128], strides = [1, 1, 1, 1]} : vector<2x8x8x128xf32> to vector<2x1x1x128xf32>
    %206 = vector.shape_cast %205 : vector<2x1x1x128xf32> to vector<2x128xf32>
    %207 = vector.extract_strided_slice %56 {offsets = [0, 7, 3, 0], sizes = [2, 1, 1, 128], strides = [1, 1, 1, 1]} : vector<2x8x8x128xf32> to vector<2x1x1x128xf32>
    %208 = vector.shape_cast %207 : vector<2x1x1x128xf32> to vector<2x128xf32>
    %209 = arith.maximumf %206, %208 : vector<2x128xf32>
    %210 = arith.maximumf %204, %209 : vector<2x128xf32>
    %211 = vector.extract_strided_slice %56 {offsets = [0, 6, 4, 0], sizes = [2, 1, 1, 128], strides = [1, 1, 1, 1]} : vector<2x8x8x128xf32> to vector<2x1x1x128xf32>
    %212 = vector.shape_cast %211 : vector<2x1x1x128xf32> to vector<2x128xf32>
    %213 = vector.extract_strided_slice %56 {offsets = [0, 6, 5, 0], sizes = [2, 1, 1, 128], strides = [1, 1, 1, 1]} : vector<2x8x8x128xf32> to vector<2x1x1x128xf32>
    %214 = vector.shape_cast %213 : vector<2x1x1x128xf32> to vector<2x128xf32>
    %215 = arith.maximumf %212, %214 : vector<2x128xf32>
    %216 = vector.extract_strided_slice %56 {offsets = [0, 7, 4, 0], sizes = [2, 1, 1, 128], strides = [1, 1, 1, 1]} : vector<2x8x8x128xf32> to vector<2x1x1x128xf32>
    %217 = vector.shape_cast %216 : vector<2x1x1x128xf32> to vector<2x128xf32>
    %218 = vector.extract_strided_slice %56 {offsets = [0, 7, 5, 0], sizes = [2, 1, 1, 128], strides = [1, 1, 1, 1]} : vector<2x8x8x128xf32> to vector<2x1x1x128xf32>
    %219 = vector.shape_cast %218 : vector<2x1x1x128xf32> to vector<2x128xf32>
    %220 = arith.maximumf %217, %219 : vector<2x128xf32>
    %221 = arith.maximumf %215, %220 : vector<2x128xf32>
    %222 = vector.extract_strided_slice %56 {offsets = [0, 6, 6, 0], sizes = [2, 1, 1, 128], strides = [1, 1, 1, 1]} : vector<2x8x8x128xf32> to vector<2x1x1x128xf32>
    %223 = vector.shape_cast %222 : vector<2x1x1x128xf32> to vector<2x128xf32>
    %224 = vector.extract_strided_slice %56 {offsets = [0, 6, 7, 0], sizes = [2, 1, 1, 128], strides = [1, 1, 1, 1]} : vector<2x8x8x128xf32> to vector<2x1x1x128xf32>
    %225 = vector.shape_cast %224 : vector<2x1x1x128xf32> to vector<2x128xf32>
    %226 = arith.maximumf %223, %225 : vector<2x128xf32>
    %227 = vector.extract_strided_slice %56 {offsets = [0, 7, 6, 0], sizes = [2, 1, 1, 128], strides = [1, 1, 1, 1]} : vector<2x8x8x128xf32> to vector<2x1x1x128xf32>
    %228 = vector.shape_cast %227 : vector<2x1x1x128xf32> to vector<2x128xf32>
    %229 = vector.extract_strided_slice %56 {offsets = [0, 7, 7, 0], sizes = [2, 1, 1, 128], strides = [1, 1, 1, 1]} : vector<2x8x8x128xf32> to vector<2x1x1x128xf32>
    %230 = vector.shape_cast %229 : vector<2x1x1x128xf32> to vector<2x128xf32>
    %231 = arith.maximumf %228, %230 : vector<2x128xf32>
    %232 = arith.maximumf %226, %231 : vector<2x128xf32>
    %233 = tpu.concatenate %67, %78, %89, %100, %111, %122, %133, %144, %155, %166, %177, %188, %199, %210, %221, %232 in 1 : vector<2x128xf32>, vector<2x128xf32>, vector<2x128xf32>, vector<2x128xf32>, vector<2x128xf32>, vector<2x128xf32>, vector<2x128xf32>, vector<2x128xf32>, vector<2x128xf32>, vector<2x128xf32>, vector<2x128xf32>, vector<2x128xf32>, vector<2x128xf32>, vector<2x128xf32>, vector<2x128xf32>, vector<2x128xf32> -> vector<2x2048xf32>
    %cst_11 = arith.constant 0.000000e+00 : f32
    %234 = vector.broadcast %cst_11 : f32 to vector<2x2048xf32>
    %235 = arith.maximumf %233, %234 : vector<2x2048xf32>
    %236 = arith.truncf %235 : vector<2x2048xf32> to vector<2x2048xbf16>
    %c0_12 = arith.constant 0 : index
    %c0_13 = arith.constant 0 : index
    %237 = vector.load %arg6[%c0_12, %c0_13] : memref<2048x128xbf16, #tpu.memory_space<vmem>>, vector<2048x128xbf16>
    %cst_14 = arith.constant dense<0.000000e+00> : vector<2x128xf32>
    %238 = tpu.matmul %236, %237, %cst_14 {dimension_numbers = #tpu.dot_dimension_numbers<[1], [0], [0], [1], [0, 0, 1, 1], [], []>} : vector<2x2048xbf16>, vector<2048x128xbf16>, vector<2x128xf32> -> vector<2x128xf32>
    %c0_15 = arith.constant 0 : index
    %c0_16 = arith.constant 0 : index
    %239 = vector.load %arg7[%c0_15, %c0_16] : memref<1x128xf32, #tpu.memory_space<vmem>>, vector<1x128xf32>
    %240 = vector.broadcast %239 : vector<1x128xf32> to vector<2x128xf32>
    %241 = arith.addf %238, %240 : vector<2x128xf32>
    %cst_17 = arith.constant 0.000000e+00 : f32
    %242 = vector.broadcast %cst_17 : f32 to vector<2x128xf32>
    %243 = arith.maximumf %241, %242 : vector<2x128xf32>
    %244 = arith.truncf %243 : vector<2x128xf32> to vector<2x128xbf16>
    %c0_18 = arith.constant 0 : index
    %c0_19 = arith.constant 0 : index
    %245 = vector.load %arg8[%c0_18, %c0_19] : memref<128x128xbf16, #tpu.memory_space<vmem>>, vector<128x128xbf16>
    %cst_20 = arith.constant dense<0.000000e+00> : vector<2x128xf32>
    %246 = tpu.matmul %244, %245, %cst_20 {dimension_numbers = #tpu.dot_dimension_numbers<[1], [0], [0], [1], [0, 0, 1, 1], [], []>} : vector<2x128xbf16>, vector<128x128xbf16>, vector<2x128xf32> -> vector<2x128xf32>
    %c0_21 = arith.constant 0 : index
    %c0_22 = arith.constant 0 : index
    %247 = vector.load %arg9[%c0_21, %c0_22] : memref<1x128xf32, #tpu.memory_space<vmem>>, vector<1x128xf32>
    %248 = vector.broadcast %247 : vector<1x128xf32> to vector<2x128xf32>
    %249 = arith.addf %246, %248 : vector<2x128xf32>
    %c0_23 = arith.constant 0 : index
    %c0_24 = arith.constant 0 : index
    %250 = vector.load %arg10[%c0_23, %c0_24] : memref<2x128xf32, #tpu.memory_space<vmem>>, vector<2x128xf32>
    tpu.vector_store %arg10[%c0_23, %c0_24], %249 {strides = array<i32>} : memref<2x128xf32, #tpu.memory_space<vmem>>, vector<2x128xf32>,
    return
  }
  func.func @transform_0(%arg0: i32) -> (i32, i32) {
    %c0_i32 = arith.constant 0 : i32
    %c0_i32_0 = arith.constant 0 : i32
    %c0_i32_1 = arith.constant 0 : i32
    return %c0_i32, %c0_i32_0 : i32, i32
  }
  func.func @transform_1(%arg0: i32) -> (i32, i32) {
    %c0_i32 = arith.constant 0 : i32
    %c0_i32_0 = arith.constant 0 : i32
    %c0_i32_1 = arith.constant 0 : i32
    return %c0_i32, %c0_i32_0 : i32, i32
  }
  func.func @transform_2(%arg0: i32) -> (i32, i32) {
    %c0_i32 = arith.constant 0 : i32
    %c0_i32_0 = arith.constant 0 : i32
    %c0_i32_1 = arith.constant 0 : i32
    return %c0_i32, %c0_i32_0 : i32, i32
  }
  func.func @transform_3(%arg0: i32) -> (i32, i32) {
    %c0_i32 = arith.constant 0 : i32
    %c0_i32_0 = arith.constant 0 : i32
    %c0_i32_1 = arith.constant 0 : i32
    return %c0_i32, %c0_i32_0 : i32, i32
  }
  func.func @transform_4(%arg0: i32) -> (i32, i32) {
    %c0_i32 = arith.constant 0 : i32
    %c0_i32_0 = arith.constant 0 : i32
    %c0_i32_1 = arith.constant 0 : i32
    return %c0_i32, %c0_i32_0 : i32, i32
  }
  func.func @transform_5(%arg0: i32) -> (i32, i32) {
    %c0_i32 = arith.constant 0 : i32
    %c0_i32_0 = arith.constant 0 : i32
    %c0_i32_1 = arith.constant 0 : i32
    return %c0_i32, %c0_i32_0 : i32, i32
  }
  func.func @transform_6(%arg0: i32) -> (i32, i32) {
    %c0_i32 = arith.constant 0 : i32
    %c0_i32_0 = arith.constant 0 : i32
    %c0_i32_1 = arith.constant 0 : i32
    return %c0_i32, %c0_i32_0 : i32, i32
  }
  func.func @transform_7(%arg0: i32) -> (i32, i32) {
    %c0_i32 = arith.constant 0 : i32
    %c0_i32_0 = arith.constant 0 : i32
    %c0_i32_1 = arith.constant 0 : i32
    return %c0_i32, %c0_i32_0 : i32, i32
  }
  func.func @transform_8(%arg0: i32) -> (i32, i32) {
    %c0_i32 = arith.constant 0 : i32
    %c0_i32_0 = arith.constant 0 : i32
    %c0_i32_1 = arith.constant 0 : i32
    return %c0_i32, %c0_i32_0 : i32, i32
  }
  func.func @transform_9(%arg0: i32) -> (i32, i32) {
    %c0_i32 = arith.constant 0 : i32
    %c0_i32_0 = arith.constant 0 : i32
    %c0_i32_1 = arith.constant 0 : i32
    return %c0_i32, %c0_i32_0 : i32, i32
  }
}

</mosaic_0001>

<bundles_post_ra>
// kernel: classifier_forward.1
= control target key start
LH: loop header
LB: loop body
LE: loop exit
PB: predicated region body
PF: predicated region fallthrough
CT: control target
= control target key end

     0   :  { %vm1330_vm0 = vcmask 1043456   ;;  %vm1331_vm1 = vcmask 1044480   ;;  %v11105_v1 = vmov 65535   ;;  %vm945_vm2 = vcmask 203776   ;;  %s15255_s0 = inlined_call_operand.vmem [shape: bf16[2048,25], index: 0, kind: input, shape index: {}]   ;;  %s15256_s1 = inlined_call_operand.vmem [shape: bf16[25,128], index: 1, kind: input, shape index: {}]   ;;  %s15257_s2 = inlined_call_operand.vmem [shape: f32[1,128], index: 2, kind: input, shape index: {}]   ;;  %s15258_s3 = inlined_call_operand.vmem [shape: bf16[3200,128], index: 3, kind: input, shape index: {}]   ;;  %s15259_s4 = inlined_call_operand.vmem [shape: f32[1,128], index: 4, kind: input, shape index: {}]   ;;  %s15260_s5 = inlined_call_operand.vmem [shape: bf16[2048,128], index: 5, kind: input, shape index: {}]   ;;  %s15261_s6 = inlined_call_operand.vmem [shape: f32[1,128], index: 6, kind: input, shape index: {}]   ;;  %s15262_s7 = inlined_call_operand.vmem [shape: bf16[128,128], index: 7, kind: input, shape index: {}]   ;;  %s15263_s8 = inlined_call_operand.vmem [shape: f32[1,128], index: 8, kind: input, shape index: {}]   ;;  %s15264_s9 = inlined_call_operand.hbm [shape: f32[2,128], index: 9, kind: output, shape index: {}]  }
   0x1   :  { %v10616_v0 = vld [vmem:[%s15256_s1 + $0x8] sm:$0x1f]   ;;  %v1332_v2 = vsel %vm1330_vm0, 4294967295, %v11105_v1  ;;  %v10618_v3 = vld [vmem:[%s15255_s0] sm:$0xff]   ;;  %v10620_v8 = vld [vmem:[%s15255_s0 + $0x10] sm:$0xff]  }
   0x2   :  { %v1333_v4 = vsel %vm1331_vm1, %v1332_v2, 0  ;;  %v10617_v6 = vld [vmem:[%s15256_s1] sm:$0xff]   ;;  %10304 = vmatprep.mubr.msk.bf16.mxu0 %vm945_vm2, %v10618_v3  ;;  %v10619_v7 = vld [vmem:[%s15255_s0 + $0x8] sm:$0xff]   ;;  %v10621_v9 = vld [vmem:[%s15255_s0 + $0x18] sm:$0xff]  }
   0x3   :  { %v1335_v5 = vand.u32 %v10616_v0, %v1333_v4  ;;  %v10622_v10 = vld [vmem:[%s15255_s0 + $0x20] sm:$0xff]   ;;  %v10623_v11 = vld [vmem:[%s15255_s0 + $0x28] sm:$0xff]   ;;  %v10624_v12 = vld [vmem:[%s15255_s0 + $0x30] sm:$0xff]  }
   0x4   :  { %v10625_v13 = vld [vmem:[%s15255_s0 + $0x38] sm:$0xff]   ;;  %v10626_v14 = vld [vmem:[%s15255_s0 + $0x40] sm:$0xff]   ;;  %v10627_v15 = vld [vmem:[%s15255_s0 + $0x48] sm:$0xff]  }
   0x5   :  { %10300 = vmatprep.subr.bf16.mxu0 %v1335_v5  ;;  %v10628_v16 = vld [vmem:[%s15255_s0 + $0x50] sm:$0xff]   ;;  %v10629_v17 = vld [vmem:[%s15255_s0 + $0x58] sm:$0xff]   ;;  %v10630_v18 = vld [vmem:[%s15255_s0 + $0x60] sm:$0xff]  }
   0x6   :  { %10301 = vmatpush3.bf16.msra.mxu0 %v1335_v5  ;;  %v10631_v19 = vld [vmem:[%s15255_s0 + $0x68] sm:$0xff]   ;;  %v10632_v20 = vld [vmem:[%s15255_s0 + $0x70] sm:$0xff]   ;;  %v10633_v21 = vld [vmem:[%s15255_s0 + $0x78] sm:$0xff]  }
   0x7   :  { %10302 = vmatprep.subr.bf16.mxu0 %v10617_v6  ;;  %v10634_v22 = vld [vmem:[%s15255_s0 + $0x80] sm:$0xff]   ;;  %v10635_v23 = vld [vmem:[%s15255_s0 + $0x88] sm:$0xff]   ;;  %v10636_v24 = vld [vmem:[%s15255_s0 + $0x90] sm:$0xff]  }
   0x8   :  { %v10637_v25 = vld [vmem:[%s15255_s0 + $0x98] sm:$0xff]   ;;  %v10638_v26 = vld [vmem:[%s15255_s0 + $0xa0] sm:$0xff]   ;;  %v10639_v27 = vld [vmem:[%s15255_s0 + $0xa8] sm:$0xff]  }
   0x9   :  { %v10640_v28 = vld [vmem:[%s15255_s0 + $0xb0] sm:$0xff]   ;;  %v10641_v29 = vld [vmem:[%s15255_s0 + $0xb8] sm:$0xff]   ;;  %v10642_v30 = vld [vmem:[%s15255_s0 + $0xc0] sm:$0xff]  }
   0xa   :  { %10303 = vmatpush3.bf16.msra.mxu0 %v10617_v6  ;;  %v10643_v31 = vld [vmem:[%s15255_s0 + $0xc8] sm:$0xff]   ;;  %v10644_v32 = vld [vmem:[%s15255_s0 + $0xd0] sm:$0xff]   ;;  %v10645_v33 = vld [vmem:[%s15255_s0 + $0xd8] sm:$0xff]  }
   0xb   :  { %v10646_v34 = vld [vmem:[%s15255_s0 + $0xe0] sm:$0xff]   ;;  %v10647_v35 = vld [vmem:[%s15255_s0 + $0xe8] sm:$0xff]   ;;  %v10648_v36 = vld [vmem:[%s15255_s0 + $0xf0] sm:$0xff]  }
   0xc   :  { %v10649_v37 = vld [vmem:[%s15255_s0 + $0xf8] sm:$0xff]   ;;  %v10650_v38 = vld [vmem:[%s15255_s0 + $0x100] sm:$0xff]   ;;  %v10651_v39 = vld [vmem:[%s15255_s0 + $0x108] sm:$0xff]  }
   0xd   :  { %10305 = vmatmul.mubr.msk.bf16.vlgmr.msra.gmra.mxu0 %vm945_vm2, %v10619_v7  ;;  %v10652_v40 = vld [vmem:[%s15255_s0 + $0x110] sm:$0xff]   ;;  %v10653_v41 = vld [vmem:[%s15255_s0 + $0x118] sm:$0xff]   ;;  %v10654_v42 = vld [vmem:[%s15255_s0 + $0x120] sm:$0xff]  }
   0xe   :  { %10308 = vmatprep.mubr.msk.bf16.mxu0 %vm945_vm2, %v10620_v8  ;;  %v10655_v43 = vld [vmem:[%s15255_s0 + $0x128] sm:$0xff]   ;;  %v10656_v44 = vld [vmem:[%s15255_s0 + $0x130] sm:$0xff]   ;;  %v10657_v45 = vld [vmem:[%s15255_s0 + $0x138] sm:$0xff]  }
   0xf   :  { %v10658_v46 = vld [vmem:[%s15255_s0 + $0x140] sm:$0xff]   ;;  %v10659_v47 = vld [vmem:[%s15255_s0 + $0x148] sm:$0xff]   ;;  %v10660_v48 = vld [vmem:[%s15255_s0 + $0x150] sm:$0xff]  }
  0x10   :  { %v10661_v49 = vld [vmem:[%s15255_s0 + $0x158] sm:$0xff]   ;;  %v10662_v50 = vld [vmem:[%s15255_s0 + $0x160] sm:$0xff]   ;;  %v10663_v51 = vld [vmem:[%s15255_s0 + $0x168] sm:$0xff]  }
  0x11   :  { %v10664_v52 = vld [vmem:[%s15255_s0 + $0x170] sm:$0xff]   ;;  %v10665_v53 = vld [vmem:[%s15255_s0 + $0x178] sm:$0xff]   ;;  %v10666_v54 = vld [vmem:[%s15255_s0 + $0x180] sm:$0xff]  }
  0x12   :  { %v10667_v55 = vld [vmem:[%s15255_s0 + $0x188] sm:$0xff]   ;;  %v10668_v56 = vld [vmem:[%s15255_s0 + $0x190] sm:$0xff]   ;;  %v10669_v59 = vld [vmem:[%s15255_s0 + $0x198] sm:$0xff]  }
  0x13   :  { %v10670_v61 = vld [vmem:[%s15255_s0 + $0x1a0] sm:$0xff]   ;;  %v10671_v1 = vld [vmem:[%s15255_s0 + $0x1a8] sm:$0xff]   ;;  %v10672_v3 = vld [vmem:[%s15255_s0 + $0x1b0] sm:$0xff]  }
  0x14   :  { %v10673_v7 = vld [vmem:[%s15255_s0 + $0x1b8] sm:$0xff]  }
  0x15   :  { %10309 = vmatmul.mubr.msk.bf16.gmra.mxu0 %vm945_vm2, %v10621_v9  ;;  %v10674_v9 = vld [vmem:[%s15255_s0 + $0x1c0] sm:$0xff]  }
  0x16   :  { %10312 = vmatprep.mubr.msk.bf16.mxu0 %vm945_vm2, %v10622_v10 }
  0x1d   :  { %10313 = vmatmul.mubr.msk.bf16.gmra.mxu0 %vm945_vm2, %v10623_v11 }
  0x1e   :  { %10316 = vmatprep.mubr.msk.bf16.mxu0 %vm945_vm2, %v10624_v12 }
  0x25   :  { %10317 = vmatmul.mubr.msk.bf16.gmra.mxu0 %vm945_vm2, %v10625_v13  ;;  %v10675_v13 = vld [vmem:[%s15255_s0 + $0x1c8] sm:$0xff]  }
  0x26   :  { %10320 = vmatprep.mubr.msk.bf16.mxu0 %vm945_vm2, %v10626_v14 }
  0x2d   :  { %10321 = vmatmul.mubr.msk.bf16.gmra.mxu0 %vm945_vm2, %v10627_v15  ;;  %v10676_v15 = vld [vmem:[%s15255_s0 + $0x1d0] sm:$0xff]  }
  0x2e   :  { %10324 = vmatprep.mubr.msk.bf16.mxu0 %vm945_vm2, %v10628_v16 }
  0x35   :  { %10325 = vmatmul.mubr.msk.bf16.gmra.mxu0 %vm945_vm2, %v10629_v17 }
  0x36   :  { %10328 = vmatprep.mubr.msk.bf16.mxu0 %vm945_vm2, %v10630_v18 }
  0x3d   :  { %10329 = vmatmul.mubr.msk.bf16.gmra.mxu0 %vm945_vm2, %v10631_v19  ;;  %v10677_v19 = vld [vmem:[%s15255_s0 + $0x1d8] sm:$0xff]  }
  0x3e   :  { %10332 = vmatprep.mubr.msk.bf16.mxu0 %vm945_vm2, %v10632_v20 }
  0x45   :  { %10333 = vmatmul.mubr.msk.bf16.gmra.mxu0 %vm945_vm2, %v10633_v21  ;;  %v10678_v21 = vld [vmem:[%s15255_s0 + $0x1e0] sm:$0xff]  }
  0x46   :  { %10336 = vmatprep.mubr.msk.bf16.mxu0 %vm945_vm2, %v10634_v22 }
  0x4d   :  { %10337 = vmatmul.mubr.msk.bf16.gmra.mxu0 %vm945_vm2, %v10635_v23 }
  0x4e   :  { %10340 = vmatprep.mubr.msk.bf16.mxu0 %vm945_vm2, %v10636_v24 }
  0x55   :  { %10341 = vmatmul.mubr.msk.bf16.gmra.mxu0 %vm945_vm2, %v10637_v25  ;;  %v10679_v25 = vld [vmem:[%s15255_s0 + $0x1e8] sm:$0xff]  }
  0x56   :  { %10344 = vmatprep.mubr.msk.bf16.mxu0 %vm945_vm2, %v10638_v26 }
  0x5d   :  { %10345 = vmatmul.mubr.msk.bf16.gmra.mxu0 %vm945_vm2, %v10639_v27  ;;  %v10680_v27 = vld [vmem:[%s15255_s0 + $0x1f0] sm:$0xff]  }
  0x5e   :  { %10348 = vmatprep.mubr.msk.bf16.mxu0 %vm945_vm2, %v10640_v28 }
  0x65   :  { %10349 = vmatmul.mubr.msk.bf16.gmra.mxu0 %vm945_vm2, %v10641_v29 }
  0x66   :  { %10352 = vmatprep.mubr.msk.bf16.mxu0 %vm945_vm2, %v10642_v30 }
  0x6d   :  { %10353 = vmatmul.mubr.msk.bf16.gmra.mxu0 %vm945_vm2, %v10643_v31  ;;  %v10681_v31 = vld [vmem:[%s15255_s0 + $0x1f8] sm:$0xff]  }
  0x6e   :  { %10356 = vmatprep.mubr.msk.bf16.mxu0 %vm945_vm2, %v10644_v32 }
  0x75   :  { %10357 = vmatmul.mubr.msk.bf16.gmra.mxu0 %vm945_vm2, %v10645_v33  ;;  %v10682_v33 = vld [vmem:[%s15255_s0 + $0x200] sm:$0xff]  }
  0x76   :  { %10360 = vmatprep.mubr.msk.bf16.mxu0 %vm945_vm2, %v10646_v34 }
  0x7d   :  { %10361 = vmatmul.mubr.msk.bf16.gmra.mxu0 %vm945_vm2, %v10647_v35 }
  0x7e   :  { %10364 = vmatprep.mubr.msk.bf16.mxu0 %vm945_vm2, %v10648_v36 }
  0x85   :  { %10365 = vmatmul.mubr.msk.bf16.gmra.mxu0 %vm945_vm2, %v10649_v37  ;;  %v10683_v37 = vld [vmem:[%s15255_s0 + $0x208] sm:$0xff]  }
  0x86   :  { %10368 = vmatprep.mubr.msk.bf16.mxu0 %vm945_vm2, %v10650_v38 }
  0x8d   :  { %10369 = vmatmul.mubr.msk.bf16.gmra.mxu0 %vm945_vm2, %v10651_v39  ;;  %v10684_v39 = vld [vmem:[%s15255_s0 + $0x210] sm:$0xff]  }
  0x8e   :  { %10372 = vmatprep.mubr.msk.bf16.mxu0 %vm945_vm2, %v10652_v40 }
  0x95   :  { %10373 = vmatmul.mubr.msk.bf16.gmra.mxu0 %vm945_vm2, %v10653_v41 }
  0x96   :  { %10376 = vmatprep.mubr.msk.bf16.mxu0 %vm945_vm2, %v10654_v42 }
  0x9d   :  { %10377 = vmatmul.mubr.msk.bf16.gmra.mxu0 %vm945_vm2, %v10655_v43  ;;  %v10685_v43 = vld [vmem:[%s15255_s0 + $0x218] sm:$0xff]  }
  0x9e   :  { %10380 = vmatprep.mubr.msk.bf16.mxu0 %vm945_vm2, %v10656_v44 }
  0xa5   :  { %10381 = vmatmul.mubr.msk.bf16.gmra.mxu0 %vm945_vm2, %v10657_v45  ;;  %v10686_v45 = vld [vmem:[%s15255_s0 + $0x220] sm:$0xff]  }
  0xa6   :  { %10384 = vmatprep.mubr.msk.bf16.mxu0 %vm945_vm2, %v10658_v46 }
  0xad   :  { %10385 = vmatmul.mubr.msk.bf16.gmra.mxu0 %vm945_vm2, %v10659_v47 }
  0xae   :  { %10388 = vmatprep.mubr.msk.bf16.mxu0 %vm945_vm2, %v10660_v48 }
  0xb5   :  { %10389 = vmatmul.mubr.msk.bf16.gmra.mxu0 %vm945_vm2, %v10661_v49  ;;  %v10687_v49 = vld [vmem:[%s15255_s0 + $0x228] sm:$0xff]  }
  0xb6   :  { %10392 = vmatprep.mubr.msk.bf16.mxu0 %vm945_vm2, %v10662_v50 }
  0xbd   :  { %10393 = vmatmul.mubr.msk.bf16.gmra.mxu0 %vm945_vm2, %v10663_v51  ;;  %v10688_v51 = vld [vmem:[%s15255_s0 + $0x230] sm:$0xff]  }
  0xbe   :  { %10396 = vmatprep.mubr.msk.bf16.mxu0 %vm945_vm2, %v10664_v52 }
  0xc5   :  { %10397 = vmatmul.mubr.msk.bf16.gmra.mxu0 %vm945_vm2, %v10665_v53 }
  0xc6   :  { %10400 = vmatprep.mubr.msk.bf16.mxu0 %vm945_vm2, %v10666_v54 }
  0xcd   :  { %v11367_v57 = vpop.f32.mrf.mxu0  ;;  %10401 = vmatmul.mubr.msk.bf16.gmra.mxu0 %vm945_vm2, %v10667_v55  ;;  %v10689_v55 = vld [vmem:[%s15255_s0 + $0x238] sm:$0xff]  }
  0xce   :  { %10404 = vmatprep.mubr.msk.bf16.mxu0 %vm945_vm2, %v10668_v56 }
  0xcf   :  { %v11371_v58 = vpop.f32.mrf.mxu0 }
  0xd1   :  { %v11376_v60 = vpop.f32.mrf.mxu0 }
  0xd3   :  { %v11381_v62 = vpop.f32.mrf.mxu0 }
  0xd5   :  { %v11383_v63 = vpop.f32.mrf.mxu0  ;;  %10405 = vmatmul.mubr.msk.bf16.gmra.mxu0 %vm945_vm2, %v10669_v59  ;;  %v10690_v59 = vld [vmem:[%s15255_s0 + $0x240] sm:$0xff]  }
  0xd6   :  { %10408 = vmatprep.mubr.msk.bf16.mxu0 %vm945_vm2, %v10670_v61 }
  0xd7   :  { %v11387_v0 = vpop.f32.mrf.mxu0 }
  0xd9   :  { %v11392_v2 = vpop.f32.mrf.mxu0 }
  0xdb   :  { %v11397_v4 = vpop.f32.mrf.mxu0 }
  0xdd   :  { %v11399_v5 = vpop.f32.mrf.mxu0  ;;  %10409 = vmatmul.mubr.msk.bf16.gmra.mxu0 %vm945_vm2, %v10671_v1 }
  0xde   :  { %10412 = vmatprep.mubr.msk.bf16.mxu0 %vm945_vm2, %v10672_v3 }
  0xdf   :  { %v11403_v6 = vpop.f32.mrf.mxu0 }
  0xe1   :  { %v11408_v8 = vpop.f32.mrf.mxu0 }
  0xe3   :  { %v11413_v10 = vpop.f32.mrf.mxu0 }
  0xe5   :  { %v11415_v11 = vpop.f32.mrf.mxu0  ;;  %10413 = vmatmul.mubr.msk.bf16.gmra.mxu0 %vm945_vm2, %v10673_v7  ;;  %v10691_v7 = vld [vmem:[%s15255_s0 + $0x248] sm:$0xff]  }
  0xe6   :  { %10416 = vmatprep.mubr.msk.bf16.mxu0 %vm945_vm2, %v10674_v9 }
  0xe7   :  { %v11419_v12 = vpop.f32.mrf.mxu0 }
  0xe9   :  { %v11424_v14 = vpop.f32.mrf.mxu0 }
  0xeb   :  { %v11429_v16 = vpop.f32.mrf.mxu0 }
  0xed   :  { %v11431_v17 = vpop.f32.mrf.mxu0  ;;  %10417 = vmatmul.mubr.msk.bf16.gmra.mxu0 %vm945_vm2, %v10675_v13  ;;  %v10692_v13 = vld [vmem:[%s15255_s0 + $0x250] sm:$0xff]  }
  0xee   :  { %10420 = vmatprep.mubr.msk.bf16.mxu0 %vm945_vm2, %v10676_v15 }
  0xef   :  { %v11435_v18 = vpop.f32.mrf.mxu0 }
  0xf1   :  { %v11440_v20 = vpop.f32.mrf.mxu0 }
  0xf3   :  { %v11445_v22 = vpop.f32.mrf.mxu0 }
  0xf5   :  { %v11447_v23 = vpop.f32.mrf.mxu0  ;;  %10421 = vmatmul.mubr.msk.bf16.gmra.mxu0 %vm945_vm2, %v10677_v19 }
  0xf6   :  { %10424 = vmatprep.mubr.msk.bf16.mxu0 %vm945_vm2, %v10678_v21 }
  0xf7   :  { %v11451_v24 = vpop.f32.mrf.mxu0 }
  0xf8   :  { %15524 = vst [vmem:[#allocation5_spill] sm:$0xff] %v11451_v24 }
  0xf9   :  { %v11456_v26 = vpop.f32.mrf.mxu0 }
  0xfa   :  { %15525 = vst [vmem:[#allocation6_spill] sm:$0xff] %v11456_v26 }
  0xfb   :  { %v11461_v28 = vpop.f32.mrf.mxu0 }
  0xfc   :  { %15526 = vst [vmem:[#allocation7_spill] sm:$0xff] %v11461_v28 }
  0xfd   :  { %v10330_v29 = vpop.f32.mrf.mxu0  ;;  %10425 = vmatmul.mubr.msk.bf16.gmra.mxu0 %vm945_vm2, %v10679_v25  ;;  %v10693_v25 = vld [vmem:[%s15255_s0 + $0x258] sm:$0xff]  }
  0xfe   :  { %10428 = vmatprep.mubr.msk.bf16.mxu0 %vm945_vm2, %v10680_v27  ;;  %v10694_v29 = vld [vmem:[%s15255_s0 + $0x260] sm:$0xff]  }
  0xff   :  { %v1467_v30 = vpop.f32.mrf.mxu0 }
 0x101   :  { %v10331_v32 = vpop.f32.mrf.mxu0 }
 0x103   :  { %v1469_v34 = vpop.f32.mrf.mxu0 }
 0x105   :  { %v10334_v35 = vpop.f32.mrf.mxu0  ;;  %10429 = vmatmul.mubr.msk.bf16.gmra.mxu0 %vm945_vm2, %v10681_v31 }
 0x106   :  { %10432 = vmatprep.mubr.msk.bf16.mxu0 %vm945_vm2, %v10682_v33  ;;  %v10695_v33 = vld [vmem:[%s15255_s0 + $0x268] sm:$0xff]   ;;  %v10696_v35 = vld [vmem:[%s15255_s0 + $0x270] sm:$0xff]  }
 0x107   :  { %v1479_v36 = vpop.f32.mrf.mxu0 }
 0x109   :  { %v10335_v38 = vpop.f32.mrf.mxu0 }
 0x10b   :  { %v1481_v40 = vpop.f32.mrf.mxu0 }
 0x10d   :  { %v11479_v41 = vpop.f32.mrf.mxu0  ;;  %10433 = vmatmul.mubr.msk.bf16.gmra.mxu0 %vm945_vm2, %v10683_v37 }
 0x10e   :  { %15527 = vst [vmem:[#allocation8_spill] sm:$0xff] %v11479_v41  ;;  %10436 = vmatprep.mubr.msk.bf16.mxu0 %vm945_vm2, %v10684_v39  ;;  %v10697_v39 = vld [vmem:[%s15255_s0 + $0x278] sm:$0xff]  }
 0x10f   :  { %v11483_v42 = vpop.f32.mrf.mxu0 }
 0x110   :  { %15528 = vst [vmem:[#allocation9_spill] sm:$0xff] %v11483_v42 }
 0x111   :  { %v11488_v44 = vpop.f32.mrf.mxu0 }
 0x112   :  { %15529 = vst [vmem:[#allocation10_spill] sm:$0xff] %v11488_v44 }
 0x113   :  { %v11493_v46 = vpop.f32.mrf.mxu0 }
 0x114   :  { %15530 = vst [vmem:[#allocation11_spill] sm:$0xff] %v11493_v46 }
 0x115   :  { %v11495_v47 = vpop.f32.mrf.mxu0  ;;  %10437 = vmatmul.mubr.msk.bf16.gmra.mxu0 %vm945_vm2, %v10685_v43  ;;  %v10698_v43 = vld [vmem:[%s15255_s0 + $0x280] sm:$0xff]  }
 0x116   :  { %15531 = vst [vmem:[#allocation12_spill] sm:$0xff] %v11495_v47  ;;  %10440 = vmatprep.mubr.msk.bf16.mxu0 %vm945_vm2, %v10686_v45 }
 0x117   :  { %v11499_v48 = vpop.f32.mrf.mxu0 }
 0x118   :  { %15532 = vst [vmem:[#allocation13_spill] sm:$0xff] %v11499_v48 }
 0x119   :  { %v11504_v50 = vpop.f32.mrf.mxu0 }
 0x11a   :  { %15533 = vst [vmem:[#allocation14_spill] sm:$0xff] %v11504_v50 }
 0x11b   :  { %v11509_v52 = vpop.f32.mrf.mxu0 }
 0x11c   :  { %15534 = vst [vmem:[#allocation15_spill] sm:$0xff] %v11509_v52 }
 0x11d   :  { %v11511_v53 = vpop.f32.mrf.mxu0  ;;  %10441 = vmatmul.mubr.msk.bf16.gmra.mxu0 %vm945_vm2, %v10687_v49 }
 0x11e   :  { %15535 = vst [vmem:[#allocation16_spill] sm:$0xff] %v11511_v53  ;;  %10444 = vmatprep.mubr.msk.bf16.mxu0 %vm945_vm2, %v10688_v51 }
 0x11f   :  { %v11515_v54 = vpop.f32.mrf.mxu0 }
 0x120   :  { %15536 = vst [vmem:[#allocation17_spill] sm:$0xff] %v11515_v54 }
 0x121   :  { %v11520_v56 = vpop.f32.mrf.mxu0 }
 0x122   :  { %15537 = vst [vmem:[#allocation18_spill] sm:$0xff] %v11520_v56 }
 0x123   :  { %v11525_v61 = vpop.f32.mrf.mxu0 }
 0x124   :  { %15538 = vst [vmem:[#allocation19_spill] sm:$0xff] %v11525_v61 }
 0x125   :  { %v11527_v1 = vpop.f32.mrf.mxu0  ;;  %10445 = vmatmul.mubr.msk.bf16.gmra.mxu0 %vm945_vm2, %v10689_v55  ;;  %v10699_v55 = vld [vmem:[%s15255_s0 + $0x288] sm:$0xff]  }
 0x126   :  { %15539 = vst [vmem:[#allocation20_spill] sm:$0xff] %v11527_v1  ;;  %10448 = vmatprep.mubr.msk.bf16.mxu0 %vm945_vm2, %v10690_v59 }
 0x127   :  { %v11531_v3 = vpop.f32.mrf.mxu0 }
 0x128   :  { %15540 = vst [vmem:[#allocation21_spill] sm:$0xff] %v11531_v3 }
 0x129   :  { %v11536_v9 = vpop.f32.mrf.mxu0 }
 0x12a   :  { %15541 = vst [vmem:[#allocation22_spill] sm:$0xff] %v11536_v9 }
 0x12b   :  { %v11541_v15 = vpop.f32.mrf.mxu0 }
 0x12c   :  { %15542 = vst [vmem:[#allocation23_spill] sm:$0xff] %v11541_v15 }
 0x12d   :  { %v11543_v19 = vpop.f32.mrf.mxu0  ;;  %10449 = vmatmul.mubr.msk.bf16.gmra.mxu0 %vm945_vm2, %v10691_v7  ;;  %v10700_v7 = vld [vmem:[%s15255_s0 + $0x290] sm:$0xff]  }
 0x12e   :  { %15543 = vst [vmem:[#allocation24_spill] sm:$0xff] %v11543_v19  ;;  %10452 = vmatprep.mubr.msk.bf16.mxu0 %vm945_vm2, %v10692_v13 }
 0x12f   :  { %v11547_v21 = vpop.f32.mrf.mxu0 }
 0x130   :  { %15544 = vst [vmem:[#allocation25_spill] sm:$0xff] %v11547_v21 }
 0x131   :  { %v11552_v27 = vpop.f32.mrf.mxu0 }
 0x132   :  { %15545 = vst [vmem:[#allocation26_spill] sm:$0xff] %v11552_v27 }
 0x133   :  { %v11557_v30 = vpop.f32.mrf.mxu0 }
 0x134   :  { %15546 = vst [vmem:[#allocation27_spill] sm:$0xff] %v11557_v30 }
 0x135   :  { %v11559_v31 = vpop.f32.mrf.mxu0  ;;  %10453 = vmatmul.mubr.msk.bf16.gmra.mxu0 %vm945_vm2, %v10693_v25 }
 0x136   :  { %15547 = vst [vmem:[#allocation28_spill] sm:$0xff] %v11559_v31  ;;  %10456 = vmatprep.mubr.msk.bf16.mxu0 %vm945_vm2, %v10694_v29 }
 0x137   :  { %v11563_v32 = vpop.f32.mrf.mxu0 }
 0x138   :  { %15548 = vst [vmem:[#allocation29_spill] sm:$0xff] %v11563_v32 }
 0x139   :  { %v11568_v34 = vpop.f32.mrf.mxu0 }
 0x13a   :  { %15549 = vst [vmem:[#allocation30_spill] sm:$0xff] %v11568_v34 }
 0x13b   :  { %v11573_v36 = vpop.f32.mrf.mxu0 }
 0x13c   :  { %15550 = vst [vmem:[#allocation31_spill] sm:$0xff] %v11573_v36 }
 0x13d   :  { %v10362_v37 = vpop.f32.mrf.mxu0  ;;  %10457 = vmatmul.mubr.msk.bf16.gmra.mxu0 %vm945_vm2, %v10695_v33  ;;  %v10701_v33 = vld [vmem:[%s15255_s0 + $0x298] sm:$0xff]  }
 0x13e   :  { %10460 = vmatprep.mubr.msk.bf16.mxu0 %vm945_vm2, %v10696_v35  ;;  %v10702_v37 = vld [vmem:[%s15255_s0 + $0x2a0] sm:$0xff]  }
 0x13f   :  { %v1587_v38 = vpop.f32.mrf.mxu0 }
 0x141   :  { %v10363_v40 = vpop.f32.mrf.mxu0 }
 0x143   :  { %v1589_v45 = vpop.f32.mrf.mxu0 }
 0x145   :  { %v10366_v49 = vpop.f32.mrf.mxu0  ;;  %10461 = vmatmul.mubr.msk.bf16.gmra.mxu0 %vm945_vm2, %v10697_v39 }
 0x146   :  { %10464 = vmatprep.mubr.msk.bf16.mxu0 %vm945_vm2, %v10698_v43  ;;  %v10703_v43 = vld [vmem:[%s15255_s0 + $0x2a8] sm:$0xff]   ;;  %v10704_v49 = vld [vmem:[%s15255_s0 + $0x2b0] sm:$0xff]  }
 0x147   :  { %v1599_v51 = vpop.f32.mrf.mxu0 }
 0x149   :  { %v10367_v59 = vpop.f32.mrf.mxu0 }
 0x14b   :  { %v1601_v13 = vpop.f32.mrf.mxu0 }
 0x14d   :  { %v11591_v25 = vpop.f32.mrf.mxu0  ;;  %10465 = vmatmul.mubr.msk.bf16.gmra.mxu0 %vm945_vm2, %v10699_v55 }
 0x14e   :  { %10468 = vmatprep.mubr.msk.bf16.mxu0 %vm945_vm2, %v10700_v7 }
 0x14f   :  { %v11595_v29 = vpop.f32.mrf.mxu0 }
 0x151   :  { %v11600_v35 = vpop.f32.mrf.mxu0 }
 0x153   :  { %v11605_v38 = vpop.f32.mrf.mxu0 }
 0x155   :  { %v11607_v39 = vpop.f32.mrf.mxu0  ;;  %10469 = vmatmul.mubr.msk.bf16.gmra.mxu0 %vm945_vm2, %v10701_v33 }
 0x156   :  { %10472 = vmatprep.mubr.msk.bf16.mxu0 %vm945_vm2, %v10702_v37 }
 0x157   :  { %v11611_v40 = vpop.f32.mrf.mxu0 }
 0x159   :  { %v11616_v45 = vpop.f32.mrf.mxu0 }
 0x15b   :  { %v11621_v51 = vpop.f32.mrf.mxu0 }
 0x15d   :  { %v11623_v55 = vpop.f32.mrf.mxu0  ;;  %10473 = vmatmul.mubr.msk.bf16.gmra.mxu0 %vm945_vm2, %v10703_v43 }
 0x15e   :  { %10476 = vmatprep.mubr.msk.bf16.mxu0 %vm945_vm2, %v10704_v49 }
 0x15f   :  { %14 = vsyncpa [#allocation3], 0  ;;  %v11627_v59 = vpop.f32.mrf.mxu0  ;;  %v10705_v13 = vld [vmem:[%s15255_s0 + $0x2b8] sm:$0xff]   ;;  %v10706_v33 = vld [vmem:[%s15255_s0 + $0x2c0] sm:$0xff]   ;;  %vm6854_vm3 = vcmask 1041409   ;;  %vm11107_vm4 = vmmov 0  }
 0x160   :  { %v10707_v34 = vld [vmem:[%s15255_s0 + $0x2c8] sm:$0xff]   ;;  %v10708_v32 = vld [vmem:[%s15255_s0 + $0x2d0] sm:$0xff]   ;;  %v10709_v27 = vld [vmem:[%s15255_s0 + $0x2d8] sm:$0xff]   ;;  %s11108_s15 = smov [#allocation2]  }
 0x161   :  { %v11629_v7 = vpop.f32.mrf.mxu0  ;;  %v10710_v21 = vld [vmem:[%s15255_s0 + $0x2e0] sm:$0xff]   ;;  %v10711_v9 = vld [vmem:[%s15255_s0 + $0x2e8] sm:$0xff]   ;;  %v10712_v3 = vld [vmem:[%s15255_s0 + $0x2f0] sm:$0xff]   ;;  %s8423_s16 = sshll.u32 %s11108_s15, 4  ;;  %s8424_s16 = int_to_ptr.vmem [resolvable:$true] %s8423_s16 }
 0x162   :  { %v10713_v56 = vld [vmem:[%s15255_s0 + $0x2f8] sm:$0xff]   ;;  %v10714_v54 = vld [vmem:[%s15255_s0 + $0x300] sm:$0xff]   ;;  %v10720_v48 = vld [vmem:[%s15255_s0 + $0x330] sm:$0xff]   ;;  %s11083_s17 = scalar_lea.vmem %s8424_s16, 32  ;;  %p11088_p1 = scmp.lt.s32.totalorder %s8424_s16, %s8424_s16 }
 0x163   :  { %v11637_v37 = vpop.f32.mrf.mxu0  ;;  %v10751_v44 = vld [vmem:[%s15258_s3 + $0x18] sm:$0xff]   ;;  %p11084_p0 = scmp.ne.s32.totalorder %s8424_s16, %s11083_s17  ;;  %p11089_p2 = scmp.lt.s32.totalorder %s11083_s17, %s11083_s17 }
 0x164   :  { %v10754_v41 = vld [vmem:[%s15258_s3 + $0x438] sm:$0xff]  }
 0x165   :  { %v11639_v36 = vpop.f32.mrf.mxu0  ;;  %10477 = vmatmul.mubr.msk.bf16.gmra.mxu0 %vm945_vm2, %v10705_v13  ;;  %v10778_v26 = vld [vmem:[%s15258_s3 + $0xf8] sm:$0xff]   ;;  %p11090_p3 = por %p11089_p2, %p11088_p1 }
 0x166   :  { %10480 = vmatprep.mubr.msk.bf16.mxu0 %vm945_vm2, %v10706_v33 }
 0x167   :  { %v11643_v43 = vpop.f32.mrf.mxu0  ;;  %p11091_p4 = pnand %p11090_p3, %p11084_p0 }
 0x169   :  { %v11645_v49 = vpop.f32.mrf.mxu0 }
 0x16b   :  { %v11653_v31 = vpop.f32.mrf.mxu0 }
 0x16d   :  { %v11655_v30 = vpop.f32.mrf.mxu0  ;;  %10481 = vmatmul.mubr.msk.bf16.gmra.mxu0 %vm945_vm2, %v10707_v34 }
 0x16e   :  { %10484 = vmatprep.mubr.msk.bf16.mxu0 %vm945_vm2, %v10708_v32 }
 0x16f   :  { %v11659_v13 = vpop.f32.mrf.mxu0 }
 0x171   :  { %v11661_v33 = vpop.f32.mrf.mxu0 }
 0x173   :  { %v11669_v19 = vpop.f32.mrf.mxu0 }
 0x175   :  { %v11671_v15 = vpop.f32.mrf.mxu0  ;;  %10485 = vmatmul.mubr.msk.bf16.gmra.mxu0 %vm945_vm2, %v10709_v27 }
 0x176   :  { %10488 = vmatprep.mubr.msk.bf16.mxu0 %vm945_vm2, %v10710_v21 }
 0x177   :  { %v11675_v32 = vpop.f32.mrf.mxu0 }
 0x179   :  { %v11677_v34 = vpop.f32.mrf.mxu0 }
 0x17a   :  { %15551 = vst [vmem:[#allocation32_spill] sm:$0xff] %v11677_v34 }
 0x17b   :  { %v11685_v1 = vpop.f32.mrf.mxu0 }
 0x17c   :  { %15552 = vst [vmem:[#allocation33_spill] sm:$0xff] %v11685_v1 }
 0x17d   :  { %v10394_v61 = vpop.f32.mrf.mxu0  ;;  %10489 = vmatmul.mubr.msk.bf16.gmra.mxu0 %vm945_vm2, %v10711_v9 }
 0x17e   :  { %10492 = vmatprep.mubr.msk.bf16.mxu0 %vm945_vm2, %v10712_v3  ;;  %v10715_v3 = vld [vmem:[%s15255_s0 + $0x308] sm:$0xff]  }
 0x17f   :  { %v1707_v21 = vpop.f32.mrf.mxu0 }
 0x180   :  { %v10716_v21 = vld [vmem:[%s15255_s0 + $0x310] sm:$0xff]  }
 0x181   :  { %v10395_v27 = vpop.f32.mrf.mxu0 }
 0x183   :  { %v1709_v53 = vpop.f32.mrf.mxu0 }
 0x185   :  { %v10398_v52 = vpop.f32.mrf.mxu0  ;;  %10493 = vmatmul.mubr.msk.bf16.gmra.mxu0 %vm945_vm2, %v10713_v56  ;;  %v10718_v56 = vld [vmem:[%s15255_s0 + $0x320] sm:$0xff]  }
 0x186   :  { %10496 = vmatprep.mubr.msk.bf16.mxu0 %vm945_vm2, %v10714_v54  ;;  %v10717_v54 = vld [vmem:[%s15255_s0 + $0x318] sm:$0xff]  }
 0x187   :  { %v1719_v61 = vpop.f32.mrf.mxu0 }
 0x189   :  { %v10399_v9 = vpop.f32.mrf.mxu0 }
 0x18b   :  { %v1721_v27 = vpop.f32.mrf.mxu0 }
 0x18c   :  { %v10719_v27 = vld [vmem:[%s15255_s0 + $0x328] sm:$0xff]  }
 0x18d   :  { %v11703_v50 = vpop.f32.mrf.mxu0  ;;  %10497 = vmatmul.mubr.msk.bf16.gmra.mxu0 %vm945_vm2, %v10715_v3 }
 0x18e   :  { %15553 = vst [vmem:[#allocation34_spill] sm:$0xff] %v11703_v50  ;;  %10500 = vmatprep.mubr.msk.bf16.mxu0 %vm945_vm2, %v10716_v21  ;;  %v10756_v50 = vld [vmem:[%s15258_s3 + $0x48] sm:$0xff]  }
 0x18f   :  { %v11707_v52 = vpop.f32.mrf.mxu0 }
 0x190   :  { %15554 = vst [vmem:[#allocation35_spill] sm:$0xff] %v11707_v52 }
 0x191   :  { %v11709_v53 = vpop.f32.mrf.mxu0 }
 0x192   :  { %15555 = vst [vmem:[#allocation36_spill] sm:$0xff] %v11709_v53 }
 0x193   :  { %v11717_v61 = vpop.f32.mrf.mxu0 }
 0x194   :  { %15556 = vst [vmem:[#allocation37_spill] sm:$0xff] %v11717_v61 }
 0x195   :  { %v11719_v9 = vpop.f32.mrf.mxu0  ;;  %10501 = vmatmul.mubr.msk.bf16.gmra.mxu0 %vm945_vm2, %v10717_v54 }
 0x196   :  { %15557 = vst [vmem:[#allocation38_spill] sm:$0xff] %v11719_v9  ;;  %10504 = vmatprep.mubr.msk.bf16.mxu0 %vm945_vm2, %v10718_v56 }
 0x197   :  { %v11723_v3 = vpop.f32.mrf.mxu0 }
 0x198   :  { %15558 = vst [vmem:[#allocation39_spill] sm:$0xff] %v11723_v3  ;;  %v10722_v3 = vld [vmem:[%s15255_s0 + $0x340] sm:$0xff]  }
 0x199   :  { %v11725_v21 = vpop.f32.mrf.mxu0 }
 0x19a   :  { %15559 = vst [vmem:[#allocation40_spill] sm:$0xff] %v11725_v21  ;;  %v10721_v21 = vld [vmem:[%s15255_s0 + $0x338] sm:$0xff]  }
 0x19b   :  { %v11733_v47 = vpop.f32.mrf.mxu0 }
 0x19c   :  { %15560 = vst [vmem:[#allocation41_spill] sm:$0xff] %v11733_v47 }
 0x19d   :  { %v11735_v46 = vpop.f32.mrf.mxu0  ;;  %10505 = vmatmul.mubr.msk.bf16.gmra.mxu0 %vm945_vm2, %v10719_v27 }
 0x19e   :  { %15561 = vst [vmem:[#allocation42_spill] sm:$0xff] %v11735_v46  ;;  %10508 = vmatprep.mubr.msk.bf16.mxu0 %vm945_vm2, %v10720_v48 }
 0x19f   :  { %v11739_v54 = vpop.f32.mrf.mxu0 }
 0x1a0   :  { %15562 = vst [vmem:[#allocation43_spill] sm:$0xff] %v11739_v54  ;;  %v10724_v54 = vld [vmem:[%s15255_s0 + $0x350] sm:$0xff]  }
 0x1a1   :  { %v11741_v56 = vpop.f32.mrf.mxu0 }
 0x1a2   :  { %15563 = vst [vmem:[#allocation44_spill] sm:$0xff] %v11741_v56  ;;  %v10723_v56 = vld [vmem:[%s15255_s0 + $0x348] sm:$0xff]  }
 0x1a3   :  { %v11749_v9 = vpop.f32.mrf.mxu0 }
 0x1a4   :  { %15564 = vst [vmem:[#allocation45_spill] sm:$0xff] %v11749_v9 }
 0x1a5   :  { %v11751_v47 = vpop.f32.mrf.mxu0  ;;  %10509 = vmatmul.mubr.msk.bf16.gmra.mxu0 %vm945_vm2, %v10721_v21 }
 0x1a6   :  { %15565 = vst [vmem:[#allocation46_spill] sm:$0xff] %v11751_v47  ;;  %10512 = vmatprep.mubr.msk.bf16.mxu0 %vm945_vm2, %v10722_v3 }
 0x1a7   :  { %v11755_v48 = vpop.f32.mrf.mxu0 }
 0x1a8   :  { %15566 = vst [vmem:[#allocation47_spill] sm:$0xff] %v11755_v48  ;;  %v10726_v48 = vld [vmem:[%s15255_s0 + $0x360] sm:$0xff]  }
 0x1a9   :  { %v11757_v27 = vpop.f32.mrf.mxu0 }
 0x1aa   :  { %15567 = vst [vmem:[#allocation48_spill] sm:$0xff] %v11757_v27  ;;  %v10725_v27 = vld [vmem:[%s15255_s0 + $0x358] sm:$0xff]  }
 0x1ab   :  { %v11765_v46 = vpop.f32.mrf.mxu0 }
 0x1ac   :  { %15568 = vst [vmem:[#allocation49_spill] sm:$0xff] %v11765_v46 }
 0x1ad   :  { %v11767_v9 = vpop.f32.mrf.mxu0  ;;  %10513 = vmatmul.mubr.msk.bf16.gmra.mxu0 %vm945_vm2, %v10723_v56 }
 0x1ae   :  { %15569 = vst [vmem:[#allocation50_spill] sm:$0xff] %v11767_v9  ;;  %10516 = vmatprep.mubr.msk.bf16.mxu0 %vm945_vm2, %v10724_v54 }
 0x1af   :  { %v11771_v3 = vpop.f32.mrf.mxu0 }
 0x1b0   :  { %15570 = vst [vmem:[#allocation51_spill] sm:$0xff] %v11771_v3  ;;  %v10728_v3 = vld [vmem:[%s15255_s0 + $0x370] sm:$0xff]  }
 0x1b1   :  { %v11773_v21 = vpop.f32.mrf.mxu0 }
 0x1b2   :  { %15571 = vst [vmem:[#allocation52_spill] sm:$0xff] %v11773_v21  ;;  %v10727_v21 = vld [vmem:[%s15255_s0 + $0x368] sm:$0xff]  }
 0x1b3   :  { %v11781_v47 = vpop.f32.mrf.mxu0 }
 0x1b4   :  { %15572 = vst [vmem:[#allocation53_spill] sm:$0xff] %v11781_v47 }
 0x1b5   :  { %v11783_v46 = vpop.f32.mrf.mxu0  ;;  %10517 = vmatmul.mubr.msk.bf16.gmra.mxu0 %vm945_vm2, %v10725_v27 }
 0x1b6   :  { %15573 = vst [vmem:[#allocation54_spill] sm:$0xff] %v11783_v46  ;;  %10520 = vmatprep.mubr.msk.bf16.mxu0 %vm945_vm2, %v10726_v48 }
 0x1b7   :  { %v11787_v54 = vpop.f32.mrf.mxu0 }
 0x1b8   :  { %15574 = vst [vmem:[#allocation55_spill] sm:$0xff] %v11787_v54  ;;  %v10730_v54 = vld [vmem:[%s15255_s0 + $0x380] sm:$0xff]  }
 0x1b9   :  { %v11789_v56 = vpop.f32.mrf.mxu0 }
 0x1ba   :  { %15575 = vst [vmem:[#allocation56_spill] sm:$0xff] %v11789_v56  ;;  %v10729_v56 = vld [vmem:[%s15255_s0 + $0x378] sm:$0xff]  }
 0x1bb   :  { %v11797_v9 = vpop.f32.mrf.mxu0 }
 0x1bc   :  { %15576 = vst [vmem:[#allocation57_spill] sm:$0xff] %v11797_v9  ;;  %v10750_v9 = vld [vmem:[%s15258_s3 + $0x58] sm:$0xff]  }
 0x1bd   :  { %v10426_v47 = vpop.f32.mrf.mxu0  ;;  %10521 = vmatmul.mubr.msk.bf16.gmra.mxu0 %vm945_vm2, %v10727_v21 }
 0x1be   :  { %10524 = vmatprep.mubr.msk.bf16.mxu0 %vm945_vm2, %v10728_v3  ;;  %v10742_v47 = vld [vmem:[%s15258_s3 + $0x78] sm:$0xff]  }
 0x1bf   :  { %v1827_v48 = vpop.f32.mrf.mxu0  ;;  %v10743_v3 = vld [vmem:[%s15258_s3 + $0x38] sm:$0xff]   ;;  %9331 = vmatprep.subr.bf16.mxu1 %v10742_v47 }
 0x1c0   :  { %9332 = vmatpush3.bf16.msra.mxu1 %v10743_v3  ;;  %v10746_v3 = vld [vmem:[%s15258_s3 + $0x68] sm:$0xff]  }
 0x1c1   :  { %v10427_v27 = vpop.f32.mrf.mxu0 }
 0x1c3   :  { %v1829_v46 = vpop.f32.mrf.mxu0 }
 0x1c4   :  { %v10731_v46 = vld [vmem:[%s15255_s0 + $0x388] sm:$0xff]  }
 0x1c5   :  { %v10430_v61 = vpop.f32.mrf.mxu0  ;;  %10525 = vmatmul.mubr.msk.bf16.gmra.mxu0 %vm945_vm2, %v10729_v56  ;;  %v10745_v56 = vld [vmem:[%s15258_s3 + $0x30] sm:$0xff]  }
 0x1c6   :  { %10528 = vmatprep.mubr.msk.bf16.mxu0 %vm945_vm2, %v10730_v54  ;;  %v10744_v61 = vld [vmem:[%s15258_s3 + $0x70] sm:$0xff]  }
 0x1c7   :  { %v1839_v21 = vpop.f32.mrf.mxu0  ;;  %v10732_v54 = vld [vmem:[%s15255_s0 + $0x390] sm:$0xff]   ;;  %9333 = vmatprep.subr.bf16.mxu1 %v10744_v61 }
 0x1c8   :  { %9334 = vmatpush3.bf16.msra.mxu1 %v10745_v56  ;;  %v10747_v21 = vld [vmem:[%s15258_s3 + $0x28] sm:$0xff]   ;;  %v10748_v56 = vld [vmem:[%s15258_s3 + $0x60] sm:$0xff]  }
 0x1c9   :  { %v10431_v48 = vpop.f32.mrf.mxu0  ;;  %9335 = vmatprep.subr.bf16.mxu1 %v10746_v3 }
 0x1cb   :  { %v1841_v27 = vpop.f32.mrf.mxu0 }
 0x1cc   :  { %9336 = vmatpush3.bf16.msra.mxu1 %v10747_v21  ;;  %v10749_v27 = vld [vmem:[%s15258_s3 + $0x20] sm:$0xff]  }
 0x1cd   :  { %v11827_v47 = vpop.f32.mrf.mxu0  ;;  %10529 = vmatmul.mubr.msk.bf16.gmra.mxu0 %vm945_vm2, %v10731_v46  ;;  %v10733_v46 = vld [vmem:[%s15255_s0 + $0x398] sm:$0xff]   ;;  %9337 = vmatprep.subr.bf16.mxu1 %v10748_v56 }
 0x1ce   :  { %10532 = vmatprep.mubr.msk.bf16.mxu0 %vm945_vm2, %v10732_v54  ;;  %v10734_v54 = vld [vmem:[%s15255_s0 + $0x3a0] sm:$0xff]  }
 0x1cf   :  { %v11837_v48 = vpop.f32.mrf.mxu0 }
 0x1d0   :  { %9338 = vmatpush3.bf16.msra.mxu1 %v10749_v27  ;;  %v10736_v27 = vld [vmem:[%s15255_s0 + $0x3b0] sm:$0xff]  }
 0x1d1   :  { %v11839_v61 = vpop.f32.mrf.mxu0  ;;  %9339 = vmatprep.subr.bf16.mxu1 %v10750_v9  ;;  %v10752_v9 = vld [vmem:[%s15258_s3 + $0x478] sm:$0xff]  }
 0x1d2   :  { %9843 = vmatprep.subr.bf16.mxu0 %v10752_v9  ;;  %v10738_v9 = vld [vmem:[%s15255_s0 + $0x3c0] sm:$0xff]  }
 0x1d3   :  { %v11853_v3 = vpop.f32.mrf.mxu0  ;;  %9844 = vmatpush3.bf16.msra.mxu0 %v10754_v41  ;;  %v10759_v41 = vld [vmem:[%s15258_s3 + $0x430] sm:$0xff]  }
 0x1d4   :  { %9340 = vmatpush3.bf16.msra.mxu1 %v10751_v44  ;;  %v10755_v44 = vld [vmem:[%s15258_s3 + $0x10] sm:$0xff]  }
 0x1d5   :  { %v11855_v21 = vpop.f32.mrf.mxu0  ;;  %10533 = vmatmul.mubr.msk.bf16.gmra.mxu0 %vm945_vm2, %v10733_v46  ;;  %v10735_v46 = vld [vmem:[%s15255_s0 + $0x3a8] sm:$0xff]  }
 0x1d6   :  { %10536 = vmatprep.mubr.msk.bf16.mxu0 %vm945_vm2, %v10734_v54  ;;  %v10753_v54 = vld [vmem:[%s15258_s3 + $0x50] sm:$0xff]  }
 0x1d7   :  { %v11865_v53 = vpop.f32.mrf.mxu0  ;;  %9341 = vmatprep.subr.bf16.mxu1 %v10753_v54  ;;  %v10757_v54 = vld [vmem:[%s15258_s3 + $0x8] sm:$0xff]  }
 0x1d8   :  { %9342 = vmatpush3.bf16.msra.mxu1 %v10755_v44 }
 0x1d9   :  { %v11867_v56 = vpop.f32.mrf.mxu0  ;;  %9343 = vmatprep.subr.bf16.mxu1 %v10756_v50  ;;  %v10760_v50 = vld [vmem:[%s15258_s3 + $0x40] sm:$0xff]  }
 0x1db   :  { %v11878_v42 = vpop.f32.mrf.mxu0 }
 0x1dc   :  { %15577 = vst [vmem:[#allocation58_spill] sm:$0xff] %v11878_v42  ;;  %9344 = vmatpush3.bf16.msra.mxu1 %v10757_v54  ;;  %v10761_v54 = vld [vmem:[%s15258_s3] sm:$0xff]  }
 0x1dd   :  { %v11886_v52 = vpop.f32.mrf.mxu0  ;;  %10537 = vmatmul.mubr.msk.bf16.gmra.mxu0 %vm945_vm2, %v10735_v46  ;;  %v10758_v46 = vld [vmem:[%s15258_s3 + $0x470] sm:$0xff]   ;;  %9345 = vmatprep.subr.bf16.mxu1 %v10760_v50  ;;  %v10764_v50 = vld [vmem:[%s15258_s3 + $0x460] sm:$0xff]  }
 0x1de   :  { %15578 = vst [vmem:[#allocation59_spill] sm:$0xff] %v11886_v52  ;;  %10540 = vmatprep.mubr.msk.bf16.mxu0 %vm945_vm2, %v10736_v27  ;;  %v10737_v27 = vld [vmem:[%s15255_s0 + $0x3b8] sm:$0xff]   ;;  %9845 = vmatprep.subr.bf16.mxu0 %v10758_v46  ;;  %v10763_v46 = vld [vmem:[%s15258_s3 + $0x428] sm:$0xff]  }
 0x1df   :  { %v11896_v28 = vpop.f32.mrf.mxu0  ;;  %9846 = vmatpush3.bf16.msra.mxu0 %v10759_v41 }
 0x1e0   :  { %15579 = vst [vmem:[#allocation60_spill] sm:$0xff] %v11896_v28  ;;  %9346 = vmatpush3.bf16.msra.mxu1 %v10761_v54  ;;  %v10765_v54 = vld [vmem:[%s15258_s3 + $0x420] sm:$0xff]  }
 0x1e1   :  { %v11904_v44 = vpop.f32.mrf.mxu0  ;;  %9395 = vmatprep.subr.bf16.mxu1 %v10778_v26 }
 0x1e2   :  { %15580 = vst [vmem:[#allocation61_spill] sm:$0xff] %v11904_v44  ;;  %v10762_v44 = vld [vmem:[%s15258_s3 + $0x468] sm:$0xff]  }
 0x1e3   :  { %v11918_v1 = vpop.f32.mrf.mxu0  ;;  %9847 = vmatprep.subr.bf16.mxu0 %v10762_v44  ;;  %v10740_v44 = vld [vmem:[%s15255_s0 + $0x3d0] sm:$0xff]  }
 0x1e4   :  { %15581 = vst [vmem:[#allocation62_spill] sm:$0xff] %v11918_v1  ;;  %9848 = vmatpush3.bf16.msra.mxu0 %v10763_v46  ;;  %v10768_v46 = vld [vmem:[%s15258_s3 + $0x458] sm:$0xff]  }
 0x1e5   :  { %v11926_v28 = vpop.f32.mrf.mxu0  ;;  %10541 = vmatmul.mubr.msk.bf16.gmra.mxu0 %vm945_vm2, %v10737_v27  ;;  %v10739_v27 = vld [vmem:[%s15255_s0 + $0x3c8] sm:$0xff]   ;;  %9849 = vmatprep.subr.bf16.mxu0 %v10764_v50 }
 0x1e6   :  { %15582 = vst [vmem:[#allocation63_spill] sm:$0xff] %v11926_v28  ;;  %10544 = vmatprep.mubr.msk.bf16.mxu0 %vm945_vm2, %v10738_v9 }
 0x1e7   :  { %v11933_v41 = vpop.f32.mrf.mxu0 }
 0x1e8   :  { %15583 = vst [vmem:[#allocation64_spill] sm:$0xff] %v11933_v41  ;;  %9850 = vmatpush3.bf16.msra.mxu0 %v10765_v54  ;;  %v10769_v41 = vld [vmem:[%s15258_s3 + $0x418] sm:$0xff]  }
 0x1e9   :  { %v11938_v1 = vpop.f32.mrf.mxu0  ;;  %9851 = vmatprep.subr.bf16.mxu0 %v10768_v46  ;;  %v10741_v54 = vld [vmem:[%s15255_s0 + $0x3d8] sm:$0xff]   ;;  %v10771_v46 = vld [vmem:[%s15258_s3 + $0x410] sm:$0xff]  }
 0x1ea   :  { %15584 = vst [vmem:[#allocation65_spill] sm:$0xff] %v11938_v1 }
 0x1eb   :  { %v11949_v9 = vpop.f32.mrf.mxu0 }
 0x1ec   :  { %15585 = vst [vmem:[#allocation66_spill] sm:$0xff] %v11949_v9  ;;  %9852 = vmatpush3.bf16.msra.mxu0 %v10769_v41 }
 0x1ed   :  { %v11954_v1 = vpop.f32.mrf.mxu0  ;;  %10545 = vmatmul.mubr.msk.bf16.gmra.mxu0 %vm945_vm2, %v10739_v27  ;;  %v10770_v27 = vld [vmem:[%s15258_s3 + $0x450] sm:$0xff]  }
 0x1ee   :  { %15586 = vst [vmem:[#allocation67_spill] sm:$0xff] %v11954_v1  ;;  %10548 = vmatprep.mubr.msk.bf16.mxu0 %vm945_vm2, %v10740_v44  ;;  %v10766_v44 = vld [vmem:[%s15255_s0 + $0x3e0] sm:$0xff]   ;;  %9853 = vmatprep.subr.bf16.mxu0 %v10770_v27  ;;  %v10767_v27 = vld [vmem:[%s15255_s0 + $0x3e8] sm:$0xff]  }
 0x1ef   :  { %v11961_v28 = vpop.f32.mrf.mxu0 }
 0x1f0   :  { %15587 = vst [vmem:[#allocation68_spill] sm:$0xff] %v11961_v28  ;;  %9854 = vmatpush3.bf16.msra.mxu0 %v10771_v46  ;;  %v10775_v46 = vld [vmem:[%s15258_s3 + $0x408] sm:$0xff]  }
 0x1f1   :  { %v11963_v50 = vpop.f32.mrf.mxu0 }
 0x1f2   :  { %15588 = vst [vmem:[#allocation69_spill] sm:$0xff] %v11963_v50  ;;  %v10774_v50 = vld [vmem:[%s15258_s3 + $0x448] sm:$0xff]  }
 0x1f3   :  { %v11977_v28 = vpop.f32.mrf.mxu0  ;;  %9855 = vmatprep.subr.bf16.mxu0 %v10774_v50  ;;  %v10776_v50 = vld [vmem:[%s15258_s3 + $0x440] sm:$0xff]  }
 0x1f4   :  { %15589 = vst [vmem:[#allocation70_spill] sm:$0xff] %v11977_v28  ;;  %9856 = vmatpush3.bf16.msra.mxu0 %v10775_v46  ;;  %v10773_v46 = vld [vmem:[%s15255_s0 + $0x3f8] sm:$0xff]  }
 0x1f5   :  { %v11979_v41 = vpop.f32.mrf.mxu0  ;;  %10549 = vmatmul.mubr.msk.bf16.gmra.mxu0 %vm945_vm2, %v10741_v54  ;;  %v10772_v54 = vld [vmem:[%s15255_s0 + $0x3f0] sm:$0xff]   ;;  %9857 = vmatprep.subr.bf16.mxu0 %v10776_v50 }
 0x1f6   :  { %15590 = vst [vmem:[#allocation71_spill] sm:$0xff] %v11979_v41  ;;  %10552 = vmatprep.mubr.msk.bf16.mxu0 %vm945_vm2, %v10766_v44 }
 0x1f7   :  { %v11986_v1 = vpop.f32.mrf.mxu0 }
 0x1f8   :  { %15591 = vst [vmem:[#allocation72_spill] sm:$0xff] %v11986_v1 }
 0x1f9   :  { %v11988_v9 = vpop.f32.mrf.mxu0 }
 0x1fa   :  { %15592 = vst [vmem:[#allocation73_spill] sm:$0xff] %v11988_v9  ;;  %v10777_v9 = vld [vmem:[%s15258_s3 + $0x400] sm:$0xff]  }
 0x1fb   :  { %v11999_v41 = vpop.f32.mrf.mxu0  ;;  %9858 = vmatpush3.bf16.msra.mxu0 %v10777_v9 }
 0x1fc   :  { %15593 = vst [vmem:[#allocation74_spill] sm:$0xff] %v11999_v41 }
 0x1fd   :  { %v10458_v44 = vpop.f32.mrf.mxu0  ;;  %10553 = vmatmul.mubr.msk.bf16.gmra.mxu0 %vm945_vm2, %v10767_v27 }
 0x1fe   :  { %10556 = vmatprep.mubr.msk.bf16.mxu0 %vm945_vm2, %v10772_v54 }
 0x1ff   :  { %v1947_v1 = vpop.f32.mrf.mxu0 }
 0x201   :  { %v10459_v28 = vpop.f32.mrf.mxu0 }
 0x203   :  { %v1949_v41 = vpop.f32.mrf.mxu0 }
 0x205   :  { %v10462_v52 = vpop.f32.mrf.mxu0  ;;  %10557 = vmatmul.mubr.msk.bf16.gmra.mxu0 %vm945_vm2, %v10773_v46 }
 0x207   :  { %v1959_v44 = vpop.f32.mrf.mxu0 }
 0x209   :  { %v10463_v27 = vpop.f32.mrf.mxu0 }
 0x20b   :  { %v1961_v34 = vpop.f32.mrf.mxu0 }
 0x20d   :  { %v12016_v54 = vpop.f32.mrf.mxu0 }
 0x20e   :  { %15594 = vst [vmem:[#allocation75_spill] sm:$0xff] %v12016_v54 }
 0x20f   :  { %v12018_v1 = vpop.f32.mrf.mxu0 }
 0x210   :  { %15595 = vst [vmem:[#allocation76_spill] sm:$0xff] %v12018_v1 }
 0x211   :  { %v12020_v28 = vpop.f32.mrf.mxu0 }
 0x212   :  { %15596 = vst [vmem:[#allocation77_spill] sm:$0xff] %v12020_v28 }
 0x213   :  { %v12022_v9 = vpop.f32.mrf.mxu0 }
 0x214   :  { %15597 = vst [vmem:[#allocation78_spill] sm:$0xff] %v12022_v9 }
 0x215   :  { %v12024_v41 = vpop.f32.mrf.mxu0 }
 0x216   :  { %15598 = vst [vmem:[#allocation79_spill] sm:$0xff] %v12024_v41 }
 0x217   :  { %v12026_v52 = vpop.f32.mrf.mxu0 }
 0x218   :  { %15599 = vst [vmem:[#allocation80_spill] sm:$0xff] %v12026_v52 }
 0x219   :  { %v12028_v50 = vpop.f32.mrf.mxu0 }
 0x21a   :  { %15600 = vst [vmem:[#allocation81_spill] sm:$0xff] %v12028_v50 }
 0x21b   :  { %v12030_v46 = vpop.f32.mrf.mxu0 }
 0x21c   :  { %15601 = vst [vmem:[#allocation82_spill] sm:$0xff] %v12030_v46 }
 0x21d   :  { %v12032_v44 = vpop.f32.mrf.mxu0 }
 0x21e   :  { %15602 = vst [vmem:[#allocation83_spill] sm:$0xff] %v12032_v44 }
 0x21f   :  { %v12034_v34 = vpop.f32.mrf.mxu0 }
 0x220   :  { %15603 = vst [vmem:[#allocation84_spill] sm:$0xff] %v12034_v34 }
 0x221   :  { %v12036_v26 = vpop.f32.mrf.mxu0 }
 0x222   :  { %15604 = vst [vmem:[#allocation85_spill] sm:$0xff] %v12036_v26 }
 0x223   :  { %v12038_v27 = vpop.f32.mrf.mxu0 }
 0x224   :  { %15605 = vst [vmem:[#allocation86_spill] sm:$0xff] %v12038_v27 }
 0x225   :  { %v12040_v1 = vpop.f32.mrf.mxu0 }
 0x226   :  { %15606 = vst [vmem:[#allocation87_spill] sm:$0xff] %v12040_v1 }
 0x227   :  { %v12042_v28 = vpop.f32.mrf.mxu0 }
 0x228   :  { %15607 = vst [vmem:[#allocation88_spill] sm:$0xff] %v12042_v28 }
 0x229   :  { %v12044_v9 = vpop.f32.mrf.mxu0 }
 0x22a   :  { %15608 = vst [vmem:[#allocation89_spill] sm:$0xff] %v12044_v9 }
 0x22b   :  { %v12046_v41 = vpop.f32.mrf.mxu0 }
 0x22c   :  { %15609 = vst [vmem:[#allocation90_spill] sm:$0xff] %v12046_v41 }
 0x22d   :  { %v12048_v52 = vpop.f32.mrf.mxu0 }
 0x22e   :  { %15610 = vst [vmem:[#allocation91_spill] sm:$0xff] %v12048_v52 }
 0x22f   :  { %v12050_v50 = vpop.f32.mrf.mxu0 }
 0x231   :  { %v12052_v46 = vpop.f32.mrf.mxu0 }
 0x232   :  { %15611 = vst [vmem:[#allocation92_spill] sm:$0xff] %v12052_v46  ;;  %v10792_v46 = vld [vmem:[%s15258_s3 + $0x578] sm:$0xff]  }
 0x233   :  { %v12054_v44 = vpop.f32.mrf.mxu0  ;;  %9971 = vmatprep.subr.bf16.mxu0 %v10792_v46  ;;  %v2334_v46 = vmax.f32 %v11387_v0, %v11611_v40 }
 0x234   :  { %15612 = vst [vmem:[#allocation93_spill] sm:$0xff] %v12054_v44 }
 0x235   :  { %v12056_v34 = vpop.f32.mrf.mxu0 }
 0x236   :  { %15613 = vst [vmem:[#allocation94_spill] sm:$0xff] %v12056_v34 }
 0x237   :  { %v12058_v26 = vpop.f32.mrf.mxu0 }
 0x238   :  { %15614 = vst [vmem:[#allocation95_spill] sm:$0xff] %v12058_v26  ;;  %v2332_v26 = vmax.f32 %v11367_v57, %v11591_v25  ;;  %v2331_v25 = vmax.f32 %v11381_v62, %v11605_v38  ;;  %v2340_v62 = vmax.f32 %v11399_v5, %v11623_v55  ;;  %v2341_v38 = vmax.f32 %v11408_v8, %v11629_v7  ;;  %v15632_v7 = vld [vmem:[#allocation63_spill] sm:$0xff] }
 0x239   :  { %v12060_v27 = vpop.f32.mrf.mxu0  ;;  %v2344_v5 = vmax.f32 %v11415_v11, %v11639_v36  ;;  %v10781_v11 = vld [vmem:[%s15258_s3 + $0xb0] sm:$0xff]  }
 0x23a   :  { %15615 = vst [vmem:[#allocation96_spill] sm:$0xff] %v12060_v27 }
 0x23b   :  { %v12062_v1 = vpop.f32.mrf.mxu0 }
 0x23c   :  { %15616 = vst [vmem:[#allocation97_spill] sm:$0xff] %v12062_v1 }
 0x23d   :  { %v10490_v28 = vpop.f32.mrf.mxu0 }
 0x23f   :  { %v2067_v9 = vpop.f32.mrf.mxu0 }
 0x241   :  { %v10491_v54 = vpop.f32.mrf.mxu0 }
 0x242   :  { %v2330_v54 = vmax.f32 %v11371_v58, %v11595_v29  ;;  %v2336_v58 = vmax.f32 %v11383_v63, %v11607_v39  ;;  %v2338_v63 = vmax.f32 %v11403_v6, %v11627_v59  ;;  %v2342_v6 = vmax.f32 %v11419_v12, %v11643_v43 }
 0x243   :  { %v2069_v41 = vpop.f32.mrf.mxu0 }
 0x244   :  { %v2333_v41 = vmax.f32 %v11376_v60, %v11600_v35  ;;  %v2335_v35 = vmax.f32 %v11397_v4, %v11621_v51  ;;  %v2339_v4 = vmax.f32 %v11413_v10, %v11637_v37 }
 0x245   :  { %v10494_v42 = vpop.f32.mrf.mxu0 }
 0x247   :  { %v2079_v52 = vpop.f32.mrf.mxu0 }
 0x249   :  { %v10495_v24 = vpop.f32.mrf.mxu0 }
 0x24a   :  { %v12075_v24 = vld [vmem:[%s15257_s2] ss:$0 sm:$0xff] }
 0x24b   :  { %v2081_v44 = vpop.f32.mrf.mxu0 }
 0x24d   :  { %v10498_v34 = vpop.f32.mrf.mxu0 }
 0x24e   :  { %v2380_v27 = vmax.f32 %v11827_v47, %v10498_v34 }
 0x24f   :  { %v2091_v1 = vpop.f32.mrf.mxu0 }
 0x250   :  { %v2428_v28 = vmax.f32 %v2332_v26, %v2380_v27  ;;  %v2378_v42 = vmax.f32 %v11837_v48, %v2091_v1  ;;  %v2337_v48 = vmax.f32 %v11392_v2, %v11616_v45  ;;  %v15626_v26 = vld [vmem:[#allocation61_spill] sm:$0xff] }
 0x251   :  { %v10499_v9 = vpop.f32.mrf.mxu0 }
 0x252   :  { %v2426_v52 = vmax.f32 %v2330_v54, %v2378_v42  ;;  %v2381_v57 = vmax.f32 %v11839_v61, %v10499_v9  ;;  %v2483_v29 = vadd.f32 %v12075_v24, %v2428_v28 }
 0x253   :  { %v2094_v47 = vpop.f32.mrf.mxu0 }
 0x254   :  { %v2429_v1 = vmax.f32 %v2333_v41, %v2381_v57  ;;  %v2379_v60 = vmax.f32 %v11853_v3, %v2094_v47  ;;  %v2481_v0 = vadd.f32 %v12075_v24, %v2426_v52  ;;  %v12108_v51 = vmax.f32 %v2483_v29, 0.0  ;;  %v15618_v47 = vld [vmem:[#allocation5_spill] sm:$0xff] }
 0x255   :  { %v10502_v39 = vpop.f32.mrf.mxu0 }
 0x256   :  { %v2484_v2 = vadd.f32 %v12075_v24, %v2429_v1  ;;  %v2427_v40 = vmax.f32 %v2331_v25, %v2379_v60  ;;  %v2384_v45 = vmax.f32 %v11855_v21, %v10502_v39  ;;  %15617 = vst [vmem:[#allocation98_spill] sm:$0xff] %v12108_v51  ;;  %v2345_v21 = vmax.f32 %v11424_v14, %v11645_v49  ;;  %v10783_v14 = vld [vmem:[%s15258_s3 + $0xa8] sm:$0xff]  }
 0x257   :  { %v2107_v55 = vpop.f32.mrf.mxu0  ;;  %v2529_v28 = vmax.f32 %v2481_v0, 0.0  ;;  %v15620_v0 = vld [vmem:[#allocation32_spill] sm:$0xff] }
 0x258   :  { %v2532_v59 = vmax.f32 %v2484_v2, 0.0  ;;  %v2482_v61 = vadd.f32 %v12075_v24, %v2427_v40  ;;  %v2432_v3 = vmax.f32 %v2336_v58, %v2384_v45  ;;  %v2382_v44 = vmax.f32 %v11865_v53, %v2107_v55  ;;  %v15621_v2 = vld [vmem:[#allocation6_spill] sm:$0xff] }
 0x259   :  { %v10503_v54 = vpop.f32.mrf.mxu0  ;;  %v9181_v1 = vpack.c.bf16 %v12108_v51, %v2529_v28 }
 0x25a   :  { %v12121_v42 = vpack.c.bf16 %v2532_v59, %v12108_v51  ;;  %v2530_v9 = vmax.f32 %v2482_v61, 0.0  ;;  %v2430_v41 = vmax.f32 %v2334_v46, %v2382_v44  ;;  %v2487_v57 = vadd.f32 %v12075_v24, %v2432_v3  ;;  %v15619_v46 = vld [vmem:[#allocation58_spill] sm:$0xff]  ;;  %v15622_v3 = vld [vmem:[#allocation59_spill] sm:$0xff]  ;;  %v15743_v51 = vld [vmem:[#allocation21_spill] sm:$0xff] }
 0x25b   :  { %v2385_v25 = vmax.f32 %v11867_v56, %v10503_v54  ;;  %v2110_v58 = vpop.f32.mrf.mxu0 }
 0x25c   :  { %v12133_v60 = vpack.c.bf16 %v2530_v9, %v2529_v28  ;;  %v2383_v39 = vmax.f32 %v15619_v46, %v2110_v58  ;;  %v2485_v45 = vadd.f32 %v12075_v24, %v2430_v41  ;;  %v2611_v56 = vshll.u32 %v12121_v42, 16 }
 0x25d   :  { %v2433_v55 = vmax.f32 %v2337_v48, %v2385_v25  ;;  %v10506_v59 = vpop.f32.mrf.mxu0  ;;  %v12143_v9 = vmax.f32 %v2487_v57, 0.0  ;;  %v15624_v25 = vld [vmem:[#allocation60_spill] sm:$0xff] }
 0x25e   :  { %v2431_v61 = vmax.f32 %v2335_v35, %v2383_v39  ;;  %v2388_v44 = vmax.f32 %v15622_v3, %v10506_v59  ;;  %v2602_v54 = vshrl.u32 %v12133_v60, 16  ;;  %v2604_v40 = vshll.u32 %v12133_v60, 16 }
 0x25f   :  { %15623 = vst [vmem:[#allocation5_spill] sm:$0xff] %v12143_v9  ;;  %v2488_v58 = vadd.f32 %v12075_v24, %v2433_v55  ;;  %v2123_v46 = vpop.f32.mrf.mxu0  ;;  %v2613_v29 = vrot.slane %v2611_v56, 1  ;;  %v2609_v35 = vshrl.u32 %v12121_v42, 16  ;;  %v12150_v39 = vmax.f32 %v2485_v45, 0.0 }
 0x260   :  { %v2486_v48 = vadd.f32 %v12075_v24, %v2431_v61  ;;  %v2436_v41 = vmax.f32 %v2340_v62, %v2388_v44  ;;  %v2386_v52 = vmax.f32 %v15624_v25, %v2123_v46  ;;  %v2606_v28 = vrot.slane %v2604_v40, 1  ;;  %v15631_v25 = vld [vmem:[#allocation62_spill] sm:$0xff] }
 0x261   :  { %15625 = vst [vmem:[#allocation58_spill] sm:$0xff] %v12150_v39  ;;  %v2536_v59 = vmax.f32 %v2488_v58, 0.0  ;;  %v10507_v3 = vpop.f32.mrf.mxu0  ;;  %v12152_v57 = vrot.slane %v2602_v54, 1  ;;  %v12159_v46 = vor.u32 %v2613_v29, %v2609_v35  ;;  %v12161_v45 = vrot.slane %v2604_v40, 2 }
 0x262   :  { %v2534_v53 = vmax.f32 %v2486_v48, 0.0  ;;  %v2491_v55 = vadd.f32 %v12075_v24, %v2436_v41  ;;  %v2434_v27 = vmax.f32 %v2338_v63, %v2386_v52  ;;  %v2389_v34 = vmax.f32 %v15626_v26, %v10507_v3 }
 0x263   :  { %v12157_v61 = vpack.c.bf16 %v2536_v59, %v12143_v9  ;;  %v2126_v62 = vpop.f32.mrf.mxu0  ;;  %v2607_v44 = vor.u32 %v2606_v28, %v2602_v54  ;;  %15628 = vst [vmem:[#allocation6_spill] sm:$0xff] %v12159_v46  ;;  %v2748_v41 = vrot.slane %v2609_v35, 1  ;;  %v2749_v63 = vrot.slane %v2611_v56, 2  ;;  %v10780_v56 = vld [vmem:[%s15258_s3 + $0xf0] sm:$0xff]  }
 0x264   :  { %v12164_v58 = vpack.c.bf16 %v2534_v53, %v12150_v39  ;;  %v2437_v48 = vmax.f32 %v2341_v38, %v2389_v34  ;;  %v12170_v52 = vmax.f32 %v2491_v55, 0.0  ;;  %v2387_v59 = vmax.f32 %v15631_v25, %v2126_v62  ;;  %v10779_v53 = vld [vmem:[%s15258_s3 + $0xb8] sm:$0xff]  }
 0x265   :  { %15627 = vst [vmem:[#allocation32_spill] sm:$0xff] %v12157_v61  ;;  %v15298_v26 = vshll.u32 %v12157_v61, 16  ;;  %v10510_v54 = vpop.f32.mrf.mxu0  ;;  %v8692_v29 = vcombine.low %v2607_v44, %v12159_v46  ;;  %v2489_v40 = vadd.f32 %v12075_v24, %v2434_v27  ;;  %v15299_v34 = vshrl.u32 %v12157_v61, 16  ;;  %v15633_v25 = vld [vmem:[#allocation64_spill] sm:$0xff] }
 0x266   :  { %15629 = vst [vmem:[#allocation59_spill] sm:$0xff] %v12164_v58  ;;  %15630 = vst [vmem:[#allocation60_spill] sm:$0xff] %v12170_v52  ;;  %v2492_v8 = vadd.f32 %v12075_v24, %v2437_v48  ;;  %v2392_v38 = vmax.f32 %v15632_v7, %v10510_v54  ;;  %v2435_v35 = vmax.f32 %v2339_v4, %v2387_v59  ;;  %v15300_v3 = vshll.u32 %v12164_v58, 16 }
 0x267   :  { %5550 = vmatprep.mubr.bf16.mxu1 %v8692_v29  ;;  %v2139_v28 = vpop.f32.mrf.mxu0  ;;  %v2627_v27 = vrot.slane %v15298_v26, 1  ;;  %v15301_v48 = vshrl.u32 %v12164_v58, 16  ;;  %v12207_v36 = vor.u32 %v2749_v63, %v2748_v41 }
 0x268   :  { %v2540_v62 = vmax.f32 %v2492_v8, 0.0  ;;  %v2440_v44 = vmax.f32 %v2344_v5, %v2392_v38  ;;  %v2390_v10 = vmax.f32 %v15633_v25, %v2139_v28  ;;  %5551 = vmatmul.mubr.bf16.vlgmr.msra.gmra.mxu1 %v9181_v1  ;;  %v2490_v37 = vadd.f32 %v12075_v24, %v2435_v35  ;;  %v15636_v8 = vld [vmem:[#allocation65_spill] sm:$0xff] }
 0x269   :  { %v2620_v4 = vrot.slane %v15300_v3, 1  ;;  %v10511_v59 = vpop.f32.mrf.mxu0  ;;  %v12202_v54 = vor.u32 %v2627_v27, %v15299_v34  ;;  %9396 = vmatpush3.bf16.msra.mxu1 %v10779_v53  ;;  %15634 = vst [vmem:[#allocation61_spill] sm:$0xff] %v12207_v36  ;;  %v10782_v53 = vld [vmem:[%s15258_s3 + $0xe8] sm:$0xff]   ;;  %v12220_v38 = vmax.f32 %v2489_v40, 0.0  ;;  %v12228_v28 = vpack.c.bf16 %v12143_v9, %v12150_v39 }
 0x26a   :  { %v12210_v5 = vpack.c.bf16 %v2540_v62, %v12170_v52  ;;  %v2495_v1 = vadd.f32 %v12075_v24, %v2440_v44  ;;  %v2438_v29 = vmax.f32 %v2342_v6, %v2390_v10  ;;  %v2393_v7 = vmax.f32 %v15636_v8, %v10511_v59  ;;  %9397 = vmatprep.subr.bf16.mxu1 %v10780_v56  ;;  %v15642_v44 = vld [vmem:[#allocation66_spill] sm:$0xff]  ;;  %v15643_v59 = vld [vmem:[#allocation67_spill] sm:$0xff]  ;;  %v15732_v9 = vld [vmem:[#allocation17_spill] sm:$0xff] }
 0x26b   :  { %15637 = vst [vmem:[#allocation63_spill] sm:$0xff] %v12220_v38  ;;  %v2538_v41 = vmax.f32 %v2490_v37, 0.0  ;;  %v12224_v63 = vor.u32 %v2620_v4, %v15301_v48  ;;  %v2142_v35 = vpop.f32.mrf.mxu0  ;;  %15639 = vst [vmem:[#allocation65_spill] sm:$0xff] %v12228_v28  ;;  %v2944_v40 = vshll.u32 %v12202_v54, 16  ;;  %v15734_v39 = vld [vmem:[#allocation18_spill] sm:$0xff] }
 0x26c   :  { %15635 = vst [vmem:[#allocation62_spill] sm:$0xff] %v12210_v5  ;;  %v12231_v12 = vshrl.u32 %v12210_v5, 16  ;;  %v12234_v43 = vshll.u32 %v12210_v5, 16  ;;  %v12236_v6 = vmax.f32 %v2495_v1, 0.0  ;;  %v2441_v62 = vmax.f32 %v2345_v21, %v2393_v7 }
 0x26d   :  { %15638 = vst [vmem:[#allocation64_spill] sm:$0xff] %v12224_v63  ;;  %v12240_v56 = vpack.c.bf16 %v2538_v41, %v12220_v38  ;;  %v2391_v25 = vmax.f32 %v15642_v44, %v2142_v35  ;;  %v10514_v10 = vpop.f32.mrf.mxu0  ;;  %9398 = vmatpush3.bf16.msra.mxu1 %v10781_v11  ;;  %v2493_v4 = vadd.f32 %v12075_v24, %v2438_v29 }
 0x26e   :  { %15640 = vst [vmem:[#allocation99_spill] sm:$0xff] %v12236_v6  ;;  %v2887_v37 = vrot.slane %v12231_v12, 7  ;;  %v2396_v1 = vmax.f32 %v15643_v59, %v10514_v10  ;;  %v12253_v8 = vcombine.low %v12224_v63, %v12202_v54  ;;  %9399 = vmatprep.subr.bf16.mxu1 %v10782_v53  ;;  %v2496_v11 = vadd.f32 %v12075_v24, %v2441_v62  ;;  %v10784_v53 = vld [vmem:[%s15258_s3 + $0xe0] sm:$0xff]  }
 0x26f   :  { %15641 = vst [vmem:[#allocation100_spill] sm:$0xff] %v12240_v56  ;;  %v12259_v49 = vshrl.u32 %v12240_v56, 16  ;;  %v12262_v21 = vshll.u32 %v12240_v56, 16  ;;  %v15645_v29 = vmax.f32 %v11429_v16, %v11653_v31  ;;  %v2155_v41 = vpop.f32.mrf.mxu0  ;;  %v15646_v44 = vmax.f32 %v11431_v17, %v11655_v30  ;;  %v15647_v59 = vld [vmem:[#allocation68_spill] sm:$0xff] }
 0x270   :  { %15644 = vst [vmem:[#allocation66_spill] sm:$0xff] %v12253_v8  ;;  %v12272_v35 = vor.u32 %v2887_v37, %v12234_v43  ;;  %5558 = vmatprep.mubr.bf16.mxu1 %v12253_v8  ;;  %v2394_v62 = vmax.f32 %v15647_v59, %v2155_v41  ;;  %v2641_v27 = vrot.slane %v12234_v43, 1  ;;  %v2544_v31 = vmax.f32 %v2496_v11, 0.0  ;;  %v15650_v41 = vld [vmem:[#allocation69_spill] sm:$0xff] }
 0x271   :  { %v2439_v7 = vmax.f32 %v15645_v29, %v2391_v25  ;;  %v2444_v10 = vmax.f32 %v15646_v44, %v2396_v1  ;;  %v2885_v16 = vrot.slane %v12259_v49, 7  ;;  %5559 = vmatmul.mubr.bf16.gmra.mxu1 %v12228_v28  ;;  %v10515_v29 = vpop.f32.mrf.mxu0  ;;  %v2634_v37 = vrot.slane %v12262_v21, 1  ;;  %v10785_v11 = vld [vmem:[%s15258_s3 + $0xa0] sm:$0xff]  }
 0x272   :  { %v12284_v26 = vmax.f32 %v2493_v4, 0.0  ;;  %v15649_v30 = vmax.f32 %v11435_v18, %v11659_v13  ;;  %v2397_v44 = vmax.f32 %v15650_v41, %v10515_v29  ;;  %9400 = vmatpush3.bf16.msra.mxu1 %v10783_v14  ;;  %v12298_v59 = vpack.c.bf16 %v2544_v31, %v12236_v6  ;;  %v10786_v18 = vld [vmem:[%s15258_s3 + $0xd8] sm:$0xff]   ;;  %v15652_v13 = vld [vmem:[#allocation33_spill] sm:$0xff] }
 0x273   :  { %v2494_v25 = vadd.f32 %v12075_v24, %v2439_v7  ;;  %v2499_v17 = vadd.f32 %v12075_v24, %v2444_v10  ;;  %v12295_v7 = vor.u32 %v2885_v16, %v12262_v21  ;;  %v2158_v34 = vpop.f32.mrf.mxu0  ;;  %v2635_v10 = vor.u32 %v2634_v37, %v12259_v49  ;;  %9401 = vmatprep.subr.bf16.mxu1 %v10784_v53  ;;  %v15653_v14 = vld [vmem:[#allocation7_spill] sm:$0xff] }
 0x274   :  { %15648 = vst [vmem:[#allocation67_spill] sm:$0xff] %v12284_v26  ;;  %v2442_v1 = vmax.f32 %v15649_v30, %v2394_v62  ;;  %15651 = vst [vmem:[#allocation68_spill] sm:$0xff] %v12298_v59  ;;  %v2351_v62 = vmax.f32 %v15653_v14, %v15652_v13  ;;  %v15654_v29 = vmax.f32 %v11440_v20, %v11661_v33  ;;  %v15655_v30 = vld [vmem:[#allocation70_spill] sm:$0xff]  ;;  %v2942_v13 = vshrl.u32 %v12202_v54, 16 }
 0x275   :  { %v2542_v4 = vmax.f32 %v2494_v25, 0.0  ;;  %v2395_v41 = vmax.f32 %v15655_v30, %v2158_v34  ;;  %v12312_v31 = vpack.c.bf16 %v12170_v52, %v12220_v38  ;;  %v10518_v37 = vpop.f32.mrf.mxu0  ;;  %v12319_v3 = vor.u32 %v2641_v27, %v12231_v12  ;;  %v15719_v52 = vld [vmem:[#allocation38_spill] sm:$0xff]  ;;  %v15720_v38 = vld [vmem:[#allocation12_spill] sm:$0xff] }
 0x276   :  { %v2445_v16 = vmax.f32 %v15654_v29, %v2397_v44  ;;  %v2497_v53 = vadd.f32 %v12075_v24, %v2442_v1  ;;  %v12322_v14 = vmax.f32 %v2499_v17, 0.0  ;;  %v15659_v33 = vmax.f32 %v11445_v22, %v11669_v19  ;;  %v15660_v44 = vld [vmem:[#allocation71_spill] sm:$0xff]  ;;  %9402 = vmatpush3.bf16.msra.mxu1 %v10785_v11 }
 0x277   :  { %15656 = vst [vmem:[#allocation69_spill] sm:$0xff] %v12312_v31  ;;  %v12315_v25 = vpack.c.bf16 %v2542_v4, %v12284_v26  ;;  %v2400_v29 = vmax.f32 %v15660_v44, %v10518_v37  ;;  %v12330_v4 = vshll.u32 %v12298_v59, 16  ;;  %v12336_v27 = vcombine.low %v2635_v10, %v12319_v3  ;;  %v2171_v17 = vpop.f32.mrf.mxu0  ;;  %9403 = vmatprep.subr.bf16.mxu1 %v10786_v18  ;;  %v10787_v22 = vld [vmem:[%s15258_s3 + $0x98] sm:$0xff]   ;;  %v10788_v44 = vld [vmem:[%s15258_s3 + $0xd0] sm:$0xff]  }
 0x278   :  { %15658 = vst [vmem:[#allocation7_spill] sm:$0xff] %v12322_v14  ;;  %v2500_v20 = vadd.f32 %v12075_v24, %v2445_v16  ;;  %v2443_v34 = vmax.f32 %v15659_v33, %v2395_v41  ;;  %v2946_v30 = vrot.slane %v2944_v40, 1  ;;  %v15664_v11 = vmax.f32 %v11447_v23, %v11671_v15  ;;  %v15665_v37 = vld [vmem:[#allocation72_spill] sm:$0xff] }
 0x279   :  { %15657 = vst [vmem:[#allocation33_spill] sm:$0xff] %v12315_v25  ;;  %15661 = vst [vmem:[#allocation70_spill] sm:$0xff] %v12330_v4  ;;  %v12333_v1 = vshll.u32 %v12315_v25, 16  ;;  %v2398_v33 = vmax.f32 %v15665_v37, %v2171_v17  ;;  %v12350_v40 = vshrl.u32 %v12298_v59, 16  ;;  %v12352_v18 = vmax.f32 %v2497_v53, 0.0  ;;  %5566 = vmatprep.mubr.bf16.mxu1 %v12336_v27 }
 0x27a   :  { %15663 = vst [vmem:[#allocation101_spill] sm:$0xff] %v12336_v27  ;;  %v2548_v19 = vmax.f32 %v2500_v20, 0.0  ;;  %v2498_v16 = vadd.f32 %v12075_v24, %v2443_v34  ;;  %v2448_v41 = vmax.f32 %v15664_v11, %v2400_v29  ;;  %v10519_v20 = vpop.f32.mrf.mxu0  ;;  %v2970_v48 = vshrl.u32 %v2635_v10, 16  ;;  %5567 = vmatmul.mubr.bf16.gmra.mxu1 %v12312_v31  ;;  %v15670_v11 = vld [vmem:[#allocation73_spill] sm:$0xff]  ;;  %v15762_v27 = vld [vmem:[#allocation82_spill] sm:$0xff] }
 0x27b   :  { %15662 = vst [vmem:[#allocation71_spill] sm:$0xff] %v12333_v1  ;;  %15666 = vst [vmem:[#allocation72_spill] sm:$0xff] %v12350_v40  ;;  %v2972_v34 = vshll.u32 %v2635_v10, 16  ;;  %v15669_v29 = vmax.f32 %v15618_v47, %v11675_v32  ;;  %v2401_v53 = vmax.f32 %v15670_v11, %v10519_v20  ;;  %v2648_v8 = vrot.slane %v12333_v1, 1  ;;  %9404 = vmatpush3.bf16.msra.mxu1 %v10787_v22  ;;  %v15765_v1 = vld [vmem:[#allocation56_spill] sm:$0xff] }
 0x27c   :  { %15667 = vst [vmem:[#allocation102_spill] sm:$0xff] %v12352_v18  ;;  %v12356_v55 = vpack.c.bf16 %v2548_v19, %v12322_v14  ;;  %v2546_v23 = vmax.f32 %v2498_v16, 0.0  ;;  %v2503_v15 = vadd.f32 %v12075_v24, %v2448_v41  ;;  %v2174_v37 = vpop.f32.mrf.mxu0  ;;  %v2655_v63 = vrot.slane %v12330_v4, 1  ;;  %v10789_v19 = vld [vmem:[%s15258_s3 + $0x90] sm:$0xff]   ;;  %9405 = vmatprep.subr.bf16.mxu1 %v10788_v44 }
 0x27d   :  { %v2446_v17 = vmax.f32 %v15669_v29, %v2398_v33  ;;  %v2974_v28 = vrot.slane %v2972_v34, 1  ;;  %v12370_v16 = vshrl.u32 %v12315_v25, 16  ;;  %v2947_v47 = vor.u32 %v2946_v30, %v2942_v13  ;;  %v10790_v33 = vld [vmem:[%s15258_s3 + $0xc8] sm:$0xff]  }
 0x27e   :  { %15668 = vst [vmem:[#allocation103_spill] sm:$0xff] %v12356_v55  ;;  %v12373_v32 = vpack.c.bf16 %v2546_v23, %v12352_v18  ;;  %v12376_v41 = vcombine.low %v12202_v54, %v2635_v10  ;;  %v15675_v20 = vmax.f32 %v15621_v2, %v15620_v0  ;;  %v15676_v29 = vld [vmem:[#allocation74_spill] sm:$0xff]  ;;  %v10522_v13 = vpop.f32.mrf.mxu0  ;;  %v12391_v54 = vshll.u32 %v12356_v55, 16  ;;  %v15708_v18 = vld [vmem:[#allocation36_spill] sm:$0xff] }
 0x27f   :  { %15671 = vst [vmem:[#allocation73_spill] sm:$0xff] %v12370_v16  ;;  %v12382_v22 = vadd.f32 %v12075_v24, %v2446_v17  ;;  %v2399_v11 = vmax.f32 %v15676_v29, %v2174_v37  ;;  %v12388_v23 = vor.u32 %v2974_v28, %v2970_v48  ;;  %v2649_v30 = vor.u32 %v2648_v8, %v12370_v16  ;;  %v10794_v28 = vld [vmem:[%s15258_s3 + $0x538] sm:$0xff]  }
 0x280   :  { %15672 = vst [vmem:[#allocation104_spill] sm:$0xff] %v12373_v32  ;;  %15673 = vst [vmem:[#allocation105_spill] sm:$0xff] %v12376_v41  ;;  %v2449_v34 = vmax.f32 %v15675_v20, %v2401_v53  ;;  %v12394_v10 = vshll.u32 %v12373_v32, 16  ;;  %v12398_v44 = vor.u32 %v2655_v63, %v12350_v40  ;;  %v2551_v17 = vmax.f32 %v2503_v15, 0.0  ;;  %v2187_v48 = vpop.f32.mrf.mxu0  ;;  %9406 = vmatpush3.bf16.msra.mxu1 %v10789_v19  ;;  %v10796_v19 = vld [vmem:[%s15258_s3 + $0x570] sm:$0xff]  }
 0x281   :  { %15674 = vst [vmem:[#allocation106_spill] sm:$0xff] %v12382_v22  ;;  %15677 = vst [vmem:[#allocation74_spill] sm:$0xff] %v12388_v23  ;;  %v2447_v2 = vmax.f32 %v2351_v62, %v2399_v11  ;;  %v8708_v53 = vcombine.low %v2947_v47, %v12388_v23  ;;  %v12406_v37 = vshrl.u32 %v12373_v32, 16  ;;  %v3000_v15 = vshll.u32 %v12319_v3, 16  ;;  %9407 = vmatprep.subr.bf16.mxu1 %v10790_v33  ;;  %v10791_v62 = vld [vmem:[%s15258_s3 + $0x88] sm:$0xff]   ;;  %v10793_v33 = vld [vmem:[%s15258_s3 + $0xc0] sm:$0xff]  }
 0x282   :  { %15678 = vst [vmem:[#allocation107_spill] sm:$0xff] %v12391_v54  ;;  %15679 = vst [vmem:[#allocation108_spill] sm:$0xff] %v12394_v10  ;;  %v2504_v0 = vadd.f32 %v12075_v24, %v2449_v34  ;;  %v12410_v63 = vcombine.low %v2649_v30, %v12398_v44  ;;  %v12422_v34 = vpack.c.bf16 %v12236_v6, %v12284_v26  ;;  %v10523_v29 = vpop.f32.mrf.mxu0  ;;  %v3028_v11 = vshll.u32 %v2649_v30, 16  ;;  %v15709_v6 = vld [vmem:[#allocation10_spill] sm:$0xff] }
 0x283   :  { %15680 = vst [vmem:[#allocation109_spill] sm:$0xff] %v12406_v37  ;;  %v2502_v20 = vadd.f32 %v12075_v24, %v2447_v2  ;;  %6326 = vmatprep.mubr.bf16.mxu0 %v8708_v53  ;;  %v2998_v13 = vshrl.u32 %v12319_v3, 16  ;;  %v3026_v48 = vshrl.u32 %v2649_v30, 16  ;;  %v2814_v2 = vrot.slane %v12394_v10, 1 }
 0x284   :  { %15681 = vst [vmem:[#allocation110_spill] sm:$0xff] %v12410_v63  ;;  %v2552_v47 = vmax.f32 %v2504_v0, 0.0  ;;  %15682 = vst [vmem:[#allocation111_spill] sm:$0xff] %v12422_v34  ;;  %6327 = vmatmul.mubr.bf16.vlgmr.msra.gmra.mxu0 %v12376_v41  ;;  %5574 = vmatprep.mubr.bf16.mxu1 %v12410_v63  ;;  %v3002_v0 = vrot.slane %v3000_v15, 1  ;;  %v2189_v29 = vpop.f32.mrf.mxu0  ;;  %v3030_v14 = vrot.slane %v3028_v11, 1  ;;  %v3056_v31 = vshll.u32 %v12398_v44, 16 }
 0x285   :  { %v2550_v8 = vmax.f32 %v2502_v20, 0.0  ;;  %5575 = vmatmul.mubr.bf16.gmra.mxu1 %v12422_v34  ;;  %9972 = vmatpush3.bf16.msra.mxu0 %v10794_v28  ;;  %v10797_v41 = vld [vmem:[%s15258_s3 + $0x530] sm:$0xff]   ;;  %v12441_v15 = vor.u32 %v2814_v2, %v12406_v37  ;;  %v15686_v28 = vor.u32 %v12161_v45, %v12152_v57  ;;  %v10798_v11 = vld [vmem:[%s15258_s3 + $0x568] sm:$0xff]   ;;  %v10799_v29 = vld [vmem:[%s15258_s3 + $0x178] sm:$0xff]   ;;  %v12466_v57 = vshrl.u32 %v12356_v55, 16 }
 0x286   :  { %v12431_v53 = vpack.c.bf16 %v2552_v47, %v2551_v17  ;;  %v12438_v46 = vor.u32 %v3002_v0, %v2998_v13  ;;  %v2840_v17 = vrot.slane %v12391_v54, 1  ;;  %9408 = vmatpush3.bf16.msra.mxu1 %v10791_v62  ;;  %v10795_v47 = vld [vmem:[%s15258_s3 + $0x80] sm:$0xff]   ;;  %9973 = vmatprep.subr.bf16.mxu0 %v10796_v19  ;;  %v15687_v13 = vmax.f32 %v12382_v22, 0.0  ;;  %v10526_v2 = vpop.f32.mrf.mxu0  ;;  %v15747_v54 = vld [vmem:[#allocation23_spill] sm:$0xff] }
 0x287   :  { %15685 = vst [vmem:[#allocation114_spill] sm:$0xff] %v12441_v15  ;;  %v12451_v20 = vcombine.low %v15686_v28, %v12207_v36  ;;  %v12460_v62 = vor.u32 %v3030_v14, %v3026_v48  ;;  %9409 = vmatprep.subr.bf16.mxu1 %v10793_v33  ;;  %15690 = vst [vmem:[#allocation117_spill] sm:$0xff] %v12466_v57  ;;  %v3058_v19 = vrot.slane %v3056_v31, 1  ;;  %v3084_v28 = vshll.u32 %v12441_v15, 16  ;;  %v15746_v63 = vld [vmem:[#allocation49_spill] sm:$0xff]  ;;  %v15753_v37 = vld [vmem:[#allocation52_spill] sm:$0xff] }
 0x288   :  { %15683 = vst [vmem:[#allocation112_spill] sm:$0xff] %v12431_v53  ;;  %15684 = vst [vmem:[#allocation113_spill] sm:$0xff] %v12438_v46  ;;  %v12458_v0 = vpack.c.bf16 %v2550_v8, %v15687_v13  ;;  %v12477_v33 = vcombine.low %v12319_v3, %v2649_v30  ;;  %v2199_v48 = vpop.f32.mrf.mxu0  ;;  %v10800_v13 = vld [vmem:[%s15258_s3 + $0x528] sm:$0xff]   ;;  %v3054_v2 = vshrl.u32 %v12398_v44, 16  ;;  %v3082_v31 = vshrl.u32 %v12441_v15, 16  ;;  %v10802_v3 = vld [vmem:[%s15258_s3 + $0x560] sm:$0xff]  }
 0x289   :  { %15689 = vst [vmem:[#allocation116_spill] sm:$0xff] %v12460_v62  ;;  %v8725_v14 = vcombine.low %v12438_v46, %v12460_v62  ;;  %9974 = vmatpush3.bf16.msra.mxu0 %v10797_v41  ;;  %v3086_v45 = vrot.slane %v3084_v28, 1  ;;  %v12485_v23 = vor.u32 %v2840_v17, %v12466_v57  ;;  %v15695_v62 = vshrl.u32 %v12164_v58, 16  ;;  %v15755_v53 = vld [vmem:[#allocation81_spill] sm:$0xff] }
 0x28a   :  { %15688 = vst [vmem:[#allocation115_spill] sm:$0xff] %v12458_v0  ;;  %v12472_v8 = vshll.u32 %v12458_v0, 16  ;;  %15692 = vst [vmem:[#allocation119_spill] sm:$0xff] %v12477_v33  ;;  %9410 = vmatpush3.bf16.msra.mxu1 %v10795_v47  ;;  %9975 = vmatprep.subr.bf16.mxu0 %v10798_v11  ;;  %v12491_v41 = vshrl.u32 %v12458_v0, 16  ;;  %v10527_v48 = vpop.f32.mrf.mxu0  ;;  %v15696_v17 = vshll.u32 %v12164_v58, 16  ;;  %v12499_v47 = vor.u32 %v3058_v19, %v3054_v2  ;;  %v15703_v2 = vld [vmem:[#allocation34_spill] sm:$0xff] }
 0x28b   :  { %15693 = vst [vmem:[#allocation120_spill] sm:$0xff] %v12485_v23  ;;  %6334 = vmatprep.mubr.bf16.mxu0 %v8725_v14  ;;  %9459 = vmatprep.subr.bf16.mxu1 %v10799_v29  ;;  %v2751_v28 = vrot.slane %v15695_v62, 1  ;;  %v12501_v11 = vor.u32 %v3086_v45, %v3082_v31  ;;  %v3112_v22 = vshll.u32 %v12485_v23, 16  ;;  %v15699_v34 = vshrl.u32 %v12157_v61, 16  ;;  %v10803_v45 = vld [vmem:[%s15258_s3 + $0x520] sm:$0xff]   ;;  %v15742_v0 = vld [vmem:[#allocation47_spill] sm:$0xff] }
 0x28c   :  { %15691 = vst [vmem:[#allocation118_spill] sm:$0xff] %v12472_v8  ;;  %15694 = vst [vmem:[#allocation121_spill] sm:$0xff] %v12491_v41  ;;  %v2866_v30 = vrot.slane %v12472_v8, 1  ;;  %v2752_v46 = vrot.slane %v15696_v17, 2  ;;  %6335 = vmatmul.mubr.bf16.gmra.mxu0 %v12477_v33  ;;  %v2201_v14 = vpop.f32.mrf.mxu0  ;;  %v15702_v48 = vshll.u32 %v12157_v61, 16  ;;  %v15704_v31 = vld [vmem:[#allocation8_spill] sm:$0xff] }
 0x28d   :  { %15697 = vst [vmem:[#allocation122_spill] sm:$0xff] %v12499_v47  ;;  %15698 = vst [vmem:[#allocation123_spill] sm:$0xff] %v12501_v11  ;;  %v2754_v32 = vrot.slane %v15699_v34, 1  ;;  %9976 = vmatpush3.bf16.msra.mxu0 %v10800_v13  ;;  %v8742_v19 = vcombine.low %v12499_v47, %v12501_v11  ;;  %v10804_v34 = vld [vmem:[%s15258_s3 + $0x558] sm:$0xff]   ;;  %v2356_v13 = vmax.f32 %v15704_v31, %v15703_v2  ;;  %v15707_v33 = vld [vmem:[#allocation9_spill] sm:$0xff] }
 0x28e   :  { %v12507_v29 = vor.u32 %v2866_v30, %v12491_v41  ;;  %v12509_v62 = vor.u32 %v2752_v46, %v2751_v28  ;;  %v2755_v17 = vrot.slane %v15702_v48, 2  ;;  %9977 = vmatprep.subr.bf16.mxu0 %v10802_v3  ;;  %v10530_v46 = vpop.f32.mrf.mxu0  ;;  %v3114_v30 = vrot.slane %v3112_v22, 1  ;;  %v15706_v48 = vld [vmem:[#allocation35_spill] sm:$0xff]  ;;  %v15744_v8 = vld [vmem:[#allocation48_spill] sm:$0xff]  ;;  %v15754_v41 = vld [vmem:[#allocation26_spill] sm:$0xff] }
 0x28f   :  { %v2354_v55 = vmax.f32 %v15707_v33, %v15706_v48  ;;  %v2357_v11 = vmax.f32 %v15709_v6, %v15708_v18  ;;  %6342 = vmatprep.mubr.bf16.mxu0 %v8742_v19  ;;  %v15710_v3 = vld [vmem:[#allocation75_spill] sm:$0xff]  ;;  %v12535_v2 = vcombine.low %v12398_v44, %v12441_v15  ;;  %v15712_v33 = vld [vmem:[#allocation76_spill] sm:$0xff]  ;;  %v2758_v44 = vrot.slane %v12262_v21, 2  ;;  %v15717_v21 = vld [vmem:[#allocation77_spill] sm:$0xff] }
 0x290   :  { %15700 = vst [vmem:[#allocation124_spill] sm:$0xff] %v12507_v29  ;;  %15701 = vst [vmem:[#allocation125_spill] sm:$0xff] %v12509_v62  ;;  %v3140_v28 = vshll.u32 %v12507_v29, 16  ;;  %v12524_v14 = vor.u32 %v2755_v17, %v2754_v32  ;;  %v2404_v47 = vmax.f32 %v15710_v3, %v10530_v46  ;;  %v2211_v22 = vpop.f32.mrf.mxu0  ;;  %v3110_v32 = vshrl.u32 %v12485_v23, 16  ;;  %v10806_v6 = vld [vmem:[%s15258_s3 + $0x518] sm:$0xff]   ;;  %v10808_v48 = vld [vmem:[%s15258_s3 + $0x550] sm:$0xff]  }
 0x291   :  { %15711 = vst [vmem:[#allocation8_spill] sm:$0xff] %v12535_v2  ;;  %v3138_v17 = vshrl.u32 %v12507_v29, 16  ;;  %9978 = vmatpush3.bf16.msra.mxu0 %v10803_v45  ;;  %v2402_v19 = vmax.f32 %v15712_v33, %v2211_v22  ;;  %v2757_v46 = vrot.slane %v12259_v49, 1  ;;  %v15716_v22 = vld [vmem:[#allocation11_spill] sm:$0xff]  ;;  %v15749_v15 = vld [vmem:[#allocation24_spill] sm:$0xff] }
 0x292   :  { %15705 = vst [vmem:[#allocation34_spill] sm:$0xff] %v12524_v14  ;;  %v3142_v31 = vrot.slane %v3140_v28, 1  ;;  %v2452_v18 = vmax.f32 %v2356_v13, %v2404_v47  ;;  %9979 = vmatprep.subr.bf16.mxu0 %v10804_v34  ;;  %v10531_v3 = vpop.f32.mrf.mxu0  ;;  %v12548_v26 = vor.u32 %v3114_v30, %v3110_v32  ;;  %v2760_v28 = vrot.slane %v12231_v12, 1  ;;  %v15715_v13 = vld [vmem:[#allocation37_spill] sm:$0xff]  ;;  %v15771_v62 = vld [vmem:[#allocation84_spill] sm:$0xff] }
 0x293   :  { %v2761_v47 = vrot.slane %v12234_v43, 2  ;;  %v2355_v34 = vmax.f32 %v15716_v22, %v15715_v13  ;;  %v2450_v49 = vmax.f32 %v2354_v55, %v2402_v19  ;;  %v2405_v33 = vmax.f32 %v15717_v21, %v10531_v3  ;;  %v10809_v55 = vld [vmem:[%s15258_s3 + $0x510] sm:$0xff]   ;;  %v15723_v19 = vld [vmem:[#allocation13_spill] sm:$0xff] }
 0x294   :  { %15713 = vst [vmem:[#allocation35_spill] sm:$0xff] %v12548_v26  ;;  %v12550_v45 = vor.u32 %v3142_v31, %v3138_v17  ;;  %6343 = vmatmul.mubr.bf16.gmra.mxu0 %v12535_v2  ;;  %v12558_v36 = vor.u32 %v2758_v44, %v2757_v46  ;;  %v2360_v30 = vmax.f32 %v15720_v38, %v15719_v52  ;;  %v2214_v17 = vpop.f32.mrf.mxu0  ;;  %v15722_v31 = vld [vmem:[#allocation39_spill] sm:$0xff]  ;;  %v15724_v44 = vld [vmem:[#allocation40_spill] sm:$0xff]  ;;  %v15725_v3 = vld [vmem:[#allocation14_spill] sm:$0xff] }
 0x295   :  { %v2507_v32 = vadd.f32 %v12075_v24, %v2452_v18  ;;  %9980 = vmatpush3.bf16.msra.mxu0 %v10806_v6  ;;  %v12565_v43 = vor.u32 %v2761_v47, %v2760_v28  ;;  %v2358_v46 = vmax.f32 %v15723_v19, %v15722_v31  ;;  %v2361_v13 = vmax.f32 %v15725_v3, %v15724_v44  ;;  %v15726_v38 = vld [vmem:[#allocation78_spill] sm:$0xff]  ;;  %v15727_v28 = vld [vmem:[#allocation41_spill] sm:$0xff]  ;;  %v15728_v47 = vld [vmem:[#allocation15_spill] sm:$0xff] }
 0x296   :  { %15714 = vst [vmem:[#allocation9_spill] sm:$0xff] %v12550_v45  ;;  %15718 = vst [vmem:[#allocation36_spill] sm:$0xff] %v12558_v36  ;;  %v8759_v12 = vcombine.low %v12548_v26, %v12550_v45  ;;  %v2453_v52 = vmax.f32 %v2357_v11, %v2405_v33  ;;  %v2403_v18 = vmax.f32 %v15726_v38, %v2214_v17  ;;  %9981 = vmatprep.subr.bf16.mxu0 %v10808_v48  ;;  %v10810_v6 = vld [vmem:[%s15258_s3 + $0x548] sm:$0xff]   ;;  %v15730_v45 = vld [vmem:[#allocation16_spill] sm:$0xff]  ;;  %v10534_v11 = vpop.f32.mrf.mxu0 }
 0x297   :  { %15721 = vst [vmem:[#allocation10_spill] sm:$0xff] %v12565_v43  ;;  %v2359_v22 = vmax.f32 %v15728_v47, %v15727_v28  ;;  %v15729_v21 = vld [vmem:[#allocation42_spill] sm:$0xff]  ;;  %v15731_v2 = vld [vmem:[#allocation43_spill] sm:$0xff]  ;;  %v15733_v19 = vld [vmem:[#allocation44_spill] sm:$0xff]  ;;  %v12587_v48 = vadd.f32 %v12075_v24, %v2450_v49  ;;  %v12595_v31 = vmax.f32 %v2507_v32, 0.0 }
 0x298   :  { %v2364_v26 = vmax.f32 %v15730_v45, %v15729_v21  ;;  %6350 = vmatprep.mubr.bf16.mxu0 %v8759_v12  ;;  %v2508_v33 = vadd.f32 %v12075_v24, %v2453_v52  ;;  %v2451_v17 = vmax.f32 %v2355_v34, %v2403_v18  ;;  %v15735_v3 = vld [vmem:[#allocation79_spill] sm:$0xff]  ;;  %v15736_v28 = vld [vmem:[#allocation45_spill] sm:$0xff]  ;;  %v15738_v45 = vld [vmem:[#allocation46_spill] sm:$0xff]  ;;  %v8758_v12 = vcombine.low %v12485_v23, %v12507_v29  ;;  %v2227_v44 = vpop.f32.mrf.mxu0 }
 0x299   :  { %v2408_v38 = vmax.f32 %v15735_v3, %v10534_v11  ;;  %v15737_v47 = vld [vmem:[#allocation19_spill] sm:$0xff]  ;;  %v15739_v21 = vld [vmem:[#allocation20_spill] sm:$0xff]  ;;  %15740 = vst [vmem:[#allocation75_spill] sm:$0xff] %v12595_v31  ;;  %9982 = vmatpush3.bf16.msra.mxu0 %v10809_v55  ;;  %v10812_v49 = vld [vmem:[%s15258_s3 + $0x508] sm:$0xff]   ;;  %v15760_v57 = vmax.f32 %v12587_v48, 0.0 }
 0x29a   :  { %v2556_v34 = vmax.f32 %v2508_v33, 0.0  ;;  %v2506_v52 = vadd.f32 %v12075_v24, %v2451_v17  ;;  %v15741_v11 = vld [vmem:[#allocation80_spill] sm:$0xff]  ;;  %9983 = vmatprep.subr.bf16.mxu0 %v10810_v6  ;;  %v15745_v55 = vld [vmem:[#allocation22_spill] sm:$0xff]  ;;  %v15751_v23 = vld [vmem:[#allocation51_spill] sm:$0xff] }
 0x29b   :  { %v2456_v18 = vmax.f32 %v2360_v30, %v2408_v38  ;;  %v2406_v3 = vmax.f32 %v15741_v11, %v2227_v44  ;;  %v10814_v32 = vld [vmem:[%s15258_s3 + $0x540] sm:$0xff]   ;;  %v15748_v33 = vld [vmem:[#allocation50_spill] sm:$0xff]  ;;  %v10535_v30 = vpop.f32.mrf.mxu0  ;;  %v15769_v43 = vld [vmem:[#allocation83_spill] sm:$0xff] }
 0x29c   :  { %v12617_v6 = vpack.c.bf16 %v2556_v34, %v12595_v31  ;;  %v2554_v38 = vmax.f32 %v2506_v52, 0.0  ;;  %6351 = vmatmul.mubr.bf16.gmra.mxu0 %v8758_v12  ;;  %v15752_v29 = vld [vmem:[#allocation25_spill] sm:$0xff]  ;;  %v2409_v59 = vmax.f32 %v15755_v53, %v10535_v30  ;;  %v15757_v52 = vld [vmem:[#allocation27_spill] sm:$0xff] }
 0x29d   :  { %v2454_v11 = vmax.f32 %v2358_v46, %v2406_v3  ;;  %v2511_v10 = vadd.f32 %v12075_v24, %v2456_v18  ;;  %v2230_v17 = vpop.f32.mrf.mxu0  ;;  %9984 = vmatpush3.bf16.msra.mxu0 %v10812_v49  ;;  %v10815_v34 = vld [vmem:[%s15258_s3 + $0x500] sm:$0xff]   ;;  %v15758_v46 = vld [vmem:[#allocation54_spill] sm:$0xff]  ;;  %v12640_v53 = vld [vmem:[%s15258_s3 + $0x638] sm:$0xff]  }
 0x29e   :  { %15750 = vst [vmem:[#allocation76_spill] sm:$0xff] %v12617_v6  ;;  %v15756_v44 = vld [vmem:[#allocation53_spill] sm:$0xff]  ;;  %v15759_v3 = vld [vmem:[#allocation28_spill] sm:$0xff]  ;;  %v12634_v5 = vpack.c.bf16 %v2554_v38, %v15760_v57  ;;  %v2407_v18 = vmax.f32 %v15762_v27, %v2230_v17  ;;  %9985 = vmatprep.subr.bf16.mxu0 %v10814_v32  ;;  %v15763_v49 = vld [vmem:[#allocation55_spill] sm:$0xff]  ;;  %v2457_v40 = vmax.f32 %v2361_v13, %v2409_v59  ;;  %v15382_v25 = vshll.u32 %v12617_v6, 16 }
 0x29f   :  { %v15764_v30 = vld [vmem:[#allocation29_spill] sm:$0xff]  ;;  %v2509_v12 = vadd.f32 %v12075_v24, %v2454_v11  ;;  %v10538_v56 = vpop.f32.mrf.mxu0  ;;  %v15766_v57 = vld [vmem:[#allocation30_spill] sm:$0xff]  ;;  %v15768_v27 = vld [vmem:[#allocation31_spill] sm:$0xff]  ;;  %v12651_v61 = vmax.f32 %v2511_v10, 0.0 }
 0x2a0   :  { %15761 = vst [vmem:[#allocation37_spill] sm:$0xff] %v12634_v5  ;;  %v15767_v36 = vld [vmem:[#allocation57_spill] sm:$0xff]  ;;  %v2455_v17 = vmax.f32 %v2359_v22, %v2407_v18  ;;  %v2412_v16 = vmax.f32 %v15769_v43, %v10538_v56  ;;  %v2512_v58 = vadd.f32 %v12075_v24, %v2457_v40  ;;  %v15384_v11 = vshll.u32 %v12634_v5, 16 }
 0x2a1   :  { %15770 = vst [vmem:[#allocation11_spill] sm:$0xff] %v12651_v61  ;;  %v2243_v4 = vpop.f32.mrf.mxu0  ;;  %v2669_v59 = vrot.slane %v15382_v25, 1  ;;  %9986 = vmatpush3.bf16.msra.mxu0 %v10815_v34  ;;  %v15383_v22 = vshrl.u32 %v12617_v6, 16  ;;  %v12661_v56 = vmax.f32 %v2509_v12, 0.0  ;;  %v15385_v43 = vshrl.u32 %v12634_v5, 16 }
 0x2a2   :  { %v2510_v13 = vadd.f32 %v12075_v24, %v2455_v17  ;;  %v2460_v38 = vmax.f32 %v2364_v26, %v2412_v16  ;;  %v2410_v14 = vmax.f32 %v15771_v62, %v2243_v4  ;;  %10560 = vmatprep.subr.bf16.mxu0 %v12640_v53  ;;  %v2560_v10 = vmax.f32 %v2512_v58, 0.0  ;;  %v15774_v16 = vld [vmem:[#allocation85_spill] sm:$0xff] }
 0x2a3   :  { %15772 = vst [vmem:[#allocation77_spill] sm:$0xff] %v12661_v56  ;;  %v10539_v40 = vpop.f32.mrf.mxu0  ;;  %v2662_v18 = vrot.slane %v15384_v11, 1  ;;  %v15773_v26 = vmax.f32 %v15732_v9, %v15731_v2  ;;  %v12678_v32 = vor.u32 %v2669_v59, %v15383_v22  ;;  %v15776_v2 = vmax.f32 %v15734_v39, %v15733_v19 }
 0x2a4   :  { %v2558_v25 = vmax.f32 %v2510_v13, 0.0  ;;  %v2515_v34 = vadd.f32 %v12075_v24, %v2460_v38  ;;  %v2413_v62 = vmax.f32 %v15774_v16, %v10539_v40  ;;  %v12672_v17 = vpack.c.bf16 %v2560_v10, %v12651_v61 }
 0x2a5   :  { %v2458_v4 = vmax.f32 %v15773_v26, %v2410_v14  ;;  %v2246_v12 = vpop.f32.mrf.mxu0  ;;  %v2663_v58 = vor.u32 %v2662_v18, %v15385_v43  ;;  %15775 = vst [vmem:[#allocation38_spill] sm:$0xff] %v12678_v32  ;;  %v15777_v18 = vld [vmem:[#allocation86_spill] sm:$0xff]  ;;  %v15779_v43 = vld [vmem:[#allocation87_spill] sm:$0xff]  ;;  %v15781_v19 = vmax.f32 %v15737_v47, %v15736_v28 }
 0x2a6   :  { %v12683_v9 = vpack.c.bf16 %v2558_v25, %v12661_v56  ;;  %v2461_v10 = vmax.f32 %v15776_v2, %v2413_v62  ;;  %v15386_v40 = vshll.u32 %v12672_v17, 16  ;;  %v2411_v26 = vmax.f32 %v15777_v18, %v2246_v12 }
 0x2a7   :  { %v2513_v14 = vadd.f32 %v12075_v24, %v2458_v4  ;;  %v10542_v16 = vpop.f32.mrf.mxu0  ;;  %v8768_v59 = vcombine.low %v2663_v58, %v12678_v32  ;;  %v12693_v11 = vmax.f32 %v2515_v34, 0.0  ;;  %v15780_v4 = vmax.f32 %v12587_v48, 0.0 }
 0x2a8   :  { %v2516_v25 = vadd.f32 %v12075_v24, %v2461_v10  ;;  %v2416_v13 = vmax.f32 %v15779_v43, %v10542_v16  ;;  %v2459_v62 = vmax.f32 %v15781_v19, %v2411_v26  ;;  %v15388_v58 = vshll.u32 %v12683_v9, 16  ;;  %v15784_v16 = vld [vmem:[#allocation88_spill] sm:$0xff] }
 0x2a9   :  { %15778 = vst [vmem:[#allocation12_spill] sm:$0xff] %v12693_v11  ;;  %v9191_v39 = vpack.c.bf16 %v12595_v31, %v15780_v4  ;;  %5582 = vmatprep.mubr.bf16.mxu1 %v8768_v59  ;;  %v2259_v12 = vpop.f32.mrf.mxu0  ;;  %v15387_v2 = vshrl.u32 %v12672_v17, 16  ;;  %v2683_v34 = vrot.slane %v15386_v40, 1  ;;  %v12707_v10 = vmax.f32 %v2513_v14, 0.0  ;;  %v15867_v31 = vld [vmem:[#allocation109_spill] sm:$0xff] }
 0x2aa   :  { %v2564_v43 = vmax.f32 %v2516_v25, 0.0  ;;  %v15783_v48 = vmax.f32 %v15739_v21, %v15738_v45  ;;  %v2414_v4 = vmax.f32 %v15784_v16, %v2259_v12  ;;  %v2514_v28 = vadd.f32 %v12075_v24, %v2459_v62 }
 0x2ab   :  { %15782 = vst [vmem:[#allocation39_spill] sm:$0xff] %v12707_v10  ;;  %5583 = vmatmul.mubr.bf16.gmra.mxu1 %v9191_v39  ;;  %v10543_v47 = vpop.f32.mrf.mxu0  ;;  %v15389_v26 = vshrl.u32 %v12683_v9, 16  ;;  %v2676_v59 = vrot.slane %v15388_v58, 1  ;;  %v12719_v14 = vor.u32 %v2683_v34, %v15387_v2  ;;  %v15785_v45 = vmax.f32 %v15743_v51, %v15742_v0 }
 0x2ac   :  { %v2464_v18 = vmax.f32 %v15783_v48, %v2416_v13  ;;  %v12722_v25 = vpack.c.bf16 %v2564_v43, %v12693_v11  ;;  %v15786_v13 = vld [vmem:[#allocation89_spill] sm:$0xff]  ;;  %v2562_v62 = vmax.f32 %v2514_v28, 0.0  ;;  %v12736_v34 = vpack.c.bf16 %v12651_v61, %v12661_v56 }
 0x2ad   :  { %v2462_v21 = vmax.f32 %v15785_v45, %v2414_v4  ;;  %v2417_v39 = vmax.f32 %v15786_v13, %v10543_v47  ;;  %v2262_v48 = vpop.f32.mrf.mxu0  ;;  %v12732_v16 = vor.u32 %v2676_v59, %v15389_v26  ;;  %v12743_v51 = vpack.c.bf16 %v12693_v11, %v12707_v10  ;;  %v15791_v59 = vld [vmem:[#allocation90_spill] sm:$0xff]  ;;  %v15793_v26 = vld [vmem:[#allocation91_spill] sm:$0xff] }
 0x2ae   :  { %v2519_v12 = vadd.f32 %v12075_v24, %v2464_v18  ;;  %15788 = vst [vmem:[#allocation40_spill] sm:$0xff] %v12736_v34  ;;  %v12739_v43 = vshll.u32 %v12722_v25, 16  ;;  %v3189_v0 = vshll.u32 %v12719_v14, 16  ;;  %v2965_v18 = vshll.u32 %v12295_v7, 16 }
 0x2af   :  { %15787 = vst [vmem:[#allocation13_spill] sm:$0xff] %v12732_v16  ;;  %15789 = vst [vmem:[#allocation14_spill] sm:$0xff] %v12743_v51  ;;  %v12748_v4 = vpack.c.bf16 %v2562_v62, %v12707_v10  ;;  %v15790_v28 = vmax.f32 %v15745_v55, %v15744_v8  ;;  %v2415_v45 = vmax.f32 %v15791_v59, %v2262_v48  ;;  %v10546_v13 = vpop.f32.mrf.mxu0  ;;  %v12759_v2 = vshrl.u32 %v12722_v25, 16  ;;  %v15852_v10 = vld [vmem:[#allocation70_spill] sm:$0xff] }
 0x2b0   :  { %v12756_v40 = vcombine.low %v12732_v16, %v12719_v14  ;;  %v2517_v58 = vadd.f32 %v12075_v24, %v2462_v21  ;;  %v2420_v22 = vmax.f32 %v15793_v26, %v10546_v13  ;;  %v2697_v62 = vrot.slane %v12739_v43, 1 }
 0x2b1   :  { %v2465_v47 = vmax.f32 %v15790_v28, %v2417_v39  ;;  %v12765_v38 = vshll.u32 %v12748_v4, 16  ;;  %v12767_v8 = vmax.f32 %v2519_v12, 0.0  ;;  %v15795_v39 = vmax.f32 %v15747_v54, %v15746_v63  ;;  %v2275_v28 = vpop.f32.mrf.mxu0 }
 0x2b2   :  { %15792 = vst [vmem:[#allocation78_spill] sm:$0xff] %v12756_v40  ;;  %5590 = vmatprep.mubr.bf16.mxu1 %v12756_v40  ;;  %v12775_v21 = vshrl.u32 %v12748_v4, 16  ;;  %v15796_v26 = vmax.f32 %v15749_v15, %v15748_v33  ;;  %v2418_v13 = vmax.f32 %v12050_v50, %v2275_v28  ;;  %v3191_v12 = vrot.slane %v3189_v0, 1 }
 0x2b3   :  { %15794 = vst [vmem:[#allocation41_spill] sm:$0xff] %v12767_v8  ;;  %v2520_v55 = vadd.f32 %v12075_v24, %v2465_v47  ;;  %v2463_v48 = vmax.f32 %v15795_v39, %v2415_v45  ;;  %5591 = vmatmul.mubr.bf16.gmra.mxu1 %v12736_v34  ;;  %v10547_v54 = vpop.f32.mrf.mxu0  ;;  %v2690_v63 = vrot.slane %v12765_v38, 1  ;;  %v12785_v45 = vor.u32 %v2697_v62, %v12759_v2 }
 0x2b4   :  { %v2468_v59 = vmax.f32 %v15796_v26, %v2420_v22  ;;  %v12787_v39 = vmax.f32 %v2517_v58, 0.0  ;;  %v15798_v15 = vmax.f32 %v15752_v29, %v15751_v23  ;;  %v15799_v22 = vld [vmem:[#allocation92_spill] sm:$0xff]  ;;  %v3187_v28 = vshrl.u32 %v12719_v14, 16  ;;  %v15801_v26 = vld [vmem:[#allocation93_spill] sm:$0xff] }
 0x2b5   :  { %v2568_v47 = vmax.f32 %v2520_v55, 0.0  ;;  %v2518_v19 = vadd.f32 %v12075_v24, %v2463_v48  ;;  %v2421_v50 = vmax.f32 %v15799_v22, %v10547_v54  ;;  %v12800_v55 = vld [vmem:[%s15257_s2] ss:$0 sm:$0xff]  ;;  %v2278_v62 = vpop.f32.mrf.mxu0  ;;  %v2691_v48 = vor.u32 %v2690_v63, %v12775_v21 }
 0x2b6   :  { %15797 = vst [vmem:[#allocation15_spill] sm:$0xff] %v12787_v39  ;;  %v2466_v33 = vmax.f32 %v15798_v15, %v2418_v13  ;;  %v2523_v58 = vadd.f32 %v12800_v55, %v2468_v59  ;;  %v15800_v23 = vmax.f32 %v15754_v41, %v15753_v37  ;;  %v2419_v13 = vmax.f32 %v15801_v26, %v2278_v62 }
 0x2b7   :  { %v12795_v0 = vpack.c.bf16 %v2568_v47, %v12767_v8  ;;  %v2566_v24 = vmax.f32 %v2518_v19, 0.0  ;;  %v3192_v54 = vor.u32 %v3191_v12, %v3187_v28  ;;  %v12808_v47 = vrot.slane %v2965_v18, 1  ;;  %v10550_v22 = vpop.f32.mrf.mxu0 }
 0x2b8   :  { %v2469_v29 = vmax.f32 %v15800_v23, %v2421_v50  ;;  %v12817_v59 = vcombine.low %v2691_v48, %v12785_v45  ;;  %v3245_v63 = vshll.u32 %v12785_v45, 16  ;;  %v2521_v37 = vadd.f32 %v12800_v55, %v2466_v33  ;;  %v15804_v50 = vld [vmem:[#allocation94_spill] sm:$0xff] }
 0x2b9   :  { %v12811_v19 = vshll.u32 %v12795_v0, 16  ;;  %v12814_v15 = vpack.c.bf16 %v2566_v24, %v12787_v39  ;;  %v15803_v18 = vmax.f32 %v15757_v52, %v15756_v44  ;;  %v2424_v28 = vmax.f32 %v15804_v50, %v10550_v22  ;;  %v2291_v26 = vpop.f32.mrf.mxu0 }
 0x2ba   :  { %15802 = vst [vmem:[#allocation42_spill] sm:$0xff] %v12817_v59  ;;  %v2524_v41 = vadd.f32 %v12800_v55, %v2469_v29  ;;  %v12832_v23 = vmax.f32 %v2523_v58, 0.0  ;;  %5598 = vmatprep.mubr.bf16.mxu1 %v12817_v59  ;;  %v3217_v33 = vshll.u32 %v2691_v48, 16  ;;  %v15806_v44 = vmax.f32 %v15759_v3, %v15758_v46 }
 0x2bb   :  { %v2467_v12 = vmax.f32 %v15803_v18, %v2419_v13  ;;  %v12827_v62 = vshrl.u32 %v12814_v15, 16  ;;  %v12830_v24 = vshll.u32 %v12814_v15, 16  ;;  %v15807_v13 = vld [vmem:[#allocation95_spill] sm:$0xff]  ;;  %5599 = vmatmul.mubr.bf16.gmra.mxu1 %v12743_v51  ;;  %v10551_v18 = vpop.f32.mrf.mxu0  ;;  %v3215_v50 = vshrl.u32 %v2691_v48, 16 }
 0x2bc   :  { %15805 = vst [vmem:[#allocation16_spill] sm:$0xff] %v12832_v23  ;;  %v2572_v34 = vmax.f32 %v2524_v41, 0.0  ;;  %v2472_v52 = vmax.f32 %v15806_v44, %v2424_v28  ;;  %v2422_v22 = vmax.f32 %v15807_v13, %v2291_v26  ;;  %v3219_v40 = vrot.slane %v3217_v33, 1  ;;  %v15811_v26 = vld [vmem:[#allocation96_spill] sm:$0xff] }
 0x2bd   :  { %v2522_v29 = vadd.f32 %v12800_v55, %v2467_v12  ;;  %v2704_v58 = vrot.slane %v12830_v24, 1  ;;  %v2711_v32 = vrot.slane %v12811_v19, 1  ;;  %v12844_v16 = vshrl.u32 %v12795_v0, 16  ;;  %v2294_v33 = vpop.f32.mrf.mxu0 }
 0x2be   :  { %v12846_v41 = vmax.f32 %v2521_v37, 0.0  ;;  %v12849_v12 = vpack.c.bf16 %v2572_v34, %v12832_v23  ;;  %v15810_v3 = vmax.f32 %v15764_v30, %v15763_v49  ;;  %v2425_v44 = vmax.f32 %v15811_v26, %v10551_v18 }
 0x2bf   :  { %v2570_v46 = vmax.f32 %v2522_v29, 0.0  ;;  %v12855_v13 = vor.u32 %v3219_v40, %v3215_v50  ;;  %v2705_v51 = vor.u32 %v2704_v58, %v12827_v62  ;;  %v12862_v37 = vor.u32 %v2711_v32, %v12844_v16  ;;  %v10554_v58 = vpop.f32.mrf.mxu0 }
 0x2c0   :  { %15808 = vst [vmem:[#allocation43_spill] sm:$0xff] %v12846_v41  ;;  %15809 = vst [vmem:[#allocation17_spill] sm:$0xff] %v12849_v12  ;;  %v2470_v28 = vmax.f32 %v15810_v3, %v2422_v22  ;;  %v12866_v34 = vpack.c.bf16 %v12767_v8, %v12787_v39  ;;  %v3243_v49 = vshrl.u32 %v12785_v45, 16  ;;  %v2527_v30 = vadd.f32 %v12800_v55, %v2472_v52  ;;  %v15816_v22 = vld [vmem:[#allocation97_spill] sm:$0xff]  ;;  %v15851_v8 = vld [vmem:[#allocation72_spill] sm:$0xff] }
 0x2c1   :  { %15812 = vst [vmem:[#allocation44_spill] sm:$0xff] %v12855_v13  ;;  %v12859_v11 = vpack.c.bf16 %v2570_v46, %v12846_v41  ;;  %v15815_v40 = vmax.f32 %v15766_v57, %v15765_v1  ;;  %v2423_v18 = vmax.f32 %v15816_v22, %v2294_v33  ;;  %v8784_v50 = vcombine.low %v3192_v54, %v12855_v13  ;;  %v2307_v33 = vpop.f32.mrf.mxu0 }
 0x2c2   :  { %15814 = vst [vmem:[#allocation79_spill] sm:$0xff] %v12866_v34  ;;  %v12876_v32 = vshll.u32 %v12849_v12, 16  ;;  %v12882_v3 = vcombine.low %v12719_v14, %v2691_v48  ;;  %v12885_v52 = vcombine.low %v2705_v51, %v12862_v37  ;;  %v12888_v1 = vadd.f32 %v12800_v55, %v2470_v28 }
 0x2c3   :  { %15813 = vst [vmem:[#allocation18_spill] sm:$0xff] %v12859_v11  ;;  %v2473_v29 = vmax.f32 %v15815_v40, %v2425_v44  ;;  %v12879_v46 = vshll.u32 %v12859_v11, 16  ;;  %v15820_v54 = vmax.f32 %v15768_v27, %v15767_v36  ;;  %6358 = vmatprep.mubr.bf16.mxu0 %v8784_v50  ;;  %v3247_v44 = vrot.slane %v3245_v63, 1  ;;  %v10555_v63 = vpop.f32.mrf.mxu0 }
 0x2c4   :  { %15817 = vst [vmem:[#allocation45_spill] sm:$0xff] %v12882_v3  ;;  %15818 = vst [vmem:[#allocation19_spill] sm:$0xff] %v12885_v52  ;;  %v12895_v40 = vshrl.u32 %v12849_v12, 16  ;;  %v12898_v14 = vshrl.u32 %v12859_v11, 16  ;;  %6359 = vmatmul.mubr.bf16.gmra.mxu0 %v12882_v3  ;;  %5606 = vmatprep.mubr.bf16.mxu1 %v12885_v52  ;;  %v3273_v48 = vshll.u32 %v2705_v51, 16  ;;  %v3301_v27 = vshll.u32 %v12862_v37, 16 }
 0x2c5   :  { %15819 = vst [vmem:[#allocation46_spill] sm:$0xff] %v12888_v1  ;;  %v2528_v57 = vadd.f32 %v12800_v55, %v2473_v29  ;;  %v2471_v26 = vmax.f32 %v15820_v54, %v2423_v18  ;;  %v2821_v28 = vrot.slane %v12879_v46, 1  ;;  %v2575_v29 = vmax.f32 %v2527_v30, 0.0  ;;  %5607 = vmatmul.mubr.bf16.gmra.mxu1 %v12866_v34  ;;  %v15866_v11 = vld [vmem:[#allocation101_spill] sm:$0xff] }
 0x2c6   :  { %5647 = vmatprep.mubr.bf16.mxu1 %v12451_v20  ;;  %v3271_v18 = vshrl.u32 %v2705_v51, 16  ;;  %v3275_v50 = vrot.slane %v3273_v48, 1  ;;  %v2847_v54 = vrot.slane %v12876_v32, 1  ;;  %v15399_v33 = vmax.f32 %v12888_v1, 0.0 }
 0x2c7   :  { %v2576_v22 = vmax.f32 %v2528_v57, 0.0  ;;  %v2526_v36 = vadd.f32 %v12800_v55, %v2471_v26  ;;  %v12908_v58 = vor.u32 %v2821_v28, %v12898_v14  ;;  %v12914_v55 = vor.u32 %v3247_v44, %v3243_v49  ;;  %v2309_v26 = vpop.f32.mrf.mxu0 }
 0x2c8   :  { %v12916_v13 = vor.u32 %v3275_v50, %v3271_v18  ;;  %v3299_v63 = vshrl.u32 %v12862_v37, 16  ;;  %v3303_v20 = vrot.slane %v3301_v27, 1  ;;  %v2991_v49 = vshrl.u32 %v12272_v35, 16  ;;  %v10801_v27 = vld [vmem:[%s15258_s3 + $0x138] sm:$0xff]  }
 0x2c9   :  { %v12912_v30 = vpack.c.bf16 %v2576_v22, %v2575_v29  ;;  %v2574_v57 = vmax.f32 %v2526_v36, 0.0  ;;  %15822 = vst [vmem:[#allocation80_spill] sm:$0xff] %v12914_v55  ;;  %v3329_v48 = vshll.u32 %v12908_v58, 16  ;;  %v3327_v23 = vshrl.u32 %v12908_v58, 16  ;;  %v10558_v44 = vpop.f32.mrf.mxu0 }
 0x2ca   :  { %15823 = vst [vmem:[#allocation47_spill] sm:$0xff] %v12916_v13  ;;  %v15825_v29 = vshrl.u32 %v12295_v7, 16  ;;  %v8801_v36 = vcombine.low %v12914_v55, %v12916_v13  ;;  %v12937_v50 = vor.u32 %v2847_v54, %v12895_v40  ;;  %v12945_v26 = vcombine.low %v12785_v45, %v2705_v51  ;;  %v15830_v13 = vld [vmem:[#allocation34_spill] sm:$0xff] }
 0x2cb   :  { %15821 = vst [vmem:[#allocation20_spill] sm:$0xff] %v12912_v30  ;;  %v12922_v28 = vpack.c.bf16 %v2574_v57, %v15399_v33  ;;  %v3331_v18 = vrot.slane %v3329_v48, 1  ;;  %v15826_v57 = vshll.u32 %v12272_v35, 16  ;;  %v15829_v44 = vrot.slane %v12133_v60, 1  ;;  %v10805_v48 = vld [vmem:[%s15258_s3 + $0x170] sm:$0xff]   ;;  %v2319_v54 = vpop.f32.mrf.mxu0  ;;  %v15831_v35 = vld [vmem:[#allocation125_spill] sm:$0xff] }
 0x2cc   :  { %v12928_v22 = vor.u32 %v12808_v47, %v15825_v29  ;;  %15827 = vst [vmem:[#allocation48_spill] sm:$0xff] %v12945_v26  ;;  %v15828_v29 = vrot.slane %v12121_v42, 1  ;;  %6366 = vmatprep.mubr.bf16.mxu0 %v8801_v36  ;;  %v12958_v55 = vor.u32 %v3303_v20, %v3299_v63  ;;  %v3357_v36 = vshll.u32 %v12937_v50, 16  ;;  %v15835_v63 = vld [vmem:[#allocation59_spill] sm:$0xff]  ;;  %v15837_v54 = vld [vmem:[#allocation32_spill] sm:$0xff] }
 0x2cd   :  { %15824 = vst [vmem:[#allocation21_spill] sm:$0xff] %v12922_v28  ;;  %v2995_v7 = vrot.slane %v15826_v57, 1  ;;  %v12942_v47 = vshll.u32 %v12922_v28, 16  ;;  %v12956_v57 = vcombine.low %v15831_v35, %v15830_v13  ;;  %v12960_v1 = vor.u32 %v3331_v18, %v3327_v23  ;;  %6367 = vmatmul.mubr.bf16.gmra.mxu0 %v12945_v26  ;;  %v15843_v13 = vld [vmem:[#allocation10_spill] sm:$0xff]  ;;  %v15846_v26 = vld [vmem:[#allocation71_spill] sm:$0xff] }
 0x2ce   :  { %v8693_v33 = vcombine.low %v15829_v44, %v15828_v29  ;;  %15833 = vst [vmem:[#allocation49_spill] sm:$0xff] %v12958_v55  ;;  %v12965_v45 = vshrl.u32 %v12922_v28, 16  ;;  %v10559_v44 = vpop.f32.mrf.mxu0  ;;  %v3359_v20 = vrot.slane %v3357_v36, 1  ;;  %v2764_v3 = vrot.slane %v15846_v26, 2 }
 0x2cf   :  { %15832 = vst [vmem:[#allocation22_spill] sm:$0xff] %v12956_v57  ;;  %15834 = vst [vmem:[#allocation23_spill] sm:$0xff] %v12960_v1  ;;  %v12962_v51 = vor.u32 %v2995_v7, %v2991_v49  ;;  %v2873_v29 = vrot.slane %v12942_v47, 1  ;;  %v8818_v23 = vcombine.low %v12958_v55, %v12960_v1  ;;  %v10807_v49 = vld [vmem:[%s15258_s3 + $0x130] sm:$0xff]   ;;  %v12986_v44 = vrot.slane %v15837_v54, 1 }
 0x2d0   :  { %5648 = vmatmul.mubr.bf16.vlgmr.msra.gmra.mxu1 %v8693_v33  ;;  %v2321_v7 = vpop.f32.mrf.mxu0  ;;  %v12991_v55 = vcombine.low %v12862_v37, %v12908_v58  ;;  %v10816_v37 = vld [vmem:[%s15258_s3 + $0x160] sm:$0xff]   ;;  %v2891_v39 = vrot.slane %v15851_v8, 7  ;;  %v2767_v61 = vrot.slane %v15852_v10, 2 }
 0x2d1   :  { %9460 = vmatpush3.bf16.msra.mxu1 %v10801_v27  ;;  %5655 = vmatprep.mubr.bf16.mxu1 %v12956_v57  ;;  %v12980_v33 = vor.u32 %v2873_v29, %v12965_v45  ;;  %v10811_v27 = vld [vmem:[%s15258_s3 + $0x168] sm:$0xff]   ;;  %15838 = vst [vmem:[#allocation24_spill] sm:$0xff] %v12986_v44  ;;  %v3355_v7 = vshrl.u32 %v12937_v50, 16 }
 0x2d2   :  { %9461 = vmatprep.subr.bf16.mxu1 %v10805_v48  ;;  %6374 = vmatprep.mubr.bf16.mxu0 %v8818_v23  ;;  %15839 = vst [vmem:[#allocation51_spill] sm:$0xff] %v12991_v55  ;;  %v15840_v48 = vrot.slane %v15835_v63, 1  ;;  %v10813_v23 = vld [vmem:[%s15258_s3 + $0x128] sm:$0xff]   ;;  %v2782_v63 = vrot.slane %v12765_v38, 2 }
 0x2d3   :  { %15836 = vst [vmem:[#allocation50_spill] sm:$0xff] %v12980_v33  ;;  %v3385_v1 = vshll.u32 %v12980_v33, 16  ;;  %v3383_v36 = vshrl.u32 %v12980_v33, 16  ;;  %v15842_v57 = vld [vmem:[#allocation73_spill] sm:$0xff] }
 0x2d4   :  { %v12996_v29 = vcombine.low %v15840_v48, %v12986_v44  ;;  %v2889_v34 = vrot.slane %v15842_v57, 7  ;;  %v15844_v48 = vld [vmem:[#allocation36_spill] sm:$0xff] }
 0x2d5   :  { %9462 = vmatpush3.bf16.msra.mxu1 %v10807_v49  ;;  %v3387_v18 = vrot.slane %v3385_v1, 1  ;;  %v13009_v35 = vcombine.low %v15844_v48, %v15843_v13  ;;  %v2763_v49 = vrot.slane %v15842_v57, 1  ;;  %6375 = vmatmul.mubr.bf16.gmra.mxu0 %v12991_v55  ;;  %v13015_v1 = vor.u32 %v3359_v20, %v3355_v7  ;;  %v15849_v44 = vld [vmem:[#allocation100_spill] sm:$0xff]  ;;  %v15876_v48 = vld [vmem:[#allocation114_spill] sm:$0xff] }
 0x2d6   :  { %15841 = vst [vmem:[#allocation25_spill] sm:$0xff] %v12996_v29  ;;  %9463 = vmatprep.subr.bf16.mxu1 %v10811_v27  ;;  %v13020_v41 = vrot.slane %v15849_v44, 1  ;;  %v2766_v57 = vrot.slane %v15851_v8, 1  ;;  %v2892_v55 = vor.u32 %v2891_v39, %v15852_v10  ;;  %v15861_v10 = vshll.u32 %v12617_v6, 16  ;;  %v15875_v13 = vld [vmem:[#allocation120_spill] sm:$0xff] }
 0x2d7   :  { %15845 = vst [vmem:[#allocation52_spill] sm:$0xff] %v13009_v35  ;;  %15847 = vst [vmem:[#allocation26_spill] sm:$0xff] %v13015_v1  ;;  %v13017_v27 = vor.u32 %v3387_v18, %v3383_v36  ;;  %v15853_v18 = vld [vmem:[#allocation62_spill] sm:$0xff]  ;;  %v2890_v36 = vor.u32 %v2889_v34, %v15846_v26  ;;  %v13038_v8 = vor.u32 %v2764_v3, %v2763_v49  ;;  %v15858_v34 = vshrl.u32 %v12634_v5, 16 }
 0x2d8   :  { %5656 = vmatmul.mubr.bf16.gmra.mxu1 %v12996_v29  ;;  %15850 = vst [vmem:[#allocation53_spill] sm:$0xff] %v13020_v41  ;;  %v10817_v29 = vld [vmem:[%s15258_s3 + $0x120] sm:$0xff]   ;;  %v13032_v7 = vrot.slane %v15853_v18, 1  ;;  %v8834_v49 = vcombine.low %v12937_v50, %v12980_v33  ;;  %v2737_v18 = vrot.slane %v12634_v5, 1  ;;  %v2906_v33 = vrot.slane %v12775_v21, 7 }
 0x2d9   :  { %15848 = vst [vmem:[#allocation81_spill] sm:$0xff] %v13017_v27  ;;  %5663 = vmatprep.mubr.bf16.mxu1 %v13009_v35  ;;  %9464 = vmatpush3.bf16.msra.mxu1 %v10813_v23  ;;  %v8835_v20 = vcombine.low %v13015_v1, %v13017_v27  ;;  %v10818_v23 = vld [vmem:[%s15258_s3 + $0x158] sm:$0xff]   ;;  %v13045_v27 = vor.u32 %v2767_v61, %v2766_v57  ;;  %v15856_v1 = vld [vmem:[#allocation33_spill] sm:$0xff]  ;;  %v2769_v26 = vrot.slane %v15858_v34, 1  ;;  %v2773_v61 = vrot.slane %v15861_v10, 2  ;;  %v10820_v34 = vld [vmem:[%s15258_s3 + $0x150] sm:$0xff]  }
 0x2da   :  { %15854 = vst [vmem:[#allocation27_spill] sm:$0xff] %v13032_v7  ;;  %9465 = vmatprep.subr.bf16.mxu1 %v10816_v37  ;;  %v13042_v35 = vcombine.low %v13020_v41, %v13032_v7  ;;  %v13048_v28 = vrot.slane %v15856_v1, 1  ;;  %v15859_v37 = vshll.u32 %v12634_v5, 16  ;;  %v3021_v39 = vshll.u32 %v2890_v36, 16 }
 0x2db   :  { %6382 = vmatprep.mubr.bf16.mxu0 %v8835_v20  ;;  %v15860_v20 = vshrl.u32 %v12617_v6, 16  ;;  %v13065_v57 = vcombine.low %v13038_v8, %v13045_v27  ;;  %v3049_v10 = vshll.u32 %v2892_v55, 16  ;;  %v2893_v1 = vrot.slane %v15867_v31, 7 }
 0x2dc   :  { %15855 = vst [vmem:[#allocation54_spill] sm:$0xff] %v13042_v35  ;;  %15857 = vst [vmem:[#allocation28_spill] sm:$0xff] %v13048_v28  ;;  %v2770_v3 = vrot.slane %v15859_v37, 2  ;;  %v15863_v37 = vld [vmem:[#allocation68_spill] sm:$0xff] }
 0x2dd   :  { %9466 = vmatpush3.bf16.msra.mxu1 %v10817_v29  ;;  %v2772_v7 = vrot.slane %v15860_v20, 1  ;;  %v10819_v29 = vld [vmem:[%s15258_s3 + $0x118] sm:$0xff]   ;;  %15862 = vst [vmem:[#allocation82_spill] sm:$0xff] %v13065_v57  ;;  %6383 = vmatmul.mubr.bf16.gmra.mxu0 %v8834_v49  ;;  %v13072_v20 = vrot.slane %v15863_v37, 1  ;;  %v3023_v37 = vrot.slane %v3021_v39, 1  ;;  %v3051_v39 = vrot.slane %v3049_v10, 1 }
 0x2de   :  { %9467 = vmatprep.subr.bf16.mxu1 %v10818_v23  ;;  %v15865_v23 = vld [vmem:[#allocation112_spill] sm:$0xff]  ;;  %6520 = vmatprep.mubr.bf16.mxu0 %v15866_v11  ;;  %v2771_v56 = vor.u32 %v2770_v3, %v2769_v26  ;;  %v15870_v26 = vshrl.u32 %v12683_v9, 16  ;;  %v15874_v11 = vshll.u32 %v12672_v17, 16  ;;  %v15879_v10 = vrot.slane %v12617_v6, 1 }
 0x2df   :  { %15864 = vst [vmem:[#allocation55_spill] sm:$0xff] %v13072_v20  ;;  %v13075_v41 = vshrl.u32 %v15865_v23, 16  ;;  %v13078_v12 = vshll.u32 %v15865_v23, 16  ;;  %v13085_v49 = vcombine.low %v13048_v28, %v13072_v20  ;;  %v10821_v23 = vld [vmem:[%s15258_s3 + $0x110] sm:$0xff]   ;;  %v15872_v20 = vld [vmem:[#allocation117_spill] sm:$0xff] }
 0x2e0   :  { %5664 = vmatmul.mubr.bf16.gmra.mxu1 %v13042_v35  ;;  %v13087_v35 = vor.u32 %v2773_v61, %v2772_v7  ;;  %v2775_v3 = vrot.slane %v15870_v26, 1  ;;  %v2895_v28 = vrot.slane %v15872_v20, 7  ;;  %v10822_v7 = vld [vmem:[%s15258_s3 + $0x148] sm:$0xff]   ;;  %v3019_v61 = vshrl.u32 %v2890_v36, 16  ;;  %v15878_v20 = vld [vmem:[#allocation108_spill] sm:$0xff] }
 0x2e1   :  { %5671 = vmatprep.mubr.bf16.mxu1 %v13065_v57  ;;  %15868 = vst [vmem:[#allocation29_spill] sm:$0xff] %v13085_v49  ;;  %9468 = vmatpush3.bf16.msra.mxu1 %v10819_v29  ;;  %v15871_v57 = vshll.u32 %v12683_v9, 16  ;;  %v15873_v29 = vshrl.u32 %v12672_v17, 16  ;;  %v2779_v31 = vrot.slane %v15874_v11, 2  ;;  %v3047_v36 = vshrl.u32 %v2892_v55, 16  ;;  %v10823_v11 = vld [vmem:[%s15258_s3 + $0x108] sm:$0xff]  }
 0x2e2   :  { %15869 = vst [vmem:[#allocation56_spill] sm:$0xff] %v13087_v35  ;;  %9469 = vmatprep.subr.bf16.mxu1 %v10820_v34  ;;  %v8770_v26 = vcombine.low %v2771_v56, %v13087_v35  ;;  %v13112_v34 = vor.u32 %v2893_v1, %v15878_v20  ;;  %v3024_v52 = vor.u32 %v3023_v37, %v3019_v61  ;;  %v2908_v56 = vrot.slane %v12759_v2, 7  ;;  %v10827_v37 = vld [vmem:[%s15258_s3 + $0x630] sm:$0xff]   ;;  %v15885_v1 = vld [vmem:[#allocation121_spill] sm:$0xff] }
 0x2e3   :  { %v2776_v44 = vrot.slane %v15871_v57, 2  ;;  %v2778_v5 = vrot.slane %v15873_v29, 1  ;;  %v13109_v57 = vcombine.low %v15876_v48, %v15875_v13  ;;  %v8769_v54 = vcombine.low %v2737_v18, %v15879_v10  ;;  %v15881_v13 = vld [vmem:[#allocation107_spill] sm:$0xff]  ;;  %v10825_v18 = vld [vmem:[%s15258_s3 + $0x140] sm:$0xff]  }
 0x2e4   :  { %v13124_v48 = vor.u32 %v2895_v28, %v15881_v13  ;;  %v2907_v55 = vor.u32 %v2906_v33, %v12765_v38  ;;  %v3052_v28 = vor.u32 %v3051_v39, %v3047_v36  ;;  %v2910_v33 = vrot.slane %v12827_v62, 7 }
 0x2e5   :  { %15877 = vst [vmem:[#allocation30_spill] sm:$0xff] %v13109_v57  ;;  %9470 = vmatpush3.bf16.msra.mxu1 %v10821_v23  ;;  %v13121_v29 = vor.u32 %v2776_v44, %v2775_v3  ;;  %v15882_v44 = vcombine.low %v12928_v22, %v12962_v51  ;;  %v13138_v23 = vor.u32 %v2779_v31, %v2778_v5  ;;  %v3077_v61 = vshll.u32 %v13112_v34, 16  ;;  %v10826_v5 = vld [vmem:[%s15258_s3 + $0x100] sm:$0xff]  }
 0x2e6   :  { %9471 = vmatprep.subr.bf16.mxu1 %v10822_v7  ;;  %v2909_v3 = vor.u32 %v2908_v56, %v12739_v43  ;;  %v15884_v7 = vld [vmem:[#allocation110_spill] sm:$0xff]  ;;  %v2781_v10 = vrot.slane %v12775_v21, 1  ;;  %v2897_v35 = vrot.slane %v15885_v1, 7  ;;  %v3210_v22 = vshll.u32 %v2907_v55, 16 }
 0x2e7   :  { %15880 = vst [vmem:[#allocation57_spill] sm:$0xff] %v13121_v29  ;;  %6521 = vmatmul.mubr.bf16.vlgmr.msra.gmra.mxu0 %v15882_v44  ;;  %15883 = vst [vmem:[#allocation31_spill] sm:$0xff] %v13138_v23  ;;  %v8728_v51 = vcombine.low %v3024_v52, %v3052_v28  ;;  %v2911_v31 = vor.u32 %v2910_v33, %v12830_v24  ;;  %v2912_v39 = vrot.slane %v12844_v16, 7  ;;  %v2902_v21 = vrot.slane %v13075_v41, 7  ;;  %v10829_v52 = vld [vmem:[%s15258_s3 + $0x1f8] sm:$0xff]  }
 0x2e8   :  { %5672 = vmatmul.mubr.bf16.gmra.mxu1 %v13085_v49  ;;  %6528 = vmatprep.mubr.bf16.mxu0 %v15884_v7  ;;  %v3238_v44 = vshll.u32 %v2909_v3, 16  ;;  %v3208_v36 = vshrl.u32 %v2907_v55, 16  ;;  %v3212_v56 = vrot.slane %v3210_v22, 1  ;;  %v13163_v7 = vcombine.low %v13121_v29, %v13138_v23 }
 0x2e9   :  { %5679 = vmatprep.mubr.bf16.mxu1 %v8770_v26  ;;  %9472 = vmatpush3.bf16.msra.mxu1 %v10823_v11  ;;  %v3105_v26 = vshll.u32 %v13124_v48, 16  ;;  %v3236_v11 = vshrl.u32 %v2909_v3, 16  ;;  %v2913_v33 = vor.u32 %v2912_v39, %v12811_v19  ;;  %v3266_v49 = vshll.u32 %v2911_v31, 16 }
 0x2ea   :  { %10561 = vmatpush3.bf16.msra.mxu0 %v12640_v53  ;;  %9473 = vmatprep.subr.bf16.mxu1 %v10825_v18  ;;  %v10828_v53 = vld [vmem:[%s15258_s3 + $0x628] sm:$0xff]   ;;  %v3240_v28 = vrot.slane %v3238_v44, 1  ;;  %15886 = vst [vmem:[#allocation83_spill] sm:$0xff] %v13163_v7  ;;  %v3079_v55 = vrot.slane %v3077_v61, 1  ;;  %v13166_v6 = vor.u32 %v3212_v56, %v3208_v36  ;;  %v3264_v1 = vshrl.u32 %v2911_v31, 16 }
 0x2eb   :  { %10562 = vmatprep.subr.bf16.mxu0 %v10827_v37  ;;  %v15887_v18 = vld [vmem:[#allocation118_spill] sm:$0xff]  ;;  %v3268_v20 = vrot.slane %v3266_v49, 1  ;;  %v3294_v3 = vshll.u32 %v2913_v33, 16  ;;  %v3075_v44 = vshrl.u32 %v13112_v34, 16  ;;  %v3107_v39 = vrot.slane %v3105_v26, 1 }
 0x2ec   :  { %v2898_v22 = vor.u32 %v2897_v35, %v15887_v18  ;;  %v13168_v13 = vor.u32 %v3240_v28, %v3236_v11  ;;  %v2905_v23 = vor.u32 %v13078_v12, %v2902_v21  ;;  %v10831_v35 = vld [vmem:[%s15258_s3 + $0x620] sm:$0xff]   ;;  %v3292_v61 = vshrl.u32 %v2913_v33, 16 }
 0x2ed   :  { %9474 = vmatpush3.bf16.msra.mxu1 %v10826_v5  ;;  %v13178_v49 = vor.u32 %v3268_v20, %v3264_v1  ;;  %v3296_v34 = vrot.slane %v3294_v3, 1  ;;  %v3103_v38 = vshrl.u32 %v13124_v48, 16  ;;  %v15452_v5 = vrot.slane %v12683_v9, 1  ;;  %v10832_v48 = vld [vmem:[%s15258_s3 + $0x618] sm:$0xff]  }
 0x2ee   :  { %10563 = vmatpush3.bf16.msra.mxu0 %v10827_v37  ;;  %9523 = vmatprep.subr.bf16.mxu1 %v10829_v52  ;;  %v2784_v31 = vrot.slane %v12759_v2, 1  ;;  %v3133_v26 = vshll.u32 %v2898_v22, 16  ;;  %v2918_v20 = vrot.slane %v12965_v45, 7  ;;  %v13190_v1 = vrot.slane %v12672_v17, 1 }
 0x2ef   :  { %10564 = vmatprep.subr.bf16.mxu0 %v10828_v53  ;;  %6529 = vmatmul.mubr.bf16.gmra.mxu0 %v8728_v51  ;;  %v2785_v51 = vrot.slane %v12739_v43, 2  ;;  %v13186_v21 = vor.u32 %v3296_v34, %v3292_v61  ;;  %v13192_v36 = vor.u32 %v2782_v63, %v2781_v10  ;;  %v3108_v2 = vor.u32 %v3107_v39, %v3103_v38  ;;  %v10835_v34 = vld [vmem:[%s15258_s3 + $0x610] sm:$0xff]  }
 0x2f0   :  { %5680 = vmatmul.mubr.bf16.gmra.mxu1 %v8769_v54  ;;  %6536 = vmatprep.mubr.bf16.mxu0 %v13109_v57  ;;  %v3080_v54 = vor.u32 %v3079_v55, %v3075_v44  ;;  %15888 = vst [vmem:[#allocation84_spill] sm:$0xff] %v13190_v1  ;;  %v3161_v56 = vshll.u32 %v2905_v23, 16  ;;  %v13200_v52 = vor.u32 %v2918_v20, %v12942_v47  ;;  %v3135_v33 = vrot.slane %v3133_v26, 1  ;;  %v15892_v55 = vld [vmem:[#allocation124_spill] sm:$0xff] }
 0x2f1   :  { %5687 = vmatprep.mubr.bf16.mxu1 %v13163_v7  ;;  %v13207_v63 = vor.u32 %v2785_v51, %v2784_v31  ;;  %v13212_v28 = vcombine.low %v15452_v5, %v13190_v1  ;;  %v2787_v39 = vrot.slane %v12827_v62, 1  ;;  %v2788_v61 = vrot.slane %v12830_v24, 2  ;;  %v15904_v5 = vld [vmem:[#allocation58_spill] sm:$0xff] }
 0x2f2   :  { %10565 = vmatpush3.bf16.msra.mxu0 %v10828_v53  ;;  %v15889_v53 = vrot.slane %v13078_v12, 1  ;;  %v8745_v10 = vcombine.low %v3080_v54, %v3108_v2  ;;  %v3163_v38 = vrot.slane %v3161_v56, 1  ;;  %v2790_v31 = vrot.slane %v12844_v16, 1 }
 0x2f3   :  { %10566 = vmatprep.subr.bf16.mxu0 %v10831_v35  ;;  %15891 = vst [vmem:[#allocation86_spill] sm:$0xff] %v13212_v28  ;;  %v13218_v44 = vcombine.low %v13192_v36, %v13207_v63  ;;  %v2791_v51 = vrot.slane %v12811_v19, 2  ;;  %v3159_v54 = vshrl.u32 %v2905_v23, 16  ;;  %v13230_v24 = vrot.slane %v12748_v4, 1 }
 0x2f4   :  { %v13205_v11 = vor.u32 %v15889_v53, %v13075_v41  ;;  %v2914_v26 = vrot.slane %v12898_v14, 7  ;;  %v13233_v20 = vor.u32 %v2788_v61, %v2787_v39  ;;  %v13239_v16 = vrot.slane %v12722_v25, 1 }
 0x2f5   :  { %15893 = vst [vmem:[#allocation87_spill] sm:$0xff] %v13218_v44  ;;  %15894 = vst [vmem:[#allocation88_spill] sm:$0xff] %v13230_v24  ;;  %v3164_v2 = vor.u32 %v3163_v38, %v3159_v54  ;;  %v13241_v19 = vor.u32 %v2791_v51, %v2790_v31  ;;  %v3070_v39 = vshll.u32 %v13045_v27, 16  ;;  %v13265_v61 = vrot.slane %v12814_v15, 1  ;;  %v15903_v31 = vld [vmem:[#allocation98_spill] sm:$0xff] }
 0x2f6   :  { %15890 = vst [vmem:[#allocation85_spill] sm:$0xff] %v13205_v11  ;;  %10567 = vmatpush3.bf16.msra.mxu0 %v10831_v35  ;;  %v8763_v3 = vcombine.low %v15892_v55, %v13205_v11  ;;  %v3131_v35 = vshrl.u32 %v2898_v22, 16  ;;  %15895 = vst [vmem:[#allocation89_spill] sm:$0xff] %v13233_v20  ;;  %v10836_v22 = vld [vmem:[%s15258_s3 + $0x608] sm:$0xff]   ;;  %v13245_v56 = vcombine.low %v13230_v24, %v13239_v16  ;;  %v13257_v55 = vshll.u32 %v12912_v30, 16  ;;  %v15915_v11 = vld [vmem:[#allocation67_spill] sm:$0xff] }
 0x2f7   :  { %10568 = vmatprep.subr.bf16.mxu0 %v10832_v48  ;;  %6537 = vmatmul.mubr.bf16.gmra.mxu0 %v8745_v10  ;;  %15896 = vst [vmem:[#allocation90_spill] sm:$0xff] %v13239_v16  ;;  %15897 = vst [vmem:[#allocation91_spill] sm:$0xff] %v13241_v19  ;;  %v13250_v53 = vcombine.low %v13233_v20, %v13241_v19  ;;  %v2916_v10 = vrot.slane %v12895_v40, 7  ;;  %v2793_v51 = vrot.slane %v12133_v60, 2  ;;  %v13272_v54 = vshrl.u32 %v12912_v30, 16  ;;  %v15907_v30 = vld [vmem:[#allocation59_spill] sm:$0xff] }
 0x2f8   :  { %5688 = vmatmul.mubr.bf16.gmra.mxu1 %v13212_v28  ;;  %6544 = vmatprep.mubr.bf16.mxu0 %v8763_v3  ;;  %v3136_v62 = vor.u32 %v3135_v33, %v3131_v35  ;;  %15898 = vst [vmem:[#allocation92_spill] sm:$0xff] %v13245_v56  ;;  %v10839_v33 = vld [vmem:[%s15258_s3 + $0x600] sm:$0xff]   ;;  %v3042_v3 = vshll.u32 %v13038_v8, 16  ;;  %15900 = vst [vmem:[#allocation94_spill] sm:$0xff] %v13265_v61  ;;  %v15901_v35 = vld [vmem:[#allocation115_spill] sm:$0xff]  ;;  %v13281_v38 = vrot.slane %v3070_v39, 1 }
 0x2f9   :  { %5695 = vmatprep.mubr.bf16.mxu1 %v13218_v44  ;;  %15899 = vst [vmem:[#allocation93_spill] sm:$0xff] %v13250_v53  ;;  %v9182_v60 = vpack.c.bf16 %v15904_v5, %v15903_v31  ;;  %v15911_v44 = vcombine.low %v13166_v6, %v13168_v13  ;;  %v2830_v6 = vrot.slane %v12898_v14, 1  ;;  %v2831_v13 = vrot.slane %v12879_v46, 2  ;;  %v15922_v28 = vld [vmem:[#allocation36_spill] sm:$0xff] }
 0x2fa   :  { %10569 = vmatpush3.bf16.msra.mxu0 %v10832_v48  ;;  %v8762_v23 = vcombine.low %v3136_v62, %v3164_v2  ;;  %v2915_v48 = vor.u32 %v2914_v26, %v12879_v46  ;;  %v2917_v62 = vor.u32 %v2916_v10, %v12876_v32  ;;  %v13274_v26 = vrot.slane %v3042_v3, 1 }
 0x2fb   :  { %10570 = vmatprep.subr.bf16.mxu0 %v10835_v34  ;;  %v13277_v2 = vrot.slane %v12795_v0, 1  ;;  %v15459_v10 = vrot.slane %v12121_v42, 2  ;;  %v13292_v3 = vcombine.low %v12908_v58, %v12937_v50  ;;  %v15913_v50 = vld [vmem:[#allocation32_spill] sm:$0xff]  ;;  %v2984_v14 = vshrl.u32 %v15922_v28, 16 }
 0x2fc   :  { %v3320_v31 = vshrl.u32 %v2915_v48, 16  ;;  %v2986_v46 = vshll.u32 %v15922_v28, 16  ;;  %v13331_v7 = vor.u32 %v2831_v13, %v2830_v6  ;;  %v15928_v6 = vcombine.low %v13178_v49, %v13186_v21  ;;  %v15931_v21 = vld [vmem:[#allocation107_spill] sm:$0xff] }
 0x2fd   :  { %15902 = vst [vmem:[#allocation95_spill] sm:$0xff] %v13277_v2  ;;  %v13288_v43 = vcombine.low %v13265_v61, %v13277_v2  ;;  %15906 = vst [vmem:[#allocation97_spill] sm:$0xff] %v13292_v3  ;;  %v8695_v39 = vcombine.low %v2793_v51, %v15459_v10  ;;  %v15918_v10 = vld [vmem:[#allocation50_spill] sm:$0xff]  ;;  %v15929_v2 = vld [vmem:[#allocation121_spill] sm:$0xff] }
 0x2fe   :  { %10571 = vmatpush3.bf16.msra.mxu0 %v10835_v34  ;;  %v3322_v34 = vshll.u32 %v2915_v48, 16  ;;  %v3348_v48 = vshrl.u32 %v2917_v62, 16  ;;  %15923 = vst [vmem:[#allocation120_spill] sm:$0xff] %v13331_v7  ;;  %v3343_v13 = vshll.u32 %v13331_v7, 16  ;;  %v2988_v29 = vrot.slane %v2986_v46, 1 }
 0x2ff   :  { %10572 = vmatprep.subr.bf16.mxu0 %v10836_v22  ;;  %6545 = vmatmul.mubr.bf16.gmra.mxu0 %v8762_v23  ;;  %v2929_v23 = vrot.slane %v13257_v55, 1  ;;  %15905 = vst [vmem:[#allocation96_spill] sm:$0xff] %v13288_v43  ;;  %v2879_v16 = vrot.slane %v15929_v2, 1  ;;  %v10837_v2 = vld [vmem:[%s15258_s3 + $0x1e8] sm:$0xff]  }
 0x300   :  { %5696 = vmatmul.mubr.bf16.gmra.mxu1 %v13245_v56  ;;  %6552 = vmatprep.mubr.bf16.mxu0 %v12817_v59  ;;  %v3324_v37 = vrot.slane %v3322_v34, 1  ;;  %v3350_v56 = vshll.u32 %v2917_v62, 16  ;;  %v15914_v34 = vld [vmem:[#allocation60_spill] sm:$0xff]  ;;  %v3345_v28 = vrot.slane %v3343_v13, 1 }
 0x301   :  { %5703 = vmatprep.mubr.bf16.mxu1 %v13250_v53  ;;  %v15909_v53 = vld [vmem:[#allocation63_spill] sm:$0xff]  ;;  %v13306_v58 = vor.u32 %v2929_v23, %v13272_v54  ;;  %v13311_v51 = vpack.c.bf16 %v15915_v11, %v15914_v34  ;;  %v15919_v11 = vrot.slane %v15913_v50, 2  ;;  %v15920_v34 = vrot.slane %v15907_v30, 2 }
 0x302   :  { %10573 = vmatpush3.bf16.msra.mxu0 %v10836_v22  ;;  %v15908_v22 = vld [vmem:[#allocation5_spill] sm:$0xff]  ;;  %v13318_v23 = vor.u32 %v3324_v37, %v3320_v31  ;;  %v3352_v62 = vrot.slane %v3350_v56, 1  ;;  %v2882_v31 = vrot.slane %v12965_v45, 1  ;;  %v3376_v56 = vshrl.u32 %v13200_v52, 16 }
 0x303   :  { %10574 = vmatprep.subr.bf16.mxu0 %v10839_v33  ;;  %v13299_v5 = vpack.c.bf16 %v15909_v53, %v15908_v22  ;;  %15912 = vst [vmem:[#allocation71_spill] sm:$0xff] %v13306_v58  ;;  %15916 = vst [vmem:[#allocation72_spill] sm:$0xff] %v13311_v51  ;;  %v2923_v53 = vrot.slane %v13272_v54, 7  ;;  %v15917_v22 = vld [vmem:[#allocation19_spill] sm:$0xff] }
 0x304   :  { %v3353_v57 = vor.u32 %v3352_v62, %v3348_v48  ;;  %v15930_v62 = vld [vmem:[#allocation117_spill] sm:$0xff] }
 0x305   :  { %15910 = vst [vmem:[#allocation73_spill] sm:$0xff] %v13299_v5  ;;  %v2853_v49 = vrot.slane %v15930_v62, 1 }
 0x306   :  { %10575 = vmatpush3.bf16.msra.mxu0 %v10839_v33  ;;  %v2883_v33 = vrot.slane %v12942_v47, 2 }
 0x307   :  { %6553 = vmatmul.mubr.bf16.gmra.mxu0 %v15911_v44  ;;  %v2856_v44 = vrot.slane %v12895_v40, 1  ;;  %v13334_v40 = vor.u32 %v13257_v55, %v2923_v53  ;;  %v10833_v53 = vld [vmem:[%s15258_s3 + $0x1f0] sm:$0xff]  }
 0x308   :  { %5704 = vmatmul.mubr.bf16.gmra.mxu1 %v13288_v43  ;;  %6560 = vmatprep.mubr.bf16.mxu0 %v15917_v22  ;;  %v13326_v43 = vcombine.low %v15920_v34, %v15919_v11  ;;  %v3378_v11 = vshll.u32 %v13200_v52, 16  ;;  %v15925_v34 = vld [vmem:[#allocation10_spill] sm:$0xff]  ;;  %v13353_v59 = vor.u32 %v2883_v33, %v2882_v31  ;;  %v3341_v52 = vshrl.u32 %v13331_v7, 16 }
 0x309   :  { %5744 = vmatprep.mubr.bf16.mxu1 %v9182_v60  ;;  %v2857_v60 = vrot.slane %v12876_v32, 2  ;;  %v10830_v32 = vld [vmem:[%s15258_s3 + $0x1b8] sm:$0xff]   ;;  %v10834_v33 = vld [vmem:[%s15258_s3 + $0x1b0] sm:$0xff]   ;;  %v3014_v48 = vshll.u32 %v15925_v34, 16  ;;  %v3404_v13 = vshrl.u32 %v13334_v40, 16  ;;  %v3406_v62 = vshll.u32 %v13334_v40, 16 }
 0x30a   :  { %15921 = vst [vmem:[#allocation70_spill] sm:$0xff] %v13326_v43  ;;  %v13369_v46 = vor.u32 %v3345_v28, %v3341_v52  ;;  %v15935_v28 = vld [vmem:[#allocation62_spill] sm:$0xff]  ;;  %v15939_v40 = vrot.slane %v12683_v9, 1  ;;  %v15970_v7 = vrot.slane %v15901_v35, 1 }
 0x30b   :  { %v13336_v37 = vor.u32 %v2857_v60, %v2856_v44  ;;  %v15926_v44 = vld [vmem:[#allocation109_spill] sm:$0xff]  ;;  %v15927_v60 = vld [vmem:[#allocation108_spill] sm:$0xff]  ;;  %v2798_v52 = vrot.slane %v15935_v28, 2 }
 0x30c   :  { %v2827_v45 = vrot.slane %v15926_v44, 1  ;;  %v2828_v47 = vrot.slane %v15927_v60, 2  ;;  %v2880_v44 = vrot.slane %v15887_v18, 2  ;;  %15932 = vst [vmem:[#allocation118_spill] sm:$0xff] %v13369_v46  ;;  %v3380_v18 = vrot.slane %v3378_v11, 1 }
 0x30d   :  { %15924 = vst [vmem:[#allocation114_spill] sm:$0xff] %v13336_v37  ;;  %v3371_v22 = vshll.u32 %v13336_v37, 16  ;;  %v3369_v60 = vshrl.u32 %v13336_v37, 16  ;;  %v8821_v11 = vcombine.low %v13318_v23, %v3353_v57  ;;  %v10838_v57 = vld [vmem:[%s15258_s3 + $0x1a8] sm:$0xff]   ;;  %v15477_v23 = vrot.slane %v12722_v25, 2 }
 0x30f   :  { %6561 = vmatmul.mubr.bf16.gmra.mxu0 %v15928_v6  ;;  %v3373_v61 = vrot.slane %v3371_v22, 1  ;;  %v15933_v22 = vld [vmem:[#allocation100_spill] sm:$0xff] }
 0x310   :  { %5745 = vmatmul.mubr.bf16.vlgmr.msra.gmra.mxu1 %v8695_v39  ;;  %6568 = vmatprep.mubr.bf16.mxu0 %v13292_v3  ;;  %v2854_v39 = vrot.slane %v15931_v21, 2  ;;  %v2797_v31 = vrot.slane %v15933_v22, 2  ;;  %v15936_v21 = vld [vmem:[#allocation33_spill] sm:$0xff]  ;;  %v13387_v3 = vor.u32 %v2880_v44, %v2879_v16  ;;  %v15940_v22 = vld [vmem:[#allocation76_spill] sm:$0xff]  ;;  %v15943_v44 = vrot.slane %v12121_v42, 2 }
 0x311   :  { %9524 = vmatpush3.bf16.msra.mxu1 %v10830_v32  ;;  %5752 = vmatprep.mubr.bf16.mxu1 %v13299_v5  ;;  %v13376_v32 = vor.u32 %v2828_v47, %v2827_v45  ;;  %v13378_v6 = vor.u32 %v3373_v61, %v3369_v60  ;;  %v3016_v61 = vrot.slane %v3014_v48, 1  ;;  %v15475_v60 = vrot.slane %v12683_v9, 2 }
 0x312   :  { %9525 = vmatprep.subr.bf16.mxu1 %v10833_v53  ;;  %v13385_v53 = vor.u32 %v2988_v29, %v2984_v14  ;;  %v13391_v47 = vor.u32 %v2854_v39, %v2853_v49  ;;  %v15941_v28 = vrot.slane %v15940_v22, 1  ;;  %v15942_v14 = vrot.slane %v15907_v30, 2  ;;  %v10840_v49 = vld [vmem:[%s15258_s3 + $0x1e0] sm:$0xff]  }
 0x313   :  { %15934 = vst [vmem:[#allocation124_spill] sm:$0xff] %v13378_v6  ;;  %v3098_v29 = vshll.u32 %v13376_v32, 16  ;;  %v3408_v48 = vrot.slane %v3406_v62, 1  ;;  %v15478_v39 = vrot.slane %v15940_v22, 2  ;;  %v3154_v62 = vshll.u32 %v13387_v3, 16 }
 0x314   :  { %15937 = vst [vmem:[#allocation115_spill] sm:$0xff] %v13385_v53  ;;  %15938 = vst [vmem:[#allocation98_spill] sm:$0xff] %v13391_v47  ;;  %v13398_v5 = vcombine.low %v15941_v28, %v15939_v40  ;;  %v15945_v28 = vrot.slane %v15936_v21, 2  ;;  %v15946_v16 = vcombine.low %v15918_v10, %v13306_v58  ;;  %v10841_v10 = vld [vmem:[%s15258_s3 + $0x1a0] sm:$0xff]  }
 0x315   :  { %9526 = vmatpush3.bf16.msra.mxu1 %v10834_v33  ;;  %v13410_v33 = vcombine.low %v15943_v44, %v15942_v14  ;;  %v3381_v14 = vor.u32 %v3380_v18, %v3376_v56  ;;  %v15476_v44 = vrot.slane %v12672_v17, 2  ;;  %v13440_v56 = vcombine.low %v15478_v39, %v15475_v60 }
 0x316   :  { %9527 = vmatprep.subr.bf16.mxu1 %v10837_v2  ;;  %v15944_v2 = vrot.slane %v15913_v50, 2  ;;  %v13422_v45 = vcombine.low %v2798_v52, %v15945_v28  ;;  %v13432_v50 = vcombine.low %v2797_v31, %v2798_v52  ;;  %v3100_v18 = vrot.slane %v3098_v29, 1 }
 0x317   :  { %6569 = vmatmul.mubr.bf16.gmra.mxu0 %v8821_v11  ;;  %v2935_v11 = vrot.slane %v13075_v41, 1  ;;  %v15949_v41 = vrot.slane %v12814_v15, 2  ;;  %v15950_v29 = vshrl.u32 %v13038_v8, 16  ;;  %v15954_v39 = vshrl.u32 %v13045_v27, 16 }
 0x318   :  { %v13418_v40 = vcombine.low %v15944_v2, %v2797_v31  ;;  %5753 = vmatmul.mubr.bf16.gmra.mxu1 %v13326_v43  ;;  %6576 = vmatprep.mubr.bf16.mxu0 %v15946_v16  ;;  %15947 = vst [vmem:[#allocation58_spill] sm:$0xff] %v13432_v50  ;;  %v3126_v2 = vshll.u32 %v13391_v47, 16  ;;  %v2936_v16 = vrot.slane %v13078_v12, 2  ;;  %v15948_v31 = vrot.slane %v12748_v4, 2  ;;  %v10842_v12 = vld [vmem:[%s15258_s3 + $0x1d8] sm:$0xff]  }
 0x319   :  { %5760 = vmatprep.mubr.bf16.mxu1 %v13311_v51  ;;  %9528 = vmatpush3.bf16.msra.mxu1 %v10838_v57  ;;  %v13456_v28 = vcombine.low %v15477_v23, %v15949_v41  ;;  %v3409_v57 = vor.u32 %v3408_v48, %v3404_v13  ;;  %v13461_v60 = vor.u32 %v13274_v26, %v15950_v29  ;;  %v3096_v41 = vshrl.u32 %v13376_v32, 16  ;;  %v15963_v26 = vld [vmem:[#allocation77_spill] sm:$0xff] }
 0x31a   :  { %v13450_v52 = vcombine.low %v15476_v44, %v15948_v31  ;;  %9529 = vmatprep.subr.bf16.mxu1 %v10840_v49  ;;  %v3156_v23 = vrot.slane %v3154_v62, 1  ;;  %v15952_v49 = vshrl.u32 %v15925_v34, 16  ;;  %v13482_v31 = vor.u32 %v13281_v38, %v15954_v39  ;;  %v15958_v38 = vld [vmem:[#allocation102_spill] sm:$0xff] }
 0x31b   :  { %15951 = vst [vmem:[#allocation59_spill] sm:$0xff] %v13461_v60  ;;  %v8838_v48 = vcombine.low %v3381_v14, %v3409_v57  ;;  %v3128_v44 = vrot.slane %v3126_v2, 1  ;;  %v13484_v58 = vor.u32 %v3100_v18, %v3096_v41  ;;  %v13486_v62 = vor.u32 %v2936_v16, %v2935_v11  ;;  %v10843_v14 = vld [vmem:[%s15258_s3 + $0x198] sm:$0xff]  }
 0x31c   :  { %v13477_v29 = vor.u32 %v3016_v61, %v15952_v49  ;;  %15955 = vst [vmem:[#allocation63_spill] sm:$0xff] %v13482_v31  ;;  %v3152_v13 = vshrl.u32 %v13387_v3, 16  ;;  %v3287_v61 = vshll.u32 %v13233_v20, 16  ;;  %v15957_v49 = vld [vmem:[#allocation99_spill] sm:$0xff]  ;;  %v8732_v2 = vcombine.low %v13461_v60, %v13482_v31  ;;  %v15960_v11 = vld [vmem:[#allocation68_spill] sm:$0xff] }
 0x31d   :  { %15956 = vst [vmem:[#allocation32_spill] sm:$0xff] %v13484_v58  ;;  %9530 = vmatpush3.bf16.msra.mxu1 %v10841_v10  ;;  %v13497_v39 = vpack.c.bf16 %v15958_v38, %v15957_v49  ;;  %v10844_v3 = vld [vmem:[%s15258_s3 + $0x1d0] sm:$0xff]   ;;  %v3124_v10 = vshrl.u32 %v13391_v47, 16  ;;  %v3259_v41 = vshll.u32 %v13207_v63, 16  ;;  %v15967_v49 = vrot.slane %v15936_v21, 2 }
 0x31e   :  { %15953 = vst [vmem:[#allocation5_spill] sm:$0xff] %v13477_v29  ;;  %v8715_v57 = vcombine.low %v13385_v53, %v13477_v29  ;;  %9531 = vmatprep.subr.bf16.mxu1 %v10842_v12  ;;  %v13507_v16 = vor.u32 %v3156_v23, %v3152_v13  ;;  %v15962_v12 = vld [vmem:[#allocation75_spill] sm:$0xff]  ;;  %v3231_v53 = vshll.u32 %v13192_v36, 16  ;;  %v3182_v13 = vshll.u32 %v13486_v62, 16 }
 0x31f   :  { %15959 = vst [vmem:[#allocation60_spill] sm:$0xff] %v13497_v39  ;;  %6577 = vmatmul.mubr.bf16.gmra.mxu0 %v8838_v48  ;;  %v9192_v18 = vpack.c.bf16 %v15963_v26, %v15962_v12  ;;  %v3315_v48 = vshll.u32 %v13241_v19, 16  ;;  %v13520_v23 = vor.u32 %v3128_v44, %v3124_v10  ;;  %v3289_v43 = vrot.slane %v3287_v61, 1  ;;  %v15968_v61 = vld [vmem:[#allocation104_spill] sm:$0xff] }
 0x320   :  { %5761 = vmatmul.mubr.bf16.gmra.mxu1 %v13432_v50  ;;  %15961 = vst [vmem:[#allocation67_spill] sm:$0xff] %v13507_v16  ;;  %10576 = vmatprep.mubr.bf16.mxu0 %v8715_v57  ;;  %v15964_v50 = vld [vmem:[#allocation103_spill] sm:$0xff]  ;;  %v15966_v12 = vrot.slane %v15960_v11, 2  ;;  %v3229_v44 = vshrl.u32 %v13192_v36, 16  ;;  %v3399_v10 = vshll.u32 %v13353_v59, 16  ;;  %v13540_v29 = vrot.slane %v15968_v61, 1 }
 0x321   :  { %5768 = vmatprep.mubr.bf16.mxu1 %v13497_v39  ;;  %v13518_v51 = vrot.slane %v15964_v50, 1  ;;  %15965 = vst [vmem:[#allocation50_spill] sm:$0xff] %v13520_v23  ;;  %9532 = vmatpush3.bf16.msra.mxu1 %v10843_v14  ;;  %v10845_v57 = vld [vmem:[%s15258_s3 + $0x190] sm:$0xff]   ;;  %v10846_v14 = vld [vmem:[%s15258_s3 + $0x1c8] sm:$0xff]   ;;  %v3257_v26 = vshrl.u32 %v13207_v63, 16  ;;  %v3261_v31 = vrot.slane %v3259_v41, 1  ;;  %v8749_v37 = vcombine.low %v13484_v58, %v13520_v23 }
 0x322   :  { %v13532_v60 = vcombine.low %v15967_v49, %v15966_v12  ;;  %9533 = vmatprep.subr.bf16.mxu1 %v10844_v3  ;;  %v3285_v50 = vshrl.u32 %v13233_v20, 16  ;;  %v3180_v49 = vshrl.u32 %v13486_v62, 16  ;;  %v3233_v3 = vrot.slane %v3231_v53, 1  ;;  %v10847_v41 = vld [vmem:[%s15258_s3 + $0x188] sm:$0xff]  }
 0x323   :  { %v3317_v12 = vrot.slane %v3315_v48, 1  ;;  %v3119_v39 = vshll.u32 %v13518_v51, 16  ;;  %v3184_v47 = vrot.slane %v3182_v13, 1  ;;  %v3147_v21 = vshll.u32 %v15970_v7, 16  ;;  %v10848_v48 = vld [vmem:[%s15258_s3 + $0x1c0] sm:$0xff]  }
 0x324   :  { %v13550_v38 = vor.u32 %v3289_v43, %v3285_v50  ;;  %v3313_v62 = vshrl.u32 %v13241_v19, 16  ;;  %v3401_v53 = vrot.slane %v3399_v10, 1  ;;  %v3091_v13 = vshll.u32 %v13540_v29, 16 }
 0x325   :  { %9534 = vmatpush3.bf16.msra.mxu1 %v10845_v57  ;;  %v3121_v43 = vrot.slane %v3119_v39, 1  ;;  %v13563_v50 = vor.u32 %v3261_v31, %v3257_v26  ;;  %v3117_v57 = vshrl.u32 %v13518_v51, 16  ;;  %v3145_v23 = vshrl.u32 %v15970_v7, 16  ;;  %v10849_v31 = vld [vmem:[%s15258_s3 + $0x180] sm:$0xff]  }
 0x326   :  { %15969 = vst [vmem:[#allocation10_spill] sm:$0xff] %v13550_v38  ;;  %9535 = vmatprep.subr.bf16.mxu1 %v10846_v14  ;;  %v3149_v58 = vrot.slane %v3147_v21, 1  ;;  %v13568_v10 = vor.u32 %v3233_v3, %v3229_v44  ;;  %v15973_v14 = vld [vmem:[#allocation37_spill] sm:$0xff]  ;;  %v13571_v20 = vor.u32 %v3317_v12, %v3313_v62  ;;  %v3397_v39 = vshrl.u32 %v13353_v59, 16  ;;  %v10850_v59 = vld [vmem:[%s15258_s3 + $0x278] sm:$0xff]  }
 0x327   :  { %10577 = vmatmul.mubr.bf16.vlgmr.msra.gmra.mxu0 %v8732_v2  ;;  %15971 = vst [vmem:[#allocation109_spill] sm:$0xff] %v13563_v50  ;;  %v2801_v19 = vrot.slane %v15973_v14, 2  ;;  %v15975_v2 = vld [vmem:[#allocation18_spill] sm:$0xff]  ;;  %v13580_v35 = vor.u32 %v3121_v43, %v3117_v57  ;;  %v3185_v44 = vor.u32 %v3184_v47, %v3180_v49  ;;  %v2938_v21 = vrot.slane %v13272_v54, 1  ;;  %v15979_v62 = vld [vmem:[#allocation17_spill] sm:$0xff]  ;;  %v15982_v14 = vld [vmem:[#allocation11_spill] sm:$0xff] }
 0x328   :  { %5769 = vmatmul.mubr.bf16.gmra.mxu1 %v13532_v60  ;;  %10580 = vmatprep.mubr.bf16.mxu0 %v8749_v37  ;;  %15972 = vst [vmem:[#allocation108_spill] sm:$0xff] %v13568_v10  ;;  %15974 = vst [vmem:[#allocation121_spill] sm:$0xff] %v13571_v20  ;;  %v13578_v26 = vrot.slane %v15975_v2, 1  ;;  %v13582_v37 = vor.u32 %v3149_v58, %v3145_v23  ;;  %v13587_v3 = vor.u32 %v3401_v53, %v3397_v39  ;;  %v15980_v54 = vld [vmem:[#allocation21_spill] sm:$0xff]  ;;  %v9347_v7 = vpop.f32.mrf.mxu1  ;;  %v15983_v39 = vld [vmem:[#allocation39_spill] sm:$0xff] }
 0x329   :  { %5776 = vmatprep.mubr.bf16.mxu1 %v9192_v18  ;;  %9536 = vmatpush3.bf16.msra.mxu1 %v10847_v41  ;;  %15976 = vst [vmem:[#allocation117_spill] sm:$0xff] %v13580_v35  ;;  %v3093_v12 = vrot.slane %v3091_v13, 1  ;;  %v2939_v41 = vrot.slane %v13257_v55, 2  ;;  %v13594_v43 = vrot.slane %v15979_v62, 1  ;;  %v2878_v23 = vrot.slane %v15980_v54, 1 }
 0x32a   :  { %15977 = vst [vmem:[#allocation107_spill] sm:$0xff] %v13582_v37  ;;  %15978 = vst [vmem:[#allocation100_spill] sm:$0xff] %v13587_v3  ;;  %9537 = vmatprep.subr.bf16.mxu1 %v10848_v48  ;;  %v3089_v49 = vshrl.u32 %v13540_v29, 16  ;;  %v8766_v53 = vcombine.low %v13507_v16, %v3185_v44  ;;  %v15981_v48 = vrot.slane %v15940_v22, 2  ;;  %v3336_v55 = vshll.u32 %v13578_v26, 16  ;;  %v16023_v37 = vld [vmem:[#allocation45_spill] sm:$0xff] }
 0x32b   :  { %v8791_v57 = vcombine.low %v13568_v10, %v13563_v50  ;;  %v13610_v18 = vpack.c.bf16 %v15983_v39, %v15982_v14  ;;  %v3392_v47 = vshll.u32 %v2878_v23, 16  ;;  %v3390_v39 = vshrl.u32 %v2878_v23, 16  ;;  %v15991_v50 = vld [vmem:[#allocation15_spill] sm:$0xff] }
 0x32c   :  { %v8771_v13 = vcombine.low %v2801_v19, %v15981_v48  ;;  %v13612_v54 = vor.u32 %v3093_v12, %v3089_v49  ;;  %v2940_v19 = vor.u32 %v2939_v41, %v2938_v21  ;;  %v3338_v22 = vrot.slane %v3336_v55, 1  ;;  %v9348_v48 = vpop.f32.mrf.mxu1  ;;  %v15990_v21 = vld [vmem:[#allocation12_spill] sm:$0xff] }
 0x32d   :  { %9538 = vmatpush3.bf16.msra.mxu1 %v10849_v31  ;;  %v3364_v31 = vshll.u32 %v13594_v43, 16  ;;  %v13618_v58 = vadd.f32 %v9348_v48, %v9347_v7  ;;  %v3362_v12 = vshrl.u32 %v13594_v43, 16  ;;  %v8808_v48 = vcombine.low %v13550_v38, %v13571_v20 }
 0x32e   :  { %9587 = vmatprep.subr.bf16.mxu1 %v10850_v59  ;;  %15984 = vst [vmem:[#allocation62_spill] sm:$0xff] %v13612_v54  ;;  %v3334_v59 = vshrl.u32 %v13578_v26, 16  ;;  %v9350_v49 = vpop.f32.mrf.mxu1  ;;  %v3427_v41 = vshll.u32 %v2940_v19, 16 }
 0x32f   :  { %10581 = vmatmul.mubr.bf16.gmra.mxu0 %v8766_v53  ;;  %v3366_v14 = vrot.slane %v3364_v31, 1  ;;  %v3394_v53 = vrot.slane %v3392_v47, 1  ;;  %v15988_v31 = vrot.slane %v12672_v17, 2  ;;  %v15989_v47 = vrot.slane %v12683_v9, 2 }
 0x330   :  { %5777 = vmatmul.mubr.bf16.gmra.mxu1 %v8771_v13  ;;  %10584 = vmatprep.mubr.bf16.mxu0 %v8791_v57  ;;  %v13624_v13 = vor.u32 %v3338_v22, %v3334_v59  ;;  %v9351_v55 = vpop.f32.mrf.mxu1  ;;  %v13642_v22 = vpack.c.bf16 %v15991_v50, %v15990_v21  ;;  %v15992_v17 = vcombine.low %v13369_v46, %v13378_v6  ;;  %v3425_v50 = vshrl.u32 %v2940_v19, 16  ;;  %v15996_v59 = vld [vmem:[#allocation43_spill] sm:$0xff] }
 0x331   :  { %5784 = vmatprep.mubr.bf16.mxu1 %v13610_v18  ;;  %v13626_v57 = vor.u32 %v3366_v14, %v3362_v12  ;;  %v13628_v44 = vor.u32 %v3394_v53, %v3390_v39  ;;  %v13630_v7 = vadd.f32 %v9351_v55, %v9350_v49  ;;  %v13638_v23 = vcombine.low %v15989_v47, %v15988_v31  ;;  %v10853_v6 = vld [vmem:[%s15258_s3 + $0x230] sm:$0xff]  }
 0x332   :  { %15985 = vst [vmem:[#allocation33_spill] sm:$0xff] %v13624_v13  ;;  %v9353_v12 = vpop.f32.mrf.mxu1  ;;  %v3429_v49 = vrot.slane %v3427_v41, 1  ;;  %v15993_v41 = vrot.slane %v12722_v25, 2  ;;  %v15994_v31 = vrot.slane %v12748_v4, 2  ;;  %v15502_v25 = vrot.slane %v12795_v0, 2 }
 0x333   :  { %15986 = vst [vmem:[#allocation76_spill] sm:$0xff] %v13626_v57  ;;  %15987 = vst [vmem:[#allocation99_spill] sm:$0xff] %v13628_v44 }
 0x334   :  { %v9354_v9 = vpop.f32.mrf.mxu1  ;;  %v3430_v21 = vor.u32 %v3429_v49, %v3425_v50  ;;  %v13660_v47 = vcombine.low %v15994_v31, %v15993_v41 }
 0x335   :  { %v13653_v39 = vadd.f32 %v9354_v9, %v9353_v12  ;;  %v15997_v9 = vrot.slane %v12814_v15, 2 }
 0x336   :  { %v9356_v53 = vpop.f32.mrf.mxu1 }
 0x337   :  { %10585 = vmatmul.mubr.bf16.gmra.mxu0 %v8808_v48  ;;  %v8842_v48 = vcombine.low %v13587_v3, %v3430_v21  ;;  %v13677_v50 = vcombine.low %v15997_v9, %v15502_v25  ;;  %v15998_v21 = vrot.slane %v15907_v30, 1  ;;  %v10851_v30 = vld [vmem:[%s15258_s3 + $0x238] sm:$0xff]  }
 0x338   :  { %5785 = vmatmul.mubr.bf16.gmra.mxu1 %v13638_v23  ;;  %10588 = vmatprep.mubr.bf16.mxu0 %v15992_v17  ;;  %v9357_v55 = vpop.f32.mrf.mxu1  ;;  %v15995_v17 = vld [vmem:[#allocation41_spill] sm:$0xff] }
 0x339   :  { %5792 = vmatprep.mubr.bf16.mxu1 %v13642_v22  ;;  %v13662_v14 = vadd.f32 %v9357_v55, %v9356_v53  ;;  %v13666_v44 = vpack.c.bf16 %v15996_v59, %v15995_v17  ;;  %v15999_v55 = vrot.slane %v12121_v42, 1 }
 0x33a   :  { %v9359_v19 = vpop.f32.mrf.mxu1 }
 0x33c   :  { %v9360_v12 = vpop.f32.mrf.mxu1 }
 0x33d   :  { %v13670_v49 = vadd.f32 %v9360_v12, %v9359_v19 }
 0x33e   :  { %v9362_v4 = vpop.f32.mrf.mxu1 }
 0x33f   :  { %10589 = vmatmul.mubr.bf16.gmra.mxu0 %v8842_v48  ;;  %v8698_v48 = vcombine.low %v15999_v55, %v15998_v21  ;;  %v16001_v21 = vld [vmem:[#allocation53_spill] sm:$0xff]  ;;  %v16002_v55 = vld [vmem:[#allocation24_spill] sm:$0xff] }
 0x340   :  { %5793 = vmatmul.mubr.bf16.gmra.mxu1 %v13660_v47  ;;  %v9363_v53 = vpop.f32.mrf.mxu1 }
 0x341   :  { %5800 = vmatprep.mubr.bf16.mxu1 %v13666_v44  ;;  %v13683_v41 = vadd.f32 %v9363_v53, %v9362_v4  ;;  %v10852_v4 = vld [vmem:[%s15258_s3 + $0x270] sm:$0xff]  }
 0x344   :  { %v9859_v31 = vpop.f32.mrf.mxu0 }
 0x345   :  { %v9365_v17 = vpop.f32.mrf.mxu1 }
 0x346   :  { %v9860_v19 = vpop.f32.mrf.mxu0 }
 0x347   :  { %v13686_v12 = vadd.f32 %v9860_v19, %v9859_v31  ;;  %v9366_v57 = vpop.f32.mrf.mxu1  ;;  %v16004_v19 = vld [vmem:[#allocation6_spill] sm:$0xff] }
 0x348   :  { %5801 = vmatmul.mubr.bf16.gmra.mxu1 %v13677_v50  ;;  %v13688_v15 = vadd.f32 %v9366_v57, %v9365_v17  ;;  %v9862_v9 = vpop.f32.mrf.mxu0  ;;  %v16005_v57 = vld [vmem:[#allocation64_spill] sm:$0xff] }
 0x349   :  { %5841 = vmatprep.mubr.bf16.mxu1 %v8698_v48  ;;  %16000 = vst [vmem:[#allocation68_spill] sm:$0xff] %v13686_v12  ;;  %v9368_v42 = vpop.f32.mrf.mxu1  ;;  %v8716_v48 = vcombine.low %v16002_v55, %v16001_v21  ;;  %v16006_v17 = vcombine.low %v16004_v19, %v16005_v57 }
 0x34a   :  { %v9863_v53 = vpop.f32.mrf.mxu0 }
 0x34b   :  { %v13698_v25 = vadd.f32 %v9863_v53, %v9862_v9  ;;  %v9369_v31 = vpop.f32.mrf.mxu1  ;;  %v10854_v9 = vld [vmem:[%s15258_s3 + $0x268] sm:$0xff]  }
 0x34c   :  { %v13703_v12 = vadd.f32 %v9369_v31, %v9368_v42  ;;  %v9865_v3 = vpop.f32.mrf.mxu0  ;;  %v10855_v42 = vld [vmem:[%s15258_s3 + $0x228] sm:$0xff]   ;;  %v16009_v31 = vld [vmem:[#allocation27_spill] sm:$0xff] }
 0x34d   :  { %16003 = vst [vmem:[#allocation75_spill] sm:$0xff] %v13698_v25 }
 0x34e   :  { %v9866_v53 = vpop.f32.mrf.mxu0 }
 0x34f   :  { %v13711_v25 = vadd.f32 %v9866_v53, %v9865_v3 }
 0x350   :  { %5842 = vmatmul.mubr.bf16.vlgmr.msra.gmra.mxu1 %v16006_v17  ;;  %v9868_v13 = vpop.f32.mrf.mxu0  ;;  %v16011_v17 = vld [vmem:[#allocation105_spill] sm:$0xff] }
 0x351   :  { %9588 = vmatpush3.bf16.msra.mxu1 %v10851_v30  ;;  %5849 = vmatprep.mubr.bf16.mxu1 %v8716_v48  ;;  %16007 = vst [vmem:[#allocation77_spill] sm:$0xff] %v13711_v25  ;;  %v10856_v30 = vld [vmem:[%s15258_s3 + $0x260] sm:$0xff]  }
 0x352   :  { %9589 = vmatprep.subr.bf16.mxu1 %v10852_v4  ;;  %v9869_v48 = vpop.f32.mrf.mxu0  ;;  %v16008_v4 = vld [vmem:[#allocation28_spill] sm:$0xff] }
 0x353   :  { %v8733_v19 = vcombine.low %v16009_v31, %v16008_v4  ;;  %v13721_v57 = vadd.f32 %v9869_v48, %v9868_v13  ;;  %v10859_v13 = vld [vmem:[%s15258_s3 + $0x218] sm:$0xff]   ;;  %v16033_v31 = vld [vmem:[#allocation34_spill] sm:$0xff] }
 0x354   :  { %v9871_v3 = vpop.f32.mrf.mxu0 }
 0x355   :  { %9590 = vmatpush3.bf16.msra.mxu1 %v10853_v6  ;;  %16010 = vst [vmem:[#allocation104_spill] sm:$0xff] %v13721_v57  ;;  %v10857_v6 = vld [vmem:[%s15258_s3 + $0x220] sm:$0xff]   ;;  %v16015_v57 = vld [vmem:[#allocation119_spill] sm:$0xff] }
 0x356   :  { %9591 = vmatprep.subr.bf16.mxu1 %v10854_v9  ;;  %v10858_v9 = vld [vmem:[%s15258_s3 + $0x258] sm:$0xff]   ;;  %v9872_v53 = vpop.f32.mrf.mxu0 }
 0x357   :  { %v13730_v25 = vadd.f32 %v9872_v53, %v9871_v3 }
 0x358   :  { %5850 = vmatmul.mubr.bf16.gmra.mxu1 %v16011_v17  ;;  %v9874_v46 = vpop.f32.mrf.mxu0 }
 0x359   :  { %5857 = vmatprep.mubr.bf16.mxu1 %v8733_v19  ;;  %9592 = vmatpush3.bf16.msra.mxu1 %v10855_v42  ;;  %16012 = vst [vmem:[#allocation37_spill] sm:$0xff] %v13730_v25  ;;  %v10860_v42 = vld [vmem:[%s15258_s3 + $0x250] sm:$0xff]  }
 0x35a   :  { %9593 = vmatprep.subr.bf16.mxu1 %v10856_v30  ;;  %v9875_v48 = vpop.f32.mrf.mxu0  ;;  %v16013_v30 = vld [vmem:[#allocation55_spill] sm:$0xff] }
 0x35b   :  { %v8750_v19 = vcombine.low %v16013_v30, %v13540_v29  ;;  %v13740_v17 = vadd.f32 %v9875_v48, %v9874_v46  ;;  %v10863_v46 = vld [vmem:[%s15258_s3 + $0x208] sm:$0xff]   ;;  %v16018_v48 = vld [vmem:[#allocation8_spill] sm:$0xff] }
 0x35c   :  { %v9877_v3 = vpop.f32.mrf.mxu0  ;;  %v16032_v30 = vld [vmem:[#allocation36_spill] sm:$0xff] }
 0x35d   :  { %9594 = vmatpush3.bf16.msra.mxu1 %v10857_v6  ;;  %16014 = vst [vmem:[#allocation18_spill] sm:$0xff] %v13740_v17  ;;  %v10861_v6 = vld [vmem:[%s15258_s3 + $0x210] sm:$0xff]   ;;  %v8717_v4 = vcombine.low %v16033_v31, %v16032_v30  ;;  %v10873_v30 = vld [vmem:[%s15258_s3 + $0x2a0] sm:$0xff]  }
 0x35e   :  { %9595 = vmatprep.subr.bf16.mxu1 %v10858_v9  ;;  %v10862_v9 = vld [vmem:[%s15258_s3 + $0x248] sm:$0xff]   ;;  %v9878_v53 = vpop.f32.mrf.mxu0 }
 0x35f   :  { %v13749_v25 = vadd.f32 %v9878_v53, %v9877_v3  ;;  %v10866_v3 = vld [vmem:[%s15258_s3 + $0x2f8] sm:$0xff]   ;;  %v16021_v17 = vld [vmem:[#allocation94_spill] sm:$0xff] }
 0x360   :  { %5858 = vmatmul.mubr.bf16.gmra.mxu1 %v16015_v57  ;;  %v9880_v20 = vpop.f32.mrf.mxu0  ;;  %v10864_v57 = vld [vmem:[%s15258_s3 + $0x240] sm:$0xff]  }
 0x361   :  { %5865 = vmatprep.mubr.bf16.mxu1 %v8750_v19  ;;  %9596 = vmatpush3.bf16.msra.mxu1 %v10859_v13  ;;  %16016 = vst [vmem:[#allocation17_spill] sm:$0xff] %v13749_v25  ;;  %v10865_v19 = vld [vmem:[%s15258_s3 + $0x200] sm:$0xff]  }
 0x362   :  { %9597 = vmatprep.subr.bf16.mxu1 %v10860_v42  ;;  %v9881_v13 = vpop.f32.mrf.mxu0 }
 0x363   :  { %v13757_v42 = vadd.f32 %v9881_v13, %v9880_v20  ;;  %v8792_v13 = vcombine.low %v13190_v1, %v13230_v24 }
 0x365   :  { %9598 = vmatpush3.bf16.msra.mxu1 %v10861_v6  ;;  %16017 = vst [vmem:[#allocation21_spill] sm:$0xff] %v13757_v42  ;;  %v16019_v6 = vld [vmem:[#allocation13_spill] sm:$0xff] }
 0x366   :  { %9599 = vmatprep.subr.bf16.mxu1 %v10862_v9  ;;  %v16020_v9 = vld [vmem:[#allocation38_spill] sm:$0xff] }
 0x367   :  { %v8773_v53 = vcombine.low %v16020_v9, %v16019_v6 }
 0x368   :  { %5866 = vmatmul.mubr.bf16.gmra.mxu1 %v16018_v48 }
 0x369   :  { %5873 = vmatprep.mubr.bf16.mxu1 %v13398_v5  ;;  %9600 = vmatpush3.bf16.msra.mxu1 %v10863_v46 }
 0x36a   :  { %9601 = vmatprep.subr.bf16.mxu1 %v10864_v57 }
 0x36b   :  { %v9371_v20 = vpop.f32.mrf.mxu1 }
 0x36d   :  { %9602 = vmatpush3.bf16.msra.mxu1 %v10865_v19  ;;  %v9372_v5 = vpop.f32.mrf.mxu1  ;;  %v16022_v19 = vld [vmem:[#allocation90_spill] sm:$0xff] }
 0x36e   :  { %9651 = vmatprep.subr.bf16.mxu1 %v10866_v3  ;;  %v13771_v46 = vadd.f32 %v9372_v5, %v9371_v20  ;;  %v8809_v38 = vcombine.low %v16022_v19, %v16021_v17  ;;  %v16024_v5 = vld [vmem:[#allocation95_spill] sm:$0xff] }
 0x36f   :  { %v9374_v48 = vpop.f32.mrf.mxu1  ;;  %v8826_v35 = vcombine.low %v16024_v5, %v13578_v26  ;;  %v16026_v17 = vld [vmem:[#allocation51_spill] sm:$0xff] }
 0x370   :  { %5874 = vmatmul.mubr.bf16.gmra.mxu1 %v8773_v53 }
 0x371   :  { %5881 = vmatprep.mubr.bf16.mxu1 %v8792_v13  ;;  %v9375_v57 = vpop.f32.mrf.mxu1 }
 0x372   :  { %v13773_v42 = vadd.f32 %v9375_v57, %v9374_v48  ;;  %v16025_v48 = vld [vmem:[#allocation48_spill] sm:$0xff] }
 0x373   :  { %v9377_v25 = vpop.f32.mrf.mxu1 }
 0x375   :  { %v9378_v3 = vpop.f32.mrf.mxu1 }
 0x376   :  { %v13778_v6 = vadd.f32 %v9378_v3, %v9377_v25 }
 0x377   :  { %v9380_v9 = vpop.f32.mrf.mxu1 }
 0x378   :  { %5882 = vmatmul.mubr.bf16.gmra.mxu1 %v16023_v37 }
 0x379   :  { %5889 = vmatprep.mubr.bf16.mxu1 %v8809_v38  ;;  %v9381_v53 = vpop.f32.mrf.mxu1 }
 0x37a   :  { %v13780_v13 = vadd.f32 %v9381_v53, %v9380_v9 }
 0x37b   :  { %v9383_v20 = vpop.f32.mrf.mxu1 }
 0x37d   :  { %v9384_v57 = vpop.f32.mrf.mxu1 }
 0x37e   :  { %v13785_v10 = vadd.f32 %v9384_v57, %v9383_v20 }
 0x37f   :  { %v9386_v19 = vpop.f32.mrf.mxu1 }
 0x380   :  { %5890 = vmatmul.mubr.bf16.gmra.mxu1 %v16025_v48 }
 0x381   :  { %5897 = vmatprep.mubr.bf16.mxu1 %v8826_v35  ;;  %v9387_v37 = vpop.f32.mrf.mxu1 }
 0x382   :  { %v13787_v38 = vadd.f32 %v9387_v37, %v9386_v19  ;;  %v10867_v19 = vld [vmem:[%s15258_s3 + $0x2b8] sm:$0xff]  }
 0x384   :  { %v9883_v25 = vpop.f32.mrf.mxu0 }
 0x385   :  { %v9389_v3 = vpop.f32.mrf.mxu1 }
 0x386   :  { %v9884_v9 = vpop.f32.mrf.mxu0 }
 0x387   :  { %v13791_v53 = vadd.f32 %v9884_v9, %v9883_v25  ;;  %v9390_v5 = vpop.f32.mrf.mxu1  ;;  %v16029_v9 = vld [vmem:[#allocation61_spill] sm:$0xff] }
 0x388   :  { %5898 = vmatmul.mubr.bf16.gmra.mxu1 %v16026_v17  ;;  %v13793_v1 = vadd.f32 %v9390_v5, %v9389_v3  ;;  %v9886_v35 = vpop.f32.mrf.mxu0  ;;  %v10868_v17 = vld [vmem:[%s15258_s3 + $0x2f0] sm:$0xff]   ;;  %v13808_v5 = vld [vmem:[%s15259_s4] ss:$0 sm:$0xff] }
 0x389   :  { %5938 = vmatprep.mubr.bf16.mxu1 %v13410_v33  ;;  %16027 = vst [vmem:[#allocation11_spill] sm:$0xff] %v13791_v53  ;;  %v9392_v48 = vpop.f32.mrf.mxu1  ;;  %v16030_v53 = vld [vmem:[#allocation125_spill] sm:$0xff] }
 0x38a   :  { %v9887_v20 = vpop.f32.mrf.mxu0  ;;  %v16031_v24 = vcombine.low %v16029_v9, %v16030_v53  ;;  %v10871_v9 = vld [vmem:[%s15258_s3 + $0x2a8] sm:$0xff]  }
 0x38b   :  { %v13798_v57 = vadd.f32 %v9887_v20, %v9886_v35  ;;  %v9393_v37 = vpop.f32.mrf.mxu1  ;;  %v10869_v35 = vld [vmem:[%s15258_s3 + $0x2b0] sm:$0xff]  }
 0x38c   :  { %v13803_v33 = vadd.f32 %v9393_v37, %v9392_v48  ;;  %v10870_v37 = vld [vmem:[%s15258_s3 + $0x2e8] sm:$0xff]  }
 0x38d   :  { %16028 = vst [vmem:[#allocation39_spill] sm:$0xff] %v13798_v57  ;;  %v9889_v25 = vpop.f32.mrf.mxu0  ;;  %v5553_v57 = vadd.f32 %v13618_v58, %v13808_v5  ;;  %v10872_v58 = vld [vmem:[%s15258_s3 + $0x2e0] sm:$0xff]  }
 0x38f   :  { %v9890_v48 = vpop.f32.mrf.mxu0 }
 0x390   :  { %v9411_v3 = vpop.f32.mrf.mxu1  ;;  %5939 = vmatmul.mubr.bf16.vlgmr.msra.gmra.mxu1 %v16031_v24  ;;  %v13822_v16 = vadd.f32 %v9890_v48, %v9889_v25  ;;  %v5556_v25 = vadd.f32 %v13630_v7, %v13808_v5  ;;  %v10874_v7 = vld [vmem:[%s15258_s3 + $0x2d8] sm:$0xff]  }
 0x391   :  { %9652 = vmatpush3.bf16.msra.mxu1 %v10867_v19  ;;  %5946 = vmatprep.mubr.bf16.mxu1 %v13418_v40  ;;  %v9892_v53 = vpop.f32.mrf.mxu0 }
 0x392   :  { %v9412_v20 = vpop.f32.mrf.mxu1  ;;  %9653 = vmatprep.subr.bf16.mxu1 %v10868_v17 }
 0x393   :  { %v9413_v24 = vadd.f32 %v9412_v20, %v9411_v3  ;;  %v9893_v17 = vpop.f32.mrf.mxu0 }
 0x394   :  { %v9414_v19 = vpop.f32.mrf.mxu1 }
 0x395   :  { %v13824_v40 = vadd.f32 %v9413_v24, %v5553_v57  ;;  %9654 = vmatpush3.bf16.msra.mxu1 %v10869_v35  ;;  %v13836_v57 = vadd.f32 %v9893_v17, %v9892_v53  ;;  %v9895_v35 = vpop.f32.mrf.mxu0 }
 0x396   :  { %v9415_v54 = vpop.f32.mrf.mxu1  ;;  %9655 = vmatprep.subr.bf16.mxu1 %v10870_v37 }
 0x397   :  { %16034 = vst [vmem:[#allocation12_spill] sm:$0xff] %v13836_v57  ;;  %v9416_v3 = vadd.f32 %v9415_v54, %v9414_v19  ;;  %v9896_v37 = vpop.f32.mrf.mxu0  ;;  %v5561_v54 = vadd.f32 %v13653_v39, %v13808_v5  ;;  %v8734_v57 = vcombine.low %v15925_v34, %v13038_v8  ;;  %v10876_v39 = vld [vmem:[%s15258_s3 + $0x2d0] sm:$0xff]  }
 0x398   :  { %v9417_v48 = vpop.f32.mrf.mxu1  ;;  %5947 = vmatmul.mubr.bf16.gmra.mxu1 %v8717_v4  ;;  %v13849_v4 = vadd.f32 %v9896_v37, %v9895_v35  ;;  %v5564_v35 = vadd.f32 %v13662_v14, %v13808_v5  ;;  %v16035_v37 = vrot.slane %v15960_v11, 2  ;;  %v10877_v34 = vld [vmem:[%s15258_s3 + $0x290] sm:$0xff]   ;;  %v5569_v11 = vadd.f32 %v13670_v49, %v13808_v5  ;;  %v10880_v49 = vld [vmem:[%s15258_s3 + $0x2c0] sm:$0xff]  }
 0x399   :  { %v13838_v20 = vadd.f32 %v9416_v3, %v5556_v25  ;;  %5954 = vmatprep.mubr.bf16.mxu1 %v13422_v45  ;;  %9656 = vmatpush3.bf16.msra.mxu1 %v10871_v9  ;;  %v15522_v45 = vrot.slane %v15968_v61, 2  ;;  %v9898_v19 = vpop.f32.mrf.mxu0 }
 0x39a   :  { %v9418_v24 = vpop.f32.mrf.mxu1  ;;  %9657 = vmatprep.subr.bf16.mxu1 %v10872_v58  ;;  %v10875_v58 = vld [vmem:[%s15258_s3 + $0x298] sm:$0xff]  }
 0x39b   :  { %v9419_v53 = vadd.f32 %v9418_v24, %v9417_v48  ;;  %v9899_v25 = vpop.f32.mrf.mxu0  ;;  %v8752_v24 = vcombine.low %v16035_v37, %v15522_v45  ;;  %v8751_v37 = vcombine.low %v13045_v27, %v13376_v32  ;;  %v10881_v27 = vld [vmem:[%s15258_s3 + $0x280] sm:$0xff]   ;;  %v5580_v45 = vadd.f32 %v13703_v12, %v13808_v5 }
 0x39c   :  { %v9420_v9 = vpop.f32.mrf.mxu1  ;;  %v13864_v48 = vadd.f32 %v9899_v25, %v9898_v19  ;;  %v10878_v19 = vld [vmem:[%s15258_s3 + $0x2c8] sm:$0xff]  }
 0x39d   :  { %v13852_v17 = vadd.f32 %v9419_v53, %v5561_v54  ;;  %9658 = vmatpush3.bf16.msra.mxu1 %v10873_v30  ;;  %v9901_v54 = vpop.f32.mrf.mxu0 }
 0x39e   :  { %v9421_v3 = vpop.f32.mrf.mxu1  ;;  %9659 = vmatprep.subr.bf16.mxu1 %v10874_v7 }
 0x39f   :  { %v9422_v30 = vadd.f32 %v9421_v3, %v9420_v9  ;;  %v9902_v14 = vpop.f32.mrf.mxu0 }
 0x3a0   :  { %v9423_v53 = vpop.f32.mrf.mxu1  ;;  %5955 = vmatmul.mubr.bf16.gmra.mxu1 %v8734_v57  ;;  %v13880_v9 = vadd.f32 %v9902_v14, %v9901_v54 }
 0x3a1   :  { %v13870_v8 = vadd.f32 %v9422_v30, %v5564_v35  ;;  %5962 = vmatprep.mubr.bf16.mxu1 %v8752_v24  ;;  %9660 = vmatpush3.bf16.msra.mxu1 %v10875_v58  ;;  %v9904_v25 = vpop.f32.mrf.mxu0  ;;  %v10879_v35 = vld [vmem:[%s15258_s3 + $0x288] sm:$0xff]   ;;  %v5572_v24 = vadd.f32 %v13683_v41, %v13808_v5  ;;  %v10882_v41 = vld [vmem:[%s15258_s3 + $0x378] sm:$0xff]  }
 0x3a2   :  { %v9424_v7 = vpop.f32.mrf.mxu1  ;;  %9661 = vmatprep.subr.bf16.mxu1 %v10876_v39 }
 0x3a3   :  { %v9425_v57 = vadd.f32 %v9424_v7, %v9423_v53  ;;  %v9905_v39 = vpop.f32.mrf.mxu0 }
 0x3a4   :  { %v9426_v3 = vpop.f32.mrf.mxu1  ;;  %v13894_v54 = vadd.f32 %v9905_v39, %v9904_v25 }
 0x3a5   :  { %v13882_v58 = vadd.f32 %v9425_v57, %v5569_v11  ;;  %9662 = vmatpush3.bf16.msra.mxu1 %v10877_v34  ;;  %v5577_v57 = vadd.f32 %v13688_v15, %v13808_v5 }
 0x3a6   :  { %v9427_v30 = vpop.f32.mrf.mxu1  ;;  %9663 = vmatprep.subr.bf16.mxu1 %v10878_v19  ;;  %16036 = vst [vmem:[#allocation15_spill] sm:$0xff] %v13894_v54 }
 0x3a7   :  { %v9428_v53 = vadd.f32 %v9427_v30, %v9426_v3  ;;  %v9987_v34 = vpop.f32.mrf.mxu0 }
 0x3a8   :  { %v9429_v14 = vpop.f32.mrf.mxu1  ;;  %5963 = vmatmul.mubr.bf16.gmra.mxu1 %v8751_v37 }
 0x3a9   :  { %v13896_v7 = vadd.f32 %v9428_v53, %v5572_v24  ;;  %5970 = vmatprep.mubr.bf16.mxu1 %v13440_v56  ;;  %9664 = vmatpush3.bf16.msra.mxu1 %v10879_v35  ;;  %v9988_v19 = vpop.f32.mrf.mxu0  ;;  %v16037_v24 = vld [vmem:[#allocation57_spill] sm:$0xff]  ;;  %v16038_v53 = vld [vmem:[#allocation56_spill] sm:$0xff] }
 0x3aa   :  { %v9430_v11 = vpop.f32.mrf.mxu1  ;;  %9665 = vmatprep.subr.bf16.mxu1 %v10880_v49  ;;  %v13907_v25 = vadd.f32 %v9988_v19, %v9987_v34  ;;  %v8775_v49 = vcombine.low %v16038_v53, %v16037_v24 }
 0x3ab   :  { %v9431_v3 = vadd.f32 %v9430_v11, %v9429_v14  ;;  %v9990_v39 = vpop.f32.mrf.mxu0 }
 0x3ac   :  { %v9432_v56 = vpop.f32.mrf.mxu1 }
 0x3ad   :  { %v13909_v35 = vadd.f32 %v9431_v3, %v5577_v57  ;;  %9666 = vmatpush3.bf16.msra.mxu1 %v10881_v27  ;;  %v9991_v30 = vpop.f32.mrf.mxu0  ;;  %v5585_v57 = vadd.f32 %v13771_v46, %v13808_v5 }
 0x3ae   :  { %v9433_v37 = vpop.f32.mrf.mxu1  ;;  %9715 = vmatprep.subr.bf16.mxu1 %v10882_v41  ;;  %v13915_v54 = vadd.f32 %v9991_v30, %v9990_v39 }
 0x3af   :  { %v9434_v15 = vadd.f32 %v9433_v37, %v9432_v56  ;;  %v9993_v34 = vpop.f32.mrf.mxu0  ;;  %v16039_v37 = vld [vmem:[#allocation31_spill] sm:$0xff] }
 0x3b0   :  { %v9435_v19 = vpop.f32.mrf.mxu1  ;;  %5971 = vmatmul.mubr.bf16.gmra.mxu1 %v8775_v49 }
 0x3b1   :  { %v13917_v14 = vadd.f32 %v9434_v15, %v5580_v45  ;;  %5978 = vmatprep.mubr.bf16.mxu1 %v13450_v52  ;;  %v9994_v27 = vpop.f32.mrf.mxu0  ;;  %v8793_v45 = vcombine.low %v16039_v37, %v13192_v36  ;;  %v5588_v52 = vadd.f32 %v13773_v42, %v13808_v5  ;;  %v15523_v42 = vrot.slane %v15975_v2, 2 }
 0x3b2   :  { %v9436_v11 = vpop.f32.mrf.mxu1  ;;  %v13922_v3 = vadd.f32 %v9994_v27, %v9993_v34 }
 0x3b3   :  { %v9437_v41 = vadd.f32 %v9436_v11, %v9435_v19  ;;  %v9996_v24 = vpop.f32.mrf.mxu0  ;;  %v5593_v11 = vadd.f32 %v13778_v6, %v13808_v5  ;;  %v16041_v6 = vrot.slane %v12795_v0, 2 }
 0x3b4   :  { %v9438_v12 = vpop.f32.mrf.mxu1 }
 0x3b5   :  { %v13924_v39 = vadd.f32 %v9437_v41, %v5585_v57  ;;  %v9997_v56 = vpop.f32.mrf.mxu0 }
 0x3b6   :  { %v9439_v30 = vpop.f32.mrf.mxu1  ;;  %v13930_v53 = vadd.f32 %v9997_v56, %v9996_v24 }
 0x3b7   :  { %v9440_v49 = vadd.f32 %v9439_v30, %v9438_v12  ;;  %v9999_v15 = vpop.f32.mrf.mxu0 }
 0x3b8   :  { %v9441_v46 = vpop.f32.mrf.mxu1  ;;  %5979 = vmatmul.mubr.bf16.gmra.mxu1 %v8793_v45  ;;  %v5596_v45 = vadd.f32 %v13780_v13, %v13808_v5  ;;  %v5601_v13 = vadd.f32 %v13785_v10, %v13808_v5  ;;  %v16047_v10 = vld [vmem:[#allocation120_spill] sm:$0xff] }
 0x3b9   :  { %v13932_v34 = vadd.f32 %v9440_v49, %v5588_v52  ;;  %5986 = vmatprep.mubr.bf16.mxu1 %v13456_v28  ;;  %v10000_v19 = vpop.f32.mrf.mxu0  ;;  %v8828_v49 = vcombine.low %v16041_v6, %v15523_v42 }
 0x3ba   :  { %v9442_v27 = vpop.f32.mrf.mxu1  ;;  %v13937_v57 = vadd.f32 %v10000_v19, %v9999_v15  ;;  %v16042_v19 = vld [vmem:[#allocation89_spill] sm:$0xff] }
 0x3bb   :  { %v9443_v36 = vadd.f32 %v9442_v27, %v9441_v46  ;;  %v10002_v41 = vpop.f32.mrf.mxu0  ;;  %v16043_v27 = vcombine.low %v13207_v63, %v16042_v19  ;;  %v5604_v63 = vadd.f32 %v13787_v38, %v13808_v5  ;;  %v5609_v38 = vadd.f32 %v13793_v1, %v13808_v5 }
 0x3bc   :  { %16040 = vst [vmem:[#allocation41_spill] sm:$0xff] %v13937_v57  ;;  %v9444_v24 = vpop.f32.mrf.mxu1  ;;  %v5612_v1 = vadd.f32 %v13803_v33, %v13808_v5  ;;  %v10886_v33 = vld [vmem:[%s15258_s3 + $0x368] sm:$0xff]  }
 0x3bd   :  { %v13940_v12 = vadd.f32 %v9443_v36, %v5593_v11  ;;  %v10003_v56 = vpop.f32.mrf.mxu0 }
 0x3be   :  { %v9445_v30 = vpop.f32.mrf.mxu1  ;;  %v13944_v28 = vadd.f32 %v10003_v56, %v10002_v41 }
 0x3bf   :  { %v9446_v52 = vadd.f32 %v9445_v30, %v9444_v24  ;;  %v10005_v15 = vpop.f32.mrf.mxu0 }
 0x3c0   :  { %v9447_v46 = vpop.f32.mrf.mxu1  ;;  %5987 = vmatmul.mubr.bf16.gmra.mxu1 %v16043_v27  ;;  %v16046_v27 = vld [vmem:[#allocation91_spill] sm:$0xff] }
 0x3c1   :  { %v13953_v11 = vadd.f32 %v9446_v52, %v5596_v45  ;;  %5994 = vmatprep.mubr.bf16.mxu1 %v8828_v49  ;;  %v10006_v36 = vpop.f32.mrf.mxu0 }
 0x3c2   :  { %v9448_v57 = vpop.f32.mrf.mxu1  ;;  %v13957_v41 = vadd.f32 %v10006_v36, %v10005_v15  ;;  %v16048_v15 = vcombine.low %v16046_v27, %v16047_v10  ;;  %v10884_v27 = vld [vmem:[%s15258_s3 + $0x370] sm:$0xff]  }
 0x3c3   :  { %v9449_v24 = vadd.f32 %v9448_v57, %v9447_v46  ;;  %v10008_v56 = vpop.f32.mrf.mxu0  ;;  %v16049_v46 = vld [vmem:[#allocation66_spill] sm:$0xff] }
 0x3c4   :  { %v9450_v0 = vpop.f32.mrf.mxu1 }
 0x3c5   :  { %v13959_v30 = vadd.f32 %v9449_v24, %v5601_v13  ;;  %v10009_v6 = vpop.f32.mrf.mxu0 }
 0x3c6   :  { %v9451_v42 = vpop.f32.mrf.mxu1  ;;  %v13963_v45 = vadd.f32 %v10009_v6, %v10008_v56  ;;  %v10883_v6 = vld [vmem:[%s15258_s3 + $0x338] sm:$0xff]  }
 0x3c7   :  { %v9452_v52 = vadd.f32 %v9451_v42, %v9450_v0  ;;  %v13965_v49 = vpop.f32.mrf.mxu0 }
 0x3c8   :  { %16044 = vst [vmem:[#allocation43_spill] sm:$0xff] %v13963_v45  ;;  %16045 = vst [vmem:[#allocation53_spill] sm:$0xff] %v13965_v49  ;;  %v9453_v19 = vpop.f32.mrf.mxu1  ;;  %5995 = vmatmul.mubr.bf16.gmra.mxu1 %v16048_v15 }
 0x3c9   :  { %v13970_v57 = vadd.f32 %v9452_v52, %v5604_v63  ;;  %6035 = vmatprep.mubr.bf16.mxu1 %v16049_v46  ;;  %v13973_v36 = vpop.f32.mrf.mxu0 }
 0x3ca   :  { %16050 = vst [vmem:[#allocation24_spill] sm:$0xff] %v13973_v36  ;;  %v9454_v13 = vpop.f32.mrf.mxu1 }
 0x3cb   :  { %v9455_v24 = vadd.f32 %v9454_v13, %v9453_v19  ;;  %v13977_v56 = vpop.f32.mrf.mxu0  ;;  %v16054_v13 = vld [vmem:[#allocation65_spill] sm:$0xff] }
 0x3cc   :  { %16051 = vst [vmem:[#allocation6_spill] sm:$0xff] %v13977_v56  ;;  %v9456_v42 = vpop.f32.mrf.mxu1 }
 0x3cd   :  { %v13979_v0 = vadd.f32 %v9455_v24, %v5609_v38  ;;  %v13984_v63 = vpop.f32.mrf.mxu0  ;;  %v16055_v24 = vld [vmem:[#allocation101_spill] sm:$0xff] }
 0x3ce   :  { %16052 = vst [vmem:[#allocation64_spill] sm:$0xff] %v13984_v63  ;;  %v9457_v52 = vpop.f32.mrf.mxu1  ;;  %v10885_v63 = vld [vmem:[%s15258_s3 + $0x330] sm:$0xff]  }
 0x3cf   :  { %v9458_v19 = vadd.f32 %v9457_v52, %v9456_v42  ;;  %v13991_v15 = vpop.f32.mrf.mxu0 }
 0x3d0   :  { %16053 = vst [vmem:[#allocation105_spill] sm:$0xff] %v13991_v15  ;;  %v9475_v46 = vpop.f32.mrf.mxu1  ;;  %6036 = vmatmul.mubr.bf16.vlgmr.msra.gmra.mxu1 %v16054_v13 }
 0x3d1   :  { %v13994_v38 = vadd.f32 %v9458_v19, %v5612_v1  ;;  %9716 = vmatpush3.bf16.msra.mxu1 %v10883_v6  ;;  %6043 = vmatprep.mubr.bf16.mxu1 %v16055_v24  ;;  %v14000_v56 = vpop.f32.mrf.mxu0  ;;  %v10887_v1 = vld [vmem:[%s15258_s3 + $0x328] sm:$0xff]  }
 0x3d2   :  { %16056 = vst [vmem:[#allocation119_spill] sm:$0xff] %v14000_v56  ;;  %v9476_v36 = vpop.f32.mrf.mxu1  ;;  %9717 = vmatprep.subr.bf16.mxu1 %v10884_v27  ;;  %v10888_v27 = vld [vmem:[%s15258_s3 + $0x360] sm:$0xff]  }
 0x3d3   :  { %v9477_v5 = vadd.f32 %v9476_v36, %v9475_v46  ;;  %v14005_v42 = vpop.f32.mrf.mxu0 }
 0x3d4   :  { %16057 = vst [vmem:[#allocation8_spill] sm:$0xff] %v14005_v42  ;;  %v9478_v52 = vpop.f32.mrf.mxu1  ;;  %v16059_v42 = vld [vmem:[#allocation69_spill] sm:$0xff] }
 0x3d5   :  { %v14008_v6 = vadd.f32 %v9477_v5, %v13824_v40  ;;  %9718 = vmatpush3.bf16.msra.mxu1 %v10885_v63  ;;  %v14013_v19 = vpop.f32.mrf.mxu0  ;;  %v16060_v63 = vld [vmem:[#allocation110_spill] sm:$0xff]  ;;  %v10889_v5 = vld [vmem:[%s15258_s3 + $0x320] sm:$0xff]  }
 0x3d6   :  { %16058 = vst [vmem:[#allocation13_spill] sm:$0xff] %v14013_v19  ;;  %v9479_v13 = vpop.f32.mrf.mxu1  ;;  %9719 = vmatprep.subr.bf16.mxu1 %v10886_v33 }
 0x3d7   :  { %v9480_v36 = vadd.f32 %v9479_v13, %v9478_v52  ;;  %v10023_v46 = vpop.f32.mrf.mxu0  ;;  %v10890_v52 = vld [vmem:[%s15258_s3 + $0x358] sm:$0xff]  }
 0x3d8   :  { %v9481_v24 = vpop.f32.mrf.mxu1  ;;  %6044 = vmatmul.mubr.bf16.gmra.mxu1 %v16059_v42 }
 0x3d9   :  { %v14020_v40 = vadd.f32 %v9480_v36, %v13838_v20  ;;  %6051 = vmatprep.mubr.bf16.mxu1 %v16060_v63  ;;  %9720 = vmatpush3.bf16.msra.mxu1 %v10887_v1  ;;  %v10024_v33 = vpop.f32.mrf.mxu0  ;;  %v10891_v1 = vld [vmem:[%s15258_s3 + $0x318] sm:$0xff]  }
 0x3da   :  { %v9482_v19 = vpop.f32.mrf.mxu1  ;;  %9721 = vmatprep.subr.bf16.mxu1 %v10888_v27  ;;  %v14029_v13 = vadd.f32 %v10024_v33, %v10023_v46  ;;  %v10892_v46 = vld [vmem:[%s15258_s3 + $0x350] sm:$0xff]  }
 0x3db   :  { %v9483_v42 = vadd.f32 %v9482_v19, %v9481_v24  ;;  %v14031_v56 = vpop.f32.mrf.mxu0 }
 0x3dc   :  { %16061 = vst [vmem:[#allocation38_spill] sm:$0xff] %v14029_v13  ;;  %16062 = vst [vmem:[#allocation45_spill] sm:$0xff] %v14031_v56  ;;  %v9484_v20 = vpop.f32.mrf.mxu1  ;;  %v16064_v56 = vld [vmem:[#allocation111_spill] sm:$0xff] }
 0x3dd   :  { %v14034_v36 = vadd.f32 %v9483_v42, %v13852_v17  ;;  %9722 = vmatpush3.bf16.msra.mxu1 %v10889_v5  ;;  %v14039_v63 = vpop.f32.mrf.mxu0  ;;  %v16065_v5 = vld [vmem:[#allocation30_spill] sm:$0xff]  ;;  %v16068_v13 = vld [vmem:[#allocation7_spill] sm:$0xff] }
 0x3de   :  { %16063 = vst [vmem:[#allocation48_spill] sm:$0xff] %v14039_v63  ;;  %v9485_v27 = vpop.f32.mrf.mxu1  ;;  %9723 = vmatprep.subr.bf16.mxu1 %v10890_v52  ;;  %v10893_v42 = vld [vmem:[%s15258_s3 + $0x310] sm:$0xff]  }
 0x3df   :  { %v9486_v19 = vadd.f32 %v9485_v27, %v9484_v20  ;;  %v10029_v24 = vpop.f32.mrf.mxu0  ;;  %v10894_v20 = vld [vmem:[%s15258_s3 + $0x348] sm:$0xff]  }
 0x3e0   :  { %v9487_v33 = vpop.f32.mrf.mxu1  ;;  %6052 = vmatmul.mubr.bf16.gmra.mxu1 %v16064_v56 }
 0x3e1   :  { %v14046_v17 = vadd.f32 %v9486_v19, %v13870_v8  ;;  %6059 = vmatprep.mubr.bf16.mxu1 %v16065_v5  ;;  %9724 = vmatpush3.bf16.msra.mxu1 %v10891_v1  ;;  %v10030_v52 = vpop.f32.mrf.mxu0  ;;  %v10895_v1 = vld [vmem:[%s15258_s3 + $0x308] sm:$0xff]  }
 0x3e2   :  { %v9488_v63 = vpop.f32.mrf.mxu1  ;;  %9725 = vmatprep.subr.bf16.mxu1 %v10892_v46  ;;  %v14055_v27 = vadd.f32 %v10030_v52, %v10029_v24  ;;  %v16067_v46 = vld [vmem:[#allocation102_spill] sm:$0xff] }
 0x3e3   :  { %v9489_v56 = vadd.f32 %v9488_v63, %v9487_v33  ;;  %v10032_v15 = vpop.f32.mrf.mxu0  ;;  %v9189_v45 = vpack.c.bf16 %v16068_v13, %v16067_v46  ;;  %v10896_v63 = vld [vmem:[%s15258_s3 + $0x340] sm:$0xff]   ;;  %v16070_v52 = vld [vmem:[#allocation78_spill] sm:$0xff] }
 0x3e4   :  { %16066 = vst [vmem:[#allocation51_spill] sm:$0xff] %v14055_v27  ;;  %v9490_v8 = vpop.f32.mrf.mxu1  ;;  %v16071_v46 = vld [vmem:[#allocation40_spill] sm:$0xff] }
 0x3e5   :  { %v14058_v19 = vadd.f32 %v9489_v56, %v13882_v58  ;;  %9726 = vmatpush3.bf16.msra.mxu1 %v10893_v42  ;;  %v10033_v5 = vpop.f32.mrf.mxu0  ;;  %v10897_v56 = vld [vmem:[%s15258_s3 + $0x300] sm:$0xff]  }
 0x3e6   :  { %v9491_v49 = vpop.f32.mrf.mxu1  ;;  %9727 = vmatprep.subr.bf16.mxu1 %v10894_v20  ;;  %v14068_v24 = vadd.f32 %v10033_v5, %v10032_v15  ;;  %v10898_v15 = vld [vmem:[%s15258_s3 + $0x3f8] sm:$0xff]  }
 0x3e7   :  { %v9492_v33 = vadd.f32 %v9491_v49, %v9490_v8 }
 0x3e8   :  { %16069 = vst [vmem:[#allocation61_spill] sm:$0xff] %v14068_v24  ;;  %v9493_v58 = vpop.f32.mrf.mxu1  ;;  %6060 = vmatmul.mubr.bf16.gmra.mxu1 %v9189_v45 }
 0x3e9   :  { %v14071_v42 = vadd.f32 %v9492_v33, %v13896_v7  ;;  %6067 = vmatprep.mubr.bf16.mxu1 %v16070_v52  ;;  %9728 = vmatpush3.bf16.msra.mxu1 %v10895_v1 }
 0x3ea   :  { %v9494_v20 = vpop.f32.mrf.mxu1  ;;  %9729 = vmatprep.subr.bf16.mxu1 %v10896_v63  ;;  %v16072_v63 = vld [vmem:[#allocation42_spill] sm:$0xff] }
 0x3eb   :  { %v9495_v5 = vadd.f32 %v9494_v20, %v9493_v58 }
 0x3ec   :  { %v9496_v49 = vpop.f32.mrf.mxu1 }
 0x3ed   :  { %v14081_v45 = vadd.f32 %v9495_v5, %v13909_v35  ;;  %9730 = vmatpush3.bf16.msra.mxu1 %v10897_v56  ;;  %v16073_v5 = vld [vmem:[#allocation14_spill] sm:$0xff] }
 0x3ee   :  { %v9497_v7 = vpop.f32.mrf.mxu1  ;;  %9779 = vmatprep.subr.bf16.mxu1 %v10898_v15 }
 0x3ef   :  { %v9498_v8 = vadd.f32 %v9497_v7, %v9496_v49  ;;  %v16074_v49 = vld [vmem:[#allocation19_spill] sm:$0xff] }
 0x3f0   :  { %v9499_v1 = vpop.f32.mrf.mxu1  ;;  %6068 = vmatmul.mubr.bf16.gmra.mxu1 %v16071_v46 }
 0x3f1   :  { %v14085_v33 = vadd.f32 %v9498_v8, %v13917_v14  ;;  %6075 = vmatprep.mubr.bf16.mxu1 %v16072_v63 }
 0x3f2   :  { %v9500_v52 = vpop.f32.mrf.mxu1 }
 0x3f3   :  { %v9501_v24 = vadd.f32 %v9500_v52, %v9499_v1  ;;  %v16076_v52 = vld [vmem:[#allocation97_spill] sm:$0xff] }
 0x3f4   :  { %v9502_v27 = vpop.f32.mrf.mxu1 }
 0x3f5   :  { %v14089_v58 = vadd.f32 %v9501_v24, %v13924_v39  ;;  %v16075_v24 = vld [vmem:[#allocation79_spill] sm:$0xff] }
 0x3f6   :  { %v9503_v35 = vpop.f32.mrf.mxu1 }
 0x3f7   :  { %v9504_v20 = vadd.f32 %v9503_v35, %v9502_v27 }
 0x3f8   :  { %v9505_v56 = vpop.f32.mrf.mxu1  ;;  %6076 = vmatmul.mubr.bf16.gmra.mxu1 %v16073_v5 }
 0x3f9   :  { %v14093_v15 = vadd.f32 %v9504_v20, %v13932_v34  ;;  %6083 = vmatprep.mubr.bf16.mxu1 %v16074_v49 }
 0x3fa   :  { %v9506_v14 = vpop.f32.mrf.mxu1 }
 0x3fb   :  { %v9507_v7 = vadd.f32 %v9506_v14, %v9505_v56 }
 0x3fc   :  { %v9508_v8 = vpop.f32.mrf.mxu1 }
 0x3fd   :  { %v14097_v46 = vadd.f32 %v9507_v7, %v13940_v12  ;;  %v16077_v12 = vld [vmem:[#allocation16_spill] sm:$0xff] }
 0x3fe   :  { %v9509_v1 = vpop.f32.mrf.mxu1  ;;  %v9199_v49 = vpack.c.bf16 %v16077_v12, %v15996_v59  ;;  %v10900_v59 = vld [vmem:[%s15258_s3 + $0x3f0] sm:$0xff]  }
 0x3ff   :  { %v9510_v63 = vadd.f32 %v9509_v1, %v9508_v8 }
 0x400   :  { %v9511_v39 = vpop.f32.mrf.mxu1  ;;  %6084 = vmatmul.mubr.bf16.gmra.mxu1 %v16075_v24 }
 0x401   :  { %v14101_v27 = vadd.f32 %v9510_v63, %v13953_v11  ;;  %6091 = vmatprep.mubr.bf16.mxu1 %v16076_v52  ;;  %v16078_v11 = vld [vmem:[#allocation22_spill] sm:$0xff] }
 0x402   :  { %v9512_v34 = vpop.f32.mrf.mxu1 }
 0x403   :  { %v9513_v35 = vadd.f32 %v9512_v34, %v9511_v39 }
 0x404   :  { %v9514_v20 = vpop.f32.mrf.mxu1 }
 0x405   :  { %v14105_v5 = vadd.f32 %v9513_v35, %v13959_v30  ;;  %v10899_v30 = vld [vmem:[%s15258_s3 + $0x3b8] sm:$0xff]   ;;  %v16079_v35 = vld [vmem:[#allocation25_spill] sm:$0xff] }
 0x406   :  { %v9515_v56 = vpop.f32.mrf.mxu1 }
 0x407   :  { %v9516_v14 = vadd.f32 %v9515_v56, %v9514_v20  ;;  %v16080_v56 = vld [vmem:[#allocation52_spill] sm:$0xff] }
 0x408   :  { %v9517_v7 = vpop.f32.mrf.mxu1  ;;  %6092 = vmatmul.mubr.bf16.gmra.mxu1 %v9199_v49 }
 0x409   :  { %v14110_v8 = vadd.f32 %v9516_v14, %v13970_v57  ;;  %6132 = vmatprep.mubr.bf16.mxu1 %v16078_v11  ;;  %v10902_v14 = vld [vmem:[%s15258_s3 + $0x3e8] sm:$0xff]  }
 0x40a   :  { %v9518_v1 = vpop.f32.mrf.mxu1 }
 0x40b   :  { %v9519_v63 = vadd.f32 %v9518_v1, %v9517_v7 }
 0x40c   :  { %v9520_v24 = vpop.f32.mrf.mxu1 }
 0x40d   :  { %v14114_v39 = vadd.f32 %v9519_v63, %v13979_v0  ;;  %v10901_v0 = vld [vmem:[%s15258_s3 + $0x3b0] sm:$0xff]  }
 0x40e   :  { %v9521_v52 = vpop.f32.mrf.mxu1 }
 0x40f   :  { %v9522_v34 = vadd.f32 %v9521_v52, %v9520_v24  ;;  %v10904_v24 = vld [vmem:[%s15258_s3 + $0x3e0] sm:$0xff]  }
 0x410   :  { %v9539_v57 = vpop.f32.mrf.mxu1  ;;  %6133 = vmatmul.mubr.bf16.vlgmr.msra.gmra.mxu1 %v16079_v35 }
 0x411   :  { %v14124_v20 = vadd.f32 %v9522_v34, %v13994_v38  ;;  %9780 = vmatpush3.bf16.msra.mxu1 %v10899_v30  ;;  %6140 = vmatprep.mubr.bf16.mxu1 %v16080_v56  ;;  %v10903_v38 = vld [vmem:[%s15258_s3 + $0x3a8] sm:$0xff]   ;;  %v10906_v56 = vld [vmem:[%s15258_s3 + $0x3d8] sm:$0xff]  }
 0x412   :  { %v9540_v49 = vpop.f32.mrf.mxu1  ;;  %9781 = vmatprep.subr.bf16.mxu1 %v10900_v59  ;;  %v16081_v59 = vld [vmem:[#allocation54_spill] sm:$0xff] }
 0x413   :  { %v9541_v7 = vadd.f32 %v9540_v49, %v9539_v57  ;;  %v10905_v57 = vld [vmem:[%s15258_s3 + $0x3a0] sm:$0xff]  }
 0x414   :  { %v9542_v11 = vpop.f32.mrf.mxu1 }
 0x415   :  { %v14134_v1 = vadd.f32 %v9541_v7, %v14008_v6  ;;  %9782 = vmatpush3.bf16.msra.mxu1 %v10901_v0  ;;  %v16082_v6 = vld [vmem:[#allocation82_spill] sm:$0xff] }
 0x416   :  { %v9543_v63 = vpop.f32.mrf.mxu1  ;;  %9783 = vmatprep.subr.bf16.mxu1 %v10902_v14 }
 0x417   :  { %v9544_v30 = vadd.f32 %v9543_v63, %v9542_v11  ;;  %v10908_v11 = vld [vmem:[%s15258_s3 + $0x3d0] sm:$0xff]  }
 0x418   :  { %v9545_v52 = vpop.f32.mrf.mxu1  ;;  %6141 = vmatmul.mubr.bf16.gmra.mxu1 %v16081_v59  ;;  %v10909_v59 = vld [vmem:[%s15258_s3 + $0x390] sm:$0xff]  }
 0x419   :  { %v14144_v34 = vadd.f32 %v9544_v30, %v14020_v40  ;;  %6148 = vmatprep.mubr.bf16.mxu1 %v16082_v6  ;;  %9784 = vmatpush3.bf16.msra.mxu1 %v10903_v38  ;;  %v10907_v40 = vld [vmem:[%s15258_s3 + $0x398] sm:$0xff]  }
 0x41a   :  { %v9546_v35 = vpop.f32.mrf.mxu1  ;;  %9785 = vmatprep.subr.bf16.mxu1 %v10904_v24  ;;  %v16083_v24 = vld [vmem:[#allocation29_spill] sm:$0xff] }
 0x41b   :  { %v9547_v0 = vadd.f32 %v9546_v35, %v9545_v52 }
 0x41c   :  { %v9548_v49 = vpop.f32.mrf.mxu1 }
 0x41d   :  { %v14154_v14 = vadd.f32 %v9547_v0, %v14034_v36  ;;  %9786 = vmatpush3.bf16.msra.mxu1 %v10905_v57  ;;  %v16084_v36 = vld [vmem:[#allocation98_spill] sm:$0xff] }
 0x41e   :  { %v9549_v7 = vpop.f32.mrf.mxu1  ;;  %9787 = vmatprep.subr.bf16.mxu1 %v10906_v56  ;;  %v16085_v52 = vcombine.low %v13376_v32, %v16084_v36  ;;  %v10910_v57 = vld [vmem:[%s15258_s3 + $0x3c8] sm:$0xff]  }
 0x41f   :  { %v9550_v38 = vadd.f32 %v9549_v7, %v9548_v49  ;;  %v10911_v32 = vld [vmem:[%s15258_s3 + $0x388] sm:$0xff]   ;;  %v8754_v49 = vcombine.low %v13540_v29, %v13518_v51  ;;  %v10914_v51 = vld [vmem:[%s15258_s3 + $0x4f8] sm:$0xff]  }
 0x420   :  { %v9551_v63 = vpop.f32.mrf.mxu1  ;;  %6149 = vmatmul.mubr.bf16.gmra.mxu1 %v16083_v24 }
 0x421   :  { %v14164_v30 = vadd.f32 %v9550_v38, %v14046_v17  ;;  %6156 = vmatprep.mubr.bf16.mxu1 %v16085_v52  ;;  %9788 = vmatpush3.bf16.msra.mxu1 %v10907_v40  ;;  %v10912_v40 = vld [vmem:[%s15258_s3 + $0x3c0] sm:$0xff]   ;;  %v16086_v38 = vld [vmem:[#allocation83_spill] sm:$0xff] }
 0x422   :  { %v9552_v6 = vpop.f32.mrf.mxu1  ;;  %9789 = vmatprep.subr.bf16.mxu1 %v10908_v11 }
 0x423   :  { %v9553_v35 = vadd.f32 %v9552_v6, %v9551_v63  ;;  %v10913_v63 = vld [vmem:[%s15258_s3 + $0x380] sm:$0xff]  }
 0x424   :  { %v9554_v56 = vpop.f32.mrf.mxu1 }
 0x425   :  { %v14176_v17 = vadd.f32 %v9553_v35, %v14058_v19  ;;  %9790 = vmatpush3.bf16.msra.mxu1 %v10909_v59 }
 0x426   :  { %v9555_v0 = vpop.f32.mrf.mxu1  ;;  %9791 = vmatprep.subr.bf16.mxu1 %v10910_v57  ;;  %v16087_v57 = vld [vmem:[#allocation86_spill] sm:$0xff] }
 0x427   :  { %v9556_v7 = vadd.f32 %v9555_v0, %v9554_v56  ;;  %v16088_v56 = vld [vmem:[#allocation87_spill] sm:$0xff] }
 0x428   :  { %v9557_v11 = vpop.f32.mrf.mxu1  ;;  %6157 = vmatmul.mubr.bf16.gmra.mxu1 %v8754_v49 }
 0x429   :  { %v14187_v19 = vadd.f32 %v9556_v7, %v14071_v42  ;;  %6164 = vmatprep.mubr.bf16.mxu1 %v16086_v38  ;;  %9792 = vmatpush3.bf16.msra.mxu1 %v10911_v32  ;;  %v16089_v38 = vld [vmem:[#allocation92_spill] sm:$0xff] }
 0x42a   :  { %v9558_v24 = vpop.f32.mrf.mxu1  ;;  %9793 = vmatprep.subr.bf16.mxu1 %v10912_v40 }
 0x42b   :  { %v9559_v29 = vadd.f32 %v9558_v24, %v9557_v11  ;;  %v16090_v24 = vld [vmem:[#allocation93_spill] sm:$0xff] }
 0x42c   :  { %v9560_v36 = vpop.f32.mrf.mxu1 }
 0x42d   :  { %v14197_v52 = vadd.f32 %v9559_v29, %v14081_v45  ;;  %9794 = vmatpush3.bf16.msra.mxu1 %v10913_v63 }
 0x42e   :  { %v9561_v42 = vpop.f32.mrf.mxu1  ;;  %9907 = vmatprep.subr.bf16.mxu1 %v10914_v51 }
 0x42f   :  { %v9562_v59 = vadd.f32 %v9561_v42, %v9560_v36 }
 0x430   :  { %v9563_v6 = vpop.f32.mrf.mxu1  ;;  %6165 = vmatmul.mubr.bf16.gmra.mxu1 %v16087_v57 }
 0x431   :  { %v14201_v35 = vadd.f32 %v9562_v59, %v14085_v33  ;;  %6172 = vmatprep.mubr.bf16.mxu1 %v16088_v56  ;;  %v16092_v56 = vld [vmem:[#allocation114_spill] sm:$0xff] }
 0x432   :  { %v9564_v32 = vpop.f32.mrf.mxu1 }
 0x433   :  { %v9565_v0 = vadd.f32 %v9564_v32, %v9563_v6  ;;  %v16091_v6 = vld [vmem:[#allocation96_spill] sm:$0xff] }
 0x434   :  { %v9566_v49 = vpop.f32.mrf.mxu1 }
 0x435   :  { %v14205_v40 = vadd.f32 %v9565_v0, %v14089_v58 }
 0x436   :  { %v9567_v45 = vpop.f32.mrf.mxu1 }
 0x437   :  { %v9568_v7 = vadd.f32 %v9567_v45, %v9566_v49 }
 0x438   :  { %v9569_v11 = vpop.f32.mrf.mxu1  ;;  %6173 = vmatmul.mubr.bf16.gmra.mxu1 %v16089_v38 }
 0x439   :  { %v14209_v63 = vadd.f32 %v9568_v7, %v14093_v15  ;;  %6180 = vmatprep.mubr.bf16.mxu1 %v16090_v24  ;;  %v16093_v15 = vcombine.low %v16047_v10, %v16092_v56  ;;  %v8830_v7 = vcombine.low %v13578_v26, %v13594_v43  ;;  %v16094_v24 = vld [vmem:[#allocation73_spill] sm:$0xff]  ;;  %v10916_v26 = vld [vmem:[%s15258_s3 + $0x4f0] sm:$0xff]  }
 0x43a   :  { %v9570_v33 = vpop.f32.mrf.mxu1 }
 0x43b   :  { %v9571_v51 = vadd.f32 %v9570_v33, %v9569_v11 }
 0x43c   :  { %v9572_v29 = vpop.f32.mrf.mxu1 }
 0x43d   :  { %v14213_v36 = vadd.f32 %v9571_v51, %v14097_v46 }
 0x43e   :  { %v9573_v42 = vpop.f32.mrf.mxu1 }
 0x43f   :  { %v9574_v59 = vadd.f32 %v9573_v42, %v9572_v29 }
 0x440   :  { %v9575_v58 = vpop.f32.mrf.mxu1  ;;  %6181 = vmatmul.mubr.bf16.gmra.mxu1 %v16091_v6  ;;  %v16096_v6 = vld [vmem:[#allocation72_spill] sm:$0xff] }
 0x441   :  { %v14217_v57 = vadd.f32 %v9574_v59, %v14101_v27  ;;  %6188 = vmatprep.mubr.bf16.mxu1 %v16093_v15  ;;  %v16095_v59 = vld [vmem:[#allocation70_spill] sm:$0xff] }
 0x442   :  { %v9576_v32 = vpop.f32.mrf.mxu1  ;;  %v10918_v15 = vld [vmem:[%s15258_s3 + $0x4e8] sm:$0xff]  }
 0x443   :  { %v9577_v0 = vadd.f32 %v9576_v32, %v9575_v58 }
 0x444   :  { %v9578_v49 = vpop.f32.mrf.mxu1 }
 0x445   :  { %v14223_v45 = vadd.f32 %v9577_v0, %v14105_v5  ;;  %v10915_v5 = vld [vmem:[%s15258_s3 + $0x4b8] sm:$0xff]  }
 0x446   :  { %v9579_v46 = vpop.f32.mrf.mxu1 }
 0x447   :  { %v9580_v11 = vadd.f32 %v9579_v46, %v9578_v49 }
 0x448   :  { %v9581_v38 = vpop.f32.mrf.mxu1  ;;  %6189 = vmatmul.mubr.bf16.gmra.mxu1 %v8830_v7  ;;  %v10920_v7 = vld [vmem:[%s15258_s3 + $0x4e0] sm:$0xff]  }
 0x449   :  { %v14228_v27 = vadd.f32 %v9580_v11, %v14110_v8  ;;  %6229 = vmatprep.mubr.bf16.mxu1 %v16094_v24  ;;  %v16097_v24 = vld [vmem:[#allocation58_spill] sm:$0xff] }
 0x44a   :  { %v9582_v10 = vpop.f32.mrf.mxu1 }
 0x44b   :  { %v9583_v33 = vadd.f32 %v9582_v10, %v9581_v38 }
 0x44c   :  { %v9584_v51 = vpop.f32.mrf.mxu1 }
 0x44d   :  { %v14232_v29 = vadd.f32 %v9583_v33, %v14114_v39  ;;  %v10917_v39 = vld [vmem:[%s15258_s3 + $0x4b0] sm:$0xff]   ;;  %v10921_v33 = vld [vmem:[%s15258_s3 + $0x4a0] sm:$0xff]  }
 0x44e   :  { %v9585_v42 = vpop.f32.mrf.mxu1 }
 0x44f   :  { %v9586_v43 = vadd.f32 %v9585_v42, %v9584_v51 }
 0x450   :  { %v9603_v8 = vpop.f32.mrf.mxu1  ;;  %6230 = vmatmul.mubr.bf16.vlgmr.msra.gmra.mxu1 %v16095_v59  ;;  %v10924_v59 = vld [vmem:[%s15258_s3 + $0x4d0] sm:$0xff]  }
 0x451   :  { %v14242_v58 = vadd.f32 %v9586_v43, %v14124_v20  ;;  %9908 = vmatpush3.bf16.msra.mxu1 %v10915_v5  ;;  %6237 = vmatprep.mubr.bf16.mxu1 %v16096_v6  ;;  %v10919_v20 = vld [vmem:[%s15258_s3 + $0x4a8] sm:$0xff]   ;;  %v10922_v5 = vld [vmem:[%s15258_s3 + $0x4d8] sm:$0xff]  }
 0x452   :  { %v9604_v56 = vpop.f32.mrf.mxu1  ;;  %9909 = vmatprep.subr.bf16.mxu1 %v10916_v26 }
 0x453   :  { %v9605_v32 = vadd.f32 %v9604_v56, %v9603_v8 }
 0x454   :  { %v9606_v0 = vpop.f32.mrf.mxu1 }
 0x455   :  { %v14252_v49 = vadd.f32 %v9605_v32, %v14134_v1  ;;  %9910 = vmatpush3.bf16.msra.mxu1 %v10917_v39  ;;  %v16098_v1 = vld [vmem:[#allocation60_spill] sm:$0xff]  ;;  %v16099_v39 = vld [vmem:[#allocation106_spill] sm:$0xff] }
 0x456   :  { %v9607_v46 = vpop.f32.mrf.mxu1  ;;  %9911 = vmatprep.subr.bf16.mxu1 %v10918_v15  ;;  %v16100_v56 = vmax.f32 %v16099_v39, 0.0 }
 0x457   :  { %v9608_v11 = vadd.f32 %v9607_v46, %v9606_v0  ;;  %v10925_v0 = vld [vmem:[%s15258_s3 + $0x490] sm:$0xff]   ;;  %v10926_v46 = vld [vmem:[%s15258_s3 + $0x4c8] sm:$0xff]  }
 0x458   :  { %v9609_v38 = vpop.f32.mrf.mxu1  ;;  %6238 = vmatmul.mubr.bf16.gmra.mxu1 %v16097_v24  ;;  %v9190_v15 = vpack.c.bf16 %v16100_v56, %v16068_v13 }
 0x459   :  { %v14262_v10 = vadd.f32 %v9608_v11, %v14144_v34  ;;  %6245 = vmatprep.mubr.bf16.mxu1 %v16098_v1  ;;  %9912 = vmatpush3.bf16.msra.mxu1 %v10919_v20  ;;  %v10923_v34 = vld [vmem:[%s15258_s3 + $0x498] sm:$0xff]   ;;  %v16102_v1 = vrot.slane %v15968_v61, 2 }
 0x45a   :  { %v9610_v51 = vpop.f32.mrf.mxu1  ;;  %9913 = vmatprep.subr.bf16.mxu1 %v10920_v7  ;;  %v16101_v11 = vld [vmem:[#allocation103_spill] sm:$0xff] }
 0x45b   :  { %v9611_v42 = vadd.f32 %v9610_v51, %v9609_v38  ;;  %v2859_v38 = vrot.slane %v16101_v11, 2  ;;  %v10928_v51 = vld [vmem:[%s15258_s3 + $0x4c0] sm:$0xff]  }
 0x45c   :  { %v9612_v26 = vpop.f32.mrf.mxu1 }
 0x45d   :  { %v14272_v43 = vadd.f32 %v9611_v42, %v14154_v14  ;;  %9914 = vmatpush3.bf16.msra.mxu1 %v10921_v33  ;;  %v8756_v33 = vcombine.low %v16102_v1, %v2859_v38  ;;  %v2958_v38 = vshll.u32 %v16033_v31, 16 }
 0x45e   :  { %v9613_v8 = vpop.f32.mrf.mxu1  ;;  %9915 = vmatprep.subr.bf16.mxu1 %v10922_v5 }
 0x45f   :  { %v9614_v6 = vadd.f32 %v9613_v8, %v9612_v26  ;;  %v10929_v26 = vld [vmem:[%s15258_s3 + $0x480] sm:$0xff]  }
 0x460   :  { %v9615_v32 = vpop.f32.mrf.mxu1  ;;  %6246 = vmatmul.mubr.bf16.gmra.mxu1 %v13532_v60 }
 0x461   :  { %v14285_v14 = vadd.f32 %v9614_v6, %v14164_v30  ;;  %6253 = vmatprep.mubr.bf16.mxu1 %v9190_v15  ;;  %9916 = vmatpush3.bf16.msra.mxu1 %v10923_v34  ;;  %v10927_v30 = vld [vmem:[%s15258_s3 + $0x488] sm:$0xff]   ;;  %v10930_v34 = vld [vmem:[%s15258_s3 + $0x5f8] sm:$0xff]  }
 0x462   :  { %v9616_v20 = vpop.f32.mrf.mxu1  ;;  %9917 = vmatprep.subr.bf16.mxu1 %v10924_v59 }
 0x463   :  { %v9617_v7 = vadd.f32 %v9616_v20, %v9615_v32 }
 0x464   :  { %v9618_v13 = vpop.f32.mrf.mxu1 }
 0x465   :  { %v14295_v60 = vadd.f32 %v9617_v7, %v14176_v17  ;;  %9918 = vmatpush3.bf16.msra.mxu1 %v10925_v0 }
 0x466   :  { %v9619_v24 = vpop.f32.mrf.mxu1  ;;  %9919 = vmatprep.subr.bf16.mxu1 %v10926_v46 }
 0x467   :  { %v9620_v5 = vadd.f32 %v9619_v24, %v9618_v13  ;;  %v16103_v24 = vld [vmem:[#allocation46_spill] sm:$0xff] }
 0x468   :  { %v9621_v42 = vpop.f32.mrf.mxu1  ;;  %6254 = vmatmul.mubr.bf16.gmra.mxu1 %v8756_v33  ;;  %v16104_v1 = vmax.f32 %v16103_v24, 0.0  ;;  %v10932_v24 = vld [vmem:[%s15258_s3 + $0x5f0] sm:$0xff]  }
 0x469   :  { %v14306_v17 = vadd.f32 %v9620_v5, %v14187_v19  ;;  %6261 = vmatprep.mubr.bf16.mxu1 %v13610_v18  ;;  %9920 = vmatpush3.bf16.msra.mxu1 %v10927_v30 }
 0x46a   :  { %v9622_v61 = vpop.f32.mrf.mxu1  ;;  %9921 = vmatprep.subr.bf16.mxu1 %v10928_v51  ;;  %v9200_v33 = vpack.c.bf16 %v16104_v1, %v16077_v12  ;;  %v2979_v51 = vshll.u32 %v16001_v21, 16 }
 0x46b   :  { %v9623_v8 = vadd.f32 %v9622_v61, %v9621_v42  ;;  %v2956_v42 = vshrl.u32 %v16033_v31, 16  ;;  %v2977_v31 = vshrl.u32 %v16001_v21, 16 }
 0x46c   :  { %v9624_v59 = vpop.f32.mrf.mxu1 }
 0x46d   :  { %v14316_v6 = vadd.f32 %v9623_v8, %v14197_v52  ;;  %9922 = vmatpush3.bf16.msra.mxu1 %v10929_v26  ;;  %v2951_v26 = vshll.u32 %v16002_v55, 16  ;;  %v2981_v8 = vrot.slane %v2979_v51, 1 }
 0x46e   :  { %v9625_v19 = vpop.f32.mrf.mxu1  ;;  %10035 = vmatprep.subr.bf16.mxu1 %v10930_v34  ;;  %v2860_v34 = vrot.slane %v15979_v62, 2  ;;  %v2949_v62 = vshrl.u32 %v16002_v55, 16 }
 0x46f   :  { %v9626_v18 = vadd.f32 %v9625_v19, %v9624_v59  ;;  %v16105_v59 = vrot.slane %v15975_v2, 2 }
 0x470   :  { %v9627_v39 = vpop.f32.mrf.mxu1  ;;  %6262 = vmatmul.mubr.bf16.gmra.mxu1 %v13638_v23 }
 0x471   :  { %v14320_v56 = vadd.f32 %v9626_v18, %v14201_v35  ;;  %6269 = vmatprep.mubr.bf16.mxu1 %v13642_v22  ;;  %v8832_v19 = vcombine.low %v16105_v59, %v2860_v34 }
 0x472   :  { %v9628_v15 = vpop.f32.mrf.mxu1 }
 0x473   :  { %v9629_v32 = vadd.f32 %v9628_v15, %v9627_v39  ;;  %v16106_v39 = vld [vmem:[#allocation115_spill] sm:$0xff] }
 0x474   :  { %v9630_v0 = vpop.f32.mrf.mxu1 }
 0x475   :  { %v14324_v20 = vadd.f32 %v9629_v32, %v14205_v40  ;;  %v2953_v32 = vrot.slane %v2951_v26, 1  ;;  %v10933_v26 = vld [vmem:[%s15258_s3 + $0x5b0] sm:$0xff]  }
 0x476   :  { %v9631_v52 = vpop.f32.mrf.mxu1 }
 0x477   :  { %v9632_v46 = vadd.f32 %v9631_v52, %v9630_v0 }
 0x478   :  { %v9633_v7 = vpop.f32.mrf.mxu1  ;;  %6270 = vmatmul.mubr.bf16.gmra.mxu1 %v13660_v47 }
 0x479   :  { %v14328_v13 = vadd.f32 %v9632_v46, %v14209_v63  ;;  %6277 = vmatprep.mubr.bf16.mxu1 %v13666_v44  ;;  %v2960_v44 = vrot.slane %v2958_v38, 1  ;;  %v14357_v46 = vor.u32 %v2981_v8, %v2977_v31  ;;  %v16108_v38 = vld [vmem:[#allocation27_spill] sm:$0xff] }
 0x47a   :  { %v9634_v23 = vpop.f32.mrf.mxu1  ;;  %v3005_v34 = vshrl.u32 %v16108_v38, 16 }
 0x47b   :  { %v9635_v35 = vadd.f32 %v9634_v23, %v9633_v7  ;;  %v16107_v7 = vld [vmem:[#allocation28_spill] sm:$0xff] }
 0x47c   :  { %v9636_v11 = vpop.f32.mrf.mxu1  ;;  %v3035_v2 = vshll.u32 %v16107_v7, 16  ;;  %v3033_v51 = vshrl.u32 %v16107_v7, 16 }
 0x47d   :  { %v14332_v22 = vadd.f32 %v9635_v35, %v14213_v36 }
 0x47e   :  { %v9637_v40 = vpop.f32.mrf.mxu1  ;;  %v3037_v1 = vrot.slane %v3035_v2, 1  ;;  %v16113_v2 = vld [vmem:[#allocation63_spill] sm:$0xff] }
 0x47f   :  { %v9638_v30 = vadd.f32 %v9637_v40, %v9636_v11  ;;  %v2954_v11 = vor.u32 %v2953_v32, %v2949_v62  ;;  %v3007_v40 = vshll.u32 %v16108_v38, 16 }
 0x480   :  { %v9639_v47 = vpop.f32.mrf.mxu1  ;;  %6278 = vmatmul.mubr.bf16.gmra.mxu1 %v13677_v50  ;;  %v2961_v50 = vor.u32 %v2960_v44, %v2956_v42 }
 0x481   :  { %v14340_v63 = vadd.f32 %v9638_v30, %v14217_v57  ;;  %6285 = vmatprep.mubr.bf16.mxu1 %v9200_v33  ;;  %v8709_v55 = vcombine.low %v2954_v11, %v14357_v46  ;;  %v3009_v44 = vrot.slane %v3007_v40, 1  ;;  %v10937_v11 = vld [vmem:[%s15258_s3 + $0x5a0] sm:$0xff]  }
 0x482   :  { %v9640_v36 = vpop.f32.mrf.mxu1  ;;  %v8710_v15 = vcombine.low %v2961_v50, %v16106_v39  ;;  %v14382_v50 = vor.u32 %v3037_v1, %v3033_v51  ;;  %v3203_v1 = vshll.u32 %v16039_v37, 16 }
 0x483   :  { %v9641_v5 = vadd.f32 %v9640_v36, %v9639_v47  ;;  %v16109_v36 = vld [vmem:[#allocation5_spill] sm:$0xff]  ;;  %v14387_v59 = vor.u32 %v3009_v44, %v3005_v34  ;;  %v16116_v44 = vld [vmem:[#allocation62_spill] sm:$0xff] }
 0x484   :  { %v9642_v61 = vpop.f32.mrf.mxu1 }
 0x485   :  { %v14347_v12 = vadd.f32 %v9641_v5, %v14223_v45  ;;  %v16110_v5 = vld [vmem:[#allocation59_spill] sm:$0xff]  ;;  %v8726_v31 = vcombine.low %v14387_v59, %v14382_v50 }
 0x486   :  { %v9643_v57 = vpop.f32.mrf.mxu1  ;;  %v16111_v42 = vcombine.low %v16109_v36, %v16110_v5  ;;  %v10940_v36 = vld [vmem:[%s15258_s3 + $0x5d0] sm:$0xff]  }
 0x487   :  { %v9644_v18 = vadd.f32 %v9643_v57, %v9642_v61 }
 0x488   :  { %v9645_v0 = vpop.f32.mrf.mxu1  ;;  %6286 = vmatmul.mubr.bf16.gmra.mxu1 %v8832_v19  ;;  %v16112_v19 = vld [vmem:[#allocation55_spill] sm:$0xff] }
 0x489   :  { %v14354_v52 = vadd.f32 %v9644_v18, %v14228_v27  ;;  %6423 = vmatprep.mubr.bf16.mxu1 %v8710_v15  ;;  %v10931_v27 = vld [vmem:[%s15258_s3 + $0x5b8] sm:$0xff]   ;;  %v3063_v18 = vshll.u32 %v16112_v19, 16  ;;  %v10935_v15 = vld [vmem:[%s15258_s3 + $0x5a8] sm:$0xff]   ;;  %v3061_v40 = vshrl.u32 %v16112_v19, 16 }
 0x48a   :  { %v9646_v45 = vpop.f32.mrf.mxu1  ;;  %v16120_v19 = vld [vmem:[#allocation88_spill] sm:$0xff] }
 0x48b   :  { %v9647_v23 = vadd.f32 %v9646_v45, %v9645_v0  ;;  %v10936_v0 = vld [vmem:[%s15258_s3 + $0x5e0] sm:$0xff]   ;;  %v3065_v7 = vrot.slane %v3063_v18, 1  ;;  %v3224_v18 = vshll.u32 %v16120_v19, 16 }
 0x48c   :  { %v9648_v35 = vpop.f32.mrf.mxu1 }
 0x48d   :  { %v14362_v21 = vadd.f32 %v9647_v23, %v14232_v29  ;;  %v16114_v23 = vld [vmem:[#allocation32_spill] sm:$0xff] }
 0x48e   :  { %v9649_v30 = vpop.f32.mrf.mxu1 }
 0x48f   :  { %v9650_v33 = vadd.f32 %v9649_v30, %v9648_v35  ;;  %v16115_v35 = vcombine.low %v16113_v2, %v16114_v23  ;;  %v10943_v2 = vld [vmem:[%s15258_s3 + $0x588] sm:$0xff]  }
 0x490   :  { %v9667_v47 = vpop.f32.mrf.mxu1  ;;  %6424 = vmatmul.mubr.bf16.vlgmr.msra.gmra.mxu1 %v8709_v55  ;;  %v14414_v55 = vor.u32 %v3065_v7, %v3061_v40 }
 0x491   :  { %v14373_v29 = vadd.f32 %v9650_v33, %v14242_v58  ;;  %10036 = vmatpush3.bf16.msra.mxu1 %v10931_v27  ;;  %6431 = vmatprep.mubr.bf16.mxu1 %v16111_v42  ;;  %v10934_v58 = vld [vmem:[%s15258_s3 + $0x5e8] sm:$0xff]   ;;  %v10938_v27 = vld [vmem:[%s15258_s3 + $0x5d8] sm:$0xff]  }
 0x492   :  { %v9668_v61 = vpop.f32.mrf.mxu1  ;;  %10037 = vmatprep.subr.bf16.mxu1 %v10932_v24  ;;  %v10939_v33 = vld [vmem:[%s15258_s3 + $0x598] sm:$0xff]   ;;  %v8743_v51 = vcombine.low %v14414_v55, %v16116_v44 }
 0x493   :  { %v9669_v8 = vadd.f32 %v9668_v61, %v9667_v47  ;;  %v16118_v61 = vld [vmem:[#allocation67_spill] sm:$0xff] }
 0x494   :  { %v9670_v57 = vpop.f32.mrf.mxu1 }
 0x495   :  { %v14391_v39 = vadd.f32 %v9669_v8, %v14252_v49  ;;  %10038 = vmatpush3.bf16.msra.mxu1 %v10933_v26  ;;  %v16117_v26 = vld [vmem:[#allocation50_spill] sm:$0xff] }
 0x496   :  { %v9671_v32 = vpop.f32.mrf.mxu1  ;;  %10039 = vmatprep.subr.bf16.mxu1 %v10934_v58  ;;  %v16119_v34 = vcombine.low %v16117_v26, %v16118_v61  ;;  %v3205_v58 = vrot.slane %v3203_v1, 1  ;;  %v10941_v8 = vld [vmem:[%s15258_s3 + $0x590] sm:$0xff]  }
 0x497   :  { %v9672_v62 = vadd.f32 %v9671_v32, %v9670_v57  ;;  %v3201_v32 = vshrl.u32 %v16039_v37, 16  ;;  %v16126_v26 = vld [vmem:[#allocation94_spill] sm:$0xff] }
 0x498   :  { %v9673_v45 = vpop.f32.mrf.mxu1  ;;  %6432 = vmatmul.mubr.bf16.gmra.mxu1 %v8726_v31  ;;  %v3280_v61 = vshll.u32 %v16126_v26, 16 }
 0x499   :  { %v14402_v49 = vadd.f32 %v9672_v62, %v14262_v10  ;;  %6439 = vmatprep.mubr.bf16.mxu1 %v16115_v35  ;;  %10040 = vmatpush3.bf16.msra.mxu1 %v10935_v15  ;;  %v10942_v15 = vld [vmem:[%s15258_s3 + $0x5c8] sm:$0xff]   ;;  %v3206_v7 = vor.u32 %v3205_v58, %v3201_v32  ;;  %v3226_v35 = vrot.slane %v3224_v18, 1 }
 0x49a   :  { %v9674_v38 = vpop.f32.mrf.mxu1  ;;  %10041 = vmatprep.subr.bf16.mxu1 %v10936_v0  ;;  %v16121_v0 = vld [vmem:[#allocation84_spill] sm:$0xff] }
 0x49b   :  { %v9675_v30 = vadd.f32 %v9674_v38, %v9673_v45  ;;  %v3196_v62 = vshll.u32 %v16121_v0, 16  ;;  %v16122_v38 = vld [vmem:[#allocation108_spill] sm:$0xff] }
 0x49c   :  { %v9676_v10 = vpop.f32.mrf.mxu1  ;;  %v8786_v40 = vcombine.low %v3206_v7, %v16122_v38 }
 0x49d   :  { %v14417_v24 = vadd.f32 %v9675_v30, %v14272_v43  ;;  %10042 = vmatpush3.bf16.msra.mxu1 %v10937_v11  ;;  %v10944_v11 = vld [vmem:[%s15258_s3 + $0x5c0] sm:$0xff]   ;;  %v3198_v1 = vrot.slane %v3196_v62, 1  ;;  %v3278_v62 = vshrl.u32 %v16126_v26, 16 }
 0x49e   :  { %v9677_v47 = vpop.f32.mrf.mxu1  ;;  %10043 = vmatprep.subr.bf16.mxu1 %v10938_v27  ;;  %v16123_v30 = vld [vmem:[#allocation117_spill] sm:$0xff] }
 0x49f   :  { %v9678_v5 = vadd.f32 %v9677_v47, %v9676_v10 }
 0x4a0   :  { %v9679_v42 = vpop.f32.mrf.mxu1  ;;  %6440 = vmatmul.mubr.bf16.gmra.mxu1 %v8743_v51  ;;  %v10945_v51 = vld [vmem:[%s15258_s3 + $0x580] sm:$0xff]  }
 0x4a1   :  { %v14429_v43 = vadd.f32 %v9678_v5, %v14285_v14  ;;  %6447 = vmatprep.mubr.bf16.mxu1 %v16119_v34  ;;  %10044 = vmatpush3.bf16.msra.mxu1 %v10939_v33  ;;  %v3222_v33 = vshrl.u32 %v16120_v19, 16  ;;  %v3194_v5 = vshrl.u32 %v16121_v0, 16 }
 0x4a2   :  { %v9680_v57 = vpop.f32.mrf.mxu1  ;;  %10045 = vmatprep.subr.bf16.mxu1 %v10940_v36 }
 0x4a3   :  { %v9681_v14 = vadd.f32 %v9680_v57, %v9679_v42  ;;  %v14464_v42 = vor.u32 %v3226_v35, %v3222_v33  ;;  %v16127_v57 = vld [vmem:[#allocation90_spill] sm:$0xff] }
 0x4a4   :  { %v9682_v31 = vpop.f32.mrf.mxu1 }
 0x4a5   :  { %v14444_v45 = vadd.f32 %v9681_v14, %v14295_v60  ;;  %10046 = vmatpush3.bf16.msra.mxu1 %v10941_v8  ;;  %v16124_v60 = vld [vmem:[#allocation107_spill] sm:$0xff]  ;;  %v3199_v8 = vor.u32 %v3198_v1, %v3194_v5  ;;  %v3282_v14 = vrot.slane %v3280_v61, 1 }
 0x4a6   :  { %v9683_v23 = vpop.f32.mrf.mxu1  ;;  %10047 = vmatprep.subr.bf16.mxu1 %v10942_v15  ;;  %v16125_v10 = vcombine.low %v16123_v30, %v16124_v60 }
 0x4a7   :  { %v9684_v37 = vadd.f32 %v9683_v23, %v9682_v31  ;;  %v8785_v15 = vcombine.low %v3199_v8, %v14464_v42  ;;  %v16129_v23 = vld [vmem:[#allocation10_spill] sm:$0xff] }
 0x4a8   :  { %v9685_v27 = vpop.f32.mrf.mxu1  ;;  %6448 = vmatmul.mubr.bf16.gmra.mxu1 %v16125_v10  ;;  %v16131_v10 = vld [vmem:[#allocation95_spill] sm:$0xff] }
 0x4a9   :  { %v14458_v47 = vadd.f32 %v9684_v37, %v14306_v17  ;;  %6455 = vmatprep.mubr.bf16.mxu1 %v8786_v40  ;;  %10048 = vmatpush3.bf16.msra.mxu1 %v10943_v2  ;;  %v3252_v17 = vshll.u32 %v16127_v57, 16  ;;  %v16128_v2 = vld [vmem:[#allocation109_spill] sm:$0xff]  ;;  %v14480_v37 = vor.u32 %v3282_v14, %v3278_v62  ;;  %v3308_v1 = vshll.u32 %v16131_v10, 16 }
 0x4aa   :  { %v9686_v36 = vpop.f32.mrf.mxu1  ;;  %10049 = vmatprep.subr.bf16.mxu1 %v10944_v11  ;;  %v16130_v35 = vcombine.low %v16128_v2, %v16129_v23  ;;  %v3250_v11 = vshrl.u32 %v16127_v57, 16  ;;  %v16136_v23 = vld [vmem:[#allocation124_spill] sm:$0xff] }
 0x4ab   :  { %v9687_v34 = vadd.f32 %v9686_v36, %v9685_v27  ;;  %v3254_v0 = vrot.slane %v3252_v17, 1  ;;  %v3310_v26 = vrot.slane %v3308_v1, 1  ;;  %v3306_v17 = vshrl.u32 %v16131_v10, 16 }
 0x4ac   :  { %v9688_v58 = vpop.f32.mrf.mxu1 }
 0x4ad   :  { %v14469_v19 = vadd.f32 %v9687_v34, %v14316_v6  ;;  %10050 = vmatpush3.bf16.msra.mxu1 %v10945_v51  ;;  %v14482_v27 = vor.u32 %v3254_v0, %v3250_v11  ;;  %v16132_v34 = vld [vmem:[#allocation121_spill] sm:$0xff] }
 0x4ae   :  { %v9689_v18 = vpop.f32.mrf.mxu1 }
 0x4af   :  { %v9690_v32 = vadd.f32 %v9689_v18, %v9688_v58  ;;  %v8802_v51 = vcombine.low %v14482_v27, %v14480_v37  ;;  %v16133_v58 = vld [vmem:[#allocation118_spill] sm:$0xff] }
 0x4b0   :  { %v9691_v31 = vpop.f32.mrf.mxu1  ;;  %6456 = vmatmul.mubr.bf16.gmra.mxu1 %v8785_v15  ;;  %v16134_v8 = vcombine.low %v16132_v34, %v16133_v58  ;;  %v14497_v15 = vor.u32 %v3310_v26, %v3306_v17 }
 0x4b1   :  { %v14474_v7 = vadd.f32 %v9690_v32, %v14320_v56  ;;  %6463 = vmatprep.mubr.bf16.mxu1 %v16130_v35  ;;  %v16137_v35 = vld [vmem:[#allocation100_spill] sm:$0xff] }
 0x4b2   :  { %v9692_v6 = vpop.f32.mrf.mxu1 }
 0x4b3   :  { %v9693_v38 = vadd.f32 %v9692_v6, %v9691_v31  ;;  %v16135_v31 = vld [vmem:[#allocation33_spill] sm:$0xff]  ;;  %v16138_v6 = vcombine.low %v16136_v23, %v16137_v35 }
 0x4b4   :  { %v9694_v40 = vpop.f32.mrf.mxu1  ;;  %v8819_v0 = vcombine.low %v14497_v15, %v16135_v31 }
 0x4b5   :  { %v14486_v33 = vadd.f32 %v9693_v38, %v14324_v20 }
 0x4b6   :  { %v9695_v56 = vpop.f32.mrf.mxu1 }
 0x4b7   :  { %v9696_v36 = vadd.f32 %v9695_v56, %v9694_v40  ;;  %v8714_v56 = vcombine.low %v14357_v46, %v14387_v59  ;;  %v8731_v46 = vcombine.low %v14382_v50, %v14414_v55  ;;  %v16146_v50 = vld [vmem:[#allocation122_spill] sm:$0xff]  ;;  %v16147_v55 = vld [vmem:[#allocation116_spill] sm:$0xff] }
 0x4b8   :  { %v9697_v5 = vpop.f32.mrf.mxu1  ;;  %6464 = vmatmul.mubr.bf16.gmra.mxu1 %v8802_v51 }
 0x4b9   :  { %v14491_v61 = vadd.f32 %v9696_v36, %v14328_v13  ;;  %6471 = vmatprep.mubr.bf16.mxu1 %v16134_v8  ;;  %v16139_v36 = vld [vmem:[#allocation76_spill] sm:$0xff] }
 0x4ba   :  { %v9698_v57 = vpop.f32.mrf.mxu1 }
 0x4bb   :  { %v9699_v20 = vadd.f32 %v9698_v57, %v9697_v5  ;;  %v16140_v5 = vld [vmem:[#allocation99_spill] sm:$0xff] }
 0x4bc   :  { %v9700_v18 = vpop.f32.mrf.mxu1 }
 0x4bd   :  { %v14500_v14 = vadd.f32 %v9699_v20, %v14332_v22  ;;  %v16142_v20 = vld [vmem:[#allocation74_spill] sm:$0xff] }
 0x4be   :  { %v9701_v32 = vpop.f32.mrf.mxu1 }
 0x4bf   :  { %v9702_v13 = vadd.f32 %v9701_v32, %v9700_v18  ;;  %v16143_v18 = vld [vmem:[#allocation113_spill] sm:$0xff] }
 0x4c0   :  { %v9703_v62 = vpop.f32.mrf.mxu1  ;;  %6472 = vmatmul.mubr.bf16.gmra.mxu1 %v8819_v0  ;;  %v16144_v32 = vcombine.low %v16142_v20, %v16143_v18  ;;  %v16145_v0 = vld [vmem:[#allocation112_spill] sm:$0xff]  ;;  %v16151_v20 = vld [vmem:[#allocation123_spill] sm:$0xff] }
 0x4c1   :  { %v14505_v2 = vadd.f32 %v9702_v13, %v14340_v63  ;;  %6479 = vmatprep.mubr.bf16.mxu1 %v16138_v6  ;;  %v16141_v63 = vcombine.low %v16139_v36, %v16140_v5  ;;  %v2933_v13 = vrot.slane %v16145_v0, 1 }
 0x4c2   :  { %v9704_v11 = vpop.f32.mrf.mxu1 }
 0x4c3   :  { %v9705_v38 = vadd.f32 %v9704_v11, %v9703_v62  ;;  %v3175_v6 = vshll.u32 %v2933_v13, 16 }
 0x4c4   :  { %v9706_v40 = vpop.f32.mrf.mxu1 }
 0x4c5   :  { %v14511_v22 = vadd.f32 %v9705_v38, %v14347_v12  ;;  %v8730_v38 = vcombine.low %v16147_v55, %v16146_v50  ;;  %v16152_v50 = vld [vmem:[#allocation9_spill] sm:$0xff] }
 0x4c6   :  { %v9707_v10 = vpop.f32.mrf.mxu1 }
 0x4c7   :  { %v9708_v1 = vadd.f32 %v9707_v10, %v9706_v40 }
 0x4c8   :  { %v9709_v51 = vpop.f32.mrf.mxu1  ;;  %6480 = vmatmul.mubr.bf16.gmra.mxu1 %v16141_v63 }
 0x4c9   :  { %v14519_v26 = vadd.f32 %v9708_v1, %v14354_v52  ;;  %6617 = vmatprep.mubr.bf16.mxu1 %v8714_v56  ;;  %v16148_v1 = vcombine.low %v16116_v44, %v16123_v30  ;;  %v3177_v56 = vrot.slane %v3175_v6, 1 }
 0x4ca   :  { %v9710_v34 = vpop.f32.mrf.mxu1 }
 0x4cb   :  { %v9711_v58 = vadd.f32 %v9710_v34, %v9709_v51 }
 0x4cc   :  { %v9712_v8 = vpop.f32.mrf.mxu1 }
 0x4cd   :  { %v14522_v12 = vadd.f32 %v9711_v58, %v14362_v21  ;;  %v16149_v58 = vld [vmem:[#allocation85_spill] sm:$0xff] }
 0x4ce   :  { %v9713_v57 = vpop.f32.mrf.mxu1 }
 0x4cf   :  { %v9714_v17 = vadd.f32 %v9713_v57, %v9712_v8  ;;  %v3168_v8 = vshll.u32 %v16149_v58, 16 }
 0x4d0   :  { %v9731_v59 = vpop.f32.mrf.mxu1  ;;  %6618 = vmatmul.mubr.bf16.vlgmr.msra.gmra.mxu1 %v16144_v32 }
 0x4d1   :  { %v14530_v52 = vadd.f32 %v9714_v17, %v14373_v29  ;;  %6625 = vmatprep.mubr.bf16.mxu1 %v8731_v46  ;;  %v3170_v30 = vrot.slane %v3168_v8, 1  ;;  %v16155_v8 = vld [vmem:[#allocation20_spill] sm:$0xff] }
 0x4d2   :  { %v9732_v62 = vpop.f32.mrf.mxu1 }
 0x4d3   :  { %v9733_v23 = vadd.f32 %v9732_v62, %v9731_v59  ;;  %v16150_v59 = vld [vmem:[#allocation35_spill] sm:$0xff]  ;;  %v3166_v62 = vshrl.u32 %v16149_v58, 16 }
 0x4d4   :  { %v9734_v21 = vpop.f32.mrf.mxu1 }
 0x4d5   :  { %v14534_v35 = vadd.f32 %v9733_v23, %v14391_v39  ;;  %v3173_v39 = vshrl.u32 %v2933_v13, 16 }
 0x4d6   :  { %v9735_v11 = vpop.f32.mrf.mxu1 }
 0x4d7   :  { %v9736_v40 = vadd.f32 %v9735_v11, %v9734_v21  ;;  %v3178_v17 = vor.u32 %v3177_v56, %v3173_v39  ;;  %v3171_v21 = vor.u32 %v3170_v30, %v3166_v62  ;;  %v16154_v39 = vld [vmem:[#allocation44_spill] sm:$0xff] }
 0x4d8   :  { %v9737_v10 = vpop.f32.mrf.mxu1  ;;  %6626 = vmatmul.mubr.bf16.gmra.mxu1 %v8730_v38  ;;  %v8790_v38 = vcombine.low %v14464_v42, %v14482_v27  ;;  %v8807_v42 = vcombine.low %v14480_v37, %v14497_v15 }
 0x4d9   :  { %v14539_v29 = vadd.f32 %v9736_v40, %v14402_v49  ;;  %6633 = vmatprep.mubr.bf16.mxu1 %v16148_v1  ;;  %v8747_v49 = vcombine.low %v16151_v20, %v16150_v59  ;;  %v8765_v32 = vcombine.low %v16124_v60, %v3178_v17  ;;  %v8764_v55 = vcombine.low %v16152_v50, %v3171_v21 }
 0x4da   :  { %v9738_v51 = vpop.f32.mrf.mxu1  ;;  %v2934_v17 = vrot.slane %v16155_v8, 1  ;;  %v16162_v8 = vld [vmem:[#allocation81_spill] sm:$0xff] }
 0x4db   :  { %v9739_v63 = vadd.f32 %v9738_v51, %v9737_v10 }
 0x4dc   :  { %v9740_v34 = vpop.f32.mrf.mxu1 }
 0x4dd   :  { %v14546_v57 = vadd.f32 %v9739_v63, %v14417_v24  ;;  %v16153_v63 = vld [vmem:[#allocation80_spill] sm:$0xff] }
 0x4de   :  { %v9741_v46 = vpop.f32.mrf.mxu1 }
 0x4df   :  { %v9742_v18 = vadd.f32 %v9741_v46, %v9740_v34  ;;  %v8789_v34 = vcombine.low %v16154_v39, %v16153_v63 }
 0x4e0   :  { %v9743_v44 = vpop.f32.mrf.mxu1  ;;  %6634 = vmatmul.mubr.bf16.gmra.mxu1 %v8747_v49  ;;  %v3420_v49 = vshll.u32 %v2934_v17, 16 }
 0x4e1   :  { %v14552_v0 = vadd.f32 %v9742_v18, %v14429_v43  ;;  %6641 = vmatprep.mubr.bf16.mxu1 %v8765_v32  ;;  %v16156_v32 = vld [vmem:[#allocation49_spill] sm:$0xff] }
 0x4e2   :  { %v9744_v13 = vpop.f32.mrf.mxu1  ;;  %v3422_v62 = vrot.slane %v3420_v49, 1 }
 0x4e3   :  { %v9745_v24 = vadd.f32 %v9744_v13, %v9743_v44  ;;  %v16157_v44 = vld [vmem:[#allocation47_spill] sm:$0xff]  ;;  %v16158_v13 = vcombine.low %v16135_v31, %v16139_v36 }
 0x4e4   :  { %v9746_v23 = vpop.f32.mrf.mxu1  ;;  %v8806_v30 = vcombine.low %v16157_v44, %v16156_v32  ;;  %v10947_v32 = vld [vmem:[%s15260_s5 + $0x38] sm:$0xff]  }
 0x4e5   :  { %v14556_v6 = vadd.f32 %v9745_v24, %v14444_v45 }
 0x4e6   :  { %v9747_v11 = vpop.f32.mrf.mxu1 }
 0x4e7   :  { %v9748_v60 = vadd.f32 %v9747_v11, %v9746_v23  ;;  %v16159_v11 = vld [vmem:[#allocation71_spill] sm:$0xff] }
 0x4e8   :  { %v9749_v40 = vpop.f32.mrf.mxu1  ;;  %6642 = vmatmul.mubr.bf16.gmra.mxu1 %v8764_v55  ;;  %v3413_v50 = vshll.u32 %v16159_v11, 16  ;;  %v3411_v39 = vshrl.u32 %v16159_v11, 16 }
 0x4e9   :  { %v14562_v43 = vadd.f32 %v9748_v60, %v14458_v47  ;;  %6649 = vmatprep.mubr.bf16.mxu1 %v8790_v38 }
 0x4ea   :  { %v9750_v10 = vpop.f32.mrf.mxu1  ;;  %v3415_v36 = vrot.slane %v3413_v50, 1 }
 0x4eb   :  { %v9751_v1 = vadd.f32 %v9750_v10, %v9749_v40  ;;  %v16160_v40 = vld [vmem:[#allocation26_spill] sm:$0xff]  ;;  %v16161_v10 = vld [vmem:[#allocation23_spill] sm:$0xff] }
 0x4ec   :  { %v9752_v56 = vpop.f32.mrf.mxu1 }
 0x4ed   :  { %v14565_v51 = vadd.f32 %v9751_v1, %v14469_v19 }
 0x4ee   :  { %v9753_v45 = vpop.f32.mrf.mxu1 }
 0x4ef   :  { %v9754_v58 = vadd.f32 %v9753_v45, %v9752_v56 }
 0x4f0   :  { %v9755_v27 = vpop.f32.mrf.mxu1  ;;  %6650 = vmatmul.mubr.bf16.gmra.mxu1 %v8789_v34 }
 0x4f1   :  { %v14572_v47 = vadd.f32 %v9754_v58, %v14474_v7  ;;  %6657 = vmatprep.mubr.bf16.mxu1 %v8807_v42  ;;  %v3416_v58 = vor.u32 %v3415_v36, %v3411_v39 }
 0x4f2   :  { %v9756_v46 = vpop.f32.mrf.mxu1 }
 0x4f3   :  { %v9757_v59 = vadd.f32 %v9756_v46, %v9755_v27 }
 0x4f4   :  { %v9758_v19 = vpop.f32.mrf.mxu1 }
 0x4f5   :  { %v14576_v20 = vadd.f32 %v9757_v59, %v14486_v33  ;;  %v3418_v33 = vshrl.u32 %v2934_v17, 16  ;;  %v8840_v17 = vcombine.low %v16162_v8, %v3416_v58  ;;  %v16166_v58 = vld [vmem:[#allocation104_spill] sm:$0xff]  ;;  %v10950_v8 = vld [vmem:[%s15260_s5 + $0x68] sm:$0xff]  }
 0x4f6   :  { %v9759_v18 = vpop.f32.mrf.mxu1 }
 0x4f7   :  { %v9760_v37 = vadd.f32 %v9759_v18, %v9758_v19  ;;  %v3423_v60 = vor.u32 %v3422_v62, %v3418_v33  ;;  %v16163_v33 = vld [vmem:[#allocation68_spill] sm:$0xff] }
 0x4f8   :  { %v9761_v15 = vpop.f32.mrf.mxu1  ;;  %6658 = vmatmul.mubr.bf16.gmra.mxu1 %v8806_v30 }
 0x4f9   :  { %v14581_v7 = vadd.f32 %v9760_v37, %v14491_v61  ;;  %6665 = vmatprep.mubr.bf16.mxu1 %v16158_v13  ;;  %v8823_v61 = vcombine.low %v16161_v10, %v16160_v40  ;;  %v8841_v56 = vcombine.low %v16140_v5, %v3423_v60  ;;  %v16164_v40 = vld [vmem:[#allocation75_spill] sm:$0xff] }
 0x4fa   :  { %v9762_v24 = vpop.f32.mrf.mxu1 }
 0x4fb   :  { %v9763_v23 = vadd.f32 %v9762_v24, %v9761_v15 }
 0x4fc   :  { %v9764_v21 = vpop.f32.mrf.mxu1 }
 0x4fd   :  { %v14588_v55 = vadd.f32 %v9763_v23, %v14500_v14 }
 0x4fe   :  { %v9765_v38 = vpop.f32.mrf.mxu1 }
 0x4ff   :  { %v9766_v1 = vadd.f32 %v9765_v38, %v9764_v21 }
 0x500   :  { %v9767_v31 = vpop.f32.mrf.mxu1  ;;  %6666 = vmatmul.mubr.bf16.gmra.mxu1 %v8823_v61 }
 0x501   :  { %v14594_v45 = vadd.f32 %v9766_v1, %v14505_v2  ;;  %6673 = vmatprep.mubr.bf16.mxu1 %v8841_v56 }
 0x502   :  { %v9768_v63 = vpop.f32.mrf.mxu1 }
 0x503   :  { %v9769_v14 = vadd.f32 %v9768_v63, %v9767_v31  ;;  %v16165_v31 = vld [vmem:[#allocation77_spill] sm:$0xff] }
 0x504   :  { %v9770_v34 = vpop.f32.mrf.mxu1 }
 0x505   :  { %v14598_v42 = vadd.f32 %v9769_v14, %v14511_v22  ;;  %v10946_v22 = vld [vmem:[%s15260_s5 + $0x78] sm:$0xff]  }
 0x506   :  { %v9771_v27 = vpop.f32.mrf.mxu1  ;;  %10115 = vmatprep.subr.bf16.mxu1 %v10946_v22 }
 0x507   :  { %v9772_v5 = vadd.f32 %v9771_v27, %v9770_v34  ;;  %10116 = vmatpush3.bf16.msra.mxu1 %v10947_v32 }
 0x508   :  { %v9773_v46 = vpop.f32.mrf.mxu1  ;;  %6674 = vmatmul.mubr.bf16.gmra.mxu1 %v8840_v17 }
 0x509   :  { %v14602_v59 = vadd.f32 %v9772_v5, %v14519_v26 }
 0x50a   :  { %v9774_v2 = vpop.f32.mrf.mxu1 }
 0x50b   :  { %v9775_v19 = vadd.f32 %v9774_v2, %v9773_v46  ;;  %v16167_v2 = vld [vmem:[#allocation37_spill] sm:$0xff] }
 0x50c   :  { %v9776_v49 = vpop.f32.mrf.mxu1 }
 0x50d   :  { %v14605_v18 = vadd.f32 %v9775_v19, %v14522_v12 }
 0x50e   :  { %v9777_v44 = vpop.f32.mrf.mxu1 }
 0x50f   :  { %v9778_v30 = vadd.f32 %v9777_v44, %v9776_v49 }
 0x510   :  { %v9795_v37 = vpop.f32.mrf.mxu1 }
 0x511   :  { %v14614_v26 = vadd.f32 %v9778_v30, %v14530_v52  ;;  %v10948_v52 = vld [vmem:[%s15260_s5 + $0x70] sm:$0xff]  }
 0x512   :  { %v9796_v15 = vpop.f32.mrf.mxu1  ;;  %10117 = vmatprep.subr.bf16.mxu1 %v10948_v52  ;;  %v16168_v30 = vld [vmem:[#allocation18_spill] sm:$0xff]  ;;  %v10954_v52 = vld [vmem:[%s15260_s5 + $0x58] sm:$0xff]  }
 0x513   :  { %v9797_v13 = vadd.f32 %v9796_v15, %v9795_v37  ;;  %v10952_v15 = vld [vmem:[%s15260_s5 + $0x60] sm:$0xff]  }
 0x514   :  { %v9798_v12 = vpop.f32.mrf.mxu1 }
 0x515   :  { %v6232_v62 = vadd.f32 %v9797_v13, %v14534_v35  ;;  %v10949_v35 = vld [vmem:[%s15260_s5 + $0x30] sm:$0xff]  }
 0x516   :  { %v9799_v24 = vpop.f32.mrf.mxu1  ;;  %10118 = vmatpush3.bf16.msra.mxu1 %v10949_v35  ;;  %v10956_v35 = vld [vmem:[%s15260_s5 + $0x18] sm:$0xff]  }
 0x517   :  { %v9800_v23 = vadd.f32 %v9799_v24, %v9798_v12  ;;  %v14618_v21 = vadd.f32 %v16163_v33, %v6232_v62  ;;  %10119 = vmatprep.subr.bf16.mxu1 %v10950_v8  ;;  %v16169_v24 = vld [vmem:[#allocation17_spill] sm:$0xff]  ;;  %v16172_v8 = vld [vmem:[#allocation39_spill] sm:$0xff] }
 0x518   :  { %v9801_v11 = vpop.f32.mrf.mxu1 }
 0x519   :  { %v6235_v50 = vadd.f32 %v9800_v23, %v14539_v29 }
 0x51a   :  { %v9802_v60 = vpop.f32.mrf.mxu1 }
 0x51b   :  { %v9803_v38 = vadd.f32 %v9802_v60, %v9801_v11  ;;  %v14622_v10 = vadd.f32 %v16164_v40, %v6235_v50 }
 0x51c   :  { %v9804_v61 = vpop.f32.mrf.mxu1 }
 0x51d   :  { %v6240_v1 = vadd.f32 %v9803_v38, %v14546_v57  ;;  %v10951_v57 = vld [vmem:[%s15260_s5 + $0x28] sm:$0xff]  }
 0x51e   :  { %v9805_v56 = vpop.f32.mrf.mxu1  ;;  %10120 = vmatpush3.bf16.msra.mxu1 %v10951_v57  ;;  %v16170_v38 = vld [vmem:[#allocation21_spill] sm:$0xff] }
 0x51f   :  { %v9806_v29 = vadd.f32 %v9805_v56, %v9804_v61  ;;  %v14632_v36 = vadd.f32 %v16165_v31, %v6240_v1  ;;  %10121 = vmatprep.subr.bf16.mxu1 %v10952_v15  ;;  %v16171_v31 = vld [vmem:[#allocation11_spill] sm:$0xff] }
 0x520   :  { %v9807_v63 = vpop.f32.mrf.mxu1 }
 0x521   :  { %v6243_v39 = vadd.f32 %v9806_v29, %v14552_v0 }
 0x522   :  { %v9808_v14 = vpop.f32.mrf.mxu1 }
 0x523   :  { %v9809_v34 = vadd.f32 %v9808_v14, %v9807_v63  ;;  %v14636_v27 = vadd.f32 %v16166_v58, %v6243_v39 }
 0x524   :  { %v9810_v17 = vpop.f32.mrf.mxu1 }
 0x525   :  { %v6248_v5 = vadd.f32 %v9809_v34, %v14556_v6  ;;  %v10953_v6 = vld [vmem:[%s15260_s5 + $0x20] sm:$0xff]  }
 0x526   :  { %v9811_v46 = vpop.f32.mrf.mxu1  ;;  %10122 = vmatpush3.bf16.msra.mxu1 %v10953_v6 }
 0x527   :  { %v9812_v0 = vadd.f32 %v9811_v46, %v9810_v17  ;;  %v14646_v19 = vadd.f32 %v16167_v2, %v6248_v5  ;;  %10123 = vmatprep.subr.bf16.mxu1 %v10954_v52  ;;  %v10959_v17 = vld [vmem:[%s15260_s5 + $0xb0] sm:$0xff]  }
 0x528   :  { %v9813_v49 = vpop.f32.mrf.mxu1  ;;  %v10960_v5 = vld [vmem:[%s15260_s5 + $0x50] sm:$0xff]  }
 0x529   :  { %v6251_v22 = vadd.f32 %v9812_v0, %v14562_v43  ;;  %v10962_v0 = vld [vmem:[%s15260_s5 + $0x10] sm:$0xff]  }
 0x52a   :  { %v9814_v32 = vpop.f32.mrf.mxu1  ;;  %10124 = vmatpush3.bf16.msra.mxu1 %v10956_v35 }
 0x52b   :  { %v9815_v44 = vadd.f32 %v9814_v32, %v9813_v49  ;;  %v14650_v37 = vadd.f32 %v16168_v30, %v6251_v22  ;;  %10125 = vmatprep.subr.bf16.mxu1 %v10960_v5  ;;  %v10963_v22 = vld [vmem:[%s15260_s5 + $0xa8] sm:$0xff]   ;;  %v16174_v5 = vld [vmem:[#allocation15_spill] sm:$0xff] }
 0x52c   :  { %v9816_v13 = vpop.f32.mrf.mxu1 }
 0x52d   :  { %v6256_v12 = vadd.f32 %v9815_v44, %v14565_v51  ;;  %v10955_v51 = vld [vmem:[%s15260_s5 + $0xf8] sm:$0xff]  }
 0x52e   :  { %v9817_v62 = vpop.f32.mrf.mxu1  ;;  %10137 = vmatprep.subr.bf16.mxu0 %v10955_v51  ;;  %10126 = vmatpush3.bf16.msra.mxu1 %v10962_v0  ;;  %v10978_v0 = vld [vmem:[%s15260_s5 + $0x178] sm:$0xff]  }
 0x52f   :  { %v9818_v43 = vadd.f32 %v9817_v62, %v9816_v13  ;;  %v14660_v23 = vadd.f32 %v16169_v24, %v6256_v12  ;;  %v16173_v13 = vld [vmem:[#allocation12_spill] sm:$0xff] }
 0x530   :  { %v9819_v33 = vpop.f32.mrf.mxu1  ;;  %v10964_v62 = vld [vmem:[%s15260_s5 + $0xe0] sm:$0xff]  }
 0x531   :  { %v6259_v11 = vadd.f32 %v9818_v43, %v14572_v47  ;;  %v10957_v47 = vld [vmem:[%s15260_s5 + $0xb8] sm:$0xff]   ;;  %v10965_v43 = vld [vmem:[%s15260_s5 + $0xa0] sm:$0xff]  }
 0x532   :  { %v9820_v50 = vpop.f32.mrf.mxu1  ;;  %10138 = vmatpush3.bf16.msra.mxu0 %v10957_v47 }
 0x533   :  { %v9821_v60 = vadd.f32 %v9820_v50, %v9819_v33  ;;  %v14664_v40 = vadd.f32 %v16170_v38, %v6259_v11  ;;  %v10968_v33 = vld [vmem:[%s15260_s5 + $0x8] sm:$0xff]  }
 0x534   :  { %v9822_v61 = vpop.f32.mrf.mxu1 }
 0x535   :  { %v6264_v1 = vadd.f32 %v9821_v60, %v14576_v20  ;;  %v10958_v20 = vld [vmem:[%s15260_s5 + $0xf0] sm:$0xff]   ;;  %v10969_v60 = vld [vmem:[%s15260_s5 + $0x98] sm:$0xff]  }
 0x536   :  { %v9823_v56 = vpop.f32.mrf.mxu1  ;;  %10139 = vmatprep.subr.bf16.mxu0 %v10958_v20 }
 0x537   :  { %v9824_v29 = vadd.f32 %v9823_v56, %v9822_v61  ;;  %v14680_v63 = vadd.f32 %v16171_v31, %v6264_v1  ;;  %10140 = vmatpush3.bf16.msra.mxu0 %v10959_v17  ;;  %v10970_v1 = vld [vmem:[%s15260_s5 + $0xd0] sm:$0xff]  }
 0x538   :  { %v9825_v39 = vpop.f32.mrf.mxu1  ;;  %v10971_v56 = vld [vmem:[%s15260_s5 + $0x90] sm:$0xff]  }
 0x539   :  { %v6267_v14 = vadd.f32 %v9824_v29, %v14581_v7  ;;  %v10961_v7 = vld [vmem:[%s15260_s5 + $0xe8] sm:$0xff]   ;;  %v10972_v29 = vld [vmem:[%s15260_s5 + $0x40] sm:$0xff]  }
 0x53a   :  { %v9826_v34 = vpop.f32.mrf.mxu1  ;;  %10141 = vmatprep.subr.bf16.mxu0 %v10961_v7  ;;  %v10976_v7 = vld [vmem:[%s15260_s5 + $0xc0] sm:$0xff]  }
 0x53b   :  { %v9827_v58 = vadd.f32 %v9826_v34, %v9825_v39  ;;  %v14684_v57 = vadd.f32 %v16172_v8, %v6267_v14  ;;  %10142 = vmatpush3.bf16.msra.mxu0 %v10963_v22  ;;  %v10975_v14 = vld [vmem:[%s15260_s5 + $0x88] sm:$0xff]  }
 0x53c   :  { %v9828_v46 = vpop.f32.mrf.mxu1  ;;  %10143 = vmatprep.subr.bf16.mxu0 %v10964_v62 }
 0x53d   :  { %v6272_v2 = vadd.f32 %v9827_v58, %v14588_v55 }
 0x53e   :  { %v9829_v49 = vpop.f32.mrf.mxu1 }
 0x53f   :  { %v9830_v32 = vadd.f32 %v9829_v49, %v9828_v46  ;;  %v14706_v44 = vadd.f32 %v13822_v16, %v6272_v2  ;;  %v10966_v16 = vld [vmem:[%s15260_s5 + $0x48] sm:$0xff]   ;;  %10144 = vmatpush3.bf16.msra.mxu0 %v10965_v43 }
 0x540   :  { %v9831_v30 = vpop.f32.mrf.mxu1  ;;  %10127 = vmatprep.subr.bf16.mxu1 %v10966_v16 }
 0x541   :  { %v6275_v15 = vadd.f32 %v9830_v32, %v14594_v45  ;;  %v10967_v45 = vld [vmem:[%s15260_s5 + $0xd8] sm:$0xff]   ;;  %10128 = vmatpush3.bf16.msra.mxu1 %v10968_v33 }
 0x542   :  { %v9832_v6 = vpop.f32.mrf.mxu1  ;;  %10145 = vmatprep.subr.bf16.mxu0 %v10967_v45  ;;  %10129 = vmatprep.subr.bf16.mxu1 %v10972_v29 }
 0x543   :  { %v9833_v55 = vadd.f32 %v9832_v6, %v9831_v30  ;;  %v14710_v12 = vadd.f32 %v16173_v13, %v6275_v15  ;;  %10146 = vmatpush3.bf16.msra.mxu0 %v10969_v60 }
 0x544   :  { %v9834_v24 = vpop.f32.mrf.mxu1  ;;  %10147 = vmatprep.subr.bf16.mxu0 %v10970_v1 }
 0x545   :  { %v6280_v11 = vadd.f32 %v9833_v55, %v14598_v42 }
 0x546   :  { %v9835_v50 = vpop.f32.mrf.mxu1 }
 0x547   :  { %v9836_v38 = vadd.f32 %v9835_v50, %v9834_v24  ;;  %v14732_v52 = vadd.f32 %v13849_v4, %v6280_v11  ;;  %10148 = vmatpush3.bf16.msra.mxu0 %v10971_v56 }
 0x548   :  { %v9837_v51 = vpop.f32.mrf.mxu1 }
 0x549   :  { %v6283_v35 = vadd.f32 %v9836_v38, %v14602_v59  ;;  %v10973_v59 = vld [vmem:[%s15260_s5 + $0xc8] sm:$0xff]  }
 0x54a   :  { %v9838_v61 = vpop.f32.mrf.mxu1  ;;  %10149 = vmatprep.subr.bf16.mxu0 %v10973_v59 }
 0x54b   :  { %v9839_v42 = vadd.f32 %v9838_v61, %v9837_v51  ;;  %v14736_v47 = vadd.f32 %v13864_v48, %v6283_v35  ;;  %v10974_v48 = vld [vmem:[%s15260_s5] sm:$0xff]   ;;  %10150 = vmatpush3.bf16.msra.mxu0 %v10975_v14  ;;  %v16176_v14 = vld [vmem:[#allocation43_spill] sm:$0xff] }
 0x54c   :  { %v9840_v4 = vpop.f32.mrf.mxu1  ;;  %10130 = vmatpush3.bf16.msra.mxu1 %v10974_v48  ;;  %10151 = vmatprep.subr.bf16.mxu0 %v10976_v7  ;;  %v16175_v35 = vld [vmem:[#allocation41_spill] sm:$0xff] }
 0x54d   :  { %v6288_v31 = vadd.f32 %v9839_v42, %v14605_v18  ;;  %10159 = vmatprep.subr.bf16.mxu1 %v10978_v0 }
 0x54e   :  { %v9841_v39 = vpop.f32.mrf.mxu1 }
 0x54f   :  { %v9842_v34 = vadd.f32 %v9841_v39, %v9840_v4  ;;  %v14758_v58 = vadd.f32 %v13880_v9, %v6288_v31  ;;  %v10977_v9 = vld [vmem:[%s15260_s5 + $0x80] sm:$0xff]  }
 0x550   :  { %v9923_v8 = vpop.f32.mrf.mxu1  ;;  %10152 = vmatpush3.bf16.msra.mxu0 %v10977_v9 }
 0x551   :  { %v6291_v20 = vadd.f32 %v9842_v34, %v14614_v26  ;;  %v10979_v26 = vld [vmem:[%s15260_s5 + $0x1f8] sm:$0xff]  }
 0x552   :  { %v9924_v17 = vpop.f32.mrf.mxu1  ;;  %10181 = vmatprep.subr.bf16.mxu0 %v10979_v26 }
 0x553   :  { %v9925_v18 = vadd.f32 %v9924_v17, %v9923_v8  ;;  %v14762_v46 = vadd.f32 %v16174_v5, %v6291_v20 }
 0x554   :  { %v9926_v2 = vpop.f32.mrf.mxu1 }
 0x555   :  { %v6426_v49 = vadd.f32 %v9925_v18, %v14618_v21 }
 0x556   :  { %v9927_v22 = vpop.f32.mrf.mxu1 }
 0x557   :  { %v9928_v32 = vadd.f32 %v9927_v22, %v9926_v2  ;;  %v14778_v30 = vadd.f32 %v13907_v25, %v6426_v49  ;;  %v16177_v49 = vld [vmem:[#allocation38_spill] sm:$0xff] }
 0x558   :  { %v9929_v15 = vpop.f32.mrf.mxu1 }
 0x559   :  { %v6429_v6 = vadd.f32 %v9928_v32, %v14622_v10 }
 0x55a   :  { %v9930_v55 = vpop.f32.mrf.mxu1 }
 0x55b   :  { %v9931_v13 = vadd.f32 %v9930_v55, %v9929_v15  ;;  %v14782_v62 = vadd.f32 %v13915_v54, %v6429_v6 }
 0x55c   :  { %v9932_v43 = vpop.f32.mrf.mxu1 }
 0x55d   :  { %v6434_v21 = vadd.f32 %v9931_v13, %v14632_v36 }
 0x55e   :  { %v9933_v16 = vpop.f32.mrf.mxu1 }
 0x55f   :  { %v9934_v24 = vadd.f32 %v9933_v16, %v9932_v43  ;;  %v14786_v45 = vadd.f32 %v13922_v3, %v6434_v21  ;;  %v10578_v43 = vpop.f32.mrf.mxu0 }
 0x560   :  { %v9935_v33 = vpop.f32.mrf.mxu1 }
 0x561   :  { %v6437_v25 = vadd.f32 %v9934_v24, %v14636_v27  ;;  %v16178_v24 = vld [vmem:[#allocation51_spill] sm:$0xff] }
 0x562   :  { %v9936_v11 = vpop.f32.mrf.mxu1 }
 0x563   :  { %v9937_v50 = vadd.f32 %v9936_v11, %v9935_v33  ;;  %v14790_v10 = vadd.f32 %v13930_v53, %v6437_v25  ;;  %v6716_v11 = vpop.f32.mrf.mxu0 }
 0x564   :  { %v9938_v60 = vpop.f32.mrf.mxu1 }
 0x565   :  { %v6442_v54 = vadd.f32 %v9937_v50, %v14646_v19 }
 0x566   :  { %v9939_v38 = vpop.f32.mrf.mxu1 }
 0x567   :  { %v9940_v51 = vadd.f32 %v9939_v38, %v9938_v60  ;;  %v14794_v36 = vadd.f32 %v16175_v35, %v6442_v54  ;;  %v16179_v54 = vld [vmem:[#allocation61_spill] sm:$0xff]  ;;  %v10579_v35 = vpop.f32.mrf.mxu0 }
 0x568   :  { %v9941_v61 = vpop.f32.mrf.mxu1 }
 0x569   :  { %v6445_v3 = vadd.f32 %v9940_v51, %v14650_v37 }
 0x56a   :  { %v9942_v42 = vpop.f32.mrf.mxu1 }
 0x56b   :  { %v9943_v1 = vadd.f32 %v9942_v42, %v9941_v61  ;;  %v14798_v27 = vadd.f32 %v13944_v28, %v6445_v3 }
 0x56c   :  { %v9944_v56 = vpop.f32.mrf.mxu1 }
 0x56d   :  { %v6450_v53 = vadd.f32 %v9943_v1, %v14660_v23 }
 0x56e   :  { %v9945_v4 = vpop.f32.mrf.mxu1 }
 0x56f   :  { %v9946_v29 = vadd.f32 %v9945_v4, %v9944_v56  ;;  %v14802_v19 = vadd.f32 %v13957_v41, %v6450_v53  ;;  %v6719_v56 = vpop.f32.mrf.mxu0 }
 0x570   :  { %v9947_v59 = vpop.f32.mrf.mxu1 }
 0x571   :  { %v6453_v48 = vadd.f32 %v9946_v29, %v14664_v40 }
 0x572   :  { %v9948_v31 = vpop.f32.mrf.mxu1 }
 0x573   :  { %v9949_v39 = vadd.f32 %v9948_v31, %v9947_v59  ;;  %v14806_v37 = vadd.f32 %v16176_v14, %v6453_v48 }
 0x574   :  { %v14808_v34 = vpop.f32.mrf.mxu1 }
 0x575   :  { %v14811_v28 = vadd.f32 %v9949_v39, %v14680_v63  ;;  %v10582_v39 = vpop.f32.mrf.mxu0 }
 0x576   :  { %v14813_v8 = vpop.f32.mrf.mxu1 }
 0x578   :  { %v9953_v23 = vpop.f32.mrf.mxu1 }
 0x57a   :  { %v9954_v20 = vpop.f32.mrf.mxu1 }
 0x57b   :  { %v9955_v17 = vadd.f32 %v9954_v20, %v9953_v23 }
 0x57c   :  { %v14815_v41 = vpop.f32.mrf.mxu1 }
 0x57d   :  { %v14818_v18 = vadd.f32 %v9955_v17, %v14706_v44 }
 0x57e   :  { %v14820_v40 = vpop.f32.mrf.mxu1 }
 0x580   :  { %v9959_v5 = vpop.f32.mrf.mxu1 }
 0x582   :  { %v9960_v7 = vpop.f32.mrf.mxu1 }
 0x583   :  { %v9961_v9 = vadd.f32 %v9960_v7, %v9959_v5 }
 0x584   :  { %v9962_v0 = vpop.f32.mrf.mxu1 }
 0x585   :  { %v6474_v2 = vadd.f32 %v9961_v9, %v14732_v52  ;;  %v6732_v9 = vpop.f32.mrf.mxu0 }
 0x586   :  { %v9963_v63 = vpop.f32.mrf.mxu1 }
 0x587   :  { %v9964_v26 = vadd.f32 %v9963_v63, %v9962_v0  ;;  %v14824_v22 = vadd.f32 %v16177_v49, %v6474_v2 }
 0x588   :  { %v9965_v32 = vpop.f32.mrf.mxu1 }
 0x589   :  { %v14827_v15 = vadd.f32 %v9964_v26, %v14736_v47 }
 0x58a   :  { %v9966_v6 = vpop.f32.mrf.mxu1 }
 0x58b   :  { %v9967_v44 = vadd.f32 %v9966_v6, %v9965_v32  ;;  %v10583_v6 = vpop.f32.mrf.mxu0 }
 0x58c   :  { %v9968_v55 = vpop.f32.mrf.mxu1 }
 0x58d   :  { %v6482_v13 = vadd.f32 %v9967_v44, %v14758_v58 }
 0x58e   :  { %v9969_v21 = vpop.f32.mrf.mxu1 }
 0x58f   :  { %v9970_v16 = vadd.f32 %v9969_v21, %v9968_v55  ;;  %v14831_v33 = vadd.f32 %v16178_v24, %v6482_v13 }
 0x590   :  { %v10051_v52 = vpop.f32.mrf.mxu1 }
 0x591   :  { %v6485_v25 = vadd.f32 %v9970_v16, %v14762_v46 }
 0x592   :  { %v10052_v50 = vpop.f32.mrf.mxu1 }
 0x593   :  { %v10053_v60 = vadd.f32 %v10052_v50, %v10051_v52  ;;  %v14835_v47 = vadd.f32 %v16179_v54, %v6485_v25  ;;  %v6735_v52 = vpop.f32.mrf.mxu0 }
 0x594   :  { %v10054_v38 = vpop.f32.mrf.mxu1 }
 0x595   :  { %v6620_v51 = vadd.f32 %v10053_v60, %v14778_v30 }
 0x596   :  { %v10055_v58 = vpop.f32.mrf.mxu1 }
 0x597   :  { %v6717_v61 = vadd.f32 %v6716_v11, %v6620_v51  ;;  %v10056_v3 = vadd.f32 %v10055_v58, %v10054_v38  ;;  %v10586_v51 = vpop.f32.mrf.mxu0 }
 0x598   :  { %v10057_v42 = vpop.f32.mrf.mxu1 }
 0x599   :  { %v6623_v1 = vadd.f32 %v10056_v3, %v14782_v62  ;;  %v6781_v4 = vrot.slane %v6717_v61, 1 }
 0x59a   :  { %v10058_v53 = vpop.f32.mrf.mxu1 }
 0x59b   :  { %v6720_v46 = vadd.f32 %v6719_v56, %v6623_v1  ;;  %v10059_v29 = vadd.f32 %v10058_v53, %v10057_v42  ;;  %v6785_v23 = vmax.f32 %v6717_v61, %v6781_v4  ;;  %v16181_v53 = vld [vmem:[#allocation24_spill] sm:$0xff] }
 0x59c   :  { %v10060_v59 = vpop.f32.mrf.mxu1 }
 0x59d   :  { %v6789_v48 = vrot.slane %v6720_v46, 1  ;;  %v6628_v31 = vadd.f32 %v10059_v29, %v14786_v45 }
 0x59e   :  { %v10061_v14 = vpop.f32.mrf.mxu1 }
 0x59f   :  { %v6793_v30 = vmax.f32 %v6720_v46, %v6789_v48  ;;  %v6725_v20 = vadd.f32 %v10578_v43, %v6628_v31  ;;  %v10062_v17 = vadd.f32 %v10061_v14, %v10060_v59  ;;  %v6748_v59 = vpop.f32.mrf.mxu0 }
 0x5a0   :  { %v10063_v5 = vpop.f32.mrf.mxu1 }
 0x5a1   :  { %v14840_v7 = vmax.f32 %v6785_v23, %v6793_v30  ;;  %v6631_v62 = vadd.f32 %v10062_v17, %v14790_v10  ;;  %v6799_v2 = vrot.slane %v6725_v20, 1  ;;  %v16182_v23 = vld [vmem:[#allocation6_spill] sm:$0xff] }
 0x5a2   :  { %v10064_v0 = vpop.f32.mrf.mxu1 }
 0x5a3   :  { %v6728_v63 = vadd.f32 %v10579_v35, %v6631_v62  ;;  %v10065_v26 = vadd.f32 %v10064_v0, %v10063_v5  ;;  %v6803_v55 = vmax.f32 %v6725_v20, %v6799_v2  ;;  %v9952_v35 = vadd.f32 %v14813_v8, %v14808_v34  ;;  %v10587_v62 = vpop.f32.mrf.mxu0 }
 0x5a4   :  { %v10066_v49 = vpop.f32.mrf.mxu1 }
 0x5a5   :  { %v6807_v32 = vrot.slane %v6728_v63, 1  ;;  %v6636_v45 = vadd.f32 %v10065_v26, %v14794_v36 }
 0x5a6   :  { %v10067_v44 = vpop.f32.mrf.mxu1 }
 0x5a7   :  { %v6811_v13 = vmax.f32 %v6728_v63, %v6807_v32  ;;  %v6733_v43 = vadd.f32 %v6732_v9, %v6636_v45  ;;  %v10068_v21 = vadd.f32 %v10067_v44, %v10066_v49  ;;  %v9958_v9 = vadd.f32 %v14820_v40, %v14815_v41  ;;  %v16184_v32 = vld [vmem:[#allocation105_spill] sm:$0xff] }
 0x5a8   :  { %v10069_v16 = vpop.f32.mrf.mxu1 }
 0x5a9   :  { %v14844_v24 = vmax.f32 %v6803_v55, %v6811_v13  ;;  %v6639_v10 = vadd.f32 %v10068_v21, %v14798_v27  ;;  %v6817_v11 = vrot.slane %v6733_v43, 1  ;;  %v16180_v27 = vld [vmem:[#allocation53_spill] sm:$0xff]  ;;  %v6751_v55 = vpop.f32.mrf.mxu0  ;;  %v6469_v13 = vadd.f32 %v9958_v9, %v14710_v12 }
 0x5aa   :  { %v10070_v25 = vpop.f32.mrf.mxu1  ;;  %v10013_v4 = vadd.f32 %v16181_v53, %v16180_v27 }
 0x5ab   :  { %v6736_v50 = vadd.f32 %v6735_v52, %v6639_v10  ;;  %v10071_v60 = vadd.f32 %v10070_v25, %v10069_v16  ;;  %v6821_v61 = vmax.f32 %v6733_v43, %v6817_v11  ;;  %v16186_v10 = vld [vmem:[#allocation8_spill] sm:$0xff]  ;;  %v16187_v52 = vld [vmem:[#allocation13_spill] sm:$0xff] }
 0x5ac   :  { %v10072_v54 = vpop.f32.mrf.mxu1  ;;  %v6555_v34 = vadd.f32 %v10013_v4, %v14811_v28  ;;  %v16185_v28 = vld [vmem:[#allocation119_spill] sm:$0xff]  ;;  %v10022_v25 = vadd.f32 %v16187_v52, %v16186_v10 }
 0x5ad   :  { %v6825_v38 = vrot.slane %v6736_v50, 1  ;;  %v6644_v36 = vadd.f32 %v10071_v60, %v14802_v19  ;;  %v6461_v19 = vadd.f32 %v9952_v35, %v14684_v57  ;;  %v10019_v45 = vadd.f32 %v16185_v28, %v16184_v32 }
 0x5ae   :  { %v10073_v58 = vpop.f32.mrf.mxu1 }
 0x5af   :  { %v6829_v3 = vmax.f32 %v6736_v50, %v6825_v38  ;;  %v6741_v42 = vadd.f32 %v10582_v39, %v6644_v36  ;;  %v10074_v1 = vadd.f32 %v10073_v58, %v10072_v54  ;;  %v16183_v39 = vld [vmem:[#allocation64_spill] sm:$0xff]  ;;  %v6563_v41 = vadd.f32 %v10019_v45, %v14818_v18  ;;  %v14869_v54 = vpop.f32.mrf.mxu0 }
 0x5b0   :  { %v10075_v56 = vpop.f32.mrf.mxu1  ;;  %v10016_v30 = vadd.f32 %v16183_v39, %v16182_v23  ;;  %v6566_v38 = vadd.f32 %v10022_v25, %v6469_v13  ;;  %v6865_v39 = vrot.slane %v14840_v7, 6 }
 0x5b1   :  { %v14852_v46 = vmax.f32 %v6821_v61, %v6829_v3  ;;  %v6647_v29 = vadd.f32 %v10074_v1, %v14806_v37  ;;  %v6835_v31 = vrot.slane %v6741_v42, 1  ;;  %v16188_v3 = vld [vmem:[#allocation45_spill] sm:$0xff]  ;;  %v6764_v4 = vpop.f32.mrf.mxu0 }
 0x5b2   :  { %v10076_v48 = vpop.f32.mrf.mxu1  ;;  %v6558_v37 = vadd.f32 %v10016_v30, %v6461_v19 }
 0x5b3   :  { %v6744_v14 = vadd.f32 %v10583_v6, %v6647_v29  ;;  %v10077_v8 = vadd.f32 %v10076_v48, %v10075_v56  ;;  %v6839_v2 = vmax.f32 %v6741_v42, %v6835_v31  ;;  %v16189_v42 = vld [vmem:[#allocation48_spill] sm:$0xff]  ;;  %v6861_v29 = vrot.slane %v14840_v7, 4 }
 0x5b4   :  { %v10078_v20 = vpop.f32.mrf.mxu1  ;;  %v10028_v1 = vadd.f32 %v16189_v42, %v16188_v3  ;;  %v6882_v3 = vrot.slane %v14844_v24, 6 }
 0x5b5   :  { %v6843_v17 = vrot.slane %v6744_v14, 1  ;;  %v6652_v5 = vadd.f32 %v10077_v8, %v6555_v34 }
 0x5b6   :  { %v10079_v0 = vpop.f32.mrf.mxu1  ;;  %v6574_v19 = vadd.f32 %v10028_v1, %v14827_v15  ;;  %v14880_v15 = vpop.f32.mrf.mxu0 }
 0x5b7   :  { %v6847_v57 = vmax.f32 %v6744_v14, %v6843_v17  ;;  %v6749_v63 = vadd.f32 %v6748_v59, %v6652_v5  ;;  %v10080_v26 = vadd.f32 %v10079_v0, %v10078_v20 }
 0x5b8   :  { %v10081_v49 = vpop.f32.mrf.mxu1 }
 0x5b9   :  { %v14863_v6 = vmax.f32 %v6839_v2, %v6847_v57  ;;  %v6655_v44 = vadd.f32 %v10080_v26, %v6558_v37  ;;  %v6782_v21 = vrot.slane %v6749_v63, 1 }
 0x5ba   :  { %v10082_v43 = vpop.f32.mrf.mxu1 }
 0x5bb   :  { %v6752_v16 = vadd.f32 %v6751_v55, %v6655_v44  ;;  %v10083_v40 = vadd.f32 %v10082_v43, %v10081_v49  ;;  %v6786_v35 = vmax.f32 %v6749_v63, %v6782_v21 }
 0x5bc   :  { %v10084_v11 = vpop.f32.mrf.mxu1 }
 0x5bd   :  { %v6790_v50 = vrot.slane %v6752_v16, 1  ;;  %v6660_v60 = vadd.f32 %v10083_v40, %v6563_v41  ;;  %v6767_v41 = vpop.f32.mrf.mxu0  ;;  %v6878_v40 = vrot.slane %v14844_v24, 4 }
 0x5be   :  { %v10085_v36 = vpop.f32.mrf.mxu1 }
 0x5bf   :  { %v6794_v58 = vmax.f32 %v6752_v16, %v6790_v50  ;;  %v6757_v61 = vadd.f32 %v10586_v51, %v6660_v60  ;;  %v10086_v12 = vadd.f32 %v10085_v36, %v10084_v11  ;;  %v6857_v51 = vrot.slane %v14840_v7, 2  ;;  %v10981_v16 = vld [vmem:[%s15260_s5 + $0x1b8] sm:$0xff]   ;;  %v10982_v11 = vld [vmem:[%s15260_s5 + $0x170] sm:$0xff]  }
 0x5c0   :  { %v10087_v56 = vpop.f32.mrf.mxu1  ;;  %v10983_v50 = vld [vmem:[%s15260_s5 + $0x1f0] sm:$0xff]  }
 0x5c1   :  { %v6796_v18 = vmax.f32 %v6786_v35, %v6794_v58  ;;  %v6800_v27 = vrot.slane %v6757_v61, 1  ;;  %v6663_v53 = vadd.f32 %v10086_v12, %v6566_v38 }
 0x5c2   :  { %v10088_v59 = vpop.f32.mrf.mxu1 }
 0x5c3   :  { %v6853_v48 = vrot.slane %v6796_v18, 7  ;;  %v6862_v31 = vrot.slane %v6796_v18, 3  ;;  %v6760_v14 = vadd.f32 %v10587_v62, %v6663_v53  ;;  %v10089_v34 = vadd.f32 %v10088_v59, %v10087_v56 }
 0x5c4   :  { %v10090_v8 = vpop.f32.mrf.mxu1  ;;  %v6858_v23 = vrot.slane %v6796_v18, 1  ;;  %v6866_v30 = vrot.slane %v6796_v18, 5  ;;  %v6804_v20 = vmax.f32 %v6757_v61, %v6800_v27  ;;  %v6874_v61 = vrot.slane %v14844_v24, 2  ;;  %v10984_v18 = vld [vmem:[%s15260_s5 + $0x130] sm:$0xff]  }
 0x5c5   :  { %v6808_v17 = vrot.slane %v6760_v14, 1  ;;  %v6855_v5 = vsel %vm6854_vm3, %v6853_v48, %v14840_v7  ;;  %v6863_v9 = vsel %vm6854_vm3, %v6862_v31, %v6861_v29  ;;  %v6668_v37 = vadd.f32 %v10089_v34, %v14824_v22  ;;  %v10980_v22 = vld [vmem:[%s15260_s5 + $0x138] sm:$0xff]   ;;  %v10985_v27 = vld [vmem:[%s15260_s5 + $0x1b0] sm:$0xff]   ;;  %v10987_v48 = vld [vmem:[%s15260_s5 + $0x1e8] sm:$0xff]  }
 0x5c6   :  { %v10091_v62 = vpop.f32.mrf.mxu1  ;;  %v6859_v0 = vsel %vm6854_vm3, %v6858_v23, %v6857_v51  ;;  %v6867_v2 = vsel %vm6854_vm3, %v6866_v30, %v6865_v39  ;;  %v6920_v57 = vmax.f32 %v6855_v5, 0.0  ;;  %v6922_v7 = vmax.f32 %v6863_v9, 0.0  ;;  %v10991_v9 = vld [vmem:[%s15260_s5 + $0x1e0] sm:$0xff]  }
 0x5c7   :  { %v6812_v63 = vmax.f32 %v6760_v14, %v6808_v17  ;;  %v10092_v26 = vadd.f32 %v10091_v62, %v10090_v8  ;;  %v6921_v49 = vmax.f32 %v6859_v0, 0.0  ;;  %v6923_v32 = vmax.f32 %v6867_v2, 0.0  ;;  %v10989_v17 = vld [vmem:[%s15260_s5 + $0x1a8] sm:$0xff]  }
 0x5c8   :  { %v6765_v28 = vadd.f32 %v6764_v4, %v6668_v37  ;;  %v10093_v45 = vpop.f32.mrf.mxu1  ;;  %v6936_v44 = vpack.c.bf16 %v6920_v57, %v6920_v57  ;;  %v6938_v25 = vpack.c.bf16 %v6922_v7, %v6922_v7  ;;  %v6895_v5 = vrot.slane %v14852_v46, 4  ;;  %v10994_v7 = vld [vmem:[%s15260_s5 + $0x158] sm:$0xff]  }
 0x5c9   :  { %v6814_v55 = vmax.f32 %v6804_v20, %v6812_v63  ;;  %v6671_v13 = vadd.f32 %v10092_v26, %v6574_v19  ;;  %v6937_v43 = vpack.c.bf16 %v6921_v49, %v6921_v49  ;;  %v6939_v21 = vpack.c.bf16 %v6923_v32, %v6923_v32  ;;  %v10988_v20 = vld [vmem:[%s15260_s5 + $0x128] sm:$0xff]  }
 0x5ca   :  { %v6818_v10 = vrot.slane %v6765_v28, 1  ;;  %v10094_v52 = vpop.f32.mrf.mxu1  ;;  %v6891_v57 = vrot.slane %v14852_v46, 2  ;;  %v6899_v26 = vrot.slane %v14852_v46, 6 }
 0x5cb   :  { %v6871_v60 = vrot.slane %v6814_v55, 7  ;;  %v6879_v38 = vrot.slane %v6814_v55, 3  ;;  %v6768_v36 = vadd.f32 %v6767_v41, %v6671_v13  ;;  %v10095_v35 = vadd.f32 %v10094_v52, %v10093_v45  ;;  %8015 = vmatprep.mubr.bf16.mxu1 %v6937_v43  ;;  %8055 = vmatprep.mubr.bf16.mxu0 %v6939_v21  ;;  %v10993_v45 = vld [vmem:[%s15260_s5 + $0x1a0] sm:$0xff]   ;;  %v10997_v41 = vld [vmem:[%s15260_s5 + $0x198] sm:$0xff]  }
 0x5cc   :  { %8016 = vmatmul.mubr.bf16.vlgmr.msra.gmra.mxu1 %v6936_v44  ;;  %8056 = vmatmul.mubr.bf16.vlgmr.msra.gmra.mxu0 %v6938_v25  ;;  %v10096_v58 = vpop.f32.mrf.mxu1  ;;  %v6875_v12 = vrot.slane %v6814_v55, 1  ;;  %v6883_v42 = vrot.slane %v6814_v55, 5  ;;  %v6822_v29 = vmax.f32 %v6765_v28, %v6818_v10  ;;  %v10992_v28 = vld [vmem:[%s15260_s5 + $0x120] sm:$0xff]   ;;  %v10995_v55 = vld [vmem:[%s15260_s5 + $0x1d8] sm:$0xff]   ;;  %v10999_v10 = vld [vmem:[%s15260_s5 + $0x1d0] sm:$0xff]   ;;  %v6908_v52 = vrot.slane %v14863_v6, 2 }
 0x5cd   :  { %v6826_v1 = vrot.slane %v6768_v36, 1  ;;  %v6676_v56 = vadd.f32 %v10095_v35, %v14831_v33  ;;  %10160 = vmatpush3.bf16.msra.mxu1 %v10980_v22  ;;  %10182 = vmatpush3.bf16.msra.mxu0 %v10981_v16  ;;  %v14909_v53 = vsel %vm6854_vm3, %v6871_v60, %v14844_v24  ;;  %v14912_v4 = vsel %vm6854_vm3, %v6879_v38, %v6878_v40  ;;  %v10986_v33 = vld [vmem:[%s15260_s5 + $0x168] sm:$0xff]   ;;  %v10996_v16 = vld [vmem:[%s15260_s5 + $0x118] sm:$0xff]   ;;  %v10998_v40 = vld [vmem:[%s15260_s5 + $0x150] sm:$0xff]  }
 0x5ce   :  { %v10097_v59 = vpop.f32.mrf.mxu1  ;;  %10161 = vmatprep.subr.bf16.mxu1 %v10982_v11  ;;  %10183 = vmatprep.subr.bf16.mxu0 %v10983_v50  ;;  %v6876_v19 = vsel %vm6854_vm3, %v6875_v12, %v6874_v61  ;;  %v6884_v24 = vsel %vm6854_vm3, %v6883_v42, %v6882_v3  ;;  %v6916_v25 = vrot.slane %v14863_v6, 6  ;;  %v11000_v35 = vld [vmem:[%s15260_s5 + $0x110] sm:$0xff]   ;;  %v11002_v42 = vld [vmem:[%s15260_s5 + $0x148] sm:$0xff]  }
 0x5cf   :  { %v6830_v31 = vmax.f32 %v6768_v36, %v6826_v1  ;;  %v6773_v14 = vadd.f32 %v14869_v54, %v6676_v56  ;;  %v10098_v51 = vadd.f32 %v10097_v59, %v10096_v58  ;;  %v6925_v34 = vmax.f32 %v6876_v19, 0.0  ;;  %v11001_v58 = vld [vmem:[%s15260_s5 + $0x190] sm:$0xff]   ;;  %v11003_v1 = vld [vmem:[%s15260_s5 + $0x1c8] sm:$0xff]   ;;  %v11008_v59 = vld [vmem:[%s15260_s5 + $0x100] sm:$0xff]  }
 0x5d0   :  { %v6927_v8 = vmax.f32 %v6884_v24, 0.0  ;;  %v6912_v36 = vrot.slane %v14863_v6, 4  ;;  %v6924_v19 = vmax.f32 %v14909_v53, 0.0  ;;  %v11010_v24 = vld [vmem:[%s15260_s5 + $0x278] sm:$0xff]  }
 0x5d1   :  { %v6832_v23 = vmax.f32 %v6822_v29, %v6830_v31  ;;  %v6679_v39 = vadd.f32 %v10098_v51, %v14835_v47  ;;  %10162 = vmatpush3.bf16.msra.mxu1 %v10984_v18  ;;  %10184 = vmatpush3.bf16.msra.mxu0 %v10985_v27  ;;  %v6941_v30 = vpack.c.bf16 %v6925_v34, %v6925_v34  ;;  %v10990_v47 = vld [vmem:[%s15260_s5 + $0x160] sm:$0xff]   ;;  %v6836_v0 = vrot.slane %v6773_v14, 1  ;;  %v11005_v18 = vld [vmem:[%s15260_s5 + $0x188] sm:$0xff]   ;;  %v11011_v31 = vld [vmem:[%s15260_s5 + $0x2f8] sm:$0xff]  }
 0x5d2   :  { %10163 = vmatprep.subr.bf16.mxu1 %v10986_v33  ;;  %10185 = vmatprep.subr.bf16.mxu0 %v10987_v48  ;;  %v6943_v54 = vpack.c.bf16 %v6927_v8, %v6927_v8  ;;  %v11006_v27 = vld [vmem:[%s15260_s5 + $0x140] sm:$0xff]   ;;  %v6926_v48 = vmax.f32 %v14912_v4, 0.0  ;;  %v11012_v34 = vld [vmem:[%s15260_s5 + $0x238] sm:$0xff]   ;;  %v6940_v53 = vpack.c.bf16 %v6924_v19, %v6924_v19 }
 0x5d3   :  { %v6888_v37 = vrot.slane %v6832_v23, 7  ;;  %v6896_v62 = vrot.slane %v6832_v23, 3  ;;  %v6776_v2 = vadd.f32 %v14880_v15, %v6679_v39  ;;  %8095 = vmatprep.mubr.bf16.mxu1 %v6941_v30  ;;  %v6892_v63 = vrot.slane %v6832_v23, 1  ;;  %v11007_v29 = vld [vmem:[%s15260_s5 + $0x1c0] sm:$0xff]   ;;  %v11013_v4 = vld [vmem:[%s15260_s5 + $0x2b8] sm:$0xff]   ;;  %v11014_v39 = vld [vmem:[%s15260_s5 + $0x270] sm:$0xff]  }
 0x5d4   :  { %8135 = vmatprep.mubr.bf16.mxu0 %v6943_v54  ;;  %v6900_v49 = vrot.slane %v6832_v23, 5  ;;  %v11009_v33 = vld [vmem:[%s15260_s5 + $0x180] sm:$0xff]   ;;  %v6942_v8 = vpack.c.bf16 %v6926_v48, %v6926_v48  ;;  %v11015_v30 = vld [vmem:[%s15260_s5 + $0x2f0] sm:$0xff]   ;;  %v11018_v54 = vld [vmem:[%s15260_s5 + $0x268] sm:$0xff]  }
 0x5d5   :  { %v6844_v32 = vrot.slane %v6776_v2, 1  ;;  %10164 = vmatpush3.bf16.msra.mxu1 %v10988_v20  ;;  %10186 = vmatpush3.bf16.msra.mxu0 %v10989_v17  ;;  %v14948_v15 = vsel %vm6854_vm3, %v6888_v37, %v14852_v46  ;;  %v14951_v44 = vsel %vm6854_vm3, %v6896_v62, %v6895_v5  ;;  %v6893_v13 = vsel %vm6854_vm3, %v6892_v63, %v6891_v57  ;;  %v11016_v17 = vld [vmem:[%s15260_s5 + $0x230] sm:$0xff]   ;;  %v11021_v37 = vld [vmem:[%s15260_s5 + $0x2a8] sm:$0xff]   ;;  %v11022_v62 = vld [vmem:[%s15260_s5 + $0x260] sm:$0xff]  }
 0x5d6   :  { %10165 = vmatprep.subr.bf16.mxu1 %v10990_v47  ;;  %10187 = vmatprep.subr.bf16.mxu0 %v10991_v9  ;;  %v14961_v43 = vsel %vm6854_vm3, %v6900_v49, %v6899_v26  ;;  %v6840_v46 = vmax.f32 %v6773_v14, %v6836_v0  ;;  %v6929_v14 = vmax.f32 %v6893_v13, 0.0  ;;  %v11017_v5 = vld [vmem:[%s15260_s5 + $0x2b0] sm:$0xff]   ;;  %v11019_v47 = vld [vmem:[%s15260_s5 + $0x2e8] sm:$0xff]   ;;  %v11023_v0 = vld [vmem:[%s15260_s5 + $0x2e0] sm:$0xff]  }
 0x5d7   :  { %v6848_v21 = vmax.f32 %v6776_v2, %v6844_v32  ;;  %v6931_v51 = vmax.f32 %v14961_v43, 0.0  ;;  %v11020_v9 = vld [vmem:[%s15260_s5 + $0x228] sm:$0xff]   ;;  %v11024_v2 = vld [vmem:[%s15260_s5 + $0x220] sm:$0xff]   ;;  %v11026_v63 = vld [vmem:[%s15260_s5 + $0x258] sm:$0xff]  }
 0x5d8   :  { %v6945_v23 = vpack.c.bf16 %v6929_v14, %v6929_v14  ;;  %v11025_v57 = vld [vmem:[%s15260_s5 + $0x2a0] sm:$0xff]   ;;  %v11027_v26 = vld [vmem:[%s15260_s5 + $0x2d8] sm:$0xff]   ;;  %v11034_v13 = vld [vmem:[%s15260_s5 + $0x248] sm:$0xff]  }
 0x5d9   :  { %v6850_v22 = vmax.f32 %v6840_v46, %v6848_v21  ;;  %10166 = vmatpush3.bf16.msra.mxu1 %v10992_v28  ;;  %10188 = vmatpush3.bf16.msra.mxu0 %v10993_v45  ;;  %v6947_v20 = vpack.c.bf16 %v6931_v51, %v6931_v51  ;;  %v11028_v49 = vld [vmem:[%s15260_s5 + $0x218] sm:$0xff]   ;;  %v11030_v28 = vld [vmem:[%s15260_s5 + $0x250] sm:$0xff]   ;;  %v11035_v43 = vld [vmem:[%s15260_s5 + $0x2c8] sm:$0xff]  }
 0x5da   :  { %10167 = vmatprep.subr.bf16.mxu1 %v10994_v7  ;;  %10189 = vmatprep.subr.bf16.mxu0 %v10995_v55  ;;  %v11029_v32 = vld [vmem:[%s15260_s5 + $0x298] sm:$0xff]   ;;  %v11031_v45 = vld [vmem:[%s15260_s5 + $0x2d0] sm:$0xff]   ;;  %v11036_v46 = vld [vmem:[%s15260_s5 + $0x208] sm:$0xff]  }
 0x5db   :  { %v6905_v11 = vrot.slane %v6850_v22, 7  ;;  %v6913_v50 = vrot.slane %v6850_v22, 3  ;;  %v6909_v60 = vrot.slane %v6850_v22, 1  ;;  %v6917_v38 = vrot.slane %v6850_v22, 5  ;;  %v11032_v7 = vld [vmem:[%s15260_s5 + $0x210] sm:$0xff]   ;;  %v11037_v21 = vld [vmem:[%s15260_s5 + $0x288] sm:$0xff]  }
 0x5dc   :  { %v11033_v55 = vld [vmem:[%s15260_s5 + $0x290] sm:$0xff]   ;;  %v11038_v22 = vld [vmem:[%s15260_s5 + $0x240] sm:$0xff]   ;;  %v11060_v14 = vld [vmem:[%s15260_s5 + $0x318] sm:$0xff]  }
 0x5dd   :  { %10168 = vmatpush3.bf16.msra.mxu1 %v10996_v16  ;;  %10190 = vmatpush3.bf16.msra.mxu0 %v10997_v41  ;;  %v14985_v61 = vsel %vm6854_vm3, %v6909_v60, %v6908_v52  ;;  %v14988_v12 = vsel %vm6854_vm3, %v6917_v38, %v6916_v25  ;;  %v14992_v3 = vsel %vm6854_vm3, %v6905_v11, %v14863_v6  ;;  %v11004_v6 = vld [vmem:[%s15260_s5 + $0x108] sm:$0xff]   ;;  %v11039_v16 = vld [vmem:[%s15260_s5 + $0x2c0] sm:$0xff]   ;;  %v11042_v52 = vld [vmem:[%s15260_s5 + $0x378] sm:$0xff]   ;;  %v6930_v25 = vmax.f32 %v14951_v44, 0.0 }
 0x5de   :  { %10169 = vmatprep.subr.bf16.mxu1 %v10998_v40  ;;  %10191 = vmatprep.subr.bf16.mxu0 %v10999_v10  ;;  %v15001_v56 = vsel %vm6854_vm3, %v6913_v50, %v6912_v36  ;;  %v11040_v41 = vld [vmem:[%s15260_s5 + $0x200] sm:$0xff]   ;;  %v6928_v10 = vmax.f32 %v14948_v15, 0.0  ;;  %v11043_v11 = vld [vmem:[%s15260_s5 + $0x3f8] sm:$0xff]   ;;  %v6933_v50 = vmax.f32 %v14985_v61, 0.0  ;;  %v6935_v15 = vmax.f32 %v14988_v12, 0.0  ;;  %v11047_v61 = vld [vmem:[%s15260_s5 + $0x3f0] sm:$0xff]  }
 0x5df   :  { %v11041_v40 = vld [vmem:[%s15260_s5 + $0x280] sm:$0xff]   ;;  %v11044_v60 = vld [vmem:[%s15260_s5 + $0x338] sm:$0xff]   ;;  %v6946_v36 = vpack.c.bf16 %v6930_v25, %v6930_v25 }
 0x5e0   :  { %v6944_v38 = vpack.c.bf16 %v6928_v10, %v6928_v10  ;;  %v11045_v44 = vld [vmem:[%s15260_s5 + $0x3b8] sm:$0xff]   ;;  %v6951_v12 = vpack.c.bf16 %v6935_v15, %v6935_v15  ;;  %v11056_v19 = vld [vmem:[%s15260_s5 + $0x320] sm:$0xff]  }
 0x5e1   :  { %10170 = vmatpush3.bf16.msra.mxu1 %v11000_v35  ;;  %10192 = vmatpush3.bf16.msra.mxu0 %v11001_v58  ;;  %v11046_v35 = vld [vmem:[%s15260_s5 + $0x370] sm:$0xff]   ;;  %v6949_v58 = vpack.c.bf16 %v6933_v50, %v6933_v50  ;;  %v11057_v48 = vld [vmem:[%s15260_s5 + $0x3a0] sm:$0xff]   ;;  %v11061_v51 = vld [vmem:[%s15260_s5 + $0x398] sm:$0xff]  }
 0x5e2   :  { %10171 = vmatprep.subr.bf16.mxu1 %v11002_v42  ;;  %10193 = vmatprep.subr.bf16.mxu0 %v11003_v1  ;;  %v11048_v42 = vld [vmem:[%s15260_s5 + $0x330] sm:$0xff]  }
 0x5e3   :  { %v11049_v1 = vld [vmem:[%s15260_s5 + $0x3b0] sm:$0xff]  }
 0x5e5   :  { %10172 = vmatpush3.bf16.msra.mxu1 %v11004_v6  ;;  %10194 = vmatpush3.bf16.msra.mxu0 %v11005_v18  ;;  %v11050_v6 = vld [vmem:[%s15260_s5 + $0x368] sm:$0xff]  }
 0x5e6   :  { %10173 = vmatprep.subr.bf16.mxu1 %v11006_v27  ;;  %10195 = vmatprep.subr.bf16.mxu0 %v11007_v29  ;;  %v11051_v18 = vld [vmem:[%s15260_s5 + $0x3e8] sm:$0xff]  }
 0x5e7   :  { %v11052_v27 = vld [vmem:[%s15260_s5 + $0x328] sm:$0xff]  }
 0x5e8   :  { %v11053_v29 = vld [vmem:[%s15260_s5 + $0x3a8] sm:$0xff]  }
 0x5e9   :  { %10174 = vmatpush3.bf16.msra.mxu1 %v11008_v59  ;;  %10196 = vmatpush3.bf16.msra.mxu0 %v11009_v33  ;;  %v11054_v59 = vld [vmem:[%s15260_s5 + $0x360] sm:$0xff]  }
 0x5ea   :  { %10203 = vmatprep.subr.bf16.mxu1 %v11010_v24  ;;  %10225 = vmatprep.subr.bf16.mxu0 %v11011_v31  ;;  %v11055_v33 = vld [vmem:[%s15260_s5 + $0x3e0] sm:$0xff]   ;;  %v11058_v24 = vld [vmem:[%s15260_s5 + $0x358] sm:$0xff]  }
 0x5eb   :  { %v11059_v31 = vld [vmem:[%s15260_s5 + $0x3d8] sm:$0xff]  }
 0x5ec   :  { %8096 = vmatmul.mubr.bf16.vlgmr.msra.gmra.mxu1 %v6940_v53  ;;  %8136 = vmatmul.mubr.bf16.vlgmr.msra.gmra.mxu0 %v6942_v8  ;;  %v11063_v53 = vld [vmem:[%s15260_s5 + $0x3d0] sm:$0xff]  }
 0x5ed   :  { %10204 = vmatpush3.bf16.msra.mxu1 %v11012_v34  ;;  %8175 = vmatprep.mubr.bf16.mxu1 %v6945_v23  ;;  %v11062_v34 = vld [vmem:[%s15260_s5 + $0x350] sm:$0xff]   ;;  %v11066_v23 = vld [vmem:[%s15260_s5 + $0x348] sm:$0xff]  }
 0x5ee   :  { %10226 = vmatpush3.bf16.msra.mxu0 %v11013_v4  ;;  %8215 = vmatprep.mubr.bf16.mxu0 %v6947_v20  ;;  %v11064_v8 = vld [vmem:[%s15260_s5 + $0x310] sm:$0xff]   ;;  %v11069_v20 = vld [vmem:[%s15260_s5 + $0x388] sm:$0xff]  }
 0x5ef   :  { %10205 = vmatprep.subr.bf16.mxu1 %v11014_v39  ;;  %10227 = vmatprep.subr.bf16.mxu0 %v11015_v30  ;;  %v11065_v4 = vld [vmem:[%s15260_s5 + $0x390] sm:$0xff]   ;;  %v11067_v39 = vld [vmem:[%s15260_s5 + $0x3c8] sm:$0xff]  }
 0x5f0   :  { %v11068_v30 = vld [vmem:[%s15260_s5 + $0x308] sm:$0xff]  }
 0x5f1   :  { %10206 = vmatpush3.bf16.msra.mxu1 %v11016_v17  ;;  %v11070_v17 = vld [vmem:[%s15260_s5 + $0x340] sm:$0xff]  }
 0x5f2   :  { %10228 = vmatpush3.bf16.msra.mxu0 %v11017_v5  ;;  %10207 = vmatprep.subr.bf16.mxu1 %v11018_v54  ;;  %v11071_v5 = vld [vmem:[%s15260_s5 + $0x3c0] sm:$0xff]  }
 0x5f3   :  { %10229 = vmatprep.subr.bf16.mxu0 %v11019_v47  ;;  %v11072_v54 = vld [vmem:[%s15260_s5 + $0x300] sm:$0xff]  }
 0x5f4   :  { %v11073_v47 = vld [vmem:[%s15260_s5 + $0x380] sm:$0xff]  }
 0x5f5   :  { %10208 = vmatpush3.bf16.msra.mxu1 %v11020_v9  ;;  %v6932_v9 = vmax.f32 %v14992_v3, 0.0  ;;  %v11075_v3 = vld [vmem:[%s15262_s7 + $0x30] sm:$0xff]  }
 0x5f6   :  { %10230 = vmatpush3.bf16.msra.mxu0 %v11021_v37  ;;  %10209 = vmatprep.subr.bf16.mxu1 %v11022_v62  ;;  %v6934_v37 = vmax.f32 %v15001_v56, 0.0  ;;  %v11076_v56 = vld [vmem:[%s15262_s7 + $0x28] sm:$0xff]  }
 0x5f7   :  { %10231 = vmatprep.subr.bf16.mxu0 %v11023_v0  ;;  %v6948_v62 = vpack.c.bf16 %v6932_v9, %v6932_v9  ;;  %v9172_v9 = vld [vmem:[%s15263_s8] ss:$0 sm:$0xff] }
 0x5f8   :  { %v6950_v0 = vpack.c.bf16 %v6934_v37, %v6934_v37 }
 0x5f9   :  { %10210 = vmatpush3.bf16.msra.mxu1 %v11024_v2  ;;  %v11074_v2 = vld [vmem:[%s15262_s7 + $0x38] sm:$0xff]  }
 0x5fa   :  { %10232 = vmatpush3.bf16.msra.mxu0 %v11025_v57  ;;  %10211 = vmatprep.subr.bf16.mxu1 %v11026_v63  ;;  %v11106_v57 = vmov 0.0   ;;  %v11077_v63 = vld [vmem:[%s15262_s7 + $0x20] sm:$0xff]  }
 0x5fb   :  { %10233 = vmatprep.subr.bf16.mxu0 %v11027_v26  ;;  %v11078_v26 = vld [vmem:[%s15262_s7 + $0x18] sm:$0xff]  }
 0x5fd   :  { %10212 = vmatpush3.bf16.msra.mxu1 %v11028_v49  ;;  %v11079_v49 = vld [vmem:[%s15262_s7 + $0x10] sm:$0xff]  }
 0x5fe   :  { %10234 = vmatpush3.bf16.msra.mxu0 %v11029_v32  ;;  %10213 = vmatprep.subr.bf16.mxu1 %v11030_v28  ;;  %v11080_v32 = vld [vmem:[%s15262_s7 + $0x8] sm:$0xff]   ;;  %v11081_v28 = vld [vmem:[%s15262_s7] sm:$0xff]  }
 0x5ff   :  { %10235 = vmatprep.subr.bf16.mxu0 %v11031_v45 }
 0x601   :  { %10214 = vmatpush3.bf16.msra.mxu1 %v11032_v7 }
 0x602   :  { %10236 = vmatpush3.bf16.msra.mxu0 %v11033_v55  ;;  %10215 = vmatprep.subr.bf16.mxu1 %v11034_v13  ;;  %v9043_v55 = vld [vmem:[%s15261_s6] ss:$0 sm:$0xff] }
 0x603   :  { %10237 = vmatprep.subr.bf16.mxu0 %v11035_v43 }
 0x605   :  { %10216 = vmatpush3.bf16.msra.mxu1 %v11036_v46 }
 0x606   :  { %10238 = vmatpush3.bf16.msra.mxu0 %v11037_v21  ;;  %10217 = vmatprep.subr.bf16.mxu1 %v11038_v22 }
 0x607   :  { %10239 = vmatprep.subr.bf16.mxu0 %v11039_v16 }
 0x609   :  { %10218 = vmatpush3.bf16.msra.mxu1 %v11040_v41 }
 0x60a   :  { %10240 = vmatpush3.bf16.msra.mxu0 %v11041_v40  ;;  %10247 = vmatprep.subr.bf16.mxu1 %v11042_v52 }
 0x60b   :  { %10269 = vmatprep.subr.bf16.mxu0 %v11043_v11 }
 0x60c   :  { %8176 = vmatmul.mubr.bf16.vlgmr.msra.gmra.mxu1 %v6944_v38 }
 0x60d   :  { %8216 = vmatmul.mubr.bf16.vlgmr.msra.gmra.mxu0 %v6946_v36  ;;  %10248 = vmatpush3.bf16.msra.mxu1 %v11044_v60 }
 0x60e   :  { %8255 = vmatprep.mubr.bf16.mxu1 %v6949_v58  ;;  %10270 = vmatpush3.bf16.msra.mxu0 %v11045_v44 }
 0x60f   :  { %8295 = vmatprep.mubr.bf16.mxu0 %v6951_v12  ;;  %10249 = vmatprep.subr.bf16.mxu1 %v11046_v35 }
 0x610   :  { %10271 = vmatprep.subr.bf16.mxu0 %v11047_v61 }
 0x611   :  { %10250 = vmatpush3.bf16.msra.mxu1 %v11048_v42 }
 0x612   :  { %10272 = vmatpush3.bf16.msra.mxu0 %v11049_v1  ;;  %10251 = vmatprep.subr.bf16.mxu1 %v11050_v6 }
 0x613   :  { %10273 = vmatprep.subr.bf16.mxu0 %v11051_v18 }
 0x615   :  { %10252 = vmatpush3.bf16.msra.mxu1 %v11052_v27 }
 0x616   :  { %10274 = vmatpush3.bf16.msra.mxu0 %v11053_v29  ;;  %10253 = vmatprep.subr.bf16.mxu1 %v11054_v59 }
 0x617   :  { %10275 = vmatprep.subr.bf16.mxu0 %v11055_v33 }
 0x619   :  { %10254 = vmatpush3.bf16.msra.mxu1 %v11056_v19 }
 0x61a   :  { %10276 = vmatpush3.bf16.msra.mxu0 %v11057_v48  ;;  %10255 = vmatprep.subr.bf16.mxu1 %v11058_v24 }
 0x61b   :  { %10277 = vmatprep.subr.bf16.mxu0 %v11059_v31 }
 0x61d   :  { %10256 = vmatpush3.bf16.msra.mxu1 %v11060_v14 }
 0x61e   :  { %10278 = vmatpush3.bf16.msra.mxu0 %v11061_v51  ;;  %10257 = vmatprep.subr.bf16.mxu1 %v11062_v34 }
 0x61f   :  { %10279 = vmatprep.subr.bf16.mxu0 %v11063_v53 }
 0x621   :  { %10258 = vmatpush3.bf16.msra.mxu1 %v11064_v8 }
 0x622   :  { %10280 = vmatpush3.bf16.msra.mxu0 %v11065_v4  ;;  %10259 = vmatprep.subr.bf16.mxu1 %v11066_v23 }
 0x623   :  { %10281 = vmatprep.subr.bf16.mxu0 %v11067_v39 }
 0x625   :  { %10260 = vmatpush3.bf16.msra.mxu1 %v11068_v30 }
 0x626   :  { %10282 = vmatpush3.bf16.msra.mxu0 %v11069_v20  ;;  %10261 = vmatprep.subr.bf16.mxu1 %v11070_v17 }
 0x627   :  { %10283 = vmatprep.subr.bf16.mxu0 %v11071_v5 }
 0x629   :  { %10262 = vmatpush3.bf16.msra.mxu1 %v11072_v54 }
 0x62a   :  { %10284 = vmatpush3.bf16.msra.mxu0 %v11073_v47  ;;  %10592 = vmatprep.subr.bf16.mxu1 %v11106_v57 }
 0x62c   :  { %8256 = vmatmul.mubr.bf16.vlgmr.msra.gmra.mxu1 %v6948_v62 }
 0x62d   :  { %8296 = vmatmul.mubr.bf16.vlgmr.msra.gmra.mxu0 %v6950_v0  ;;  %10593 = vmatpush3.bf16.msra.mxu1 %v11074_v2 }
 0x62e   :  { %10594 = vmatprep.subr.bf16.mxu1 %v11106_v57  ;;  %10608 = vmatprep.mubr.msk.bf16.mxu1 %vm11107_vm4, %v11106_v57 }
 0x631   :  { %10595 = vmatpush3.bf16.msra.mxu1 %v11075_v3 }
 0x632   :  { %10596 = vmatprep.subr.bf16.mxu1 %v11106_v57 }
 0x635   :  { %10597 = vmatpush3.bf16.msra.mxu1 %v11076_v56 }
 0x636   :  { %10598 = vmatprep.subr.bf16.mxu1 %v11106_v57 }
 0x639   :  { %10599 = vmatpush3.bf16.msra.mxu1 %v11077_v63 }
 0x63a   :  { %10600 = vmatprep.subr.bf16.mxu1 %v11106_v57 }
 0x63d   :  { %10601 = vmatpush3.bf16.msra.mxu1 %v11078_v26 }
 0x63e   :  { %10602 = vmatprep.subr.bf16.mxu1 %v11106_v57 }
 0x641   :  { %10603 = vmatpush3.bf16.msra.mxu1 %v11079_v49 }
 0x642   :  { %10604 = vmatprep.subr.bf16.mxu1 %v11106_v57 }
 0x645   :  { %10605 = vmatpush3.bf16.msra.mxu1 %v11080_v32 }
 0x646   :  { %10606 = vmatprep.subr.bf16.mxu1 %v11106_v57 }
 0x649   :  { %10607 = vmatpush3.bf16.msra.mxu1 %v11081_v28 }
 0x68c   :  { %v10131_v45 = vpop.f32.mrf.mxu1  ;;  %v10153_v7 = vpop.f32.mrf.mxu0 }
 0x68e   :  { %v10132_v13 = vpop.f32.mrf.mxu1  ;;  %v10154_v43 = vpop.f32.mrf.mxu0 }
 0x68f   :  { %v10133_v46 = vadd.f32 %v10132_v13, %v10131_v45  ;;  %v10155_v21 = vadd.f32 %v10154_v43, %v10153_v7 }
 0x690   :  { %v10134_v22 = vpop.f32.mrf.mxu1  ;;  %v10156_v16 = vpop.f32.mrf.mxu0 }
 0x691   :  { %v8018_v41 = vadd.f32 %v10133_v46, %v9043_v55 }
 0x692   :  { %v10135_v40 = vpop.f32.mrf.mxu1  ;;  %v10157_v10 = vpop.f32.mrf.mxu0 }
 0x693   :  { %v8058_v52 = vadd.f32 %v10155_v21, %v8018_v41 }
 0x6ac   :  { %v10175_v25 = vpop.f32.mrf.mxu1  ;;  %v10197_v11 = vpop.f32.mrf.mxu0 }
 0x6ae   :  { %v10176_v50 = vpop.f32.mrf.mxu1  ;;  %v10198_v60 = vpop.f32.mrf.mxu0 }
 0x6af   :  { %v10177_v27 = vadd.f32 %v10176_v50, %v10175_v25  ;;  %v10199_v59 = vadd.f32 %v10198_v60, %v10197_v11 }
 0x6b0   :  { %v10178_v15 = vpop.f32.mrf.mxu1  ;;  %v10200_v38 = vpop.f32.mrf.mxu0 }
 0x6b1   :  { %v8098_v29 = vadd.f32 %v10177_v27, %v8058_v52 }
 0x6b2   :  { %v10179_v44 = vpop.f32.mrf.mxu1  ;;  %v10201_v36 = vpop.f32.mrf.mxu0 }
 0x6b3   :  { %v8138_v19 = vadd.f32 %v10199_v59, %v8098_v29 }
 0x6cc   :  { %v10219_v35 = vpop.f32.mrf.mxu1 }
 0x6cd   :  { %v10241_v58 = vpop.f32.mrf.mxu0 }
 0x6ce   :  { %v10220_v61 = vpop.f32.mrf.mxu1 }
 0x6cf   :  { %v10242_v12 = vpop.f32.mrf.mxu0  ;;  %v10221_v33 = vadd.f32 %v10220_v61, %v10219_v35 }
 0x6d0   :  { %v10222_v42 = vpop.f32.mrf.mxu1  ;;  %v10243_v31 = vadd.f32 %v10242_v12, %v10241_v58 }
 0x6d1   :  { %v10244_v1 = vpop.f32.mrf.mxu0  ;;  %v8178_v48 = vadd.f32 %v10221_v33, %v8138_v19 }
 0x6d2   :  { %v10223_v6 = vpop.f32.mrf.mxu1 }
 0x6d3   :  { %v10245_v18 = vpop.f32.mrf.mxu0  ;;  %v8218_v34 = vadd.f32 %v10243_v31, %v8178_v48 }
 0x6ec   :  { %v10263_v24 = vpop.f32.mrf.mxu1 }
 0x6ed   :  { %v10285_v14 = vpop.f32.mrf.mxu0 }
 0x6ee   :  { %v10264_v51 = vpop.f32.mrf.mxu1 }
 0x6ef   :  { %v10265_v53 = vadd.f32 %v10264_v51, %v10263_v24  ;;  %v10286_v8 = vpop.f32.mrf.mxu0 }
 0x6f0   :  { %v10266_v4 = vpop.f32.mrf.mxu1  ;;  %v10287_v39 = vadd.f32 %v10286_v8, %v10285_v14 }
 0x6f1   :  { %v8258_v23 = vadd.f32 %v10265_v53, %v8218_v34  ;;  %v10288_v30 = vpop.f32.mrf.mxu0 }
 0x6f2   :  { %v10267_v20 = vpop.f32.mrf.mxu1 }
 0x6f3   :  { %v8298_v17 = vadd.f32 %v10287_v39, %v8258_v23  ;;  %v10289_v5 = vpop.f32.mrf.mxu0 }
 0x6f5   :  { %v8303_v54 = vmax.f32 %v8298_v17, 0.0 }
 0x6f7   :  { %v8304_v47 = vpack.c.bf16 %v8303_v54, %v8303_v54 }
 0x6f9   :  { %10609 = vmatmul.mubr.bf16.vlgmr.msra.gmra.mxu1 %v8304_v47 }
 0x7b9   :  { %v8410_v37 = vpop.f32.mrf.mxu1 }
 0x7ba   :  { %v8411_v62 = vadd.f32 %v9172_v9, %v8410_v37 }
 0x7bb   :  { %v10610_v0 = vpop.f32.mrf.mxu1 }
 0x7bc   :  { %8416 = vst [vmem:[#allocation2] sm:$0x3] %v8411_v62 }
 0x7bd   :  { %v8413_v2 = vpop.f32.mrf.mxu1 }
 0x7be   :  { %11094 = shalt.err (!%p11091_p4)
}
 0x7bf   :  { %8426 = dma.vmem_to_hbm [thread:$0]  %s8424_s16, 32, %s15264_s9, [#allocation3]   ;;  %v10611_v57 = vpop.f32.mrf.mxu1 }
 0x7c0   :  { %11103 = dma.done.wait [#allocation3], 32  }
 0x7c1   :  { %11104 = vsyncadd [#allocation3], 4294967264 }
 0x7c2   :  { %8430 = vsyncpa [#allocation3], 1 }

</bundles_post_ra>
